<compile_context>
chip_gen: v7x
topology: tpu7x:2x2x1
jax: 0.10.0
libtpu: 0.0.40
codegen_flags: <defaults>
</compile_context>

<pallas_src>
import functools

import jax
import jax.numpy as jnp
from jax.experimental import pallas as pl
from jax.experimental.pallas import tpu as pltpu


def _round_up(x, m):
    return (x + m - 1) // m * m


def _fused_conv_kernel(xs_ref, w_ref, o_ref, rhs_ref, *, slope1, slope2, wc, pc):
    """Fused conv1/conv2/conv3 + folded leaky-where epilogue.

    xs_ref : (3*C, PBUF) f32  stacked zero-padded canvases (rows 0..C-1 = x1,
                              C..2C-1 = x2, 2C..3C-1 = x3), flat (n, h, w) lanes.
    w_ref  : (2*CO, NROWS) f32 packed weights/biases:
               rows 0..CO-1 : col 0 = b2+b3, cols 1..1+27 = conv2 taps,
                              cols 28..102 = conv3 taps (tap-major, channel minor)
               rows CO..2CO : col 0 = b1, cols 1..C = conv1 weights
    o_ref  : (CO, pc)    fused output, lane-dense (full-width unmasked stores).
    rhs_ref: (NROWS, pc) VMEM scratch holding the stacked (im2col) RHS.
    """
    co = o_ref.shape[0]
    c = xs_ref.shape[0] // 3
    nrows = rhs_ref.shape[0]

    # ---- Build the stacked RHS once (each shifted window copied exactly once).
    # Zero the padded tail rows first: their weight columns are 0, but
    # 0 * uninitialized-scratch could still inject NaN into the MXU accumulate.
    rhs_ref[nrows - 8:nrows, :] = jnp.zeros((8, pc), jnp.float32)
    rhs_ref[0:1, :] = jnp.ones((1, pc), jnp.float32)          # bias row -> b2+b3
    # conv2 taps: x2 canvas rows [c, 2c), canvas shift = 1.
    for dh in range(3):
        for dw in range(3):
            off = (dh + 1) * wc + (dw + 1)
            r = 1 + c * (dh * 3 + dw)
            rhs_ref[r:r + c, :] = xs_ref[c:2 * c, off:off + pc]
    # conv3 taps: x3 canvas rows [2c, 3c), canvas shift = 0.
    base3 = 1 + 9 * c
    for dh in range(5):
        for dw in range(5):
            off = dh * wc + dw
            r = base3 + c * (dh * 5 + dw)
            rhs_ref[r:r + c, :] = xs_ref[2 * c:3 * c, off:off + pc]

    # ---- conv2 + conv3 (and their combined bias) in ONE MXU contraction.
    v23 = jnp.dot(w_ref[0:co, :], rhs_ref[...],
                  preferred_element_type=jnp.float32,
                  precision=jax.lax.Precision.HIGHEST)

    # ---- conv1 (1x1, C channels) exactly in f32 on the VPU; it drives the mask.
    off1 = 2 * wc + 2
    acc1 = w_ref[co:2 * co, 1:2] * xs_ref[0:1, off1:off1 + pc]
    for ci in range(1, c):
        acc1 = acc1 + w_ref[co:2 * co, 1 + ci:2 + ci] * xs_ref[ci:ci + 1, off1:off1 + pc]
    v1 = acc1 + w_ref[co:2 * co, 0:1]                         # + b1

    # ---- Folded epilogue: one select, one negative-branch multiply.
    out = jnp.where(v1 > 0.0, v1 + v23, v1 * (slope1 + 2.0 * slope2))
    o_ref[...] = out.astype(o_ref.dtype)


def model_forward(x1, x2, x3, params, slope1=0.01, slope2=0.01):
    """x1/x2/x3 are NCHW float32 (torch convention). Returns NCHW float32."""
    w1, b1, w2, b2, w3, b3 = params        # HWIO weights, (CO,) biases

    N, C = x1.shape[0], x1.shape[1]
    H, W = x1.shape[2] + 2, x1.shape[3] + 2            # common conv-output size
    assert x2.shape == (N, C, H, W), x2.shape           # conv2: k=3, pad=1
    assert x3.shape == (N, C, H + 2, W + 2), x3.shape   # conv3: k=5, pad=1
    CO = w1.shape[-1]

    KMAX = 5
    Hc, Wc = H + KMAX - 1, W + KMAX - 1                 # shared padded canvas
    P = N * Hc * Wc                                     # valid flat length
    PC = _round_up(P, 128)                              # lane-dense output width
    max_off = (KMAX - 1) * Wc + (KMAX - 1)              # largest tap offset (conv3)
    PBUF = _round_up(PC + max_off, 128)                 # padded input lane width
    NROWS = _round_up(1 + (9 + 25) * C, 8)              # ones row + conv2/conv3 taps

    # --- single stacked lane-dense activation operand (one DMA for all inputs)
    def canvas(x, k):
        q = 1 + (KMAX - k) // 2                         # per-side canvas padding
        xc = jnp.transpose(x, (1, 0, 2, 3))
        xc = jnp.pad(xc, ((0, 0), (0, 0), (q, q), (q, q)))
        return xc.reshape(C, P)

    xs = jnp.concatenate([canvas(x1, 1), canvas(x2, 3), canvas(x3, 5)], axis=0)
    xs = jnp.pad(xs, ((0, 0), (0, PBUF - P)))

    # --- single packed weight/bias operand, column layout matching the RHS rows
    w2f = jnp.transpose(w2, (3, 0, 1, 2)).reshape(CO, 9 * C)   # (CO, tap*C)
    w3f = jnp.transpose(w3, (3, 0, 1, 2)).reshape(CO, 25 * C)
    wpack = jnp.zeros((2 * CO, NROWS), jnp.float32)
    wpack = wpack.at[0:CO, 0].set(b2 + b3)                     # combined conv2+conv3 bias
    wpack = wpack.at[0:CO, 1:1 + 9 * C].set(w2f)
    wpack = wpack.at[0:CO, 1 + 9 * C:1 + 34 * C].set(w3f)
    wpack = wpack.at[CO:2 * CO, 0].set(b1)
    wpack = wpack.at[CO:2 * CO, 1:1 + C].set(jnp.transpose(w1.reshape(C, CO)))

    kernel = functools.partial(_fused_conv_kernel,
                               slope1=slope1, slope2=slope2, wc=Wc, pc=PC)

    out_flat = pl.pallas_call(
        kernel,
        out_shape=jax.ShapeDtypeStruct((CO, PC), jnp.float32),
        scratch_shapes=[pltpu.VMEM((NROWS, PC), jnp.float32)],
    )(xs, wpack)

    # Crop valid region and go back to NCHW.
    out = out_flat[:, :P].reshape(CO, N, Hc, Wc)[:, :, :H, :W]
    return jnp.transpose(out, (1, 0, 2, 3))


def reference_forward(x1, x2, x3, params, slope1=0.01, slope2=0.01):
    """Plain-JAX reference (XLA conv) for verification. NCHW in / NCHW out."""
    w1, b1, w2, b2, w3, b3 = params

    def conv(x_nchw, w, b):
        x = jnp.transpose(x_nchw, (0, 2, 3, 1))
        y = jax.lax.conv_general_dilated(
            x, w, window_strides=(1, 1), padding=((1, 1), (1, 1)),
            dimension_numbers=('NHWC', 'HWIO', 'NHWC'),
            precision=jax.lax.Precision.HIGHEST)
        return y + b

    v1 = conv(x1, w1, b1)
    v5 = conv(x2, w2, b2)
    v9 = conv(x3, w3, b3)
    pos = v1 > 0
    out = (jnp.where(pos, v1, v1 * slope1) +
           jnp.where(pos, v5, v1 * slope2) +
           jnp.where(pos, v9, v1 * slope2))
    return jnp.transpose(out, (0, 3, 1, 2))


def init_params(key):
    """Deterministic torch-Conv2d-style init (uniform in +/- 1/sqrt(fan_in)), HWIO."""
    def conv_init(k, ksize, cin, cout):
        kw, kb = jax.random.split(k)
        bound = 1.0 / float(cin * ksize * ksize) ** 0.5
        w = jax.random.uniform(kw, (ksize, ksize, cin, cout), jnp.float32,
                               -bound, bound)
        b = jax.random.uniform(kb, (cout,), jnp.float32, -bound, bound)
        return w, b

    k1, k2, k3 = jax.random.split(key, 3)
    w1, b1 = conv_init(k1, 1, 3, 8)
    w2, b2 = conv_init(k2, 3, 3, 8)
    w3, b3 = conv_init(k3, 5, 3, 8)
    return (w1, b1, w2, b2, w3, b3)


if __name__ == "__main__":
    key = jax.random.PRNGKey(0)
    kp, ka, kb, kc = jax.random.split(key, 4)
    params = init_params(kp)

    # The original script's literal input sizes are mutually incompatible with
    # the forward's broadcasting; pick small consistent shapes so all three
    # conv outputs are (2, 8, 16, 16):
    #   conv1(14x14, k=1, p=1) -> 16x16; conv2(16x16, k=3, p=1) -> 16x16;
    #   conv3(18x18, k=5, p=1) -> 16x16.
    x1 = jax.random.normal(ka, (2, 3, 14, 14), jnp.float32)
    x2 = jax.random.normal(kb, (2, 3, 16, 16), jnp.float32)
    x3 = jax.random.normal(kc, (2, 3, 18, 18), jnp.float32)

    fwd = jax.jit(model_forward)
    out = jax.block_until_ready(fwd(x1, x2, x3, params))
    ref = jax.block_until_ready(reference_forward(x1, x2, x3, params))

    assert out.shape == (2, 8, 16, 16), out.shape
    max_err = float(jnp.max(jnp.abs(out - ref)))
    assert jnp.allclose(out, ref, atol=1e-3, rtol=1e-3), max_err
    print("KERNEL_OK")
</pallas_src>

<mosaic_0001>
module attributes {stable_mosaic.version = 11 : i64} {
  func.func @_fused_conv_kernel(%arg0: memref<9x1024xf32, #tpu.memory_space<vmem>>, %arg1: memref<16x104xf32, #tpu.memory_space<vmem>>, %arg2: memref<8x896xf32, #tpu.memory_space<vmem>>, %arg3: memref<104x896xf32, #tpu.memory_space<vmem>>) attributes {dimension_semantics = [], scalar_prefetch = 0 : i64, scratch_operands = 1 : i64, tpu.core_type = #tpu.core_type<tc>} {
    %cst = arith.constant 0.000000e+00 : f32
    %0 = vector.broadcast %cst : f32 to vector<8x896xf32>
    %c96 = arith.constant 96 : index
    %c0 = arith.constant 0 : index
    %1 = vector.load %arg3[%c96, %c0] : memref<104x896xf32, #tpu.memory_space<vmem>>, vector<8x896xf32>
    tpu.vector_store %arg3[%c96, %c0], %0 {strides = array<i32>} : memref<104x896xf32, #tpu.memory_space<vmem>>, vector<8x896xf32>,
    %cst_0 = arith.constant 1.000000e+00 : f32
    %2 = vector.broadcast %cst_0 : f32 to vector<1x896xf32>
    %c0_1 = arith.constant 0 : index
    %c0_2 = arith.constant 0 : index
    %3 = vector.load %arg3[%c0_1, %c0_2] : memref<104x896xf32, #tpu.memory_space<vmem>>, vector<1x896xf32>
    tpu.vector_store %arg3[%c0_1, %c0_2], %2 {strides = array<i32>} : memref<104x896xf32, #tpu.memory_space<vmem>>, vector<1x896xf32>,
    %c3 = arith.constant 3 : index
    %c21 = arith.constant 21 : index
    %4 = vector.load %arg0[%c3, %c21] : memref<9x1024xf32, #tpu.memory_space<vmem>>, vector<3x896xf32>
    %c1 = arith.constant 1 : index
    %c0_3 = arith.constant 0 : index
    %5 = vector.load %arg3[%c1, %c0_3] : memref<104x896xf32, #tpu.memory_space<vmem>>, vector<3x896xf32>
    tpu.vector_store %arg3[%c1, %c0_3], %4 {strides = array<i32>} : memref<104x896xf32, #tpu.memory_space<vmem>>, vector<3x896xf32>,
    %c3_4 = arith.constant 3 : index
    %c22 = arith.constant 22 : index
    %6 = vector.load %arg0[%c3_4, %c22] : memref<9x1024xf32, #tpu.memory_space<vmem>>, vector<3x896xf32>
    %c4 = arith.constant 4 : index
    %c0_5 = arith.constant 0 : index
    %7 = vector.load %arg3[%c4, %c0_5] : memref<104x896xf32, #tpu.memory_space<vmem>>, vector<3x896xf32>
    tpu.vector_store %arg3[%c4, %c0_5], %6 {strides = array<i32>} : memref<104x896xf32, #tpu.memory_space<vmem>>, vector<3x896xf32>,
    %c3_6 = arith.constant 3 : index
    %c23 = arith.constant 23 : index
    %8 = vector.load %arg0[%c3_6, %c23] : memref<9x1024xf32, #tpu.memory_space<vmem>>, vector<3x896xf32>
    %c7 = arith.constant 7 : index
    %c0_7 = arith.constant 0 : index
    %9 = vector.load %arg3[%c7, %c0_7] : memref<104x896xf32, #tpu.memory_space<vmem>>, vector<3x896xf32>
    tpu.vector_store %arg3[%c7, %c0_7], %8 {strides = array<i32>} : memref<104x896xf32, #tpu.memory_space<vmem>>, vector<3x896xf32>,
    %c3_8 = arith.constant 3 : index
    %c41 = arith.constant 41 : index
    %10 = vector.load %arg0[%c3_8, %c41] : memref<9x1024xf32, #tpu.memory_space<vmem>>, vector<3x896xf32>
    %c10 = arith.constant 10 : index
    %c0_9 = arith.constant 0 : index
    %11 = vector.load %arg3[%c10, %c0_9] : memref<104x896xf32, #tpu.memory_space<vmem>>, vector<3x896xf32>
    tpu.vector_store %arg3[%c10, %c0_9], %10 {strides = array<i32>} : memref<104x896xf32, #tpu.memory_space<vmem>>, vector<3x896xf32>,
    %c3_10 = arith.constant 3 : index
    %c42 = arith.constant 42 : index
    %12 = vector.load %arg0[%c3_10, %c42] : memref<9x1024xf32, #tpu.memory_space<vmem>>, vector<3x896xf32>
    %c13 = arith.constant 13 : index
    %c0_11 = arith.constant 0 : index
    %13 = vector.load %arg3[%c13, %c0_11] : memref<104x896xf32, #tpu.memory_space<vmem>>, vector<3x896xf32>
    tpu.vector_store %arg3[%c13, %c0_11], %12 {strides = array<i32>} : memref<104x896xf32, #tpu.memory_space<vmem>>, vector<3x896xf32>,
    %c3_12 = arith.constant 3 : index
    %c43 = arith.constant 43 : index
    %14 = vector.load %arg0[%c3_12, %c43] : memref<9x1024xf32, #tpu.memory_space<vmem>>, vector<3x896xf32>
    %c16 = arith.constant 16 : index
    %c0_13 = arith.constant 0 : index
    %15 = vector.load %arg3[%c16, %c0_13] : memref<104x896xf32, #tpu.memory_space<vmem>>, vector<3x896xf32>
    tpu.vector_store %arg3[%c16, %c0_13], %14 {strides = array<i32>} : memref<104x896xf32, #tpu.memory_space<vmem>>, vector<3x896xf32>,
    %c3_14 = arith.constant 3 : index
    %c61 = arith.constant 61 : index
    %16 = vector.load %arg0[%c3_14, %c61] : memref<9x1024xf32, #tpu.memory_space<vmem>>, vector<3x896xf32>
    %c19 = arith.constant 19 : index
    %c0_15 = arith.constant 0 : index
    %17 = vector.load %arg3[%c19, %c0_15] : memref<104x896xf32, #tpu.memory_space<vmem>>, vector<3x896xf32>
    tpu.vector_store %arg3[%c19, %c0_15], %16 {strides = array<i32>} : memref<104x896xf32, #tpu.memory_space<vmem>>, vector<3x896xf32>,
    %c3_16 = arith.constant 3 : index
    %c62 = arith.constant 62 : index
    %18 = vector.load %arg0[%c3_16, %c62] : memref<9x1024xf32, #tpu.memory_space<vmem>>, vector<3x896xf32>
    %c22_17 = arith.constant 22 : index
    %c0_18 = arith.constant 0 : index
    %19 = vector.load %arg3[%c22_17, %c0_18] : memref<104x896xf32, #tpu.memory_space<vmem>>, vector<3x896xf32>
    tpu.vector_store %arg3[%c22_17, %c0_18], %18 {strides = array<i32>} : memref<104x896xf32, #tpu.memory_space<vmem>>, vector<3x896xf32>,
    %c3_19 = arith.constant 3 : index
    %c63 = arith.constant 63 : index
    %20 = vector.load %arg0[%c3_19, %c63] : memref<9x1024xf32, #tpu.memory_space<vmem>>, vector<3x896xf32>
    %c25 = arith.constant 25 : index
    %c0_20 = arith.constant 0 : index
    %21 = vector.load %arg3[%c25, %c0_20] : memref<104x896xf32, #tpu.memory_space<vmem>>, vector<3x896xf32>
    tpu.vector_store %arg3[%c25, %c0_20], %20 {strides = array<i32>} : memref<104x896xf32, #tpu.memory_space<vmem>>, vector<3x896xf32>,
    %c6 = arith.constant 6 : index
    %c0_21 = arith.constant 0 : index
    %22 = vector.load %arg0[%c6, %c0_21] : memref<9x1024xf32, #tpu.memory_space<vmem>>, vector<3x896xf32>
    %c28 = arith.constant 28 : index
    %c0_22 = arith.constant 0 : index
    %23 = vector.load %arg3[%c28, %c0_22] : memref<104x896xf32, #tpu.memory_space<vmem>>, vector<3x896xf32>
    tpu.vector_store %arg3[%c28, %c0_22], %22 {strides = array<i32>} : memref<104x896xf32, #tpu.memory_space<vmem>>, vector<3x896xf32>,
    %c6_23 = arith.constant 6 : index
    %c1_24 = arith.constant 1 : index
    %24 = vector.load %arg0[%c6_23, %c1_24] : memref<9x1024xf32, #tpu.memory_space<vmem>>, vector<3x896xf32>
    %c31 = arith.constant 31 : index
    %c0_25 = arith.constant 0 : index
    %25 = vector.load %arg3[%c31, %c0_25] : memref<104x896xf32, #tpu.memory_space<vmem>>, vector<3x896xf32>
    tpu.vector_store %arg3[%c31, %c0_25], %24 {strides = array<i32>} : memref<104x896xf32, #tpu.memory_space<vmem>>, vector<3x896xf32>,
    %c6_26 = arith.constant 6 : index
    %c2 = arith.constant 2 : index
    %26 = vector.load %arg0[%c6_26, %c2] : memref<9x1024xf32, #tpu.memory_space<vmem>>, vector<3x896xf32>
    %c34 = arith.constant 34 : index
    %c0_27 = arith.constant 0 : index
    %27 = vector.load %arg3[%c34, %c0_27] : memref<104x896xf32, #tpu.memory_space<vmem>>, vector<3x896xf32>
    tpu.vector_store %arg3[%c34, %c0_27], %26 {strides = array<i32>} : memref<104x896xf32, #tpu.memory_space<vmem>>, vector<3x896xf32>,
    %c6_28 = arith.constant 6 : index
    %c3_29 = arith.constant 3 : index
    %28 = vector.load %arg0[%c6_28, %c3_29] : memref<9x1024xf32, #tpu.memory_space<vmem>>, vector<3x896xf32>
    %c37 = arith.constant 37 : index
    %c0_30 = arith.constant 0 : index
    %29 = vector.load %arg3[%c37, %c0_30] : memref<104x896xf32, #tpu.memory_space<vmem>>, vector<3x896xf32>
    tpu.vector_store %arg3[%c37, %c0_30], %28 {strides = array<i32>} : memref<104x896xf32, #tpu.memory_space<vmem>>, vector<3x896xf32>,
    %c6_31 = arith.constant 6 : index
    %c4_32 = arith.constant 4 : index
    %30 = vector.load %arg0[%c6_31, %c4_32] : memref<9x1024xf32, #tpu.memory_space<vmem>>, vector<3x896xf32>
    %c40 = arith.constant 40 : index
    %c0_33 = arith.constant 0 : index
    %31 = vector.load %arg3[%c40, %c0_33] : memref<104x896xf32, #tpu.memory_space<vmem>>, vector<3x896xf32>
    tpu.vector_store %arg3[%c40, %c0_33], %30 {strides = array<i32>} : memref<104x896xf32, #tpu.memory_space<vmem>>, vector<3x896xf32>,
    %c6_34 = arith.constant 6 : index
    %c20 = arith.constant 20 : index
    %32 = vector.load %arg0[%c6_34, %c20] : memref<9x1024xf32, #tpu.memory_space<vmem>>, vector<3x896xf32>
    %c43_35 = arith.constant 43 : index
    %c0_36 = arith.constant 0 : index
    %33 = vector.load %arg3[%c43_35, %c0_36] : memref<104x896xf32, #tpu.memory_space<vmem>>, vector<3x896xf32>
    tpu.vector_store %arg3[%c43_35, %c0_36], %32 {strides = array<i32>} : memref<104x896xf32, #tpu.memory_space<vmem>>, vector<3x896xf32>,
    %c6_37 = arith.constant 6 : index
    %c21_38 = arith.constant 21 : index
    %34 = vector.load %arg0[%c6_37, %c21_38] : memref<9x1024xf32, #tpu.memory_space<vmem>>, vector<3x896xf32>
    %c46 = arith.constant 46 : index
    %c0_39 = arith.constant 0 : index
    %35 = vector.load %arg3[%c46, %c0_39] : memref<104x896xf32, #tpu.memory_space<vmem>>, vector<3x896xf32>
    tpu.vector_store %arg3[%c46, %c0_39], %34 {strides = array<i32>} : memref<104x896xf32, #tpu.memory_space<vmem>>, vector<3x896xf32>,
    %c6_40 = arith.constant 6 : index
    %c22_41 = arith.constant 22 : index
    %36 = vector.load %arg0[%c6_40, %c22_41] : memref<9x1024xf32, #tpu.memory_space<vmem>>, vector<3x896xf32>
    %c49 = arith.constant 49 : index
    %c0_42 = arith.constant 0 : index
    %37 = vector.load %arg3[%c49, %c0_42] : memref<104x896xf32, #tpu.memory_space<vmem>>, vector<3x896xf32>
    tpu.vector_store %arg3[%c49, %c0_42], %36 {strides = array<i32>} : memref<104x896xf32, #tpu.memory_space<vmem>>, vector<3x896xf32>,
    %c6_43 = arith.constant 6 : index
    %c23_44 = arith.constant 23 : index
    %38 = vector.load %arg0[%c6_43, %c23_44] : memref<9x1024xf32, #tpu.memory_space<vmem>>, vector<3x896xf32>
    %c52 = arith.constant 52 : index
    %c0_45 = arith.constant 0 : index
    %39 = vector.load %arg3[%c52, %c0_45] : memref<104x896xf32, #tpu.memory_space<vmem>>, vector<3x896xf32>
    tpu.vector_store %arg3[%c52, %c0_45], %38 {strides = array<i32>} : memref<104x896xf32, #tpu.memory_space<vmem>>, vector<3x896xf32>,
    %c6_46 = arith.constant 6 : index
    %c24 = arith.constant 24 : index
    %40 = vector.load %arg0[%c6_46, %c24] : memref<9x1024xf32, #tpu.memory_space<vmem>>, vector<3x896xf32>
    %c55 = arith.constant 55 : index
    %c0_47 = arith.constant 0 : index
    %41 = vector.load %arg3[%c55, %c0_47] : memref<104x896xf32, #tpu.memory_space<vmem>>, vector<3x896xf32>
    tpu.vector_store %arg3[%c55, %c0_47], %40 {strides = array<i32>} : memref<104x896xf32, #tpu.memory_space<vmem>>, vector<3x896xf32>,
    %c6_48 = arith.constant 6 : index
    %c40_49 = arith.constant 40 : index
    %42 = vector.load %arg0[%c6_48, %c40_49] : memref<9x1024xf32, #tpu.memory_space<vmem>>, vector<3x896xf32>
    %c58 = arith.constant 58 : index
    %c0_50 = arith.constant 0 : index
    %43 = vector.load %arg3[%c58, %c0_50] : memref<104x896xf32, #tpu.memory_space<vmem>>, vector<3x896xf32>
    tpu.vector_store %arg3[%c58, %c0_50], %42 {strides = array<i32>} : memref<104x896xf32, #tpu.memory_space<vmem>>, vector<3x896xf32>,
    %c6_51 = arith.constant 6 : index
    %c41_52 = arith.constant 41 : index
    %44 = vector.load %arg0[%c6_51, %c41_52] : memref<9x1024xf32, #tpu.memory_space<vmem>>, vector<3x896xf32>
    %c61_53 = arith.constant 61 : index
    %c0_54 = arith.constant 0 : index
    %45 = vector.load %arg3[%c61_53, %c0_54] : memref<104x896xf32, #tpu.memory_space<vmem>>, vector<3x896xf32>
    tpu.vector_store %arg3[%c61_53, %c0_54], %44 {strides = array<i32>} : memref<104x896xf32, #tpu.memory_space<vmem>>, vector<3x896xf32>,
    %c6_55 = arith.constant 6 : index
    %c42_56 = arith.constant 42 : index
    %46 = vector.load %arg0[%c6_55, %c42_56] : memref<9x1024xf32, #tpu.memory_space<vmem>>, vector<3x896xf32>
    %c64 = arith.constant 64 : index
    %c0_57 = arith.constant 0 : index
    %47 = vector.load %arg3[%c64, %c0_57] : memref<104x896xf32, #tpu.memory_space<vmem>>, vector<3x896xf32>
    tpu.vector_store %arg3[%c64, %c0_57], %46 {strides = array<i32>} : memref<104x896xf32, #tpu.memory_space<vmem>>, vector<3x896xf32>,
    %c6_58 = arith.constant 6 : index
    %c43_59 = arith.constant 43 : index
    %48 = vector.load %arg0[%c6_58, %c43_59] : memref<9x1024xf32, #tpu.memory_space<vmem>>, vector<3x896xf32>
    %c67 = arith.constant 67 : index
    %c0_60 = arith.constant 0 : index
    %49 = vector.load %arg3[%c67, %c0_60] : memref<104x896xf32, #tpu.memory_space<vmem>>, vector<3x896xf32>
    tpu.vector_store %arg3[%c67, %c0_60], %48 {strides = array<i32>} : memref<104x896xf32, #tpu.memory_space<vmem>>, vector<3x896xf32>,
    %c6_61 = arith.constant 6 : index
    %c44 = arith.constant 44 : index
    %50 = vector.load %arg0[%c6_61, %c44] : memref<9x1024xf32, #tpu.memory_space<vmem>>, vector<3x896xf32>
    %c70 = arith.constant 70 : index
    %c0_62 = arith.constant 0 : index
    %51 = vector.load %arg3[%c70, %c0_62] : memref<104x896xf32, #tpu.memory_space<vmem>>, vector<3x896xf32>
    tpu.vector_store %arg3[%c70, %c0_62], %50 {strides = array<i32>} : memref<104x896xf32, #tpu.memory_space<vmem>>, vector<3x896xf32>,
    %c6_63 = arith.constant 6 : index
    %c60 = arith.constant 60 : index
    %52 = vector.load %arg0[%c6_63, %c60] : memref<9x1024xf32, #tpu.memory_space<vmem>>, vector<3x896xf32>
    %c73 = arith.constant 73 : index
    %c0_64 = arith.constant 0 : index
    %53 = vector.load %arg3[%c73, %c0_64] : memref<104x896xf32, #tpu.memory_space<vmem>>, vector<3x896xf32>
    tpu.vector_store %arg3[%c73, %c0_64], %52 {strides = array<i32>} : memref<104x896xf32, #tpu.memory_space<vmem>>, vector<3x896xf32>,
    %c6_65 = arith.constant 6 : index
    %c61_66 = arith.constant 61 : index
    %54 = vector.load %arg0[%c6_65, %c61_66] : memref<9x1024xf32, #tpu.memory_space<vmem>>, vector<3x896xf32>
    %c76 = arith.constant 76 : index
    %c0_67 = arith.constant 0 : index
    %55 = vector.load %arg3[%c76, %c0_67] : memref<104x896xf32, #tpu.memory_space<vmem>>, vector<3x896xf32>
    tpu.vector_store %arg3[%c76, %c0_67], %54 {strides = array<i32>} : memref<104x896xf32, #tpu.memory_space<vmem>>, vector<3x896xf32>,
    %c6_68 = arith.constant 6 : index
    %c62_69 = arith.constant 62 : index
    %56 = vector.load %arg0[%c6_68, %c62_69] : memref<9x1024xf32, #tpu.memory_space<vmem>>, vector<3x896xf32>
    %c79 = arith.constant 79 : index
    %c0_70 = arith.constant 0 : index
    %57 = vector.load %arg3[%c79, %c0_70] : memref<104x896xf32, #tpu.memory_space<vmem>>, vector<3x896xf32>
    tpu.vector_store %arg3[%c79, %c0_70], %56 {strides = array<i32>} : memref<104x896xf32, #tpu.memory_space<vmem>>, vector<3x896xf32>,
    %c6_71 = arith.constant 6 : index
    %c63_72 = arith.constant 63 : index
    %58 = vector.load %arg0[%c6_71, %c63_72] : memref<9x1024xf32, #tpu.memory_space<vmem>>, vector<3x896xf32>
    %c82 = arith.constant 82 : index
    %c0_73 = arith.constant 0 : index
    %59 = vector.load %arg3[%c82, %c0_73] : memref<104x896xf32, #tpu.memory_space<vmem>>, vector<3x896xf32>
    tpu.vector_store %arg3[%c82, %c0_73], %58 {strides = array<i32>} : memref<104x896xf32, #tpu.memory_space<vmem>>, vector<3x896xf32>,
    %c6_74 = arith.constant 6 : index
    %c64_75 = arith.constant 64 : index
    %60 = vector.load %arg0[%c6_74, %c64_75] : memref<9x1024xf32, #tpu.memory_space<vmem>>, vector<3x896xf32>
    %c85 = arith.constant 85 : index
    %c0_76 = arith.constant 0 : index
    %61 = vector.load %arg3[%c85, %c0_76] : memref<104x896xf32, #tpu.memory_space<vmem>>, vector<3x896xf32>
    tpu.vector_store %arg3[%c85, %c0_76], %60 {strides = array<i32>} : memref<104x896xf32, #tpu.memory_space<vmem>>, vector<3x896xf32>,
    %c6_77 = arith.constant 6 : index
    %c80 = arith.constant 80 : index
    %62 = vector.load %arg0[%c6_77, %c80] : memref<9x1024xf32, #tpu.memory_space<vmem>>, vector<3x896xf32>
    %c88 = arith.constant 88 : index
    %c0_78 = arith.constant 0 : index
    %63 = vector.load %arg3[%c88, %c0_78] : memref<104x896xf32, #tpu.memory_space<vmem>>, vector<3x896xf32>
    tpu.vector_store %arg3[%c88, %c0_78], %62 {strides = array<i32>} : memref<104x896xf32, #tpu.memory_space<vmem>>, vector<3x896xf32>,
    %c6_79 = arith.constant 6 : index
    %c81 = arith.constant 81 : index
    %64 = vector.load %arg0[%c6_79, %c81] : memref<9x1024xf32, #tpu.memory_space<vmem>>, vector<3x896xf32>
    %c91 = arith.constant 91 : index
    %c0_80 = arith.constant 0 : index
    %65 = vector.load %arg3[%c91, %c0_80] : memref<104x896xf32, #tpu.memory_space<vmem>>, vector<3x896xf32>
    tpu.vector_store %arg3[%c91, %c0_80], %64 {strides = array<i32>} : memref<104x896xf32, #tpu.memory_space<vmem>>, vector<3x896xf32>,
    %c6_81 = arith.constant 6 : index
    %c82_82 = arith.constant 82 : index
    %66 = vector.load %arg0[%c6_81, %c82_82] : memref<9x1024xf32, #tpu.memory_space<vmem>>, vector<3x896xf32>
    %c94 = arith.constant 94 : index
    %c0_83 = arith.constant 0 : index
    %67 = vector.load %arg3[%c94, %c0_83] : memref<104x896xf32, #tpu.memory_space<vmem>>, vector<3x896xf32>
    tpu.vector_store %arg3[%c94, %c0_83], %66 {strides = array<i32>} : memref<104x896xf32, #tpu.memory_space<vmem>>, vector<3x896xf32>,
    %c6_84 = arith.constant 6 : index
    %c83 = arith.constant 83 : index
    %68 = vector.load %arg0[%c6_84, %c83] : memref<9x1024xf32, #tpu.memory_space<vmem>>, vector<3x896xf32>
    %c97 = arith.constant 97 : index
    %c0_85 = arith.constant 0 : index
    %69 = vector.load %arg3[%c97, %c0_85] : memref<104x896xf32, #tpu.memory_space<vmem>>, vector<3x896xf32>
    tpu.vector_store %arg3[%c97, %c0_85], %68 {strides = array<i32>} : memref<104x896xf32, #tpu.memory_space<vmem>>, vector<3x896xf32>,
    %c6_86 = arith.constant 6 : index
    %c84 = arith.constant 84 : index
    %70 = vector.load %arg0[%c6_86, %c84] : memref<9x1024xf32, #tpu.memory_space<vmem>>, vector<3x896xf32>
    %c100 = arith.constant 100 : index
    %c0_87 = arith.constant 0 : index
    %71 = vector.load %arg3[%c100, %c0_87] : memref<104x896xf32, #tpu.memory_space<vmem>>, vector<3x896xf32>
    tpu.vector_store %arg3[%c100, %c0_87], %70 {strides = array<i32>} : memref<104x896xf32, #tpu.memory_space<vmem>>, vector<3x896xf32>,
    %c0_88 = arith.constant 0 : index
    %c0_89 = arith.constant 0 : index
    %72 = vector.load %arg1[%c0_88, %c0_89] : memref<16x104xf32, #tpu.memory_space<vmem>>, vector<8x104xf32>
    %c0_90 = arith.constant 0 : index
    %c0_91 = arith.constant 0 : index
    %73 = vector.load %arg3[%c0_90, %c0_91] : memref<104x896xf32, #tpu.memory_space<vmem>>, vector<104x896xf32>
    %cst_92 = arith.constant dense<0.000000e+00> : vector<8x896xf32>
    %74 = tpu.matmul %72, %73, %cst_92 {dimension_numbers = #tpu.dot_dimension_numbers<[1], [0], [0], [1], [0, 0, 1, 1], [], []>, precision = #tpu.contract_precision<fp32>} : vector<8x104xf32>, vector<104x896xf32>, vector<8x896xf32> -> vector<8x896xf32>
    %c8 = arith.constant 8 : index
    %c1_93 = arith.constant 1 : index
    %75 = vector.load %arg1[%c8, %c1_93] : memref<16x104xf32, #tpu.memory_space<vmem>>, vector<8x1xf32>
    %c0_94 = arith.constant 0 : index
    %c42_95 = arith.constant 42 : index
    %76 = vector.load %arg0[%c0_94, %c42_95] : memref<9x1024xf32, #tpu.memory_space<vmem>>, vector<1x896xf32>
    %77 = vector.broadcast %75 : vector<8x1xf32> to vector<8x896xf32>
    %78 = vector.broadcast %76 : vector<1x896xf32> to vector<8x896xf32>
    %79 = arith.mulf %77, %78 : vector<8x896xf32>
    %c8_96 = arith.constant 8 : index
    %c2_97 = arith.constant 2 : index
    %80 = vector.load %arg1[%c8_96, %c2_97] : memref<16x104xf32, #tpu.memory_space<vmem>>, vector<8x1xf32>
    %c1_98 = arith.constant 1 : index
    %c42_99 = arith.constant 42 : index
    %81 = vector.load %arg0[%c1_98, %c42_99] : memref<9x1024xf32, #tpu.memory_space<vmem>>, vector<1x896xf32>
    %82 = vector.broadcast %80 : vector<8x1xf32> to vector<8x896xf32>
    %83 = vector.broadcast %81 : vector<1x896xf32> to vector<8x896xf32>
    %84 = arith.mulf %82, %83 : vector<8x896xf32>
    %85 = arith.addf %79, %84 : vector<8x896xf32>
    %c8_100 = arith.constant 8 : index
    %c3_101 = arith.constant 3 : index
    %86 = vector.load %arg1[%c8_100, %c3_101] : memref<16x104xf32, #tpu.memory_space<vmem>>, vector<8x1xf32>
    %c2_102 = arith.constant 2 : index
    %c42_103 = arith.constant 42 : index
    %87 = vector.load %arg0[%c2_102, %c42_103] : memref<9x1024xf32, #tpu.memory_space<vmem>>, vector<1x896xf32>
    %88 = vector.broadcast %86 : vector<8x1xf32> to vector<8x896xf32>
    %89 = vector.broadcast %87 : vector<1x896xf32> to vector<8x896xf32>
    %90 = arith.mulf %88, %89 : vector<8x896xf32>
    %91 = arith.addf %85, %90 : vector<8x896xf32>
    %c8_104 = arith.constant 8 : index
    %c0_105 = arith.constant 0 : index
    %92 = vector.load %arg1[%c8_104, %c0_105] : memref<16x104xf32, #tpu.memory_space<vmem>>, vector<8x1xf32>
    %93 = vector.broadcast %92 : vector<8x1xf32> to vector<8x896xf32>
    %94 = arith.addf %91, %93 : vector<8x896xf32>
    %cst_106 = arith.constant 0.000000e+00 : f32
    %95 = vector.broadcast %cst_106 : f32 to vector<8x896xf32>
    %96 = arith.cmpf ogt, %94, %95 : vector<8x896xf32>
    %97 = arith.addf %94, %74 : vector<8x896xf32>
    %cst_107 = arith.constant 3.000000e-02 : f32
    %98 = vector.broadcast %cst_107 : f32 to vector<8x896xf32>
    %99 = arith.mulf %94, %98 : vector<8x896xf32>
    %100 = arith.select %96, %97, %99 : vector<8x896xi1>, vector<8x896xf32>
    %c0_108 = arith.constant 0 : index
    %c0_109 = arith.constant 0 : index
    %101 = vector.load %arg2[%c0_108, %c0_109] : memref<8x896xf32, #tpu.memory_space<vmem>>, vector<8x896xf32>
    tpu.vector_store %arg2[%c0_108, %c0_109], %100 {strides = array<i32>} : memref<8x896xf32, #tpu.memory_space<vmem>>, vector<8x896xf32>,
    return
  }
}

</mosaic_0001>

<bundles_post_ra>
// kernel: model_forward.1
= control target key start
LH: loop header
LB: loop body
LE: loop exit
PB: predicated region body
PF: predicated region fallthrough
CT: control target
= control target key end

     0   :  { %s7281_s17 = smov 106   ;;  %s7282_s18 = smov 107   ;;  %v11956_v46 = vlaneseq  ;;  %v7286_v53 = vmov 1.0   ;;  %vm616_vm1 = vcmask 1045504   ;;  %vm684_vm2 = vcmask 1040384   ;;  %s11952_s0 = inlined_call_operand.vmem [shape: f32[9,1024], index: 0, kind: input, shape index: {}]   ;;  %s11953_s1 = inlined_call_operand.vmem [shape: f32[16,104], index: 1, kind: input, shape index: {}]   ;;  %s11954_s2 = inlined_call_operand.vmem [shape: f32[8,896], index: 2, kind: output, shape index: {}]  }
   0x1   :  { %v87_v0 = vld [vmem:[%s11952_s0 + $0x8] sm:$0x38]  ;;  %v88_v2 = vld [vmem:[%s11952_s0 + $0x10] sm:$0x38]  ;;  %s7283_s27 = smov 105   ;;  %s7284_s4 = smov 87  }
   0x2   :  { %v25_v1 = vld [vmem:[%s11952_s0 + $0x8] sm:$0x38]  ;;  %v103_v3 = vrot.slane %v87_v0, 7  ;;  %v26_v5 = vld [vmem:[%s11952_s0 + $0x10] sm:$0x38]  ;;  %v104_v6 = vrot.slane %v88_v2, 7 }
   0x3   :  { %v41_v4 = vrot.slane %v25_v1, 2  ;;  %v42_v7 = vrot.slane %v26_v5, 2  ;;  %v150_v8 = vld [vmem:[%s11952_s0 + $0x10] sm:$0x38]  ;;  %v149_v9 = vld [vmem:[%s11952_s0 + $0x8] sm:$0x38] }
   0x4   :  { %112 = vrot.lane.b32.xlu1 %v103_v3, %s7281_s17  ;;  %v166_v10 = vrot.slane %v150_v8, 4  ;;  %v165_v11 = vrot.slane %v149_v9, 4  ;;  %v219_v12 = vld [vmem:[%s11952_s0 + $0x10] sm:$0x38]  ;;  %v218_v13 = vld [vmem:[%s11952_s0 + $0x8] sm:$0x38] }
   0x5   :  { %50 = vrot.lane.b32.xlu0 %v41_v4, %s7282_s18  ;;  %v235_v14 = vrot.slane %v219_v12, 1  ;;  %v234_v15 = vrot.slane %v218_v13, 1  ;;  %v281_v16 = vld [vmem:[%s11952_s0 + $0x10] sm:$0x38]  ;;  %v280_v17 = vld [vmem:[%s11952_s0 + $0x8] sm:$0x38] }
   0x6   :  { %v297_v18 = vrot.slane %v281_v16, 6  ;;  %v296_v19 = vrot.slane %v280_v17, 6  ;;  %v27_v20 = vld [vmem:[%s11952_s0 + $0x18] sm:$0x38]  ;;  %v24_v21 = vld [vmem:[%s11952_s0] sm:$0x38] }
   0x7   :  { %s7285_s9 = smov 86   ;;  %v43_v22 = vrot.slane %v27_v20, 2  ;;  %v40_v23 = vrot.slane %v24_v21, 2  ;;  %v86_v24 = vld [vmem:[%s11952_s0] sm:$0x38]  ;;  %vm20_vm0 = vcmp.lt.s32.totalorder %v11956_v46, 896 }
   0x8   :  { %114 = vrot.lane.b32.xlu1 %v104_v6, %s7281_s17  ;;  %v28_v25 = vld [vmem:[%s11952_s0 + $0x20] sm:$0x38]  ;;  %v102_v26 = vrot.slane %v86_v24, 7  ;;  %v89_v29 = vld [vmem:[%s11952_s0 + $0x18] sm:$0x38]  ;;  %s7287_s19 = smov 85  }
   0x9   :  { %52 = vrot.lane.b32.xlu0 %v42_v7, %s7282_s18  ;;  %v44_v27 = vrot.slane %v28_v25, 2  ;;  %v90_v28 = vld [vmem:[%s11952_s0 + $0x20] sm:$0x38]  ;;  %v105_v31 = vrot.slane %v89_v29, 7  ;;  %v151_v32 = vld [vmem:[%s11952_s0 + $0x18] sm:$0x38] }
   0xa   :  { %v106_v30 = vrot.slane %v90_v28, 7  ;;  %v148_v33 = vld [vmem:[%s11952_s0] sm:$0x38]  ;;  %v167_v34 = vrot.slane %v151_v32, 4  ;;  %v220_v41 = vld [vmem:[%s11952_s0 + $0x18] sm:$0x38] }
   0xb   :  { %v164_v35 = vrot.slane %v148_v33, 4  ;;  %v217_v36 = vld [vmem:[%s11952_s0] sm:$0x38]  ;;  %v236_v43 = vrot.slane %v220_v41, 1  ;;  %v282_v44 = vld [vmem:[%s11952_s0 + $0x18] sm:$0x38] }
   0xc   :  { %176 = vrot.lane.b32.xlu1 %v166_v10, %s7283_s27  ;;  %v152_v37 = vld [vmem:[%s11952_s0 + $0x20] sm:$0x38]  ;;  %v233_v38 = vrot.slane %v217_v36, 1  ;;  %v298_v47 = vrot.slane %v282_v44, 6  ;;  %v342_v49 = vld [vmem:[%s11952_s0 + $0x8] sm:$0x38] }
   0xd   :  { %174 = vrot.lane.b32.xlu0 %v165_v11, %s7283_s27  ;;  %v168_v39 = vrot.slane %v152_v37, 4  ;;  %v221_v40 = vld [vmem:[%s11952_s0 + $0x20] sm:$0x38]  ;;  %v358_v51 = vrot.slane %v342_v49, 3  ;;  %v343_v54 = vld [vmem:[%s11952_s0 + $0x10] sm:$0x38] }
   0xe   :  { %v237_v42 = vrot.slane %v221_v40, 1  ;;  %v279_v45 = vld [vmem:[%s11952_s0] sm:$0x38]  ;;  %22 = vst.msk [vmem:[#allocation2] ss:$8 sm:$0xf] %vm20_vm0, %v7286_v53 }
   0xf   :  { %v295_v48 = vrot.slane %v279_v45, 6  ;;  %v283_v50 = vld [vmem:[%s11952_s0 + $0x20] sm:$0x38]  ;;  %23 = vst.msk [vmem:[#allocation2] ss:$8 sm:$0x70] %vm20_vm0, %v7286_v53 }
  0x10   :  { %245 = vrot.lane.b32.xlu1 %v235_v14, %s7284_s4  ;;  %v299_v52 = vrot.slane %v283_v50, 6  ;;  %v359_v55 = vrot.slane %v343_v54, 3  ;;  %v404_v56 = vld [vmem:[%s11952_s0 + $0x8] sm:$0x38]  ;;  %s7288_s24 = smov 67   ;;  %s7289_s5 = smov 66  }
  0x11   :  { %243 = vrot.lane.b32.xlu0 %v234_v15, %s7284_s4  ;;  %v458_v57 = vld [vmem:[%s11952_s0 + $0x8] sm:$0x38]  ;;  %v405_v59 = vld [vmem:[%s11952_s0 + $0x10] sm:$0x38]  ;;  %v7459_v0 = vld [vmem:[%s11952_s0 + $0x8] sm:$0xc0] }
  0x12   :  { %v474_v58 = vrot.slane %v458_v57, 5  ;;  %v527_v60 = vld [vmem:[%s11952_s0 + $0x8] sm:$0x38]  ;;  %v459_v61 = vld [vmem:[%s11952_s0 + $0x10] sm:$0x38]  ;;  %s7290_s11 = smov 65  }
  0x13   :  { %v543_v62 = vrot.slane %v527_v60, 2  ;;  %v475_v63 = vrot.slane %v459_v61, 5  ;;  %v528_v1 = vld [vmem:[%s11952_s0 + $0x10] sm:$0x38]  ;;  %v686_v2 = vrot.slane %v7459_v0, 7  ;;  %s7291_s21 = smov 127  }
  0x14   :  { %307 = vrot.lane.b32.xlu1 %v297_v18, %s7285_s9  ;;  %v544_v3 = vrot.slane %v528_v1, 2  ;;  %v341_v4 = vld [vmem:[%s11952_s0] sm:$0x38]  ;;  %v7473_v5 = vld [vmem:[%s11952_s0 + $0x10] sm:$0xc0]  ;;  %vm816_vm3 = vcmask 1043456  }
  0x15   :  { %305 = vrot.lane.b32.xlu0 %v296_v19, %s7285_s9  ;;  %v589_v6 = vld [vmem:[%s11952_s0 + $0x8] sm:$0xc0]  ;;  %v357_v7 = vrot.slane %v341_v4, 3  ;;  %v687_v8 = vrot.slane %v7473_v5, 7  ;;  %v596_v9 = vld [vmem:[%s11952_s0 + $0x48] sm:$0x1] }
  0x16   :  { %v345_v10 = vld [vmem:[%s11952_s0 + $0x20] sm:$0x38]  ;;  %v344_v11 = vld [vmem:[%s11952_s0 + $0x18] sm:$0x38]  ;;  %v620_v12 = vrot.slane %v589_v6, 2  ;;  %v621_v13 = vrot.slane %v596_v9, 2 }
  0x17   :  { %v361_v14 = vrot.slane %v345_v10, 3  ;;  %v360_v15 = vrot.slane %v344_v11, 3  ;;  %v406_v17 = vld [vmem:[%s11952_s0 + $0x18] sm:$0x38]  ;;  %v403_v18 = vld [vmem:[%s11952_s0] sm:$0x38] }
  0x18   :  { %54 = vrot.lane.b32.xlu1 %v43_v22, %s7282_s18  ;;  %v622_v16 = vsel %vm616_vm1, %v620_v12, %v621_v13  ;;  %v457_v19 = vld [vmem:[%s11952_s0] sm:$0x38]  ;;  %v588_v24 = vld [vmem:[%s11952_s0] sm:$0xc0]  ;;  %v595_v25 = vld [vmem:[%s11952_s0 + $0x40] sm:$0x1] }
  0x19   :  { %48 = vrot.lane.b32.xlu0 %v40_v23, %s7282_s18  ;;  %646 = vst [vmem:[#allocation2 + $0xb0] sm:$0x70] %v622_v16  ;;  %v473_v20 = vrot.slane %v457_v19, 5  ;;  %v407_v21 = vld [vmem:[%s11952_s0 + $0x20] sm:$0x38]  ;;  %vm911_vm4 = vcmask 1046528  }
  0x1a   :  { %v461_v22 = vld [vmem:[%s11952_s0 + $0x20] sm:$0x38]  ;;  %v460_v23 = vld [vmem:[%s11952_s0 + $0x18] sm:$0x38]  ;;  %v591_v33 = vld [vmem:[%s11952_s0 + $0x18] sm:$0xc0] }
  0x1b   :  { %v477_v28 = vrot.slane %v461_v22, 5  ;;  %v476_v29 = vrot.slane %v460_v23, 5  ;;  %v526_v32 = vld [vmem:[%s11952_s0] sm:$0x38]  ;;  %v590_v37 = vld [vmem:[%s11952_s0 + $0x10] sm:$0xc0] }
  0x1c   :  { %110 = vrot.lane.b32.xlu1 %v102_v26, %s7281_s17  ;;  %v617_v26 = vrot.slane %v588_v24, 2  ;;  %v542_v40 = vrot.slane %v526_v32, 2  ;;  %v623_v41 = vrot.slane %v590_v37, 2  ;;  %v530_v44 = vld [vmem:[%s11952_s0 + $0x20] sm:$0x38]  ;;  %s7292_s16 = smov 126  }
  0x1d   :  { %56 = vrot.lane.b32.xlu0 %v44_v27, %s7282_s18  ;;  %v618_v27 = vrot.slane %v595_v25, 2  ;;  %v546_v49 = vrot.slane %v530_v44, 2  ;;  %v7564_v50 = vld [vmem:[%s11952_s0 + $0x20] sm:$0xc0]  ;;  %v661_v53 = vld [vmem:[%s11952_s0 + $0x48] sm:$0x1] }
  0x1e   :  { %v689_v54 = vrot.slane %v7564_v50, 7  ;;  %v695_v57 = vrot.slane %v661_v53, 7  ;;  %v785_v60 = vld [vmem:[%s11952_s0 + $0x8] sm:$0xc0]  ;;  %v793_v61 = vld [vmem:[%s11952_s0 + $0x48] sm:$0x1] }
  0x1f   :  { %v820_v4 = vrot.slane %v785_v60, 4  ;;  %v821_v6 = vrot.slane %v793_v61, 4  ;;  %v889_v9 = vld [vmem:[%s11952_s0 + $0x50] sm:$0x1]  ;;  %v880_v5 = vld [vmem:[%s11952_s0 + $0x8] sm:$0xc0] }
  0x20   :  { %118 = vrot.lane.b32.xlu1 %v106_v30, %s7281_s17  ;;  %v619_v30 = vsel %vm616_vm1, %v617_v26, %v618_v27  ;;  %v888_v0 = vld [vmem:[%s11952_s0 + $0x48] sm:$0x1]  ;;  %v915_v12 = vrot.slane %v880_v5, 1  ;;  %v975_v16 = vld [vmem:[%s11952_s0 + $0x8] sm:$0xc0]  ;;  %vm1006_vm5 = vcmask 1041408  }
  0x21   :  { %116 = vrot.lane.b32.xlu0 %v105_v31, %s7281_s17  ;;  %v529_v31 = vld [vmem:[%s11952_s0 + $0x18] sm:$0x38]  ;;  %645 = vst [vmem:[#allocation2 + $0xa8] sm:$0x70] %v619_v30  ;;  %v822_v11 = vsel %vm816_vm3, %v820_v4, %v821_v6  ;;  %v916_v13 = vrot.slane %v888_v0, 1  ;;  %v1010_v22 = vrot.slane %v975_v16, 6 }
  0x22   :  { %v1071_v24 = vld [vmem:[%s11952_s0 + $0x10] sm:$0xc0]  ;;  %v1079_v25 = vld [vmem:[%s11952_s0 + $0x50] sm:$0x1]  ;;  %v1070_v26 = vld [vmem:[%s11952_s0 + $0x8] sm:$0xc0] }
  0x23   :  { %v1078_v27 = vld [vmem:[%s11952_s0 + $0x48] sm:$0x1]  ;;  %s7293_s3 = smov 125   ;;  %v1105_v32 = vrot.slane %v1070_v26, 3  ;;  %vm1101_vm6 = vcmask 1044480   ;;  %s7294_s6 = smov 124  }
  0x24   :  { %178 = vrot.lane.b32.xlu1 %v167_v34, %s7283_s27  ;;  %v598_v34 = vld [vmem:[%s11952_s0 + $0x58] sm:$0x1]  ;;  %s7295_s13 = smov 108   ;;  %vm126_vm7 = vcmask 867328   ;;  %vm64_vm8 = vcmask 875520   ;;  %vm12095_vm9 = vcmask 859136  }
  0x25   :  { %172 = vrot.lane.b32.xlu0 %v164_v35, %s7283_s27  ;;  %v626_v35 = vrot.slane %v591_v33, 2  ;;  %v627_v36 = vrot.slane %v598_v34, 2  ;;  %v1106_v33 = vrot.slane %v1078_v27, 3  ;;  %v664_v53 = vld [vmem:[%s11952_s0 + $0x60] sm:$0x1]  ;;  %vm12094_vm10 = vcmask 711680  }
  0x26   :  { %v879_v50 = vld [vmem:[%s11952_s0] sm:$0xc0]  ;;  %vm11955_vm11 = vcmask 703488   ;;  %vm1302_vm12 = vcmask 1042432   ;;  %vm11979_vm13 = vcmask 695296   ;;  %vm11962_vm14 = vcmask 547840  }
  0x27   :  { %v628_v45 = vsel %vm616_vm1, %v626_v35, %v627_v36  ;;  %v1107_v35 = vsel %vm1101_vm6, %v1105_v32, %v1106_v33  ;;  %vm11961_vm15 = vcmask 539648   ;;  %vm11960_vm0 = vcmask 531456   ;;  %s7296_s14 = smov 104   ;;  %s7297_s28 = smov 88  }
  0x28   :  { %241 = vrot.lane.b32.xlu1 %v233_v38, %s7284_s4  ;;  %v597_v38 = vld [vmem:[%s11952_s0 + $0x50] sm:$0x1]  ;;  %648 = vst [vmem:[#allocation2 + $0xc0] sm:$0x70] %v628_v45  ;;  %v784_v45 = vld [vmem:[%s11952_s0] sm:$0xc0] }
  0x29   :  { %180 = vrot.lane.b32.xlu0 %v168_v39, %s7283_s27  ;;  %v545_v39 = vrot.slane %v529_v31, 2  ;;  %v1109_v31 = vrot.slane %v1079_v25, 3  ;;  %s12029_s10 = smov 84   ;;  %s12027_s29 = smov 68  }
  0x2a   :  { %s12060_s22 = smov 64   ;;  %s12058_s23 = smov 48  }
  0x2b   :  { %s12056_s8 = smov 47   ;;  %s7303_s25 = smov 46  }
  0x2c   :  { %249 = vrot.lane.b32.xlu1 %v237_v42, %s7284_s4  ;;  %v624_v42 = vrot.slane %v597_v38, 2  ;;  %v663_v38 = vld [vmem:[%s11952_s0 + $0x58] sm:$0x1]  ;;  %s7305_s15 = smov 45   ;;  %s12423_s30 = smov 68  }
  0x2d   :  { %247 = vrot.lane.b32.xlu0 %v236_v43, %s7284_s4  ;;  %v7551_v43 = vld [vmem:[%s11952_s0] sm:$0xc0] }
  0x30   :  { %309 = vrot.lane.b32.xlu1 %v298_v47, %s7285_s9  ;;  %v625_v47 = vsel %vm616_vm1, %v623_v41, %v624_v42  ;;  %v1165_v41 = vld [vmem:[%s11952_s0 + $0x8] sm:$0xc0]  ;;  %v699_v42 = vrot.slane %v663_v38, 7 }
  0x31   :  { %303 = vrot.lane.b32.xlu0 %v295_v48, %s7285_s9  ;;  %647 = vst [vmem:[#allocation2 + $0xb8] sm:$0x70] %v625_v47  ;;  %v685_v48 = vrot.slane %v7551_v43, 7  ;;  %v787_v43 = vld [vmem:[%s11952_s0 + $0x18] sm:$0xc0] }
  0x32   :  { %v826_v5 = vrot.slane %v787_v43, 4  ;;  %v1069_v43 = vld [vmem:[%s11952_s0] sm:$0xc0] }
  0x34   :  { %367 = vrot.lane.b32.xlu1 %v358_v51, %s7287_s19  ;;  %v7569_v51 = vld [vmem:[%s11952_s0 + $0x18] sm:$0xc0] }
  0x35   :  { %311 = vrot.lane.b32.xlu0 %v299_v52, %s7285_s9  ;;  %v662_v52 = vld [vmem:[%s11952_s0 + $0x50] sm:$0x1] }
  0x38   :  { %421 = vrot.lane.b32.xlu1 %v404_v56, %s7288_s24  ;;  %v697_v56 = vrot.slane %v662_v52, 7  ;;  %v792_v52 = vld [vmem:[%s11952_s0 + $0x40] sm:$0x1] }
  0x39   :  { %369 = vrot.lane.b32.xlu0 %v359_v55, %s7287_s19  ;;  %v688_v55 = vrot.slane %v7569_v51, 7  ;;  %v818_v61 = vrot.slane %v792_v52, 4 }
  0x3a   :  { %v698_v1 = vsel %vm684_vm2, %v687_v8, %v697_v56 }
  0x3c   :  { %483 = vrot.lane.b32.xlu1 %v474_v58, %s7289_s5  ;;  %v786_v58 = vld [vmem:[%s11952_s0 + $0x10] sm:$0xc0] }
  0x3d   :  { %423 = vrot.lane.b32.xlu0 %v405_v59, %s7288_s24  ;;  %v794_v59 = vld [vmem:[%s11952_s0 + $0x50] sm:$0x1] }
  0x40   :  { %552 = vrot.lane.b32.xlu1 %v543_v62, %s7290_s11  ;;  %v823_v62 = vrot.slane %v786_v58, 4  ;;  %v817_v58 = vrot.slane %v784_v45, 4 }
  0x41   :  { %485 = vrot.lane.b32.xlu0 %v475_v63, %s7289_s5  ;;  %v824_v63 = vrot.slane %v794_v59, 4  ;;  %v700_v59 = vsel %vm684_vm2, %v688_v55, %v699_v42  ;;  %v985_v42 = vld [vmem:[%s11952_s0 + $0x58] sm:$0x1] }
  0x43   :  { %v825_v10 = vsel %vm816_vm3, %v823_v62, %v824_v63  ;;  %v701_v62 = vrot.slane %v664_v53, 7  ;;  %v788_v63 = vld [vmem:[%s11952_s0 + $0x20] sm:$0xc0] }
  0x44   :  { %711 = vrot.lane.b32.xlu1 %v686_v2, %s7291_s21 }
  0x45   :  { %554 = vrot.lane.b32.xlu0 %v544_v3, %s7290_s11  ;;  %v696_v3 = vsel %vm684_vm2, %v686_v2, %v695_v57 }
  0x48   :  { %365 = vrot.lane.b32.xlu1 %v357_v7, %s7287_s19  ;;  %v881_v7 = vld [vmem:[%s11952_s0 + $0x10] sm:$0xc0] }
  0x49   :  { %713 = vrot.lane.b32.xlu0 %v687_v8, %s7291_s21  ;;  %v918_v2 = vrot.slane %v881_v7, 1  ;;  %v919_v8 = vrot.slane %v889_v9, 1  ;;  %v819_v7 = vsel %vm816_vm3, %v817_v58, %v818_v61  ;;  %v702_v9 = vsel %vm684_vm2, %v689_v54, %v701_v62 }
  0x4c   :  { %373 = vrot.lane.b32.xlu1 %v361_v14, %s7287_s19  ;;  %v976_v14 = vld [vmem:[%s11952_s0 + $0x10] sm:$0xc0] }
  0x4d   :  { %371 = vrot.lane.b32.xlu0 %v360_v15, %s7287_s19  ;;  %v984_v15 = vld [vmem:[%s11952_s0 + $0x50] sm:$0x1] }
  0x4e   :  { %v1014_v19 = vrot.slane %v984_v15, 6 }
  0x50   :  { %425 = vrot.lane.b32.xlu1 %v406_v17, %s7288_s24  ;;  %v983_v17 = vld [vmem:[%s11952_s0 + $0x48] sm:$0x1] }
  0x51   :  { %419 = vrot.lane.b32.xlu0 %v403_v18, %s7288_s24  ;;  %v1013_v18 = vrot.slane %v976_v14, 6  ;;  %v1011_v23 = vrot.slane %v983_v17, 6  ;;  %v912_v17 = vrot.slane %v879_v50, 1  ;;  %v1102_v50 = vrot.slane %v1069_v43, 3 }
  0x53   :  { %v1012_v30 = vsel %vm1006_vm5, %v1010_v22, %v1011_v23  ;;  %v883_v23 = vld [vmem:[%s11952_s0 + $0x20] sm:$0xc0] }
  0x54   :  { %481 = vrot.lane.b32.xlu1 %v473_v20, %s7289_s5  ;;  %v920_v20 = vsel %vm911_vm4, %v918_v2, %v919_v8  ;;  %v882_v2 = vld [vmem:[%s11952_s0 + $0x18] sm:$0xc0]  ;;  %v890_v8 = vld [vmem:[%s11952_s0 + $0x58] sm:$0x1]  ;;  %v924_v32 = vrot.slane %v883_v23, 1 }
  0x55   :  { %427 = vrot.lane.b32.xlu0 %v407_v21, %s7288_s24  ;;  %v917_v21 = vsel %vm911_vm4, %v915_v12, %v916_v13  ;;  %v921_v13 = vrot.slane %v882_v2, 1  ;;  %v922_v14 = vrot.slane %v890_v8, 1 }
  0x58   :  { %489 = vrot.lane.b32.xlu1 %v477_v28, %s7289_s5  ;;  %v1015_v28 = vsel %vm1006_vm5, %v1013_v18, %v1014_v19  ;;  %v974_v19 = vld [vmem:[%s11952_s0] sm:$0xc0] }
  0x59   :  { %487 = vrot.lane.b32.xlu0 %v476_v29, %s7289_s5  ;;  %v1108_v29 = vrot.slane %v1071_v24, 3  ;;  %v891_v24 = vld [vmem:[%s11952_s0 + $0x60] sm:$0x1]  ;;  %v1007_v27 = vrot.slane %v974_v19, 6 }
  0x5a   :  { %v925_v33 = vrot.slane %v891_v24, 1 }
  0x5b   :  { %v1110_v34 = vsel %vm1101_vm6, %v1108_v29, %v1109_v31 }
  0x5c   :  { %556 = vrot.lane.b32.xlu1 %v545_v39, %s7290_s11  ;;  %v660_v39 = vld [vmem:[%s11952_s0 + $0x40] sm:$0x1] }
  0x5d   :  { %550 = vrot.lane.b32.xlu0 %v542_v40, %s7290_s11  ;;  %v1166_v40 = vld [vmem:[%s11952_s0 + $0x10] sm:$0xc0]  ;;  %v693_v44 = vrot.slane %v660_v39, 7  ;;  %v986_v39 = vld [vmem:[%s11952_s0 + $0x60] sm:$0x1] }
  0x5f   :  { %v694_v60 = vsel %vm684_vm2, %v685_v48, %v693_v44 }
  0x60   :  { %709 = vrot.lane.b32.xlu1 %v685_v48, %s7291_s21  ;;  %v795_v48 = vld [vmem:[%s11952_s0 + $0x58] sm:$0x1] }
  0x61   :  { %558 = vrot.lane.b32.xlu0 %v546_v49, %s7290_s11  ;;  %v827_v0 = vrot.slane %v795_v48, 4  ;;  %v1077_v48 = vld [vmem:[%s11952_s0 + $0x40] sm:$0x1] }
  0x63   :  { %v828_v16 = vsel %vm816_vm3, %v826_v5, %v827_v0 }
  0x64   :  { %717 = vrot.lane.b32.xlu1 %v689_v54, %s7291_s21  ;;  %v887_v54 = vld [vmem:[%s11952_s0 + $0x40] sm:$0x1] }
  0x65   :  { %715 = vrot.lane.b32.xlu0 %v688_v55, %s7291_s21  ;;  %v829_v55 = vrot.slane %v788_v63, 4  ;;  %v913_v18 = vrot.slane %v887_v54, 1  ;;  %v1103_v54 = vrot.slane %v1077_v48, 3 }
  0x67   :  { %v914_v31 = vsel %vm911_vm4, %v912_v17, %v913_v18  ;;  %v1104_v24 = vsel %vm1101_vm6, %v1102_v50, %v1103_v54  ;;  %v1365_v50 = vld [vmem:[%s11952_s0 + $0x8] sm:$0xc0]  ;;  %v1373_v54 = vld [vmem:[%s11952_s0 + $0x48] sm:$0x1] }
  0x68   :  { %729 = vrot.lane.b32.xlu1 %v698_v1, %s7291_s21  ;;  %v796_v1 = vld [vmem:[%s11952_s0 + $0x60] sm:$0x1] }
  0x69   :  { %727 = vrot.lane.b32.xlu0 %v696_v3, %s7291_s21  ;;  %v830_v6 = vrot.slane %v796_v1, 4 }
  0x6b   :  { %v831_v15 = vsel %vm816_vm3, %v829_v55, %v830_v6 }
  0x6c   :  { %845 = vrot.lane.b32.xlu1 %v825_v10, %s7292_s16 }
  0x6d   :  { %843 = vrot.lane.b32.xlu0 %v822_v11, %s7292_s16 }
  0x70   :  { %940 = vrot.lane.b32.xlu1 %v920_v20, %s7293_s3  ;;  %v982_v20 = vld [vmem:[%s11952_s0 + $0x40] sm:$0x1] }
  0x71   :  { %938 = vrot.lane.b32.xlu0 %v917_v21, %s7293_s3 }
  0x74   :  { %1035 = vrot.lane.b32.xlu1 %v1015_v28, %s7294_s6  ;;  %v1008_v28 = vrot.slane %v982_v20, 6 }
  0x75   :  { %1033 = vrot.lane.b32.xlu0 %v1012_v30, %s7294_s6  ;;  %v923_v30 = vsel %vm911_vm4, %v921_v13, %v922_v14 }
  0x76   :  { %v7659_v36 = vpop.permute.xlu1 %112  ;;  %v1009_v52 = vsel %vm1006_vm5, %v1007_v27, %v1008_v28 }
  0x77   :  { %v7661_v37 = vpop.permute.xlu0 %50 }
  0x78   :  { %1130 = vrot.lane.b32.xlu1 %v1110_v34, %s7295_s13  ;;  %v978_v34 = vld [vmem:[%s11952_s0 + $0x20] sm:$0xc0] }
  0x79   :  { %1128 = vrot.lane.b32.xlu0 %v1107_v35, %s7295_s13  ;;  %v1019_v53 = vrot.slane %v978_v34, 6 }
  0x7a   :  { %v7680_v47 = vpop.permute.xlu1 %114 }
  0x7b   :  { %v7682_v49 = vpop.permute.xlu0 %52  ;;  %v128_v56 = vsel %vm126_vm7, %v7659_v36, %v7680_v47 }
  0x7c   :  { %v66_v57 = vsel %vm64_vm8, %v7661_v37, %v7682_v49  ;;  %142 = vst [vmem:[#allocation2 + $0x8] sm:$0x70] %v128_v56  ;;  %1200 = vrot.lane.b32.xlu1 %v1166_v40, %s7282_s18  ;;  %v926_v56 = vsel %vm911_vm4, %v924_v32, %v925_v33  ;;  %v1164_v32 = vld [vmem:[%s11952_s0] sm:$0xc0] }
  0x7d   :  { %80 = vst [vmem:[#allocation2 + $0x8] sm:$0xe] %v66_v57  ;;  %1198 = vrot.lane.b32.xlu0 %v1165_v41, %s7282_s18  ;;  %v977_v41 = vld [vmem:[%s11952_s0 + $0x18] sm:$0xc0]  ;;  %v1020_v57 = vrot.slane %v986_v39, 6 }
  0x7e   :  { %v7710_v3 = vpop.permute.xlu1 %176  ;;  %v1016_v58 = vrot.slane %v977_v41, 6  ;;  %v1168_v39 = vld [vmem:[%s11952_s0 + $0x20] sm:$0xc0]  ;;  %v1167_v41 = vld [vmem:[%s11952_s0 + $0x18] sm:$0xc0] }
  0x7f   :  { %v7712_v4 = vpop.permute.xlu0 %174  ;;  %v1021_v55 = vsel %vm1006_vm5, %v1019_v53, %v1020_v57  ;;  %v1279_v57 = vld [vmem:[%s11952_s0 + $0x48] sm:$0x1] }
  0x80   :  { %v190_v51 = vsel %vm12095_vm9, %v7712_v4, %v7710_v3  ;;  %731 = vrot.lane.b32.xlu1 %v700_v59, %s7291_s21  ;;  %v1017_v59 = vrot.slane %v985_v42, 6 }
  0x81   :  { %204 = vst [vmem:[#allocation2 + $0x40] ss:$-52 sps:$4 sm:$0x83] %v190_v51   ;;  %725 = vrot.lane.b32.xlu0 %v694_v60, %s7291_s21 }
  0x82   :  { %v7735_v10 = vpop.permute.xlu1 %245  ;;  %v1018_v6 = vsel %vm1006_vm5, %v1016_v58, %v1017_v59 }
  0x83   :  { %v7737_v11 = vpop.permute.xlu0 %243 }
  0x84   :  { %v259_v12 = vsel %vm12094_vm10, %v7737_v11, %v7735_v10  ;;  %841 = vrot.lane.b32.xlu1 %v819_v7, %s7292_s16 }
  0x85   :  { %273 = vst [vmem:[#allocation2 + $0x40] sm:$0x1c] %v259_v12  ;;  %733 = vrot.lane.b32.xlu0 %v702_v9, %s7291_s21  ;;  %v1073_v12 = vld [vmem:[%s11952_s0 + $0x20] sm:$0xc0] }
  0x86   :  { %v7758_v21 = vpop.permute.xlu1 %307  ;;  %v1114_v19 = vrot.slane %v1073_v12, 3 }
  0x87   :  { %v7760_v22 = vpop.permute.xlu0 %305 }
  0x88   :  { %v321_v25 = vsel %vm11955_vm11, %v7760_v22, %v7758_v21  ;;  %v3057_v26 = vld [vmem:[#allocation2 + $0x8] sm:$0xff]  ;;  %849 = vrot.lane.b32.xlu1 %v831_v15, %s7292_s16  ;;  %v1081_v15 = vld [vmem:[%s11952_s0 + $0x60] sm:$0x1] }
  0x89   :  { %335 = vst [vmem:[#allocation2 + $0x40] sm:$0xe0] %v321_v25  ;;  %847 = vrot.lane.b32.xlu0 %v828_v16, %s7292_s16  ;;  %v3150_v29 = vand.u32 4294901760, %v3057_v26  ;;  %v1115_v25 = vrot.slane %v1081_v15, 3 }
  0x8a   :  { %v55_v35 = vpop.permute.xlu1 %54 }
  0x8b   :  { %v49_v38 = vpop.permute.xlu0 %48  ;;  %v7781_v40 = vsub.f32 %v3057_v26, %v3150_v29  ;;  %v67_v44 = vsel %vm64_vm8, %v7682_v49, %v55_v35  ;;  %v1080_v49 = vld [vmem:[%s11952_s0 + $0x58] sm:$0x1] }
  0x8c   :  { %v65_v45 = vsel %vm64_vm8, %v49_v38, %v7661_v37  ;;  %81 = vst [vmem:[#allocation2 + $0x10] sm:$0xe] %v67_v44  ;;  %942 = vrot.lane.b32.xlu1 %v923_v30, %s7293_s3  ;;  %v1072_v37 = vld [vmem:[%s11952_s0 + $0x18] sm:$0xc0]  ;;  %v1112_v9 = vrot.slane %v1080_v49, 3 }
  0x8d   :  { %12197 = vst [vmem:[#allocation3_spill] sm:$0xff] %v7781_v40  ;;  %79 = vst [vmem:[#allocation2] sm:$0xe] %v65_v45  ;;  %936 = vrot.lane.b32.xlu0 %v914_v31, %s7293_s3  ;;  %v1111_v7 = vrot.slane %v1072_v37, 3  ;;  %v1272_v44 = vld [vmem:[%s11952_s0 + $0x10] sm:$0xc0] }
  0x8e   :  { %v111_v60 = vpop.permute.xlu1 %110  ;;  %v1280_v45 = vld [vmem:[%s11952_s0 + $0x50] sm:$0x1]  ;;  %v1173_v49 = vld [vmem:[%s11952_s0 + $0x48] sm:$0x1] }
  0x8f   :  { %v7797_v61 = vpop.permute.xlu0 %56  ;;  %v127_v62 = vsel %vm126_vm7, %v111_v60, %v7659_v36  ;;  %v3254_v36 = vand.u32 4294901760, %v7781_v40  ;;  %v1113_v18 = vsel %vm1101_vm6, %v1111_v7, %v1112_v9  ;;  %v1174_v37 = vld [vmem:[%s11952_s0 + $0x50] sm:$0x1] }
  0x90   :  { %v68_v63 = vsel %vm64_vm8, %v55_v35, %v7797_v61  ;;  %v3064_v1 = vld [vmem:[#allocation2 + $0x40] sm:$0xff]  ;;  %141 = vst [vmem:[#allocation2] sm:$0x70] %v127_v62  ;;  %1031 = vrot.lane.b32.xlu1 %v1009_v52, %s7294_s6  ;;  %v1271_v52 = vld [vmem:[%s11952_s0 + $0x8] sm:$0xc0]  ;;  %v1309_v62 = vrot.slane %v1272_v44, 5 }
  0x91   :  { %82 = vst [vmem:[#allocation2 + $0x18] sm:$0xe] %v68_v63  ;;  %944 = vrot.lane.b32.xlu0 %v926_v56, %s7293_s3  ;;  %v3154_v51 = vand.u32 4294901760, %v3064_v1  ;;  %v3255_v16 = vsub.f32 %v7781_v40, %v3254_v36  ;;  %v1310_v63 = vrot.slane %v1280_v45, 5  ;;  %v1306_v48 = vrot.slane %v1271_v52, 5 }
  0x92   :  { %v7820_v5 = vpop.permute.xlu1 %118 }
  0x93   :  { %v117_v0 = vpop.permute.xlu0 %116  ;;  %v7822_v2 = vpack.c.bf16 %v3154_v51, %v3150_v29  ;;  %v7824_v8 = vsub.f32 %v3064_v1, %v3154_v51  ;;  %v3256_v30 = vand.u32 4294901760, %v3255_v16  ;;  %v1307_v51 = vrot.slane %v1279_v57, 5 }
  0x94   :  { %v129_v13 = vsel %vm126_vm7, %v7680_v47, %v117_v0  ;;  %v130_v14 = vsel %vm126_vm7, %v117_v0, %v7820_v5  ;;  %1039 = vrot.lane.b32.xlu1 %v1021_v55, %s7294_s6  ;;  %v1374_v55 = vld [vmem:[%s11952_s0 + $0x50] sm:$0x1] }
  0x95   :  { %12198 = vst [vmem:[#allocation4_spill] sm:$0xff] %v7822_v2  ;;  %143 = vst [vmem:[#allocation2 + $0x10] sm:$0x70] %v129_v13  ;;  %6663 = vmatprep.subr.bf16.mxu0 %v7822_v2  ;;  %v3266_v17 = vand.u32 4294901760, %v7824_v8  ;;  %1037 = vrot.lane.b32.xlu0 %v1018_v6, %s7294_s6 }
  0x96   :  { %144 = vst [vmem:[#allocation2 + $0x18] sm:$0x70] %v130_v14  ;;  %v179_v20 = vpop.permute.xlu1 %178  ;;  %v1403_v14 = vrot.slane %v1374_v55, 2 }
  0x97   :  { %v173_v23 = vpop.permute.xlu0 %172  ;;  %v3267_v26 = vsub.f32 %v7824_v8, %v3266_v17  ;;  %v7846_v27 = vpack.c.bf16 %v3266_v17, %v3254_v36  ;;  %v191_v28 = vsel %vm12095_vm9, %v7710_v3, %v179_v20  ;;  %v1116_v3 = vsel %vm1101_vm6, %v1114_v19, %v1115_v25  ;;  %v1366_v36 = vld [vmem:[%s11952_s0 + $0x10] sm:$0xc0] }
  0x98   :  { %v189_v29 = vsel %vm12095_vm9, %v173_v23, %v7712_v4  ;;  %205 = vst [vmem:[#allocation2 + $0x48] ss:$-52 sps:$4 sm:$0x83] %v191_v28   ;;  %1132 = vrot.lane.b32.xlu1 %v1113_v18, %s7295_s13  ;;  %v1308_v17 = vsel %vm1302_vm12, %v1306_v48, %v1307_v51  ;;  %v1399_v18 = vrot.slane %v1365_v50, 2  ;;  %v1400_v19 = vrot.slane %v1373_v54, 2 }
  0x99   :  { %12199 = vst [vmem:[#allocation5_spill] sm:$0xff] %v7846_v27  ;;  %203 = vst [vmem:[#allocation2 + $0x38] ss:$-52 sps:$4 sm:$0x83] %v189_v29   ;;  %v3268_v31 = vand.u32 4294901760, %v3267_v26  ;;  %1126 = vrot.lane.b32.xlu0 %v1104_v24, %s7295_s13 }
  0x9a   :  { %v242_v33 = vpop.permute.xlu1 %241  ;;  %v1459_v25 = vld [vmem:[%s11952_s0 + $0x10] sm:$0xc0]  ;;  %v1466_v26 = vld [vmem:[%s11952_s0 + $0x48] sm:$0x1] }
  0x9b   :  { %v7857_v34 = vpop.permute.xlu0 %180  ;;  %v7860_v35 = vpack.c.bf16 %v3268_v31, %v3256_v30  ;;  %v258_v4 = vsel %vm12094_vm10, %v242_v33, %v7737_v11  ;;  %v1458_v33 = vld [vmem:[%s11952_s0 + $0x8] sm:$0xc0]  ;;  %v1597_v51 = vld [vmem:[%s11952_s0 + $0x48] sm:$0x1] }
  0x9c   :  { %v192_v38 = vsel %vm12095_vm9, %v179_v20, %v7857_v34  ;;  %272 = vst [vmem:[#allocation2 + $0x38] sm:$0x1c] %v258_v4  ;;  %1196 = vrot.lane.b32.xlu1 %v1164_v32, %s7282_s18  ;;  %v1467_v20 = vld [vmem:[%s11952_s0 + $0x50] sm:$0x1]  ;;  %v1401_v32 = vsel %vm616_vm1, %v1399_v18, %v1400_v19  ;;  %v1624_v18 = vrot.slane %v1597_v51, 4 }
  0x9d   :  { %206 = vst [vmem:[#allocation2 + $0x50] ss:$-52 sps:$4 sm:$0x83] %v192_v38   ;;  %1134 = vrot.lane.b32.xlu0 %v1116_v3, %s7295_s13  ;;  %v1501_v29 = vrot.slane %v1467_v20, 7  ;;  %v1590_v3 = vld [vmem:[%s11952_s0 + $0x10] sm:$0xc0] }
  0x9e   :  { %v7874_v42 = vpop.permute.xlu1 %249  ;;  %v1598_v4 = vld [vmem:[%s11952_s0 + $0x50] sm:$0x1] }
  0x9f   :  { %v248_v11 = vpop.permute.xlu0 %247  ;;  %v7894_v59 = vld [vmem:[#allocation2 + $0x10] sm:$0xff] }
  0xa0   :  { %v260_v53 = vsel %vm12094_vm10, %v7735_v10, %v248_v11  ;;  %v261_v56 = vsel %vm12094_vm10, %v248_v11, %v7874_v42  ;;  %v7892_v58 = vld [vmem:[#allocation2] sm:$0xff]  ;;  %1204 = vrot.lane.b32.xlu1 %v1168_v39, %s7282_s18  ;;  %v3929_v10 = vand.u32 4294901760, %v7894_v59  ;;  %v1491_v39 = vrot.slane %v1459_v25, 7  ;;  %v1692_v19 = vld [vmem:[%s11952_s0 + $0x50] sm:$0x1] }
  0xa1   :  { %274 = vst [vmem:[#allocation2 + $0x48] sm:$0x1c] %v260_v53  ;;  %275 = vst [vmem:[#allocation2 + $0x50] sm:$0x1c] %v261_v56  ;;  %v3152_v60 = vand.u32 4294901760, %v7892_v58  ;;  %1202 = vrot.lane.b32.xlu0 %v1167_v41, %s7282_s18  ;;  %v1499_v11 = vrot.slane %v1466_v26, 7 }
  0xa2   :  { %v310_v1 = vpop.permute.xlu1 %309  ;;  %v7920_v7 = vsub.f32 %v7894_v59, %v3929_v10  ;;  %v1589_v53 = vld [vmem:[%s11952_s0 + $0x8] sm:$0xc0]  ;;  %v1490_v56 = vrot.slane %v1458_v33, 7  ;;  %v1502_v57 = vsel %vm684_vm2, %v1491_v39, %v1501_v29 }
  0xa3   :  { %v304_v43 = vpop.permute.xlu0 %303  ;;  %v7915_v6 = vsub.f32 %v7892_v58, %v3152_v60  ;;  %v322_v9 = vsel %vm11955_vm11, %v7758_v21, %v310_v1  ;;  %v1311_v21 = vsel %vm1302_vm12, %v1309_v62, %v1310_v63 }
  0xa4   :  { %12201 = vst [vmem:[#allocation7_spill] sm:$0xff] %v7920_v7  ;;  %v320_v0 = vsel %vm11955_vm11, %v304_v43, %v7760_v22  ;;  %v7932_v12 = vld [vmem:[#allocation2 + $0x18] sm:$0xff]  ;;  %336 = vst [vmem:[#allocation2 + $0x48] sm:$0xe0] %v322_v9  ;;  %1216 = vrot.lane.b32.xlu1 %v1174_v37, %s7282_s18  ;;  %v1402_v22 = vrot.slane %v1366_v36, 2  ;;  %v1626_v37 = vrot.slane %v1590_v3, 4 }
  0xa5   :  { %12200 = vst [vmem:[#allocation6_spill] sm:$0xff] %v7915_v6  ;;  %334 = vst [vmem:[#allocation2 + $0x38] sm:$0xe0] %v320_v0  ;;  %v3927_v13 = vand.u32 4294901760, %v7932_v12  ;;  %1214 = vrot.lane.b32.xlu0 %v1173_v49, %s7282_s18  ;;  %v1627_v49 = vrot.slane %v1598_v4, 4  ;;  %v3260_v55 = vand.u32 4294901760, %v7915_v6 }
  0xa6   :  { %v7938_v15 = vpop.permute.xlu1 %367  ;;  %v1404_v28 = vsel %vm616_vm1, %v1402_v22, %v1403_v14  ;;  %v8003_v36 = vld [vmem:[%s11952_s0 + $0x10] sm:$0xc0]  ;;  %v1623_v0 = vrot.slane %v1589_v53, 4  ;;  %v4037_v50 = vand.u32 4294901760, %v7920_v7 }
  0xa7   :  { %v7940_v16 = vpop.permute.xlu0 %311  ;;  %v7949_v23 = vsub.f32 %v7932_v12, %v3927_v13  ;;  %v1720_v20 = vrot.slane %v8003_v36, 1  ;;  %v3261_v33 = vsub.f32 %v7915_v6, %v3260_v55  ;;  %v1691_v12 = vld [vmem:[%s11952_s0 + $0x48] sm:$0x1] }
  0xa8   :  { %v323_v24 = vsel %vm11955_vm11, %v310_v1, %v7940_v16  ;;  %1331 = vrot.lane.b32.xlu1 %v1311_v21, %s7281_s17  ;;  %vm12062_vm11 = vcmask 1039360  }
  0xa9   :  { %12202 = vst [vmem:[#allocation8_spill] sm:$0xff] %v7949_v23  ;;  %337 = vst [vmem:[#allocation2 + $0x50] sm:$0xe0] %v323_v24  ;;  %1329 = vrot.lane.b32.xlu0 %v1308_v17, %s7281_s17  ;;  %v1628_v17 = vsel %vm816_vm3, %v1626_v37, %v1627_v49  ;;  %v4031_v3 = vand.u32 4294901760, %v7949_v23  ;;  %v1718_v37 = vrot.slane %v1691_v12, 1  ;;  %v3262_v49 = vand.u32 4294901760, %v3261_v33 }
  0xaa   :  { %v7962_v30 = vpop.permute.xlu1 %421  ;;  %v1690_v24 = vld [vmem:[%s11952_s0 + $0x40] sm:$0x1] }
  0xab   :  { %v7964_v31 = vpop.permute.xlu0 %369  ;;  %v3065_v44 = vld [vmem:[#allocation2 + $0x48] sm:$0xff]  ;;  %v4032_v36 = vsub.f32 %v7949_v23, %v4031_v3 }
  0xac   :  { %v383_v38 = vsel %vm11979_vm13, %v7938_v15, %v7964_v31  ;;  %v3063_v41 = vld [vmem:[#allocation2 + $0x38] sm:$0xff]  ;;  %1424 = vrot.lane.b32.xlu1 %v1404_v28, %s7283_s27  ;;  %v3933_v52 = vand.u32 4294901760, %v3065_v44 }
  0xad   :  { %397 = vst [vmem:[#allocation2 + $0x78] sm:$0x7] %v383_v38  ;;  %v3156_v45 = vand.u32 4294901760, %v3063_v41  ;;  %1422 = vrot.lane.b32.xlu0 %v1401_v32, %s7283_s27  ;;  %v1683_v32 = vld [vmem:[%s11952_s0 + $0x8] sm:$0xc0]  ;;  %v4033_v33 = vand.u32 4294901760, %v4032_v36 }
  0xae   :  { %v7985_v62 = vpop.permute.xlu1 %483  ;;  %v7995_v48 = vsub.f32 %v3065_v44, %v3933_v52  ;;  %v8045_v38 = vpack.c.bf16 %v3933_v52, %v3929_v10  ;;  %v1625_v44 = vsel %vm816_vm3, %v1623_v0, %v1624_v18  ;;  %v1281_v36 = vld [vmem:[%s11952_s0 + $0x58] sm:$0x1] }
  0xaf   :  { %v7987_v63 = vpop.permute.xlu0 %423  ;;  %v7991_v1 = vpack.c.bf16 %v3156_v45, %v3152_v60  ;;  %v7993_v43 = vsub.f32 %v3063_v41, %v3156_v45  ;;  %v1500_v60 = vsel %vm684_vm2, %v1490_v56, %v1499_v11  ;;  %v1721_v41 = vrot.slane %v1692_v19, 1 }
  0xb0   :  { %12205 = vst [vmem:[#allocation11_spill] sm:$0xff] %v7995_v48  ;;  %v437_v58 = vsel %vm11962_vm14, %v7962_v30, %v7987_v63  ;;  %v3066_v9 = vld [vmem:[#allocation2 + $0x50] sm:$0xff]  ;;  %1517 = vrot.lane.b32.xlu1 %v1491_v39, %s7296_s14  ;;  %v4049_v22 = vand.u32 4294901760, %v7995_v48  ;;  %12208 = vst [vmem:[#allocation14_spill] sm:$0xff] %v8045_v38  ;;  %v4038_v39 = vsub.f32 %v7920_v7, %v4037_v50  ;;  %v1717_v45 = vrot.slane %v1683_v32, 1 }
  0xb1   :  { %12203 = vst [vmem:[#allocation9_spill] sm:$0xff] %v7991_v1  ;;  %12204 = vst [vmem:[#allocation10_spill] sm:$0xff] %v7993_v43  ;;  %6665 = vmatpush1.bf16.msra.mxu0 %v7991_v1  ;;  %v3931_v54 = vand.u32 4294901760, %v3066_v9  ;;  %v3272_v21 = vand.u32 4294901760, %v7993_v43  ;;  %1515 = vrot.lane.b32.xlu0 %v1490_v56, %s7296_s14 }
  0xb2   :  { %451 = vst [vmem:[#allocation2 + $0x78] sm:$0x38] %v437_v58  ;;  %v8025_v25 = vpop.permute.xlu1 %552  ;;  %v4050_v59 = vsub.f32 %v7995_v48, %v4049_v22  ;;  %v8063_v53 = vpack.c.bf16 %v4049_v22, %v4037_v50  ;;  %v1278_v22 = vld [vmem:[%s11952_s0 + $0x40] sm:$0x1]  ;;  %v1719_v32 = vsel %vm911_vm4, %v1717_v45, %v1718_v37 }
  0xb3   :  { %v8027_v26 = vpop.permute.xlu0 %485  ;;  %v8031_v28 = vpack.c.bf16 %v3931_v54, %v3927_v13  ;;  %v8033_v29 = vsub.f32 %v3066_v9, %v3931_v54  ;;  %v3273_v13 = vsub.f32 %v7993_v43, %v3272_v21  ;;  %v8061_v52 = vpack.c.bf16 %v3272_v21, %v3260_v55  ;;  %v1270_v21 = vld [vmem:[%s11952_s0] sm:$0xc0] }
  0xb4   :  { %v499_v4 = vsel %vm11961_vm15, %v7985_v62, %v8027_v26  ;;  %1533 = vrot.lane.b32.xlu1 %v1502_v57, %s7296_s14  ;;  %12210 = vst [vmem:[#allocation16_spill] sm:$0xff] %v8063_v53  ;;  %v4039_v9 = vand.u32 4294901760, %v4038_v39  ;;  %v4051_v55 = vand.u32 4294901760, %v4050_v59  ;;  %v1722_v54 = vsel %vm911_vm4, %v1720_v20, %v1721_v41  ;;  %v1172_v59 = vld [vmem:[%s11952_s0 + $0x40] sm:$0x1] }
  0xb5   :  { %12206 = vst [vmem:[#allocation12_spill] sm:$0xff] %v8031_v28  ;;  %12207 = vst [vmem:[#allocation13_spill] sm:$0xff] %v8033_v29  ;;  %6807 = vmatprep.subr.bf16.mxu1 %v8031_v28  ;;  %v4043_v11 = vand.u32 4294901760, %v8033_v29  ;;  %1531 = vrot.lane.b32.xlu0 %v1500_v60, %s7296_s14  ;;  %v3274_v51 = vand.u32 4294901760, %v3273_v13  ;;  %v1303_v13 = vrot.slane %v1270_v21, 5  ;;  %v1304_v39 = vrot.slane %v1278_v22, 5 }
  0xb6   :  { %513 = vst [vmem:[#allocation2 + $0xb0] ss:$-52 sps:$4 sm:$0xc1] %v499_v4   ;;  %6809 = vmatpush1.bf16.msra.mxu1 %v8045_v38  ;;  %12209 = vst [vmem:[#allocation15_spill] sm:$0xff] %v8061_v52  ;;  %v8065_v56 = vpop.permute.xlu1 %711  ;;  %v8087_v18 = vpack.c.bf16 %v4051_v55, %v4039_v9 }
  0xb7   :  { %v8067_v57 = vpop.permute.xlu0 %554  ;;  %v4044_v60 = vsub.f32 %v8033_v29, %v4043_v11  ;;  %v8075_v0 = vpack.c.bf16 %v3274_v51, %v3262_v49  ;;  %v8077_v50 = vpack.c.bf16 %v4043_v11, %v4031_v3  ;;  %v1282_v49 = vld [vmem:[%s11952_s0 + $0x60] sm:$0x1]  ;;  %v1273_v51 = vld [vmem:[%s11952_s0 + $0x18] sm:$0xc0]  ;;  %v1305_v55 = vsel %vm1302_vm12, %v1303_v13, %v1304_v39  ;;  %v1364_v39 = vld [vmem:[%s11952_s0] sm:$0xc0] }
  0xb8   :  { %v568_v58 = vsel %vm11960_vm0, %v8025_v25, %v8067_v57  ;;  %1648 = vrot.lane.b32.xlu1 %v1628_v17, %s7297_s28  ;;  %v1316_v21 = vrot.slane %v1282_v49, 5  ;;  %v1312_v22 = vrot.slane %v1273_v51, 5 }
  0xb9   :  { %582 = vst [vmem:[#allocation2 + $0xb0] sm:$0xe] %v568_v58  ;;  %12211 = vst [vmem:[#allocation17_spill] sm:$0xff] %v8077_v50  ;;  %1646 = vrot.lane.b32.xlu0 %v1625_v44, %s7297_s28  ;;  %v4045_v3 = vand.u32 4294901760, %v4044_v60  ;;  %v1274_v44 = vld [vmem:[%s11952_s0 + $0x20] sm:$0xc0] }
  0xba   :  { %v366_v17 = vpop.permute.xlu1 %365 }
  0xbb   :  { %v8089_v19 = vpop.permute.xlu0 %713  ;;  %v382_v20 = vsel %vm11979_vm13, %v366_v17, %v7938_v15  ;;  %v8098_v11 = vpack.c.bf16 %v4045_v3, %v4033_v33  ;;  %v1175_v15 = vld [vmem:[%s11952_s0 + $0x58] sm:$0x1]  ;;  %v1313_v17 = vrot.slane %v1281_v36, 5  ;;  %v1367_v3 = vld [vmem:[%s11952_s0 + $0x18] sm:$0xc0] }
  0xbc   :  { %v743_v4 = vsel %vm12062_vm11, %v8065_v56, %v8089_v19  ;;  %396 = vst [vmem:[#allocation2 + $0x70] sm:$0x7] %v382_v20  ;;  %1742 = vrot.lane.b32.xlu1 %v1722_v54, %s7284_s4  ;;  %v1315_v54 = vrot.slane %v1274_v44, 5  ;;  %v1375_v20 = vld [vmem:[%s11952_s0 + $0x58] sm:$0x1] }
  0xbd   :  { %v3071_v12 = vld [vmem:[#allocation2 + $0x78] sm:$0xff]  ;;  %771 = vst [vmem:[#allocation2 + $0xb0] sm:$0x80] %v743_v4  ;;  %1740 = vrot.lane.b32.xlu0 %v1719_v32, %s7284_s4  ;;  %v1406_v49 = vrot.slane %v1375_v20, 2 }
  0xbe   :  { %v3158_v41 = vand.u32 4294901760, %v3071_v12  ;;  %v8110_v45 = vpop.permute.xlu1 %373 }
  0xbf   :  { %v372_v37 = vpop.permute.xlu0 %371 }
  0xc0   :  { %v8121_v58 = vsub.f32 %v3071_v12, %v3158_v41  ;;  %v384_v60 = vsel %vm11979_vm13, %v7964_v31, %v372_v37  ;;  %v385_v9 = vsel %vm11979_vm13, %v372_v37, %v8110_v45  ;;  %1218 = vrot.lane.b32.xlu1 %v1175_v15, %s7282_s18  ;;  %v1176_v31 = vld [vmem:[%s11952_s0 + $0x60] sm:$0x1]  ;;  %v1405_v37 = vrot.slane %v1367_v3, 2 }
  0xc1   :  { %398 = vst [vmem:[#allocation2 + $0x80] sm:$0x7] %v384_v60  ;;  %399 = vst [vmem:[#allocation2 + $0x88] sm:$0x7] %v385_v9  ;;  %1212 = vrot.lane.b32.xlu0 %v1172_v59, %s7282_s18  ;;  %v1372_v15 = vld [vmem:[%s11952_s0 + $0x40] sm:$0x1] }
  0xc2   :  { %12212 = vst [vmem:[#allocation18_spill] sm:$0xff] %v8121_v58  ;;  %v426_v32 = vpop.permute.xlu1 %425  ;;  %v3278_v44 = vand.u32 4294901760, %v8121_v58  ;;  %vm11997_vm13 = vcmask 883712  }
  0xc3   :  { %v420_v33 = vpop.permute.xlu0 %419  ;;  %v438_v4 = vsel %vm11962_vm14, %v7987_v63, %v426_v32  ;;  %v1314_v63 = vsel %vm1302_vm12, %v1312_v22, %v1313_v17  ;;  %v1407_v17 = vsel %vm616_vm1, %v1405_v37, %v1406_v49 }
  0xc4   :  { %v436_v12 = vsel %vm11962_vm14, %v420_v33, %v7962_v30  ;;  %v3078_v13 = vld [vmem:[#allocation2 + $0xb0] sm:$0xff]  ;;  %452 = vst [vmem:[#allocation2 + $0x80] sm:$0x38] %v438_v4  ;;  %1327 = vrot.lane.b32.xlu1 %v1305_v55, %s7281_s17  ;;  %v1317_v30 = vsel %vm1302_vm12, %v1315_v54, %v1316_v21  ;;  %v1396_v33 = vrot.slane %v1364_v39, 2  ;;  %v1397_v55 = vrot.slane %v1372_v15, 2 }
  0xc5   :  { %450 = vst [vmem:[#allocation2 + $0x70] sm:$0x38] %v436_v12  ;;  %v3162_v59 = vand.u32 4294901760, %v3078_v13  ;;  %1220 = vrot.lane.b32.xlu0 %v1176_v31, %s7282_s18  ;;  %v1368_v54 = vld [vmem:[%s11952_s0 + $0x20] sm:$0xc0] }
  0xc6   :  { %v482_v51 = vpop.permute.xlu1 %481  ;;  %v1376_v21 = vld [vmem:[%s11952_s0 + $0x60] sm:$0x1]  ;;  %v1398_v12 = vsel %vm616_vm1, %v1396_v33, %v1397_v55  ;;  %v8199_v33 = vld [vmem:[%s11952_s0 + $0x20] sm:$0xc0] }
  0xc7   :  { %v8154_v36 = vpop.permute.xlu0 %427  ;;  %v8156_v60 = vpack.c.bf16 %v3162_v59, %v3158_v41  ;;  %v8158_v9 = vsub.f32 %v3078_v13, %v3162_v59  ;;  %v498_v4 = vsel %vm11961_vm15, %v482_v51, %v7985_v62  ;;  %v3279_v41 = vsub.f32 %v8121_v58, %v3278_v44 }
  0xc8   :  { %12213 = vst [vmem:[#allocation19_spill] sm:$0xff] %v8154_v36  ;;  %v439_v31 = vsel %vm11962_vm14, %v426_v32, %v8154_v36  ;;  %512 = vst [vmem:[#allocation2 + $0xa8] ss:$-52 sps:$4 sm:$0xc1] %v498_v4   ;;  %1335 = vrot.lane.b32.xlu1 %v1317_v30, %s7281_s17  ;;  %v8181_v32 = vld [vmem:[%s11952_s0] sm:$0xc0] }
  0xc9   :  { %12214 = vst [vmem:[#allocation20_spill] sm:$0xff] %v8156_v60  ;;  %12215 = vst [vmem:[#allocation21_spill] sm:$0xff] %v8158_v9  ;;  %6667 = vmatprep.subr.bf16.mxu0 %v8156_v60  ;;  %v3290_v62 = vand.u32 4294901760, %v8158_v9  ;;  %1333 = vrot.lane.b32.xlu0 %v1314_v63, %s7281_s17  ;;  %v1408_v13 = vrot.slane %v1368_v54, 2  ;;  %v1409_v39 = vrot.slane %v1376_v21, 2  ;;  %v1489_v37 = vrot.slane %v8181_v32, 7 }
  0xca   :  { %453 = vst [vmem:[#allocation2 + $0x88] sm:$0x38] %v439_v31  ;;  %v8183_v3 = vpop.permute.xlu1 %489  ;;  %v3280_v49 = vand.u32 4294901760, %v3279_v41  ;;  %v1460_v4 = vld [vmem:[%s11952_s0 + $0x18] sm:$0xc0]  ;;  %vm12013_vm14 = vcmask 1014784  }
  0xcb   :  { %12216 = vst [vmem:[#allocation22_spill] sm:$0xff] %v8183_v3  ;;  %v488_v20 = vpop.permute.xlu0 %487  ;;  %v3291_v15 = vsub.f32 %v8158_v9, %v3290_v62  ;;  %v8191_v63 = vpack.c.bf16 %v3290_v62, %v3278_v44  ;;  %v1410_v44 = vsel %vm616_vm1, %v1408_v13, %v1409_v39  ;;  %v1468_v31 = vld [vmem:[%s11952_s0 + $0x58] sm:$0x1]  ;;  %v1465_v62 = vld [vmem:[%s11952_s0 + $0x40] sm:$0x1]  ;;  %v1492_v13 = vrot.slane %v1460_v4, 7 }
  0xcc   :  { %v500_v59 = vsel %vm11961_vm15, %v8027_v26, %v488_v20  ;;  %v501_v30 = vsel %vm11961_vm15, %v488_v20, %v8183_v3  ;;  %1426 = vrot.lane.b32.xlu1 %v1407_v17, %s7283_s27  ;;  %v1588_v17 = vld [vmem:[%s11952_s0] sm:$0xc0]  ;;  %v1493_v20 = vrot.slane %v8199_v33, 7  ;;  %v1503_v39 = vrot.slane %v1468_v31, 7 }
  0xcd   :  { %12217 = vst [vmem:[#allocation23_spill] sm:$0xff] %v8191_v63  ;;  %514 = vst [vmem:[#allocation2 + $0xb8] ss:$-52 sps:$4 sm:$0xc1] %v500_v59   ;;  %v3292_v51 = vand.u32 4294901760, %v3291_v15  ;;  %1420 = vrot.lane.b32.xlu0 %v1398_v12, %s7283_s27  ;;  %vm12037_vm15 = vcmask 1022976  }
  0xce   :  { %515 = vst [vmem:[#allocation2 + $0xc0] ss:$-52 sps:$4 sm:$0xc1] %v501_v30   ;;  %v557_v26 = vpop.permute.xlu1 %556  ;;  %v1497_v30 = vrot.slane %v1465_v62, 7 }
  0xcf   :  { %v551_v55 = vpop.permute.xlu0 %550  ;;  %v8208_v54 = vpack.c.bf16 %v3292_v51, %v3280_v49  ;;  %v569_v21 = vsel %vm11960_vm0, %v8067_v57, %v557_v26  ;;  %v8220_v32 = vld [vmem:[#allocation2 + $0x70] sm:$0xff]  ;;  %v1469_v57 = vld [vmem:[%s11952_s0 + $0x60] sm:$0x1]  ;;  %v1620_v49 = vrot.slane %v1588_v17, 4  ;;  %v1504_v17 = vsel %vm684_vm2, %v1492_v13, %v1503_v39  ;;  %v1682_v39 = vld [vmem:[%s11952_s0] sm:$0xc0] }
  0xd0   :  { %v567_v41 = vsel %vm11960_vm0, %v551_v55, %v8025_v25  ;;  %583 = vst [vmem:[#allocation2 + $0xb8] sm:$0xe] %v569_v21  ;;  %1513 = vrot.lane.b32.xlu1 %v1489_v37, %s7296_s14  ;;  %v1596_v25 = vld [vmem:[%s11952_s0 + $0x40] sm:$0x1]  ;;  %v11958_v12 = vand.u32 4294901760, %v8220_v32  ;;  %v1498_v46 = vsel %vm684_vm2, %v1489_v37, %v1497_v30 }
  0xd1   :  { %581 = vst [vmem:[#allocation2 + $0xa8] sm:$0xe] %v567_v41  ;;  %1428 = vrot.lane.b32.xlu0 %v1410_v44, %s7283_s27  ;;  %v1621_v21 = vrot.slane %v1596_v25, 4  ;;  %v1505_v44 = vrot.slane %v1469_v57, 7  ;;  %v1592_v41 = vld [vmem:[%s11952_s0 + $0x20] sm:$0xc0] }
  0xd2   :  { %v710_v15 = vpop.permute.xlu1 %709  ;;  %v8237_v51 = vsub.f32 %v8220_v32, %v11958_v12  ;;  %v1591_v25 = vld [vmem:[%s11952_s0 + $0x18] sm:$0xc0]  ;;  %v1599_v57 = vld [vmem:[%s11952_s0 + $0x58] sm:$0x1]  ;;  %v1632_v14 = vrot.slane %v1592_v41, 4 }
  0xd3   :  { %v8232_v59 = vpop.permute.xlu0 %558  ;;  %v742_v33 = vsel %vm12062_vm11, %v710_v15, %v8065_v56  ;;  %v1600_v56 = vld [vmem:[%s11952_s0 + $0x60] sm:$0x1]  ;;  %v1685_v15 = vld [vmem:[%s11952_s0 + $0x18] sm:$0xc0]  ;;  %v1629_v12 = vrot.slane %v1591_v25, 4  ;;  %v1630_v53 = vrot.slane %v1599_v57, 4 }
  0xd4   :  { %12218 = vst [vmem:[#allocation24_spill] sm:$0xff] %v8232_v59  ;;  %12219 = vst [vmem:[#allocation25_spill] sm:$0xff] %v8237_v51  ;;  %v570_v55 = vsel %vm11960_vm0, %v557_v26, %v8232_v59  ;;  %v8245_v31 = vld [vmem:[#allocation2 + $0x80] sm:$0xff]  ;;  %1521 = vrot.lane.b32.xlu1 %v1493_v20, %s7296_s14  ;;  %v1633_v47 = vrot.slane %v1600_v56, 4  ;;  %v1723_v41 = vrot.slane %v1685_v15, 1  ;;  %vm12055_vm0 = vcmask 1031168  }
  0xd5   :  { %v8243_v4 = vld [vmem:[#allocation2 + $0x88] sm:$0xff]  ;;  %770 = vst [vmem:[#allocation2 + $0xa8] sm:$0x80] %v742_v33  ;;  %584 = vst [vmem:[#allocation2 + $0xc0] sm:$0xe] %v570_v55  ;;  %v11959_v62 = vand.u32 4294901760, %v8245_v31  ;;  %1519 = vrot.lane.b32.xlu0 %v1492_v13, %s7296_s14 }
  0xd6   :  { %v11957_v26 = vand.u32 4294901760, %v8243_v4  ;;  %v8267_v33 = vpop.permute.xlu1 %717  ;;  %v1693_v13 = vld [vmem:[%s11952_s0 + $0x58] sm:$0x1] }
  0xd7   :  { %12220 = vst [vmem:[#allocation26_spill] sm:$0xff] %v8267_v33  ;;  %v716_v55 = vpop.permute.xlu0 %715  ;;  %v8287_v37 = vsub.f32 %v8245_v31, %v11959_v62  ;;  %v1776_v62 = vld [vmem:[%s11952_s0 + $0x8] sm:$0xc0]  ;;  %v1724_v56 = vrot.slane %v1693_v13, 1 }
  0xd8   :  { %v8282_v10 = vsub.f32 %v8243_v4, %v11957_v26  ;;  %v744_v30 = vsel %vm12062_vm11, %v8089_v19, %v716_v55  ;;  %v745_v22 = vsel %vm12062_vm11, %v716_v55, %v8267_v33  ;;  %1535 = vrot.lane.b32.xlu1 %v1504_v17, %s7296_s14  ;;  %v1622_v26 = vsel %vm816_vm3, %v1620_v49, %v1621_v21  ;;  %v1784_v19 = vld [vmem:[%s11952_s0 + $0x48] sm:$0x1]  ;;  %v8310_v21 = vld [vmem:[%s11952_s0 + $0x20] sm:$0xc0] }
  0xd9   :  { %12222 = vst [vmem:[#allocation28_spill] sm:$0xff] %v8287_v37  ;;  %772 = vst [vmem:[#allocation2 + $0xb8] sm:$0x80] %v744_v30  ;;  %1529 = vrot.lane.b32.xlu0 %v1498_v46, %s7296_s14  ;;  %v1714_v55 = vrot.slane %v1682_v39, 1  ;;  %v1506_v49 = vsel %vm684_vm2, %v1493_v20, %v1505_v44  ;;  %v1810_v57 = vrot.slane %v1776_v62, 6  ;;  %v1811_v15 = vrot.slane %v1784_v19, 6 }
  0xda   :  { %12221 = vst [vmem:[#allocation27_spill] sm:$0xff] %v8282_v10  ;;  %773 = vst [vmem:[#allocation2 + $0xc0] sm:$0x80] %v745_v22  ;;  %v1715_v22 = vrot.slane %v1690_v24, 1  ;;  %v8302_v30 = vpop.permute.xlu1 %729  ;;  %v8318_v24 = vld [vmem:[%s11952_s0 + $0x60] sm:$0x1]  ;;  %v1634_v20 = vsel %vm816_vm3, %v1632_v14, %v1633_v47  ;;  %v1631_v44 = vsel %vm816_vm3, %v1629_v12, %v1630_v53  ;;  %v1725_v39 = vsel %vm911_vm4, %v1723_v41, %v1724_v56 }
  0xdb   :  { %v8304_v17 = vpop.permute.xlu0 %727  ;;  %v8329_v19 = vld [vmem:[%s11952_s0 + $0x8] sm:$0xc0]  ;;  %v12223_v14 = vand.u32 4294901760, %v8220_v32  ;;  %v1726_v41 = vrot.slane %v8310_v21, 1  ;;  %v1727_v56 = vrot.slane %v8318_v24, 1  ;;  %v1812_v21 = vsel %vm1006_vm5, %v1810_v57, %v1811_v15 }
  0xdc   :  { %v750_v25 = vsel %vm12062_vm11, %v8304_v17, %v8302_v30  ;;  %v3077_v46 = vld [vmem:[#allocation2 + $0xa8] sm:$0xff]  ;;  %1644 = vrot.lane.b32.xlu1 %v1622_v26, %s7297_s28  ;;  %v1716_v62 = vsel %vm911_vm4, %v1714_v55, %v1715_v22  ;;  %v3284_v26 = vand.u32 4294901760, %v8237_v51  ;;  %v8352_v22 = vld [vmem:[%s11952_s0 + $0x10] sm:$0xc0]  ;;  %v4055_v24 = vand.u32 4294901760, %v8282_v10 }
  0xdd   :  { %778 = vst [vmem:[#allocation2 + $0xe8] sm:$0x3] %v750_v25  ;;  %v3164_v13 = vand.u32 4294901760, %v3077_v46  ;;  %1537 = vrot.lane.b32.xlu0 %v1506_v49, %s7296_s14  ;;  %v8347_v55 = vld [vmem:[%s11952_s0 + $0x48] sm:$0x1]  ;;  %v1903_v63 = vrot.slane %v8329_v19, 3  ;;  %v1728_v33 = vsel %vm911_vm4, %v1726_v41, %v1727_v56 }
  0xde   :  { %v8332_v25 = vpop.permute.xlu1 %845  ;;  %v1904_v27 = vrot.slane %v8347_v55, 3  ;;  %v1813_v57 = vrot.slane %v8352_v22, 6  ;;  %v3285_v15 = vsub.f32 %v8237_v51, %v3284_v26 }
  0xdf   :  { %v8334_v47 = vpop.permute.xlu0 %843  ;;  %v8338_v53 = vpack.c.bf16 %v3164_v13, %v12223_v14  ;;  %v8340_v12 = vsub.f32 %v3077_v46, %v3164_v13  ;;  %v4061_v13 = vand.u32 4294901760, %v8287_v37 }
  0xe0   :  { %v859_v32 = vsel %vm12055_vm0, %v8334_v47, %v8332_v25  ;;  %v3079_v46 = vld [vmem:[#allocation2 + $0xb8] sm:$0xff]  ;;  %1652 = vrot.lane.b32.xlu1 %v1634_v20, %s7297_s28 }
  0xe1   :  { %12224 = vst [vmem:[#allocation29_spill] sm:$0xff] %v8338_v53  ;;  %12225 = vst [vmem:[#allocation30_spill] sm:$0xff] %v8340_v12  ;;  %v3080_v49 = vld [vmem:[#allocation2 + $0xc0] sm:$0xff]  ;;  %6669 = vmatpush1.bf16.msra.mxu0 %v8338_v53  ;;  %v3941_v50 = vand.u32 4294901760, %v3079_v46  ;;  %v3296_v52 = vand.u32 4294901760, %v8340_v12  ;;  %1650 = vrot.lane.b32.xlu0 %v1631_v44, %s7297_s28  ;;  %v12226_v53 = vand.u32 4294901760, %v8243_v4 }
  0xe2   :  { %873 = vst [vmem:[#allocation2 + $0xe8] sm:$0x1c] %v859_v32  ;;  %v3939_v14 = vand.u32 4294901760, %v3080_v49  ;;  %v8370_v20 = vpop.permute.xlu1 %940  ;;  %v12229_v44 = vand.u32 4294901760, %v8245_v31  ;;  %v1785_v32 = vld [vmem:[%s11952_s0 + $0x50] sm:$0x1] }
  0xe3   :  { %v8372_v38 = vpop.permute.xlu0 %938  ;;  %v8384_v22 = vsub.f32 %v3079_v46, %v3941_v50  ;;  %v3297_v4 = vsub.f32 %v8340_v12, %v3296_v52 }
  0xe4   :  { %v8376_v19 = vpack.c.bf16 %v3939_v14, %v12226_v53  ;;  %v8378_v28 = vsub.f32 %v3080_v49, %v3939_v14  ;;  %v8382_v55 = vpack.c.bf16 %v3941_v50, %v12229_v44  ;;  %v954_v60 = vsel %vm12037_vm15, %v8372_v38, %v8370_v20  ;;  %1744 = vrot.lane.b32.xlu1 %v1725_v39, %s7284_s4 }
  0xe5   :  { %12231 = vst [vmem:[#allocation34_spill] sm:$0xff] %v8384_v22  ;;  %v4056_v53 = vsub.f32 %v8282_v10, %v4055_v24  ;;  %v4062_v49 = vsub.f32 %v8287_v37, %v4061_v13  ;;  %968 = vst [vmem:[#allocation2 + $0xe8] sm:$0xe0] %v954_v60  ;;  %v4073_v31 = vand.u32 4294901760, %v8384_v22  ;;  %1738 = vrot.lane.b32.xlu0 %v1716_v62, %s7284_s4  ;;  %v1814_v44 = vrot.slane %v1785_v32, 6 }
  0xe6   :  { %12227 = vst [vmem:[#allocation31_spill] sm:$0xff] %v8376_v19  ;;  %12228 = vst [vmem:[#allocation32_spill] sm:$0xff] %v8378_v28  ;;  %6811 = vmatprep.subr.bf16.mxu1 %v8376_v19  ;;  %v4067_v50 = vand.u32 4294901760, %v8378_v28  ;;  %v3286_v60 = vand.u32 4294901760, %v3285_v15  ;;  %v3298_v1 = vand.u32 4294901760, %v3297_v4  ;;  %v8405_v39 = vpack.c.bf16 %v3296_v52, %v3284_v26  ;;  %v8407_v19 = vpop.permute.xlu1 %1035 }
  0xe7   :  { %12230 = vst [vmem:[#allocation33_spill] sm:$0xff] %v8382_v55  ;;  %6813 = vmatpush1.bf16.msra.mxu1 %v8382_v55  ;;  %v8409_v2 = vpop.permute.xlu0 %1033  ;;  %v4074_v59 = vsub.f32 %v8384_v22, %v4073_v31  ;;  %v1870_v52 = vld [vmem:[%s11952_s0 + $0x10] sm:$0xc0]  ;;  %v1878_v26 = vld [vmem:[%s11952_s0 + $0x50] sm:$0x1]  ;;  %v8427_v56 = vpack.c.bf16 %v4073_v31, %v4061_v13  ;;  %v4063_v32 = vand.u32 4294901760, %v4062_v49 }
  0xe8   :  { %12232 = vst [vmem:[#allocation35_spill] sm:$0xff] %v8405_v39  ;;  %v4068_v46 = vsub.f32 %v8378_v28, %v4067_v50  ;;  %v8414_v14 = vpack.c.bf16 %v4067_v50, %v4055_v24  ;;  %v1049_v62 = vsel %vm12013_vm14, %v8409_v2, %v8407_v19  ;;  %v8425_v41 = vpack.c.bf16 %v3298_v1, %v3286_v60 }
  0xe9   :  { %12234 = vst [vmem:[#allocation37_spill] sm:$0xff] %v8427_v56  ;;  %1063 = vst [vmem:[#allocation2 + $0x120] sm:$0x7] %v1049_v62  ;;  %1833 = vrot.lane.b32.xlu1 %v1812_v21, %s7285_s9  ;;  %v4057_v24 = vand.u32 4294901760, %v4056_v53  ;;  %v4075_v4 = vand.u32 4294901760, %v4074_v59  ;;  %1746 = vrot.lane.b32.xlu0 %v1728_v33, %s7284_s4  ;;  %v1905_v50 = vsel %vm1101_vm6, %v1903_v63, %v1904_v27  ;;  %v1906_v1 = vrot.slane %v1870_v52, 3 }
  0xea   :  { %12233 = vst [vmem:[#allocation36_spill] sm:$0xff] %v8414_v14  ;;  %v4069_v15 = vand.u32 4294901760, %v4068_v46  ;;  %v1815_v14 = vsel %vm1006_vm5, %v1813_v57, %v1814_v44  ;;  %v8433_v39 = vpop.permute.xlu1 %1130  ;;  %v1907_v13 = vrot.slane %v1878_v26, 3  ;;  %v1962_v27 = vld [vmem:[%s11952_s0 + $0x8] sm:$0xc0] }
  0xeb   :  { %v8435_v55 = vpop.permute.xlu0 %1128  ;;  %v8439_v60 = vpack.c.bf16 %v4075_v4, %v4063_v32  ;;  %v2069_v33 = vld [vmem:[%s11952_s0 + $0x8] sm:$0xc0]  ;;  %v2077_v57 = vld [vmem:[%s11952_s0 + $0x48] sm:$0x1] }
  0xec   :  { %v8437_v31 = vpack.c.bf16 %v4069_v15, %v4057_v24  ;;  %v1144_v59 = vsel %vm11997_vm13, %v8435_v55, %v8433_v39  ;;  %v3085_v21 = vld [vmem:[#allocation2 + $0xe8] sm:$0xff]  ;;  %v1908_v46 = vsel %vm1101_vm6, %v1906_v1, %v1907_v13  ;;  %v2103_v62 = vrot.slane %v2069_v33, 5  ;;  %v1963_v24 = vld [vmem:[%s11952_s0 + $0x10] sm:$0xc0]  ;;  %v2078_v13 = vld [vmem:[%s11952_s0 + $0x50] sm:$0x1] }
  0xed   :  { %1158 = vst [vmem:[#allocation2 + $0x120] sm:$0x38] %v1144_v59  ;;  %1926 = vrot.lane.b32.xlu1 %v1905_v50, %s7287_s19  ;;  %v3166_v63 = vand.u32 4294901760, %v3085_v21  ;;  %1835 = vrot.lane.b32.xlu0 %v1815_v14, %s7285_s9  ;;  %v2104_v52 = vrot.slane %v2077_v57, 5  ;;  %v1970_v26 = vld [vmem:[%s11952_s0 + $0x48] sm:$0x1] }
  0xee   :  { %v8455_v53 = vpop.permute.xlu1 %1200  ;;  %v2163_v15 = vld [vmem:[%s11952_s0 + $0x8] sm:$0xc0]  ;;  %v2171_v50 = vld [vmem:[%s11952_s0 + $0x48] sm:$0x1]  ;;  %v2070_v1 = vld [vmem:[%s11952_s0 + $0x10] sm:$0xc0] }
  0xef   :  { %v8457_v49 = vpop.permute.xlu0 %1198  ;;  %v8460_v44 = vsub.f32 %v3085_v21, %v3166_v63  ;;  %v2197_v33 = vrot.slane %v2163_v15, 2  ;;  %v2198_v57 = vrot.slane %v2171_v50, 2 }
  0xf0   :  { %v1229_v14 = vsel %vm64_vm8, %v8457_v49, %v8455_v53 }
  0xf1   :  { %12235 = vst [vmem:[#allocation38_spill] sm:$0xff] %v8460_v44  ;;  %1257 = vst [vmem:[#allocation2 + $0x120] sm:$0xc0] %v1229_v14  ;;  %1995 = vrot.lane.b32.xlu1 %v1962_v27, %s12029_s10  ;;  %1928 = vrot.lane.b32.xlu0 %v1908_v46, %s7287_s19  ;;  %v2105_v27 = vsel %vm1302_vm12, %v2103_v62, %v2104_v52  ;;  %v2106_v46 = vrot.slane %v2070_v1, 5  ;;  %v2107_v14 = vrot.slane %v2078_v13, 5 }
  0xf2   :  { %v732_v32 = vpop.permute.xlu1 %731  ;;  %v2164_v52 = vld [vmem:[%s11952_s0 + $0x10] sm:$0xc0] }
  0xf3   :  { %v726_v4 = vpop.permute.xlu0 %725  ;;  %v751_v59 = vsel %vm12062_vm11, %v8302_v30, %v732_v32  ;;  %v1971_v30 = vld [vmem:[%s11952_s0 + $0x50] sm:$0x1] }
  0xf4   :  { %v749_v21 = vsel %vm12062_vm11, %v726_v4, %v8304_v17  ;;  %779 = vst [vmem:[#allocation2 + $0xf0] sm:$0x3] %v751_v59  ;;  %v8515_v4 = vld [vmem:[%s11952_s0 + $0x8] sm:$0xc0] }
  0xf5   :  { %777 = vst [vmem:[#allocation2 + $0xe0] sm:$0x3] %v749_v21  ;;  %2011 = vrot.lane.b32.xlu1 %v1970_v26, %s12029_s10  ;;  %1997 = vrot.lane.b32.xlu0 %v1963_v24, %s12029_s10  ;;  %v2172_v24 = vld [vmem:[%s11952_s0 + $0x50] sm:$0x1]  ;;  %v2200_v21 = vrot.slane %v2164_v52, 2 }
  0xf6   :  { %v842_v56 = vpop.permute.xlu1 %841  ;;  %v1779_v52 = vld [vmem:[%s11952_s0 + $0x20] sm:$0xc0] }
  0xf7   :  { %v8492_v37 = vpop.permute.xlu0 %733  ;;  %v858_v17 = vsel %vm12055_vm0, %v842_v56, %v8334_v47  ;;  %v3302_v47 = vand.u32 4294901760, %v8460_v44  ;;  %v2199_v56 = vsel %vm616_vm1, %v2197_v33, %v2198_v57  ;;  %v1775_v33 = vld [vmem:[%s11952_s0] sm:$0xc0]  ;;  %v1783_v57 = vld [vmem:[%s11952_s0 + $0x40] sm:$0x1] }
  0xf8   :  { %12236 = vst [vmem:[#allocation39_spill] sm:$0xff] %v8492_v37  ;;  %v752_v26 = vsel %vm12062_vm11, %v732_v32, %v8492_v37  ;;  %v3092_v62 = vld [vmem:[#allocation2 + $0x120] sm:$0xff]  ;;  %872 = vst [vmem:[#allocation2 + $0xe0] sm:$0x1c] %v858_v17  ;;  %v2108_v32 = vsel %vm1302_vm12, %v2106_v46, %v2107_v14  ;;  %vm12298_vm11 = vcmask 539648  }
  0xf9   :  { %780 = vst [vmem:[#allocation2 + $0xf8] sm:$0x3] %v752_v26  ;;  %2126 = vrot.lane.b32.xlu1 %v2105_v27, %s12027_s29  ;;  %v3170_v15 = vand.u32 4294901760, %v3092_v62  ;;  %2013 = vrot.lane.b32.xlu0 %v1971_v30, %s12029_s10  ;;  %v2201_v27 = vrot.slane %v2172_v24, 2  ;;  %v3303_v30 = vsub.f32 %v8460_v44, %v3302_v47  ;;  %v1787_v24 = vld [vmem:[%s11952_s0 + $0x60] sm:$0x1] }
  0xfa   :  { %v8517_v50 = vpop.permute.xlu1 %849  ;;  %v1819_v26 = vrot.slane %v1779_v52, 6  ;;  %v1868_v52 = vld [vmem:[%s11952_s0] sm:$0xc0] }
  0xfb   :  { %12237 = vst [vmem:[#allocation40_spill] sm:$0xff] %v8517_v50  ;;  %v848_v1 = vpop.permute.xlu0 %847  ;;  %v8519_v13 = vpack.c.bf16 %v3170_v15, %v3166_v63  ;;  %v8521_v59 = vsub.f32 %v3092_v62, %v3170_v15  ;;  %v11989_v63 = vrot.slane %v8515_v4, 7  ;;  %v1808_v62 = vrot.slane %v1783_v57, 6 }
  0xfc   :  { %v860_v46 = vsel %vm12055_vm0, %v8332_v25, %v848_v1  ;;  %v861_v14 = vsel %vm12055_vm0, %v848_v1, %v8517_v50  ;;  %v1807_v25 = vrot.slane %v1775_v33, 6  ;;  %v2202_v1 = vsel %vm616_vm1, %v2200_v21, %v2201_v27  ;;  %v1786_v33 = vld [vmem:[%s11952_s0 + $0x58] sm:$0x1] }
  0xfd   :  { %12238 = vst [vmem:[#allocation41_spill] sm:$0xff] %v8519_v13  ;;  %12239 = vst [vmem:[#allocation42_spill] sm:$0xff] %v8521_v59  ;;  %2220 = vrot.lane.b32.xlu1 %v2199_v56, %s7288_s24  ;;  %6671 = vmatprep.subr.bf16.mxu0 %v8519_v13  ;;  %v3314_v17 = vand.u32 4294901760, %v8521_v59  ;;  %v1820_v13 = vrot.slane %v1787_v24, 6  ;;  %v3304_v50 = vand.u32 4294901760, %v3303_v30  ;;  %vm12296_vm0 = vcmask 547840  }
  0xfe   :  { %874 = vst [vmem:[#allocation2 + $0xf0] sm:$0x1c] %v860_v46  ;;  %875 = vst [vmem:[#allocation2 + $0xf8] sm:$0x1c] %v861_v14  ;;  %2128 = vrot.lane.b32.xlu0 %v2108_v32, %s12027_s29  ;;  %v943_v15 = vpop.permute.xlu1 %942  ;;  %v8551_v46 = vld [vmem:[%s11952_s0 + $0x10] sm:$0xc0]  ;;  %v1809_v22 = vsel %vm1006_vm5, %v1807_v25, %v1808_v62 }
  0xff   :  { %v937_v56 = vpop.permute.xlu0 %936  ;;  %v1778_v32 = vld [vmem:[%s11952_s0 + $0x18] sm:$0xc0]  ;;  %v3315_v57 = vsub.f32 %v8521_v59, %v3314_v17  ;;  %v955_v14 = vsel %vm12037_vm15, %v8370_v20, %v943_v15  ;;  %v8564_v27 = vpack.c.bf16 %v3314_v17, %v3302_v47  ;;  %v11990_v20 = vrot.slane %v8551_v46, 7  ;;  %v1879_v30 = vld [vmem:[%s11952_s0 + $0x58] sm:$0x1] }
 0x100   :  { %v953_v21 = vsel %vm12037_vm15, %v937_v56, %v8372_v38  ;;  %969 = vst [vmem:[#allocation2 + $0xf0] sm:$0xe0] %v955_v14  ;;  %v1816_v10 = vrot.slane %v1778_v32, 6  ;;  %v1817_v38 = vrot.slane %v1786_v33, 6  ;;  %v1871_v47 = vld [vmem:[%s11952_s0 + $0x18] sm:$0xc0]  ;;  %v1821_v32 = vsel %vm1006_vm5, %v1819_v26, %v1820_v13 }
 0x101   :  { %12240 = vst [vmem:[#allocation43_spill] sm:$0xff] %v8564_v27  ;;  %967 = vst [vmem:[#allocation2 + $0xe0] sm:$0xe0] %v953_v21  ;;  %2313 = vrot.lane.b32.xlu1 %v11989_v63, %s7289_s5  ;;  %v3316_v37 = vand.u32 4294901760, %v3315_v57  ;;  %v1876_v25 = vld [vmem:[%s11952_s0 + $0x40] sm:$0x1] }
 0x102   :  { %2222 = vrot.lane.b32.xlu0 %v2202_v1, %s7288_s24  ;;  %v1032_v17 = vpop.permute.xlu1 %1031  ;;  %v1909_v33 = vrot.slane %v1871_v47, 3  ;;  %v1910_v57 = vrot.slane %v1879_v30, 3 }
 0x103   :  { %v8575_v56 = vpop.permute.xlu0 %944  ;;  %v8586_v62 = vpack.c.bf16 %v3316_v37, %v3304_v50  ;;  %v1048_v24 = vsel %vm12013_vm14, %v1032_v17, %v8409_v2  ;;  %v1900_v37 = vrot.slane %v1868_v52, 3  ;;  %v1901_v50 = vrot.slane %v1876_v25, 3 }
 0x104   :  { %12241 = vst [vmem:[#allocation44_spill] sm:$0xff] %v8575_v56  ;;  %v956_v1 = vsel %vm12037_vm15, %v943_v15, %v8575_v56  ;;  %1062 = vst [vmem:[#allocation2 + $0x118] sm:$0x7] %v1048_v24  ;;  %v1818_v2 = vsel %vm1006_vm5, %v1816_v10, %v1817_v38  ;;  %v1872_v15 = vld [vmem:[%s11952_s0 + $0x20] sm:$0xc0]  ;;  %v1911_v30 = vsel %vm1101_vm6, %v1909_v33, %v1910_v57  ;;  %vm12285_vm15 = vcmask 695296  }
 0x105   :  { %970 = vst [vmem:[#allocation2 + $0xf8] sm:$0xe0] %v956_v1  ;;  %1831 = vrot.lane.b32.xlu1 %v1809_v22, %s7285_s9  ;;  %v1880_v22 = vld [vmem:[%s11952_s0 + $0x60] sm:$0x1]  ;;  %v1902_v52 = vsel %vm1101_vm6, %v1900_v37, %v1901_v50  ;;  %v1912_v24 = vrot.slane %v1872_v15, 3 }
 0x106   :  { %2315 = vrot.lane.b32.xlu0 %v11990_v20, %s7289_s5  ;;  %v8597_v14 = vpop.permute.xlu1 %1039  ;;  %v1961_v50 = vld [vmem:[%s11952_s0] sm:$0xc0] }
 0x107   :  { %12242 = vst [vmem:[#allocation45_spill] sm:$0xff] %v8597_v14  ;;  %v1038_v21 = vpop.permute.xlu0 %1037  ;;  %v8608_v26 = vld [vmem:[#allocation2 + $0xf0] sm:$0xff] }
 0x108   :  { %v8606_v13 = vld [vmem:[#allocation2 + $0xe0] sm:$0xff]  ;;  %v1050_v47 = vsel %vm12013_vm14, %v8407_v19, %v1038_v21  ;;  %v1051_v17 = vsel %vm12013_vm14, %v1038_v21, %v8597_v14  ;;  %v11991_v38 = vand.u32 4294901760, %v8608_v26  ;;  %v1913_v19 = vrot.slane %v1880_v22, 3 }
 0x109   :  { %1839 = vrot.lane.b32.xlu1 %v1821_v32, %s7285_s9  ;;  %v11993_v10 = vand.u32 4294901760, %v8606_v13  ;;  %1064 = vst [vmem:[#allocation2 + $0x128] sm:$0x7] %v1050_v47  ;;  %1065 = vst [vmem:[#allocation2 + $0x130] sm:$0x7] %v1051_v17  ;;  %vm12034_vm14 = vcmask 719872  }
 0x10a   :  { %1837 = vrot.lane.b32.xlu0 %v1818_v2, %s7285_s9  ;;  %v1133_v25 = vpop.permute.xlu1 %1132  ;;  %v8628_v32 = vsub.f32 %v8608_v26, %v11991_v38 }
 0x10b   :  { %v8623_v1 = vsub.f32 %v8606_v13, %v11993_v10  ;;  %v1145_v2 = vsel %vm11997_vm13, %v8433_v39, %v1133_v25  ;;  %v1127_v21 = vpop.permute.xlu0 %1126  ;;  %v1914_v39 = vsel %vm1101_vm6, %v1912_v24, %v1913_v19  ;;  %v2068_v24 = vld [vmem:[%s11952_s0] sm:$0xc0] }
 0x10c   :  { %12244 = vst [vmem:[#allocation47_spill] sm:$0xff] %v8628_v32  ;;  %v8632_v33 = vld [vmem:[#allocation2 + $0xf8] sm:$0xff]  ;;  %1159 = vst [vmem:[#allocation2 + $0x128] sm:$0x38] %v1145_v2  ;;  %v1143_v57 = vsel %vm11997_vm13, %v1127_v21, %v8435_v55  ;;  %v2072_v2 = vld [vmem:[%s11952_s0 + $0x20] sm:$0xc0] }
 0x10d   :  { %12243 = vst [vmem:[#allocation46_spill] sm:$0xff] %v8623_v1  ;;  %1930 = vrot.lane.b32.xlu1 %v1911_v30, %s7287_s19  ;;  %v11992_v37 = vand.u32 4294901760, %v8632_v33  ;;  %1157 = vst [vmem:[#allocation2 + $0x118] sm:$0x38] %v1143_v57  ;;  %v1965_v30 = vld [vmem:[%s11952_s0 + $0x20] sm:$0xc0] }
 0x10e   :  { %1924 = vrot.lane.b32.xlu0 %v1902_v52, %s7287_s19  ;;  %v1197_v15 = vpop.permute.xlu1 %1196  ;;  %v2080_v21 = vld [vmem:[%s11952_s0 + $0x60] sm:$0x1]  ;;  %v2112_v63 = vrot.slane %v2072_v2, 5 }
 0x10f   :  { %v8646_v22 = vsub.f32 %v8632_v33, %v11992_v37  ;;  %v1228_v55 = vsel %vm64_vm8, %v1197_v15, %v8457_v49  ;;  %v8650_v47 = vpop.permute.xlu0 %1134  ;;  %v1964_v49 = vld [vmem:[%s11952_s0 + $0x18] sm:$0xc0]  ;;  %v2113_v20 = vrot.slane %v2080_v21, 5 }
 0x110   :  { %12246 = vst [vmem:[#allocation49_spill] sm:$0xff] %v8650_v47  ;;  %1256 = vst [vmem:[#allocation2 + $0x118] sm:$0xc0] %v1228_v55  ;;  %v1146_v17 = vsel %vm11997_vm13, %v1133_v25, %v8650_v47  ;;  %v2076_v25 = vld [vmem:[%s11952_s0 + $0x40] sm:$0x1]  ;;  %v2100_v55 = vrot.slane %v2068_v24, 5 }
 0x111   :  { %12245 = vst [vmem:[#allocation48_spill] sm:$0xff] %v8646_v22  ;;  %1993 = vrot.lane.b32.xlu1 %v1961_v50, %s12029_s10  ;;  %1160 = vst [vmem:[#allocation2 + $0x130] sm:$0x38] %v1146_v17  ;;  %v2071_v15 = vld [vmem:[%s11952_s0 + $0x18] sm:$0xc0]  ;;  %v2101_v17 = vrot.slane %v2076_v25, 5 }
 0x112   :  { %1932 = vrot.lane.b32.xlu0 %v1914_v39, %s7287_s19  ;;  %v8659_v52 = vpop.permute.xlu1 %1204  ;;  %v2079_v39 = vld [vmem:[%s11952_s0 + $0x58] sm:$0x1]  ;;  %v2109_v38 = vrot.slane %v2071_v15, 5  ;;  %v3308_v25 = vand.u32 4294901760, %v8623_v1  ;;  %v1973_v15 = vld [vmem:[%s11952_s0 + $0x60] sm:$0x1] }
 0x113   :  { %12247 = vst [vmem:[#allocation50_spill] sm:$0xff] %v8659_v52  ;;  %v1203_v19 = vpop.permute.xlu0 %1202  ;;  %v2110_v37 = vrot.slane %v2079_v39, 5  ;;  %v2173_v24 = vld [vmem:[%s11952_s0 + $0x58] sm:$0x1]  ;;  %v2102_v10 = vsel %vm1302_vm12, %v2100_v55, %v2101_v17  ;;  %v2170_v55 = vld [vmem:[%s11952_s0 + $0x40] sm:$0x1] }
 0x114   :  { %v1230_v57 = vsel %vm64_vm8, %v8455_v53, %v1203_v19  ;;  %v1231_v50 = vsel %vm64_vm8, %v1203_v19, %v8659_v52  ;;  %v1972_v53 = vld [vmem:[%s11952_s0 + $0x58] sm:$0x1]  ;;  %v12248_v52 = vand.u32 4294901760, %v8606_v13  ;;  %v4085_v17 = vand.u32 4294901760, %v8628_v32 }
 0x115   :  { %2001 = vrot.lane.b32.xlu1 %v1965_v30, %s12029_s10  ;;  %1258 = vst [vmem:[#allocation2 + $0x128] sm:$0xc0] %v1230_v57  ;;  %1259 = vst [vmem:[#allocation2 + $0x130] sm:$0xc0] %v1231_v50  ;;  %v1969_v30 = vld [vmem:[%s11952_s0 + $0x40] sm:$0x1]  ;;  %v2111_v13 = vsel %vm1302_vm12, %v2109_v38, %v2110_v37 }
 0x116   :  { %1999 = vrot.lane.b32.xlu0 %v1964_v49, %s12029_s10  ;;  %v8691_v19 = vpop.permute.xlu1 %1216  ;;  %v2165_v57 = vld [vmem:[%s11952_s0 + $0x18] sm:$0xc0]  ;;  %vm1545_vm13 = vcmask 850944   ;;  %v4079_v28 = vand.u32 4294901760, %v8646_v22  ;;  %v2195_v44 = vrot.slane %v2170_v55, 2  ;;  %v4086_v7 = vsub.f32 %v8628_v32, %v4085_v17 }
 0x117   :  { %v8699_v50 = vpop.permute.xlu0 %1214  ;;  %v3091_v49 = vld [vmem:[#allocation2 + $0x118] sm:$0xff]  ;;  %v2203_v39 = vrot.slane %v2165_v57, 2 }
 0x118   :  { %v1236_v2 = vsel %vm64_vm8, %v8699_v50, %v8691_v19  ;;  %v3172_v21 = vand.u32 4294901760, %v3091_v49 }
 0x119   :  { %2015 = vrot.lane.b32.xlu1 %v1972_v53, %s12029_s10  ;;  %1264 = vst [vmem:[#allocation2 + $0x158] sm:$0x1] %v1236_v2  ;;  %v2204_v53 = vrot.slane %v2173_v24, 2  ;;  %v2114_v2 = vsel %vm1302_vm12, %v2112_v63, %v2113_v20 }
 0x11a   :  { %2009 = vrot.lane.b32.xlu0 %v1969_v30, %s12029_s10  ;;  %v8714_v27 = vpop.permute.xlu1 %1331  ;;  %v8718_v47 = vpack.c.bf16 %v3172_v21, %v12248_v52  ;;  %v8720_v14 = vsub.f32 %v3091_v49, %v3172_v21  ;;  %v2162_v30 = vld [vmem:[%s11952_s0] sm:$0xc0]  ;;  %v3309_v52 = vsub.f32 %v8623_v1, %v3308_v25 }
 0x11b   :  { %v8729_v57 = vpop.permute.xlu0 %1329  ;;  %v2194_v37 = vrot.slane %v2162_v30, 2  ;;  %v12255_v30 = vand.u32 4294901760, %v8608_v26 }
 0x11c   :  { %12249 = vst [vmem:[#allocation51_spill] sm:$0xff] %v8718_v47  ;;  %12250 = vst [vmem:[#allocation52_spill] sm:$0xff] %v8720_v14  ;;  %v1344_v49 = vsel %vm126_vm7, %v8729_v57, %v8714_v27  ;;  %6673 = vmatpush1.bf16.msra.mxu0 %v8718_v47  ;;  %v3094_v24 = vld [vmem:[#allocation2 + $0x130] sm:$0xff]  ;;  %v3093_v21 = vld [vmem:[#allocation2 + $0x128] sm:$0xff]  ;;  %v3320_v56 = vand.u32 4294901760, %v8720_v14 }
 0x11d   :  { %2124 = vrot.lane.b32.xlu1 %v2102_v10, %s12027_s29  ;;  %1358 = vst [vmem:[#allocation2 + $0x158] sm:$0xe] %v1344_v49  ;;  %v3947_v20 = vand.u32 4294901760, %v3094_v24  ;;  %v3949_v38 = vand.u32 4294901760, %v3093_v21  ;;  %v2205_v10 = vsel %vm616_vm1, %v2203_v39, %v2204_v53  ;;  %v12252_v49 = vand.u32 4294901760, %v8632_v33 }
 0x11e   :  { %2017 = vrot.lane.b32.xlu0 %v1973_v15, %s12029_s10  ;;  %v8744_v59 = vpop.permute.xlu1 %1424  ;;  %v3321_v47 = vsub.f32 %v8720_v14, %v3320_v56  ;;  %v8749_v48 = vpack.c.bf16 %v3320_v56, %v3308_v25  ;;  %v2166_v39 = vld [vmem:[%s11952_s0 + $0x20] sm:$0xc0]  ;;  %v2174_v56 = vld [vmem:[%s11952_s0 + $0x60] sm:$0x1]  ;;  %v3310_v25 = vand.u32 4294901760, %v3309_v52  ;;  %v4080_v53 = vsub.f32 %v8646_v22, %v4079_v28 }
 0x11f   :  { %v8751_v51 = vpop.permute.xlu0 %1422  ;;  %v8755_v63 = vpack.c.bf16 %v3947_v20, %v12252_v49  ;;  %v8757_v15 = vsub.f32 %v3094_v24, %v3947_v20  ;;  %v8761_v55 = vpack.c.bf16 %v3949_v38, %v12255_v30  ;;  %v8763_v1 = vsub.f32 %v3093_v21, %v3949_v38  ;;  %v8781_v24 = vld [vmem:[%s11952_s0] sm:$0xc0] }
 0x120   :  { %12251 = vst [vmem:[#allocation53_spill] sm:$0xff] %v8749_v48  ;;  %v1437_v33 = vsel %vm12095_vm9, %v8751_v51, %v8744_v59  ;;  %v3322_v26 = vand.u32 4294901760, %v3321_v47  ;;  %v2196_v52 = vsel %vm616_vm1, %v2194_v37, %v2195_v44  ;;  %v2206_v38 = vrot.slane %v2166_v39, 2  ;;  %v8812_v37 = vld [vmem:[%s11952_s0 + $0x20] sm:$0xc0] }
 0x121   :  { %12253 = vst [vmem:[#allocation54_spill] sm:$0xff] %v8755_v63  ;;  %12254 = vst [vmem:[#allocation55_spill] sm:$0xff] %v8757_v15  ;;  %2132 = vrot.lane.b32.xlu1 %v2114_v2, %s12027_s29  ;;  %6815 = vmatprep.subr.bf16.mxu1 %v8755_v63  ;;  %v4091_v21 = vand.u32 4294901760, %v8757_v15  ;;  %v4097_v20 = vand.u32 4294901760, %v8763_v1  ;;  %v2207_v49 = vrot.slane %v2174_v56, 2  ;;  %v12014_v2 = vrot.slane %v8781_v24, 7 }
 0x122   :  { %12256 = vst [vmem:[#allocation56_spill] sm:$0xff] %v8761_v55  ;;  %12257 = vst [vmem:[#allocation57_spill] sm:$0xff] %v8763_v1  ;;  %2130 = vrot.lane.b32.xlu0 %v2111_v13, %s12027_s29  ;;  %6817 = vmatpush1.bf16.msra.mxu1 %v8761_v55  ;;  %v8790_v13 = vpop.permute.xlu1 %1517  ;;  %v8793_v30 = vpack.c.bf16 %v3322_v26, %v3310_v25  ;;  %v4081_v39 = vand.u32 4294901760, %v4080_v53  ;;  %v4087_v25 = vand.u32 4294901760, %v4086_v7  ;;  %v2264_v7 = vld [vmem:[%s11952_s0 + $0x48] sm:$0x1] }
 0x123   :  { %1451 = vst [vmem:[#allocation2 + $0x158] sm:$0x70] %v1437_v33  ;;  %v8795_v33 = vpop.permute.xlu0 %1515  ;;  %v4092_v48 = vsub.f32 %v8757_v15, %v4091_v21  ;;  %v4098_v63 = vsub.f32 %v8763_v1, %v4097_v20  ;;  %v8804_v55 = vpack.c.bf16 %v4091_v21, %v4079_v28  ;;  %v8806_v44 = vpack.c.bf16 %v4097_v20, %v4085_v17  ;;  %v8820_v28 = vld [vmem:[%s11952_s0 + $0x18] sm:$0xc0]  ;;  %v2265_v17 = vld [vmem:[%s11952_s0 + $0x50] sm:$0x1] }
 0x124   :  { %v1547_v47 = vsel %vm1545_vm13, %v8795_v33, %v8790_v13  ;;  %v12018_v20 = vrot.slane %v8812_v37, 7  ;;  %v12261_v15 = vrot.slane %v8515_v4, 7  ;;  %v2487_v4 = vld [vmem:[%s11952_s0 + $0x48] sm:$0x1]  ;;  %s12089_s29 = smov 44  }
 0x125   :  { %2224 = vrot.lane.b32.xlu1 %v2205_v10, %s7288_s24  ;;  %12258 = vst [vmem:[#allocation58_spill] sm:$0xff] %v8804_v55  ;;  %12259 = vst [vmem:[#allocation59_spill] sm:$0xff] %v8806_v44  ;;  %v4093_v56 = vand.u32 4294901760, %v4092_v48  ;;  %v4099_v26 = vand.u32 4294901760, %v4098_v63  ;;  %v2208_v10 = vsel %vm616_vm1, %v2206_v38, %v2207_v49  ;;  %v2297_v49 = vrot.slane %v2264_v7, 7 }
 0x126   :  { %1575 = vst [vmem:[#allocation2 + $0x158] sm:$0x80] %v1547_v47  ;;  %2218 = vrot.lane.b32.xlu0 %v2196_v52, %s7288_s24  ;;  %v8814_v32 = vpop.permute.xlu1 %1533  ;;  %v12020_v47 = vrot.slane %v8820_v28, 7  ;;  %v2299_v52 = vrot.slane %v2265_v17, 7 }
 0x127   :  { %v8825_v21 = vpop.permute.xlu0 %1531  ;;  %v8830_v48 = vpack.c.bf16 %v4093_v56, %v4081_v39  ;;  %v8832_v63 = vpack.c.bf16 %v4099_v26, %v4087_v25  ;;  %v2387_v39 = vld [vmem:[%s11952_s0 + $0x10] sm:$0xc0]  ;;  %v2395_v56 = vld [vmem:[%s11952_s0 + $0x50] sm:$0x1]  ;;  %v2386_v26 = vld [vmem:[%s11952_s0 + $0x8] sm:$0xc0] }
 0x128   :  { %v1554_v53 = vsel %vm1545_vm13, %v8825_v21, %v8814_v32  ;;  %v2423_v44 = vrot.slane %v2387_v39, 4  ;;  %v2424_v55 = vrot.slane %v2395_v56, 4  ;;  %v2420_v14 = vrot.slane %v2386_v26, 4  ;;  %v2479_v39 = vld [vmem:[%s11952_s0 + $0x8] sm:$0xc0] }
 0x129   :  { %2311 = vrot.lane.b32.xlu1 %v12014_v2, %s7289_s5  ;;  %1582 = vst [vmem:[#allocation2 + $0x190] sm:$0x3] %v1554_v53  ;;  %v12260_v53 = vrot.slane %v8551_v46, 7  ;;  %v2488_v46 = vld [vmem:[%s11952_s0 + $0x50] sm:$0x1]  ;;  %v2513_v23 = vrot.slane %v2479_v39, 1 }
 0x12a   :  { %2226 = vrot.lane.b32.xlu0 %v2208_v10, %s7288_s24  ;;  %v8843_v38 = vpop.permute.xlu1 %1648  ;;  %v2394_v10 = vld [vmem:[%s11952_s0 + $0x48] sm:$0x1]  ;;  %v2425_v56 = vsel %vm816_vm3, %v2423_v44, %v2424_v55  ;;  %v2573_v55 = vld [vmem:[%s11952_s0 + $0x8] sm:$0xc0] }
 0x12b   :  { %v8851_v25 = vpop.permute.xlu0 %1646  ;;  %v2300_v2 = vsel %vm684_vm2, %v12260_v53, %v2299_v52  ;;  %v2574_v53 = vld [vmem:[%s11952_s0 + $0x10] sm:$0xc0]  ;;  %v2581_v44 = vld [vmem:[%s11952_s0 + $0x48] sm:$0x1] }
 0x12c   :  { %v1662_v17 = vsel %vm12034_vm14, %v8851_v25, %v8843_v38  ;;  %v2608_v29 = vrot.slane %v2581_v44, 6 }
 0x12d   :  { %2319 = vrot.lane.b32.xlu1 %v12018_v20, %s7289_s5  ;;  %v8865_v7 = vld [vmem:[#allocation2 + $0x158] sm:$0xff]  ;;  %1676 = vst [vmem:[#allocation2 + $0x190] sm:$0x1c] %v1662_v17  ;;  %v2298_v20 = vsel %vm684_vm2, %v12261_v15, %v2297_v49  ;;  %v2421_v17 = vrot.slane %v2394_v10, 4  ;;  %v2517_v10 = vrot.slane %v2488_v46, 1 }
 0x12e   :  { %2317 = vrot.lane.b32.xlu0 %v12020_v47, %s7289_s5  ;;  %v12021_v1 = vand.u32 4294901760, %v8865_v7  ;;  %v8874_v22 = vpop.permute.xlu1 %1742  ;;  %v2480_v47 = vld [vmem:[%s11952_s0 + $0x10] sm:$0xc0] }
 0x12f   :  { %v8885_v52 = vpop.permute.xlu0 %1740  ;;  %v2516_v26 = vrot.slane %v2480_v47, 1  ;;  %v2422_v3 = vsel %vm816_vm3, %v2420_v14, %v2421_v17  ;;  %v2610_v14 = vrot.slane %v2574_v53, 6 }
 0x130   :  { %v8896_v15 = vsub.f32 %v8865_v7, %v12021_v1  ;;  %v1755_v49 = vsel %vm12094_vm10, %v8885_v52, %v8874_v22  ;;  %v2582_v1 = vld [vmem:[%s11952_s0 + $0x50] sm:$0x1] }
 0x131   :  { %2331 = vrot.lane.b32.xlu1 %v2300_v2, %s7289_s5  ;;  %1769 = vst [vmem:[#allocation2 + $0x190] sm:$0xe0] %v1755_v49  ;;  %v2514_v2 = vrot.slane %v2487_v4, 1  ;;  %v2611_v17 = vrot.slane %v2582_v1, 6  ;;  %v2607_v4 = vrot.slane %v2573_v55, 6 }
 0x132   :  { %12262 = vst [vmem:[#allocation60_spill] sm:$0xff] %v8896_v15  ;;  %2329 = vrot.lane.b32.xlu0 %v2298_v20, %s7289_s5  ;;  %v1219_v12 = vpop.permute.xlu1 %1218  ;;  %v3326_v55 = vand.u32 4294901760, %v8896_v15 }
 0x133   :  { %v1237_v20 = vsel %vm64_vm8, %v8691_v19, %v1219_v12  ;;  %v1213_v49 = vpop.permute.xlu0 %1212  ;;  %v2518_v19 = vsel %vm911_vm4, %v2516_v26, %v2517_v10  ;;  %v2515_v39 = vsel %vm911_vm4, %v2513_v23, %v2514_v2  ;;  %v2675_v23 = vld [vmem:[%s11952_s0 + $0x48] sm:$0x1]  ;;  %v2612_v10 = vsel %vm1006_vm5, %v2610_v14, %v2611_v17 }
 0x134   :  { %1265 = vst [vmem:[#allocation2 + $0x160] sm:$0x1] %v1237_v20  ;;  %v1235_v47 = vsel %vm64_vm8, %v1213_v49, %v8699_v50  ;;  %v2668_v20 = vld [vmem:[%s11952_s0 + $0x10] sm:$0xc0]  ;;  %v2676_v50 = vld [vmem:[%s11952_s0 + $0x50] sm:$0x1] }
 0x135   :  { %2445 = vrot.lane.b32.xlu1 %v2425_v56, %s7290_s11  ;;  %1263 = vst [vmem:[#allocation2 + $0x150] sm:$0x1] %v1235_v47  ;;  %v2704_v2 = vrot.slane %v2668_v20, 3  ;;  %v2705_v49 = vrot.slane %v2676_v50, 3  ;;  %v2609_v47 = vsel %vm1006_vm5, %v2607_v4, %v2608_v29 }
 0x136   :  { %2443 = vrot.lane.b32.xlu0 %v2422_v3, %s7290_s11  ;;  %v1328_v46 = vpop.permute.xlu1 %1327  ;;  %v2667_v3 = vld [vmem:[%s11952_s0 + $0x8] sm:$0xc0] }
 0x137   :  { %v1343_v1 = vsel %vm126_vm7, %v1328_v46, %v8729_v57  ;;  %v8933_v56 = vpop.permute.xlu0 %1220  ;;  %v2701_v46 = vrot.slane %v2667_v3, 3  ;;  %v2706_v29 = vsel %vm1101_vm6, %v2704_v2, %v2705_v49  ;;  %v2266_v3 = vld [vmem:[%s11952_s0 + $0x58] sm:$0x1]  ;;  %v2762_v2 = vld [vmem:[%s11952_s0 + $0x10] sm:$0xc0] }
 0x138   :  { %12263 = vst [vmem:[#allocation61_spill] sm:$0xff] %v8933_v56  ;;  %1357 = vst [vmem:[#allocation2 + $0x150] sm:$0xe] %v1343_v1  ;;  %v1238_v26 = vsel %vm64_vm8, %v1219_v12, %v8933_v56  ;;  %v3106_v57 = vld [vmem:[#allocation2 + $0x190] sm:$0xff]  ;;  %v2702_v12 = vrot.slane %v2675_v23, 3 }
 0x139   :  { %2538 = vrot.lane.b32.xlu1 %v2518_v19, %s12060_s22  ;;  %1266 = vst [vmem:[#allocation2 + $0x168] sm:$0x1] %v1238_v26  ;;  %v3178_v53 = vand.u32 4294901760, %v3106_v57  ;;  %v12265_v19 = vand.u32 4294901760, %v8865_v7  ;;  %v3327_v7 = vsub.f32 %v8896_v15, %v3326_v55 }
 0x13a   :  { %2536 = vrot.lane.b32.xlu0 %v2515_v39, %s12060_s22  ;;  %v8947_v44 = vpop.permute.xlu1 %1335  ;;  %v2703_v50 = vsel %vm1101_vm6, %v2701_v46, %v2702_v12 }
 0x13b   :  { %12264 = vst [vmem:[#allocation62_spill] sm:$0xff] %v8947_v44  ;;  %v1334_v1 = vpop.permute.xlu0 %1333  ;;  %v8952_v56 = vpack.c.bf16 %v3178_v53, %v12265_v19  ;;  %v8954_v14 = vsub.f32 %v3106_v57, %v3178_v53  ;;  %v3328_v46 = vand.u32 4294901760, %v3327_v7  ;;  %v2385_v19 = vld [vmem:[%s11952_s0] sm:$0xc0] }
 0x13c   :  { %v1345_v17 = vsel %vm126_vm7, %v8714_v27, %v1334_v1  ;;  %v1346_v39 = vsel %vm126_vm7, %v1334_v1, %v8947_v44 }
 0x13d   :  { %12266 = vst [vmem:[#allocation63_spill] sm:$0xff] %v8952_v56  ;;  %12267 = vst [vmem:[#allocation64_spill] sm:$0xff] %v8954_v14  ;;  %2632 = vrot.lane.b32.xlu1 %v2612_v10, %s12058_s23  ;;  %6675 = vmatprep.subr.bf16.mxu0 %v8952_v56  ;;  %v3338_v4 = vand.u32 4294901760, %v8954_v14  ;;  %v2263_v10 = vld [vmem:[%s11952_s0 + $0x40] sm:$0x1] }
 0x13e   :  { %1359 = vst [vmem:[#allocation2 + $0x160] sm:$0xe] %v1345_v17  ;;  %1360 = vst [vmem:[#allocation2 + $0x168] sm:$0xe] %v1346_v39  ;;  %2630 = vrot.lane.b32.xlu0 %v2609_v47, %s12058_s23  ;;  %v1427_v20 = vpop.permute.xlu1 %1426  ;;  %v2301_v47 = vrot.slane %v2266_v3, 7  ;;  %v2295_v1 = vrot.slane %v2263_v10, 7 }
 0x13f   :  { %v1438_v23 = vsel %vm12095_vm9, %v8744_v59, %v1427_v20  ;;  %v1421_v26 = vpop.permute.xlu0 %1420  ;;  %v3339_v57 = vsub.f32 %v8954_v14, %v3338_v4  ;;  %v8984_v49 = vpack.c.bf16 %v3338_v4, %v3326_v55  ;;  %v2761_v59 = vld [vmem:[%s11952_s0 + $0x8] sm:$0xc0]  ;;  %v2393_v55 = vld [vmem:[%s11952_s0 + $0x40] sm:$0x1]  ;;  %v2417_v3 = vrot.slane %v2385_v19, 4 }
 0x140   :  { %1452 = vst [vmem:[#allocation2 + $0x160] sm:$0x70] %v1438_v23  ;;  %v1436_v53 = vsel %vm12095_vm9, %v1421_v26, %v8751_v51  ;;  %v2418_v23 = vrot.slane %v2393_v55, 4  ;;  %v12272_v10 = vrot.slane %v8781_v24, 7  ;;  %v2396_v24 = vld [vmem:[%s11952_s0 + $0x58] sm:$0x1] }
 0x141   :  { %2726 = vrot.lane.b32.xlu1 %v2706_v29, %s12056_s8  ;;  %12268 = vst [vmem:[#allocation65_spill] sm:$0xff] %v8984_v49  ;;  %1450 = vst [vmem:[#allocation2 + $0x150] sm:$0x70] %v1436_v53  ;;  %v3340_v12 = vand.u32 4294901760, %v3339_v57  ;;  %v2267_v29 = vld [vmem:[%s11952_s0 + $0x60] sm:$0x1] }
 0x142   :  { %2724 = vrot.lane.b32.xlu0 %v2703_v50, %s12056_s8  ;;  %v1514_v51 = vpop.permute.xlu1 %1513  ;;  %v2296_v57 = vsel %vm684_vm2, %v12272_v10, %v2295_v1  ;;  %v2303_v53 = vrot.slane %v2267_v29, 7  ;;  %v2481_v19 = vld [vmem:[%s11952_s0 + $0x18] sm:$0xc0]  ;;  %v2486_v10 = vld [vmem:[%s11952_s0 + $0x40] sm:$0x1] }
 0x143   :  { %v1546_v17 = vsel %vm1545_vm13, %v1514_v51, %v8795_v33  ;;  %v8998_v39 = vpop.permute.xlu0 %1428  ;;  %v9003_v7 = vpack.c.bf16 %v3340_v12, %v3328_v46  ;;  %v12270_v33 = vrot.slane %v8820_v28, 7  ;;  %v2419_v12 = vsel %vm816_vm3, %v2417_v3, %v2418_v23  ;;  %v2478_v23 = vld [vmem:[%s11952_s0] sm:$0xc0] }
 0x144   :  { %12269 = vst [vmem:[#allocation66_spill] sm:$0xff] %v8998_v39  ;;  %1574 = vst [vmem:[#allocation2 + $0x150] sm:$0x80] %v1546_v17  ;;  %v1439_v4 = vsel %vm12095_vm9, %v1427_v20, %v8998_v39  ;;  %v2389_v20 = vld [vmem:[%s11952_s0 + $0x20] sm:$0xc0]  ;;  %v12273_v17 = vrot.slane %v8812_v37, 7 }
 0x145   :  { %2796 = vrot.lane.b32.xlu1 %v2762_v2, %s7303_s25  ;;  %1453 = vst [vmem:[#allocation2 + $0x168] sm:$0x70] %v1439_v4  ;;  %v2302_v50 = vsel %vm684_vm2, %v12270_v33, %v2301_v47  ;;  %v2397_v2 = vld [vmem:[%s11952_s0 + $0x60] sm:$0x1]  ;;  %v2429_v51 = vrot.slane %v2389_v20, 4  ;;  %v2427_v33 = vrot.slane %v2396_v24, 4 }
 0x146   :  { %2794 = vrot.lane.b32.xlu0 %v2761_v59, %s7303_s25  ;;  %v9012_v26 = vpop.permute.xlu1 %1521  ;;  %v2388_v59 = vld [vmem:[%s11952_s0 + $0x18] sm:$0xc0]  ;;  %v2430_v1 = vrot.slane %v2397_v2, 4  ;;  %v2304_v29 = vsel %vm684_vm2, %v12273_v17, %v2303_v53  ;;  %v2519_v53 = vrot.slane %v2481_v19, 1  ;;  %v2510_v24 = vrot.slane %v2478_v23, 1 }
 0x147   :  { %12271 = vst [vmem:[#allocation67_spill] sm:$0xff] %v9012_v26  ;;  %v1520_v28 = vpop.permute.xlu0 %1519  ;;  %v2426_v4 = vrot.slane %v2388_v59, 4  ;;  %v2482_v19 = vld [vmem:[%s11952_s0 + $0x20] sm:$0xc0] }
 0x148   :  { %v1548_v47 = vsel %vm1545_vm13, %v8790_v13, %v1520_v28  ;;  %v1549_v46 = vsel %vm1545_vm13, %v1520_v28, %v9012_v26  ;;  %v2489_v13 = vld [vmem:[%s11952_s0 + $0x58] sm:$0x1]  ;;  %v2431_v2 = vsel %vm816_vm3, %v2429_v51, %v2430_v1 }
 0x149   :  { %2333 = vrot.lane.b32.xlu1 %v2302_v50, %s7289_s5  ;;  %1576 = vst [vmem:[#allocation2 + $0x160] sm:$0x80] %v1548_v47  ;;  %1577 = vst [vmem:[#allocation2 + $0x168] sm:$0x80] %v1549_v46  ;;  %v2520_v20 = vrot.slane %v2489_v13, 1  ;;  %v2428_v59 = vsel %vm816_vm3, %v2426_v4, %v2427_v33  ;;  %v2511_v47 = vrot.slane %v2486_v10, 1 }
 0x14a   :  { %2327 = vrot.lane.b32.xlu0 %v2296_v57, %s7289_s5  ;;  %v1536_v55 = vpop.permute.xlu1 %1535  ;;  %v2580_v46 = vld [vmem:[%s11952_s0 + $0x40] sm:$0x1] }
 0x14b   :  { %v1555_v50 = vsel %vm1545_vm13, %v8814_v32, %v1536_v55  ;;  %v1530_v3 = vpop.permute.xlu0 %1529  ;;  %v9053_v57 = vld [vmem:[#allocation2 + $0x150] sm:$0xff]  ;;  %v2490_v13 = vld [vmem:[%s11952_s0 + $0x60] sm:$0x1] }
 0x14c   :  { %1583 = vst [vmem:[#allocation2 + $0x198] sm:$0x3] %v1555_v50  ;;  %v1553_v37 = vsel %vm1545_vm13, %v1530_v3, %v8825_v21  ;;  %v12033_v32 = vand.u32 4294901760, %v9053_v57  ;;  %v2572_v21 = vld [vmem:[%s11952_s0] sm:$0xc0]  ;;  %v2605_v50 = vrot.slane %v2580_v46, 6 }
 0x14d   :  { %2441 = vrot.lane.b32.xlu1 %v2419_v12, %s7290_s11  ;;  %1581 = vst [vmem:[#allocation2 + $0x188] sm:$0x3] %v1553_v37  ;;  %v2604_v33 = vrot.slane %v2572_v21, 6  ;;  %v2522_v37 = vrot.slane %v2482_v19, 1  ;;  %v2583_v21 = vld [vmem:[%s11952_s0 + $0x58] sm:$0x1] }
 0x14e   :  { %2335 = vrot.lane.b32.xlu0 %v2304_v29, %s7289_s5  ;;  %v1645_v28 = vpop.permute.xlu1 %1644  ;;  %v9071_v12 = vsub.f32 %v9053_v57, %v12033_v32  ;;  %v2521_v29 = vsel %vm911_vm4, %v2519_v53, %v2520_v20  ;;  %v2576_v53 = vld [vmem:[%s11952_s0 + $0x20] sm:$0xc0]  ;;  %v2584_v20 = vld [vmem:[%s11952_s0 + $0x60] sm:$0x1]  ;;  %v2614_v32 = vrot.slane %v2583_v21, 6 }
 0x14f   :  { %v1661_v51 = vsel %vm12034_vm14, %v1645_v28, %v8851_v25  ;;  %v9075_v1 = vpop.permute.xlu0 %1537  ;;  %v2606_v19 = vsel %vm1006_vm5, %v2604_v33, %v2605_v50  ;;  %v2666_v33 = vld [vmem:[%s11952_s0] sm:$0xc0]  ;;  %v2674_v50 = vld [vmem:[%s11952_s0 + $0x40] sm:$0x1] }
 0x150   :  { %12274 = vst [vmem:[#allocation68_spill] sm:$0xff] %v9071_v12  ;;  %12275 = vst [vmem:[#allocation69_spill] sm:$0xff] %v9075_v1  ;;  %v1556_v17 = vsel %vm1545_vm13, %v1536_v55, %v9075_v1  ;;  %v9087_v4 = vld [vmem:[#allocation2 + $0x168] sm:$0xff]  ;;  %v9089_v25 = vld [vmem:[#allocation2 + $0x160] sm:$0xff]  ;;  %v2512_v55 = vsel %vm911_vm4, %v2510_v24, %v2511_v47  ;;  %v2698_v21 = vrot.slane %v2666_v33, 3  ;;  %v7304_v33 = vmov 0.0  }
 0x151   :  { %1675 = vst [vmem:[#allocation2 + $0x188] sm:$0x1c] %v1661_v51  ;;  %2449 = vrot.lane.b32.xlu1 %v2431_v2, %s7290_s11  ;;  %1584 = vst [vmem:[#allocation2 + $0x1a0] sm:$0x3] %v1556_v17  ;;  %v12032_v3 = vand.u32 4294901760, %v9087_v4  ;;  %v12031_v23 = vand.u32 4294901760, %v9089_v25  ;;  %3240 = vmatprep.mubr.f32.mxu0 %v7304_v33 }
 0x152   :  { %2447 = vrot.lane.b32.xlu0 %v2428_v59, %s7290_s11  ;;  %v9094_v10 = vpop.permute.xlu1 %1652  ;;  %v2523_v2 = vrot.slane %v2490_v13, 1  ;;  %v2575_v59 = vld [vmem:[%s11952_s0 + $0x18] sm:$0xc0]  ;;  %v2616_v13 = vrot.slane %v2576_v53, 6  ;;  %v2617_v17 = vrot.slane %v2584_v20, 6  ;;  %12 = vst [vmem:[#allocation2 + $0x2a8] sm:$0xff] %v7304_v33  ;;  %4017 = vmatprep.mubr.f32.mxu1 %v7304_v33 }
 0x153   :  { %12276 = vst [vmem:[#allocation70_spill] sm:$0xff] %v9094_v10  ;;  %v1651_v28 = vpop.permute.xlu0 %1650  ;;  %v9112_v24 = vsub.f32 %v9087_v4, %v12032_v3  ;;  %v9117_v47 = vsub.f32 %v9089_v25, %v12031_v23  ;;  %v2613_v3 = vrot.slane %v2575_v59, 6  ;;  %11 = vst [vmem:[#allocation2 + $0x2a0] sm:$0xff] %v7304_v33 }
 0x154   :  { %v1663_v46 = vsel %vm12034_vm14, %v8843_v38, %v1651_v28  ;;  %v1664_v51 = vsel %vm12034_vm14, %v1651_v28, %v9094_v10  ;;  %v2524_v23 = vsel %vm911_vm4, %v2522_v37, %v2523_v2  ;;  %v2669_v38 = vld [vmem:[%s11952_s0 + $0x18] sm:$0xc0]  ;;  %13 = vst [vmem:[#allocation2 + $0x2b0] sm:$0xff] %v7304_v33  ;;  %14 = vst [vmem:[#allocation2 + $0x2b8] sm:$0xff] %v7304_v33  ;;  %vm12280_vm14 = vcmask 703488  }
 0x155   :  { %12277 = vst [vmem:[#allocation71_spill] sm:$0xff] %v9112_v24  ;;  %12278 = vst [vmem:[#allocation72_spill] sm:$0xff] %v9117_v47  ;;  %2540 = vrot.lane.b32.xlu1 %v2521_v29, %s12060_s22  ;;  %v2677_v29 = vld [vmem:[%s11952_s0 + $0x58] sm:$0x1]  ;;  %v2707_v2 = vrot.slane %v2669_v38, 3  ;;  %v2615_v59 = vsel %vm1006_vm5, %v2613_v3, %v2614_v32 }
 0x156   :  { %1677 = vst [vmem:[#allocation2 + $0x198] sm:$0x1c] %v1663_v46  ;;  %1678 = vst [vmem:[#allocation2 + $0x1a0] sm:$0x1c] %v1664_v51  ;;  %2534 = vrot.lane.b32.xlu0 %v2512_v55, %s12060_s22  ;;  %v1745_v27 = vpop.permute.xlu1 %1744  ;;  %v2708_v53 = vrot.slane %v2677_v29, 3  ;;  %v2699_v46 = vrot.slane %v2674_v50, 3 }
 0x157   :  { %v1756_v55 = vsel %vm12094_vm10, %v8874_v22, %v1745_v27  ;;  %v1739_v28 = vpop.permute.xlu0 %1738  ;;  %v2618_v22 = vsel %vm1006_vm5, %v2616_v13, %v2617_v17  ;;  %15 = vst [vmem:[#allocation2 + $0x2c0] sm:$0xff] %v7304_v33  ;;  %16 = vst [vmem:[#allocation2 + $0x2c8] sm:$0xff] %v7304_v33 }
 0x158   :  { %1770 = vst [vmem:[#allocation2 + $0x198] sm:$0xe0] %v1756_v55  ;;  %v1754_v37 = vsel %vm12094_vm10, %v1739_v28, %v8885_v52  ;;  %v2670_v52 = vld [vmem:[%s11952_s0 + $0x20] sm:$0xc0]  ;;  %v2709_v32 = vsel %vm1101_vm6, %v2707_v2, %v2708_v53  ;;  %v2700_v13 = vsel %vm1101_vm6, %v2698_v21, %v2699_v46  ;;  %v9177_v28 = vld [vmem:[%s11952_s0 + $0x50] sm:$0x1] }
 0x159   :  { %2628 = vrot.lane.b32.xlu1 %v2606_v19, %s12058_s23  ;;  %1768 = vst [vmem:[#allocation2 + $0x188] sm:$0xe0] %v1754_v37  ;;  %v2710_v17 = vrot.slane %v2670_v52, 3  ;;  %17 = vst [vmem:[#allocation2 + $0x2d0] sm:$0xff] %v7304_v33  ;;  %v9187_v2 = vld [vmem:[%s11952_s0 + $0x8] sm:$0xc0] }
 0x15a   :  { %2542 = vrot.lane.b32.xlu0 %v2524_v23, %s12060_s22  ;;  %v2678_v23 = vld [vmem:[%s11952_s0 + $0x60] sm:$0x1]  ;;  %v4109_v53 = vand.u32 4294901760, %v9117_v47  ;;  %v3332_v46 = vand.u32 4294901760, %v9071_v12  ;;  %v2906_v10 = vrot.slane %v9177_v28, 5  ;;  %v4103_v28 = vand.u32 4294901760, %v9112_v24 }
 0x15b   :  { %v9146_v20 = vpop.permute.xlu1 %1833  ;;  %v9149_v51 = vpop.permute.xlu0 %1746  ;;  %v2711_v38 = vrot.slane %v2678_v23, 3 }
 0x15c   :  { %12279 = vst [vmem:[#allocation73_spill] sm:$0xff] %v9149_v51  ;;  %v1757_v19 = vsel %vm12094_vm10, %v1745_v27, %v9149_v51  ;;  %v9172_v27 = vld [vmem:[%s11952_s0 + $0x10] sm:$0xc0]  ;;  %vm12335_vm10 = vcmask 539648  }
 0x15d   :  { %2636 = vrot.lane.b32.xlu1 %v2618_v22, %s12058_s23  ;;  %1771 = vst [vmem:[#allocation2 + $0x1a0] sm:$0xe0] %v1757_v19  ;;  %v2712_v23 = vsel %vm1101_vm6, %v2710_v17, %v2711_v38  ;;  %v2876_v17 = vld [vmem:[%s11952_s0 + $0x48] sm:$0x1]  ;;  %v2902_v38 = vrot.slane %v9187_v2, 5  ;;  %vm12336_vm9 = vmmov %vm12335_vm10 }
 0x15e   :  { %2634 = vrot.lane.b32.xlu0 %v2615_v59, %s12058_s23  ;;  %v2760_v59 = vld [vmem:[%s11952_s0] sm:$0xc0]  ;;  %s12388_s23 = smov 84  }
 0x15f   :  { %v9162_v3 = vpop.permute.xlu1 %1926  ;;  %v9165_v29 = vpop.permute.xlu0 %1835  ;;  %v9167_v55 = vld [vmem:[#allocation2 + $0x198] sm:$0xff]  ;;  %v2764_v2 = vld [vmem:[%s11952_s0 + $0x20] sm:$0xc0] }
 0x160   :  { %v1848_v50 = vsel %vm12280_vm14, %v9146_v20, %v9165_v29  ;;  %v3105_v37 = vld [vmem:[#allocation2 + $0x188] sm:$0xff]  ;;  %v3957_v22 = vand.u32 4294901760, %v9167_v55  ;;  %vm12091_vm14 = vcmask 687104  }
 0x161   :  { %2728 = vrot.lane.b32.xlu1 %v2709_v32, %s12056_s8  ;;  %1862 = vst [vmem:[#allocation2 + $0x1c8] sm:$0x7] %v1848_v50  ;;  %v3180_v21 = vand.u32 4294901760, %v3105_v37 }
 0x162   :  { %2722 = vrot.lane.b32.xlu0 %v2700_v13, %s12056_s8  ;;  %v9199_v19 = vsub.f32 %v9167_v55, %v3957_v22  ;;  %v12282_v13 = vand.u32 4294901760, %v9053_v57  ;;  %v4110_v57 = vsub.f32 %v9117_v47, %v4109_v53 }
 0x163   :  { %v9195_v52 = vpop.permute.xlu1 %1995  ;;  %v9202_v33 = vpop.permute.xlu0 %1928  ;;  %v9208_v51 = vsub.f32 %v3105_v37, %v3180_v21 }
 0x164   :  { %12281 = vst [vmem:[#allocation74_spill] sm:$0xff] %v9199_v19  ;;  %v9206_v50 = vpack.c.bf16 %v3180_v21, %v12282_v13  ;;  %v1941_v55 = vsel %vm12285_vm15, %v9162_v3, %v9202_v33  ;;  %v3108_v32 = vld [vmem:[#allocation2 + $0x1a0] sm:$0xff]  ;;  %v4121_v37 = vand.u32 4294901760, %v9199_v19  ;;  %vm12083_vm15 = vcmask 556032  }
 0x165   :  { %12284 = vst [vmem:[#allocation76_spill] sm:$0xff] %v9208_v51  ;;  %2792 = vrot.lane.b32.xlu1 %v2760_v59, %s7303_s25  ;;  %1955 = vst [vmem:[#allocation2 + $0x1c8] sm:$0x38] %v1941_v55  ;;  %v3955_v21 = vand.u32 4294901760, %v3108_v32  ;;  %v3333_v59 = vsub.f32 %v9071_v12, %v3332_v46  ;;  %v3344_v13 = vand.u32 4294901760, %v9208_v51  ;;  %v2903_v55 = vrot.slane %v2876_v17, 5 }
 0x166   :  { %12283 = vst [vmem:[#allocation75_spill] sm:$0xff] %v9206_v50  ;;  %2730 = vrot.lane.b32.xlu0 %v2712_v23, %s12056_s8  ;;  %6677 = vmatpush1.bf16.msra.mxu0 %v9206_v50  ;;  %v2763_v23 = vld [vmem:[%s11952_s0 + $0x18] sm:$0xc0]  ;;  %v4122_v39 = vsub.f32 %v9199_v19, %v4121_v37  ;;  %v9239_v44 = vpack.c.bf16 %v4121_v37, %v4109_v53  ;;  %v12287_v50 = vand.u32 4294901760, %v9087_v4  ;;  %v12291_v53 = vand.u32 4294901760, %v9089_v25 }
 0x167   :  { %v9232_v26 = vpop.permute.xlu1 %2011  ;;  %v9241_v49 = vpop.permute.xlu0 %1997  ;;  %v9247_v1 = vsub.f32 %v3108_v32, %v3955_v21  ;;  %v3345_v47 = vsub.f32 %v9208_v51, %v3344_v13  ;;  %v9250_v12 = vpack.c.bf16 %v3344_v13, %v3332_v46  ;;  %v2770_v46 = vld [vmem:[%s11952_s0 + $0x50] sm:$0x1]  ;;  %v3334_v32 = vand.u32 4294901760, %v3333_v59 }
 0x168   :  { %12286 = vst [vmem:[#allocation77_spill] sm:$0xff] %v9239_v44  ;;  %v9245_v56 = vpack.c.bf16 %v3955_v21, %v12287_v50  ;;  %v2027_v17 = vsel %vm12091_vm14, %v9195_v52, %v9241_v49  ;;  %v9258_v37 = vpack.c.bf16 %v3957_v22, %v12291_v53  ;;  %v4111_v44 = vand.u32 4294901760, %v4110_v57  ;;  %v2963_v57 = vld [vmem:[%s11952_s0 + $0x10] sm:$0xc0] }
 0x169   :  { %12289 = vst [vmem:[#allocation79_spill] sm:$0xff] %v9247_v1  ;;  %12290 = vst [vmem:[#allocation80_spill] sm:$0xff] %v9250_v12  ;;  %2800 = vrot.lane.b32.xlu1 %v2764_v2, %s7303_s25  ;;  %v4123_v4 = vand.u32 4294901760, %v4122_v39  ;;  %v3346_v50 = vand.u32 4294901760, %v3345_v47  ;;  %v4115_v21 = vand.u32 4294901760, %v9247_v1  ;;  %v4104_v2 = vsub.f32 %v9112_v24, %v4103_v28 }
 0x16a   :  { %12288 = vst [vmem:[#allocation78_spill] sm:$0xff] %v9245_v56  ;;  %12292 = vst [vmem:[#allocation81_spill] sm:$0xff] %v9258_v37  ;;  %2798 = vrot.lane.b32.xlu0 %v2763_v23, %s7303_s25  ;;  %6819 = vmatprep.subr.bf16.mxu1 %v9245_v56  ;;  %v2769_v39 = vld [vmem:[%s11952_s0 + $0x48] sm:$0x1]  ;;  %v2971_v47 = vld [vmem:[%s11952_s0 + $0x50] sm:$0x1] }
 0x16b   :  { %2055 = vst [vmem:[#allocation2 + $0x1c8] sm:$0xc0] %v2027_v17  ;;  %6821 = vmatpush1.bf16.msra.mxu1 %v9258_v37  ;;  %v9269_v22 = vpop.permute.xlu1 %2126  ;;  %v9281_v59 = vpack.c.bf16 %v4123_v4, %v4111_v44  ;;  %v9283_v13 = vpop.permute.xlu0 %2013  ;;  %v2962_v23 = vld [vmem:[%s11952_s0 + $0x8] sm:$0xc0]  ;;  %v2970_v17 = vld [vmem:[%s11952_s0 + $0x48] sm:$0x1]  ;;  %v9291_v53 = vpack.c.bf16 %v3346_v50, %v3334_v32  ;;  %v4116_v25 = vsub.f32 %v9247_v1, %v4115_v21 }
 0x16c   :  { %v9294_v12 = vpack.c.bf16 %v4115_v21, %v4103_v28  ;;  %v2034_v44 = vsel %vm12091_vm14, %v9232_v26, %v9283_v13  ;;  %v12294_v4 = vrot.slane %v9172_v27, 5  ;;  %v2904_v32 = vsel %vm1302_vm12, %v2902_v38, %v2903_v55 }
 0x16d   :  { %2812 = vrot.lane.b32.xlu1 %v2770_v46, %s7303_s25  ;;  %2062 = vst [vmem:[#allocation2 + $0x200] sm:$0x1] %v2034_v44  ;;  %v2999_v50 = vrot.slane %v2963_v57, 2  ;;  %v3000_v56 = vrot.slane %v2971_v47, 2  ;;  %v2996_v21 = vrot.slane %v2962_v23, 2  ;;  %v4105_v19 = vand.u32 4294901760, %v4104_v2 }
 0x16e   :  { %12293 = vst [vmem:[#allocation82_spill] sm:$0xff] %v9294_v12  ;;  %2810 = vrot.lane.b32.xlu0 %v2769_v39, %s7303_s25  ;;  %v2907_v37 = vsel %vm1302_vm12, %v12294_v4, %v2906_v10  ;;  %v2997_v12 = vrot.slane %v2970_v17, 2  ;;  %v4117_v24 = vand.u32 4294901760, %v4116_v25  ;;  %v2867_v57 = vld [vmem:[%s11952_s0] sm:$0xc0] }
 0x16f   :  { %v9305_v28 = vpop.permute.xlu1 %2220  ;;  %v3001_v38 = vsel %vm616_vm1, %v2999_v50, %v3000_v56  ;;  %v2899_v47 = vrot.slane %v2867_v57, 5  ;;  %v2768_v17 = vld [vmem:[%s11952_s0 + $0x40] sm:$0x1]  ;;  %v2871_v44 = vld [vmem:[%s11952_s0 + $0x20] sm:$0xc0] }
 0x170   :  { %v9307_v1 = vpop.permute.xlu0 %2128  ;;  %v9315_v27 = vpack.c.bf16 %v4117_v24, %v4105_v19  ;;  %v2998_v39 = vsel %vm616_vm1, %v2996_v21, %v2997_v12  ;;  %v2875_v24 = vld [vmem:[%s11952_s0 + $0x40] sm:$0x1]  ;;  %v2771_v12 = vld [vmem:[%s11952_s0 + $0x58] sm:$0x1]  ;;  %v2870_v21 = vld [vmem:[%s11952_s0 + $0x18] sm:$0xc0] }
 0x171   :  { %v2142_v46 = vsel %vm12083_vm15, %v9269_v22, %v9307_v1  ;;  %2927 = vrot.lane.b32.xlu1 %v2907_v37, %s7305_s15  ;;  %v2900_v2 = vrot.slane %v2875_v24, 5  ;;  %v2879_v4 = vld [vmem:[%s11952_s0 + $0x60] sm:$0x1]  ;;  %v2911_v57 = vrot.slane %v2871_v44, 5 }
 0x172   :  { %v9313_v10 = vld [vmem:[#allocation2 + $0x1c8] sm:$0xff]  ;;  %2156 = vst [vmem:[#allocation2 + $0x200] sm:$0xe] %v2142_v46  ;;  %2925 = vrot.lane.b32.xlu0 %v2904_v32, %s7305_s15  ;;  %v2878_v46 = vld [vmem:[%s11952_s0 + $0x58] sm:$0x1]  ;;  %v2912_v24 = vrot.slane %v2879_v4, 5 }
 0x173   :  { %v12063_v55 = vand.u32 4294901760, %v9313_v10  ;;  %v9320_v25 = vpop.permute.xlu1 %2313 }
 0x174   :  { %v9329_v19 = vpop.permute.xlu0 %2222 }
 0x175   :  { %v9334_v56 = vsub.f32 %v9313_v10, %v12063_v55  ;;  %v2235_v37 = vsel %vm12296_vm0, %v9305_v28, %v9329_v19  ;;  %3021 = vrot.lane.b32.xlu1 %v3001_v38, %s12089_s29  ;;  %vm12297_vm0 = vcmask 703488   ;;  %v2964_v55 = vld [vmem:[%s11952_s0 + $0x18] sm:$0xc0] }
 0x176   :  { %2249 = vst [vmem:[#allocation2 + $0x200] sm:$0x70] %v2235_v37  ;;  %3019 = vrot.lane.b32.xlu0 %v2998_v39, %s12089_s29  ;;  %v2772_v39 = vld [vmem:[%s11952_s0 + $0x60] sm:$0x1] }
 0x177   :  { %12295 = vst [vmem:[#allocation83_spill] sm:$0xff] %v9334_v56  ;;  %v1832_v23 = vpop.permute.xlu1 %1831 }
 0x178   :  { %v1847_v32 = vsel %vm12297_vm0, %v1832_v23, %v9146_v20  ;;  %v9355_v50 = vpop.permute.xlu0 %2315  ;;  %v2901_v20 = vsel %vm1302_vm12, %v2899_v47, %v2900_v2  ;;  %v2908_v23 = vrot.slane %v2870_v21, 5  ;;  %v2961_v47 = vld [vmem:[%s11952_s0] sm:$0xc0]  ;;  %v2969_v2 = vld [vmem:[%s11952_s0 + $0x40] sm:$0x1]  ;;  %v2913_v21 = vsel %vm1302_vm12, %v2911_v57, %v2912_v24 }
 0x179   :  { %1861 = vst [vmem:[#allocation2 + $0x1c0] sm:$0x7] %v1847_v32  ;;  %v2344_v38 = vsel %vm12298_vm11, %v9320_v25, %v9355_v50  ;;  %2814 = vrot.lane.b32.xlu1 %v2771_v12, %s7303_s25  ;;  %v2909_v32 = vrot.slane %v2878_v46, 5  ;;  %v2972_v12 = vld [vmem:[%s11952_s0 + $0x58] sm:$0x1]  ;;  %vm12300_vm11 = vmmov %vm12297_vm0  ;;  %v3002_v46 = vrot.slane %v2964_v55, 2 }
 0x17a   :  { %2372 = vst [vmem:[#allocation2 + $0x200] sm:$0x80] %v2344_v38  ;;  %2808 = vrot.lane.b32.xlu0 %v2768_v17, %s7303_s25  ;;  %v3003_v38 = vrot.slane %v2972_v12, 2  ;;  %v2993_v14 = vrot.slane %v2961_v47, 2  ;;  %v2994_v58 = vrot.slane %v2969_v2, 2 }
 0x17b   :  { %v9372_v37 = vpop.permute.xlu1 %1839  ;;  %v2910_v15 = vsel %vm1302_vm12, %v2908_v23, %v2909_v32  ;;  %v29_v23 = vld [vmem:[%s11952_s0 + $0x28] sm:$0x38]  ;;  %v3350_v32 = vand.u32 4294901760, %v9334_v56 }
 0x17c   :  { %12299 = vst [vmem:[#allocation84_spill] sm:$0xff] %v9372_v37  ;;  %v1838_v17 = vpop.permute.xlu0 %1837 }
 0x17d   :  { %v1849_v44 = vsel %vm12300_vm11, %v9165_v29, %v1838_v17  ;;  %v1850_v4 = vsel %vm12297_vm0, %v1838_v17, %v9372_v37  ;;  %2923 = vrot.lane.b32.xlu1 %v2901_v20, %s7305_s15  ;;  %vm12301_vm11 = vcmask 695296   ;;  %v2965_v20 = vld [vmem:[%s11952_s0 + $0x20] sm:$0xc0]  ;;  %v2995_v17 = vsel %vm616_vm1, %v2993_v14, %v2994_v58  ;;  %v91_v14 = vld [vmem:[%s11952_s0 + $0x28] sm:$0x38] }
 0x17e   :  { %1863 = vst [vmem:[#allocation2 + $0x1d0] sm:$0x7] %v1849_v44  ;;  %1864 = vst [vmem:[#allocation2 + $0x1d8] sm:$0x7] %v1850_v4  ;;  %2816 = vrot.lane.b32.xlu0 %v2772_v39, %s7303_s25  ;;  %v2973_v39 = vld [vmem:[%s11952_s0 + $0x60] sm:$0x1] }
 0x17f   :  { %v1931_v51 = vpop.permute.xlu1 %1930  ;;  %vm12302_vm0 = vmmov %vm12301_vm11  ;;  %v3005_v47 = vrot.slane %v2965_v20, 2  ;;  %v45_v58 = vrot.slane %v29_v23, 2 }
 0x180   :  { %v1942_v29 = vsel %vm12301_vm11, %v9202_v33, %v1931_v51  ;;  %v1925_v9 = vpop.permute.xlu0 %1924  ;;  %v3004_v33 = vsel %vm616_vm1, %v3002_v46, %v3003_v38  ;;  %vm12307_vm11 = vmmov %vm12302_vm0 }
 0x181   :  { %1956 = vst [vmem:[#allocation2 + $0x1d0] sm:$0x38] %v1942_v29  ;;  %v1940_v55 = vsel %vm12302_vm0, %v1925_v9, %v9162_v3  ;;  %2931 = vrot.lane.b32.xlu1 %v2913_v21, %s7305_s15  ;;  %v3120_v57 = vld [vmem:[#allocation2 + $0x200] sm:$0xff]  ;;  %v3006_v9 = vrot.slane %v2973_v39, 2  ;;  %v30_v29 = vld [vmem:[%s11952_s0 + $0x30] sm:$0x38] }
 0x182   :  { %1954 = vst [vmem:[#allocation2 + $0x1c0] sm:$0x38] %v1940_v55  ;;  %2929 = vrot.lane.b32.xlu0 %v2910_v15, %s7305_s15  ;;  %v3186_v24 = vand.u32 4294901760, %v3120_v57  ;;  %v12304_v15 = vand.u32 4294901760, %v9313_v10  ;;  %v46_v23 = vrot.slane %v30_v29, 2  ;;  %vm12315_vm0 = vcmask 547840  }
 0x183   :  { %v1994_v12 = vpop.permute.xlu1 %1993  ;;  %v3007_v38 = vsel %vm616_vm1, %v3005_v47, %v3006_v9  ;;  %v154_v29 = vld [vmem:[%s11952_s0 + $0x30] sm:$0x38] }
 0x184   :  { %v2026_v3 = vsel %vm12091_vm14, %v1994_v12, %v9195_v52  ;;  %v9414_v2 = vpop.permute.xlu0 %1932  ;;  %v9418_v44 = vpack.c.bf16 %v3186_v24, %v12304_v15  ;;  %v9420_v4 = vsub.f32 %v3120_v57, %v3186_v24  ;;  %v3351_v52 = vsub.f32 %v9334_v56, %v3350_v32  ;;  %v153_v12 = vld [vmem:[%s11952_s0 + $0x28] sm:$0x38] }
 0x185   :  { %12303 = vst [vmem:[#allocation85_spill] sm:$0xff] %v9414_v2  ;;  %2054 = vst [vmem:[#allocation2 + $0x1c0] sm:$0xc0] %v2026_v3  ;;  %v1943_v21 = vsel %vm12307_vm11, %v1931_v51, %v9414_v2  ;;  %3023 = vrot.lane.b32.xlu1 %v3004_v33, %s12089_s29  ;;  %v107_v24 = vrot.slane %v91_v14, 7  ;;  %v169_v14 = vrot.slane %v153_v12, 4  ;;  %v170_v12 = vrot.slane %v154_v29, 4 }
 0x186   :  { %12305 = vst [vmem:[#allocation86_spill] sm:$0xff] %v9418_v44  ;;  %12306 = vst [vmem:[#allocation87_spill] sm:$0xff] %v9420_v4  ;;  %3017 = vrot.lane.b32.xlu0 %v2995_v17, %s12089_s29  ;;  %6679 = vmatprep.subr.bf16.mxu0 %v9418_v44  ;;  %v3362_v10 = vand.u32 4294901760, %v9420_v4  ;;  %v31_v29 = vld [vmem:[%s11952_s0 + $0x38] sm:$0x38] }
 0x187   :  { %1957 = vst [vmem:[#allocation2 + $0x1d8] sm:$0x38] %v1943_v21  ;;  %v9434_v51 = vpop.permute.xlu1 %2001  ;;  %vm12316_vm11 = vmmov %vm12315_vm0 }
 0x188   :  { %12308 = vst [vmem:[#allocation88_spill] sm:$0xff] %v9434_v51  ;;  %v2000_v20 = vpop.permute.xlu0 %1999  ;;  %v3363_v39 = vsub.f32 %v9420_v4, %v3362_v10  ;;  %v9441_v55 = vpack.c.bf16 %v3362_v10, %v3350_v32  ;;  %v3352_v32 = vand.u32 4294901760, %v3351_v52 }
 0x189   :  { %v2028_v57 = vsel %vm12091_vm14, %v9241_v49, %v2000_v20  ;;  %v2029_v33 = vsel %vm12091_vm14, %v2000_v20, %v9434_v51  ;;  %58 = vrot.lane.b32.xlu1 %v45_v58, %s7282_s18  ;;  %v92_v49 = vld [vmem:[%s11952_s0 + $0x30] sm:$0x38] }
 0x18a   :  { %12309 = vst [vmem:[#allocation89_spill] sm:$0xff] %v9441_v55  ;;  %2056 = vst [vmem:[#allocation2 + $0x1d0] sm:$0xc0] %v2028_v57  ;;  %3025 = vrot.lane.b32.xlu0 %v3007_v38, %s12089_s29  ;;  %v3364_v17 = vand.u32 4294901760, %v3363_v39  ;;  %v108_v10 = vrot.slane %v92_v49, 7 }
 0x18b   :  { %2057 = vst [vmem:[#allocation2 + $0x1d8] sm:$0xc0] %v2029_v33  ;;  %v2016_v47 = vpop.permute.xlu1 %2015  ;;  %v223_v49 = vld [vmem:[%s11952_s0 + $0x30] sm:$0x38] }
 0x18c   :  { %v2035_v9 = vsel %vm12091_vm14, %v9283_v13, %v2016_v47  ;;  %v2010_v3 = vpop.permute.xlu0 %2009  ;;  %v9457_v15 = vld [vmem:[#allocation2 + $0x1c0] sm:$0xff]  ;;  %v9459_v21 = vpack.c.bf16 %v3364_v17, %v3352_v32  ;;  %v222_v13 = vld [vmem:[%s11952_s0 + $0x28] sm:$0x38] }
 0x18d   :  { %2063 = vst [vmem:[#allocation2 + $0x208] sm:$0x1] %v2035_v9  ;;  %v2033_v58 = vsel %vm12091_vm14, %v2010_v3, %v9232_v26  ;;  %120 = vrot.lane.b32.xlu1 %v107_v24, %s7281_s17  ;;  %v3184_v52 = vand.u32 4294901760, %v9457_v15  ;;  %v238_v33 = vrot.slane %v222_v13, 1 }
 0x18e   :  { %2061 = vst [vmem:[#allocation2 + $0x1f8] sm:$0x1] %v2033_v58  ;;  %60 = vrot.lane.b32.xlu0 %v46_v23, %s7282_s18 }
 0x18f   :  { %v2125_v38 = vpop.permute.xlu1 %2124  ;;  %v9475_v26 = vsub.f32 %v9457_v15, %v3184_v52 }
 0x190   :  { %v2141_v20 = vsel %vm12083_vm15, %v2125_v38, %v9269_v22  ;;  %v9479_v39 = vpop.permute.xlu0 %2017  ;;  %v284_v22 = vld [vmem:[%s11952_s0 + $0x28] sm:$0x38]  ;;  %v239_v38 = vrot.slane %v223_v49, 1  ;;  %v155_v49 = vld [vmem:[%s11952_s0 + $0x38] sm:$0x38] }
 0x191   :  { %12310 = vst [vmem:[#allocation90_spill] sm:$0xff] %v9475_v26  ;;  %12311 = vst [vmem:[#allocation91_spill] sm:$0xff] %v9479_v39  ;;  %v2036_v57 = vsel %vm12091_vm14, %v2016_v47, %v9479_v39  ;;  %182 = vrot.lane.b32.xlu1 %v169_v14, %s7283_s27  ;;  %v9486_v23 = vld [vmem:[#allocation2 + $0x1d0] sm:$0xff]  ;;  %v300_v13 = vrot.slane %v284_v22, 6  ;;  %vm2824_vm14 = vcmask 375808  }
 0x192   :  { %2155 = vst [vmem:[#allocation2 + $0x1f8] sm:$0xe] %v2141_v20  ;;  %v9484_v24 = vld [vmem:[#allocation2 + $0x1d8] sm:$0xff]  ;;  %2064 = vst [vmem:[#allocation2 + $0x210] sm:$0x1] %v2036_v57  ;;  %122 = vrot.lane.b32.xlu0 %v108_v10, %s7281_s17  ;;  %v12069_v17 = vand.u32 4294901760, %v9486_v23 }
 0x193   :  { %v12070_v32 = vand.u32 4294901760, %v9484_v24  ;;  %v9494_v47 = vpop.permute.xlu1 %2132  ;;  %v12325_v2 = vand.u32 4294901760, %v9484_v24 }
 0x194   :  { %12312 = vst [vmem:[#allocation92_spill] sm:$0xff] %v9494_v47  ;;  %v2131_v9 = vpop.permute.xlu0 %2130  ;;  %v9507_v58 = vsub.f32 %v9486_v23, %v12069_v17 }
 0x195   :  { %v9502_v3 = vsub.f32 %v9484_v24, %v12070_v32  ;;  %v2143_v14 = vsel %vm12083_vm15, %v9307_v1, %v2131_v9  ;;  %v2144_v10 = vsel %vm12083_vm15, %v2131_v9, %v9494_v47  ;;  %251 = vrot.lane.b32.xlu1 %v238_v33, %s7284_s4  ;;  %v285_v1 = vld [vmem:[%s11952_s0 + $0x30] sm:$0x38]  ;;  %vm2738_vm15 = vcmask 384000  }
 0x196   :  { %12314 = vst [vmem:[#allocation94_spill] sm:$0xff] %v9507_v58  ;;  %2157 = vst [vmem:[#allocation2 + $0x208] sm:$0xe] %v2143_v14  ;;  %184 = vrot.lane.b32.xlu0 %v170_v12, %s7283_s27  ;;  %v47_v12 = vrot.slane %v31_v29, 2  ;;  %v301_v22 = vrot.slane %v285_v1, 6 }
 0x197   :  { %12313 = vst [vmem:[#allocation93_spill] sm:$0xff] %v9502_v3  ;;  %2158 = vst [vmem:[#allocation2 + $0x210] sm:$0xe] %v2144_v10  ;;  %v2225_v20 = vpop.permute.xlu1 %2224  ;;  %v286_v1 = vld [vmem:[%s11952_s0 + $0x38] sm:$0x38]  ;;  %v4127_v46 = vand.u32 4294901760, %v9502_v3 }
 0x198   :  { %v2236_v57 = vsel %vm12315_vm0, %v9329_v19, %v2225_v20  ;;  %v2219_v9 = vpop.permute.xlu0 %2218  ;;  %v93_v19 = vld [vmem:[%s11952_s0 + $0x38] sm:$0x38]  ;;  %vm12317_vm0 = vcmask 539648  }
 0x199   :  { %2250 = vst [vmem:[#allocation2 + $0x208] sm:$0x70] %v2236_v57  ;;  %v2234_v33 = vsel %vm12316_vm11, %v2219_v9, %v9305_v28  ;;  %313 = vrot.lane.b32.xlu1 %v300_v13, %s7285_s9  ;;  %v109_v29 = vrot.slane %v93_v19, 7 }
 0x19a   :  { %2248 = vst [vmem:[#allocation2 + $0x1f8] sm:$0x70] %v2234_v33  ;;  %253 = vrot.lane.b32.xlu0 %v239_v38, %s7284_s4  ;;  %v171_v38 = vrot.slane %v155_v49, 4  ;;  %v347_v49 = vld [vmem:[%s11952_s0 + $0x30] sm:$0x38] }
 0x19b   :  { %v2312_v14 = vpop.permute.xlu1 %2311 }
 0x19c   :  { %v2343_v10 = vsel %vm12317_vm0, %v2312_v14, %v9320_v25  ;;  %v9535_v28 = vpop.permute.xlu0 %2226  ;;  %v224_v25 = vld [vmem:[%s11952_s0 + $0x38] sm:$0x38] }
 0x19d   :  { %12318 = vst [vmem:[#allocation95_spill] sm:$0xff] %v9535_v28  ;;  %2371 = vst [vmem:[#allocation2 + $0x1f8] sm:$0x80] %v2343_v10  ;;  %v2237_v13 = vsel %vm12316_vm11, %v2225_v20, %v9535_v28  ;;  %62 = vrot.lane.b32.xlu1 %v47_v12, %s7282_s18  ;;  %v302_v12 = vrot.slane %v286_v1, 6  ;;  %v408_v28 = vld [vmem:[%s11952_s0 + $0x28] sm:$0x38] }
 0x19e   :  { %2251 = vst [vmem:[#allocation2 + $0x210] sm:$0x70] %v2237_v13  ;;  %315 = vrot.lane.b32.xlu0 %v301_v22, %s7285_s9  ;;  %vm12320_vm11 = vmmov %vm12317_vm0  ;;  %v240_v22 = vrot.slane %v224_v25, 1  ;;  %v3356_v13 = vand.u32 4294901760, %v9475_v26 }
 0x19f   :  { %v9544_v57 = vpop.permute.xlu1 %2319 }
 0x1a0   :  { %12319 = vst [vmem:[#allocation96_spill] sm:$0xff] %v9544_v57  ;;  %v2318_v9 = vpop.permute.xlu0 %2317 }
 0x1a1   :  { %v2345_v20 = vsel %vm12317_vm0, %v9355_v50, %v2318_v9  ;;  %v2346_v33 = vsel %vm12320_vm11, %v2318_v9, %v9544_v57  ;;  %186 = vrot.lane.b32.xlu1 %v171_v38, %s7283_s27  ;;  %v346_v50 = vld [vmem:[%s11952_s0 + $0x28] sm:$0x38]  ;;  %vm12323_vm11 = vcmask 531456  }
 0x1a2   :  { %2373 = vst [vmem:[#allocation2 + $0x208] sm:$0x80] %v2345_v20  ;;  %2374 = vst [vmem:[#allocation2 + $0x210] sm:$0x80] %v2346_v33  ;;  %124 = vrot.lane.b32.xlu0 %v109_v29, %s7281_s17  ;;  %v363_v29 = vrot.slane %v347_v49, 3  ;;  %v362_v25 = vrot.slane %v346_v50, 3  ;;  %v3357_v49 = vsub.f32 %v9475_v26, %v3356_v13 }
 0x1a3   :  { %v9558_v14 = vpop.permute.xlu1 %2331  ;;  %v532_v26 = vld [vmem:[%s11952_s0 + $0x30] sm:$0x38] }
 0x1a4   :  { %v9563_v19 = vpop.permute.xlu0 %2329  ;;  %v3119_v10 = vld [vmem:[#allocation2 + $0x1f8] sm:$0xff]  ;;  %v3358_v24 = vand.u32 4294901760, %v3357_v49  ;;  %v548_v49 = vrot.slane %v532_v26, 2  ;;  %v9660_v26 = vld [vmem:[%s11952_s0 + $0x30] sm:$0xc0] }
 0x1a5   :  { %v2351_v38 = vsel %vm12317_vm0, %v9563_v19, %v9558_v14  ;;  %317 = vrot.lane.b32.xlu1 %v302_v12, %s7285_s9  ;;  %v3188_v1 = vand.u32 4294901760, %v3119_v10  ;;  %v463_v12 = vld [vmem:[%s11952_s0 + $0x30] sm:$0x38]  ;;  %vm2550_vm0 = vcmask 523264  }
 0x1a6   :  { %2379 = vst [vmem:[#allocation2 + $0x238] sm:$0x3] %v2351_v38  ;;  %255 = vrot.lane.b32.xlu0 %v240_v22, %s7284_s4  ;;  %v479_v47 = vrot.slane %v463_v12, 5  ;;  %v4128_v38 = vsub.f32 %v9502_v3, %v4127_v46  ;;  %v12328_v12 = vand.u32 4294901760, %v9486_v23 }
 0x1a7   :  { %v9571_v9 = vpop.permute.xlu1 %2445  ;;  %v9575_v20 = vpack.c.bf16 %v3188_v1, %v3184_v52  ;;  %v9577_v33 = vsub.f32 %v3119_v10, %v3188_v1  ;;  %v4133_v10 = vand.u32 4294901760, %v9507_v58  ;;  %v409_v1 = vld [vmem:[%s11952_s0 + $0x30] sm:$0x38] }
 0x1a8   :  { %v9580_v17 = vpop.permute.xlu0 %2443 }
 0x1a9   :  { %12321 = vst [vmem:[#allocation97_spill] sm:$0xff] %v9575_v20  ;;  %12322 = vst [vmem:[#allocation98_spill] sm:$0xff] %v9577_v33  ;;  %v2458_v22 = vsel %vm12323_vm11, %v9580_v17, %v9571_v9  ;;  %377 = vrot.lane.b32.xlu1 %v363_v29, %s7287_s19  ;;  %6681 = vmatpush1.bf16.msra.mxu0 %v9575_v20  ;;  %v3122_v15 = vld [vmem:[#allocation2 + $0x210] sm:$0xff]  ;;  %v3121_v52 = vld [vmem:[#allocation2 + $0x208] sm:$0xff]  ;;  %v3368_v50 = vand.u32 4294901760, %v9577_v33  ;;  %vm2644_vm11 = vcmask 392192  }
 0x1aa   :  { %2472 = vst [vmem:[#allocation2 + $0x238] sm:$0x1c] %v2458_v22  ;;  %375 = vrot.lane.b32.xlu0 %v362_v25, %s7287_s19  ;;  %v3963_v29 = vand.u32 4294901760, %v3122_v15  ;;  %v3965_v32 = vand.u32 4294901760, %v3121_v52  ;;  %v462_v22 = vld [vmem:[%s11952_s0 + $0x28] sm:$0x38] }
 0x1ab   :  { %v9599_v57 = vpop.permute.xlu1 %2538  ;;  %v3369_v25 = vsub.f32 %v9577_v33, %v3368_v50  ;;  %v9609_v39 = vpack.c.bf16 %v3368_v50, %v3356_v13 }
 0x1ac   :  { %v9611_v51 = vpop.permute.xlu0 %2536  ;;  %v9615_v37 = vpack.c.bf16 %v3963_v29, %v12325_v2  ;;  %v9617_v55 = vsub.f32 %v3122_v15, %v3963_v29  ;;  %v9621_v20 = vpack.c.bf16 %v3965_v32, %v12328_v12  ;;  %v9623_v44 = vsub.f32 %v3121_v52, %v3965_v32  ;;  %v531_v2 = vld [vmem:[%s11952_s0 + $0x28] sm:$0x38] }
 0x1ad   :  { %12324 = vst [vmem:[#allocation99_spill] sm:$0xff] %v9609_v39  ;;  %v2552_v13 = vsel %vm2550_vm0, %v9611_v51, %v9599_v57  ;;  %431 = vrot.lane.b32.xlu1 %v409_v1, %s7288_s24  ;;  %v3370_v23 = vand.u32 4294901760, %v3369_v25  ;;  %v4134_v15 = vsub.f32 %v9507_v58, %v4133_v10  ;;  %v478_v32 = vrot.slane %v462_v22, 5 }
 0x1ae   :  { %12326 = vst [vmem:[#allocation100_spill] sm:$0xff] %v9615_v37  ;;  %12327 = vst [vmem:[#allocation101_spill] sm:$0xff] %v9617_v55  ;;  %429 = vrot.lane.b32.xlu0 %v408_v28, %s7288_s24  ;;  %6823 = vmatprep.subr.bf16.mxu1 %v9615_v37  ;;  %v4139_v52 = vand.u32 4294901760, %v9617_v55  ;;  %v4145_v50 = vand.u32 4294901760, %v9623_v44  ;;  %v547_v22 = vrot.slane %v531_v2, 2 }
 0x1af   :  { %12329 = vst [vmem:[#allocation102_spill] sm:$0xff] %v9621_v20  ;;  %12330 = vst [vmem:[#allocation103_spill] sm:$0xff] %v9623_v44  ;;  %6825 = vmatpush1.bf16.msra.mxu1 %v9621_v20  ;;  %v9643_v29 = vpop.permute.xlu1 %2632  ;;  %v9645_v25 = vpack.c.bf16 %v3370_v23, %v3358_v24  ;;  %v4135_v24 = vand.u32 4294901760, %v4134_v15  ;;  %v593_v20 = vld [vmem:[%s11952_s0 + $0x28] sm:$0xc0] }
 0x1b0   :  { %2566 = vst [vmem:[#allocation2 + $0x238] sm:$0xe0] %v2552_v13  ;;  %v9649_v12 = vpop.permute.xlu0 %2630  ;;  %v4129_v13 = vand.u32 4294901760, %v4128_v38  ;;  %v4140_v39 = vsub.f32 %v9617_v55, %v4139_v52  ;;  %v4146_v37 = vsub.f32 %v9623_v44, %v4145_v50  ;;  %v9662_v23 = vpack.c.bf16 %v4139_v52, %v4127_v46  ;;  %v9678_v46 = vld [vmem:[%s11952_s0 + $0x28] sm:$0xc0] }
 0x1b1   :  { %v2646_v1 = vsel %vm2644_vm11, %v9649_v12, %v9643_v29  ;;  %493 = vrot.lane.b32.xlu1 %v479_v47, %s7289_s5  ;;  %v9664_v2 = vpack.c.bf16 %v4145_v50, %v4133_v10  ;;  %v600_v47 = vld [vmem:[%s11952_s0 + $0x68] sm:$0x1] }
 0x1b2   :  { %12331 = vst [vmem:[#allocation104_spill] sm:$0xff] %v9662_v23  ;;  %2660 = vst [vmem:[#allocation2 + $0x270] sm:$0x7] %v2646_v1  ;;  %491 = vrot.lane.b32.xlu0 %v478_v32, %s7289_s5  ;;  %v4141_v38 = vand.u32 4294901760, %v4140_v39  ;;  %v4147_v28 = vand.u32 4294901760, %v4146_v37  ;;  %v633_v23 = vrot.slane %v600_v47, 2 }
 0x1b3   :  { %12332 = vst [vmem:[#allocation105_spill] sm:$0xff] %v9664_v2  ;;  %v9673_v58 = vpop.permute.xlu1 %2726  ;;  %v592_v39 = vld [vmem:[%s11952_s0 + $0x20] sm:$0xc0]  ;;  %v599_v37 = vld [vmem:[%s11952_s0 + $0x60] sm:$0x1]  ;;  %v632_v2 = vrot.slane %v593_v20, 2 }
 0x1b4   :  { %v9686_v10 = vpop.permute.xlu0 %2724  ;;  %v9688_v15 = vpack.c.bf16 %v4141_v38, %v4129_v13  ;;  %v9690_v32 = vpack.c.bf16 %v4147_v28, %v4135_v24  ;;  %v690_v13 = vrot.slane %v9678_v46, 7  ;;  %v629_v24 = vrot.slane %v592_v39, 2  ;;  %v410_v39 = vld [vmem:[%s11952_s0 + $0x38] sm:$0x38] }
 0x1b5   :  { %v2740_v52 = vsel %vm2738_vm15, %v9686_v10, %v9673_v58  ;;  %562 = vrot.lane.b32.xlu1 %v548_v49, %s7290_s11  ;;  %v630_v38 = vrot.slane %v599_v37, 2  ;;  %v348_v49 = vld [vmem:[%s11952_s0 + $0x38] sm:$0x38]  ;;  %v634_v50 = vsel %vm616_vm1, %v632_v2, %v633_v23  ;;  %v12334_v46 = vrot.slane %v9660_v26, 7 }
 0x1b6   :  { %2754 = vst [vmem:[#allocation2 + $0x270] sm:$0x38] %v2740_v52  ;;  %560 = vrot.lane.b32.xlu0 %v547_v22, %s7290_s11  ;;  %650 = vst [vmem:[#allocation2 + $0xd0] sm:$0x70] %v634_v50  ;;  %v533_v23 = vld [vmem:[%s11952_s0 + $0x38] sm:$0x38] }
 0x1b7   :  { %v9697_v1 = vld [vmem:[#allocation2 + $0x238] sm:$0xff]  ;;  %v9702_v44 = vpop.permute.xlu1 %2796  ;;  %v631_v22 = vsel %vm616_vm1, %v629_v24, %v630_v38  ;;  %v364_v37 = vrot.slane %v348_v49, 3  ;;  %v665_v52 = vld [vmem:[%s11952_s0 + $0x68] sm:$0x1]  ;;  %v549_v38 = vrot.slane %v533_v23, 2 }
 0x1b8   :  { %v3190_v28 = vand.u32 4294901760, %v9697_v1  ;;  %v9708_v3 = vpop.permute.xlu0 %2794  ;;  %v464_v2 = vld [vmem:[%s11952_s0 + $0x38] sm:$0x38]  ;;  %649 = vst [vmem:[#allocation2 + $0xc8] sm:$0x70] %v631_v22  ;;  %v703_v55 = vrot.slane %v665_v52, 7 }
 0x1b9   :  { %v2826_v47 = vsel %vm2824_vm14, %v9708_v3, %v9702_v44  ;;  %721 = vrot.lane.b32.xlu1 %v12334_v46, %s7291_s21  ;;  %v480_v46 = vrot.slane %v464_v2, 5  ;;  %v594_v22 = vld [vmem:[%s11952_s0 + $0x30] sm:$0xc0]  ;;  %v9748_v23 = vld [vmem:[%s11952_s0 + $0x38] sm:$0xc0] }
 0x1ba   :  { %v9711_v20 = vsub.f32 %v9697_v1, %v3190_v28  ;;  %2854 = vst [vmem:[#allocation2 + $0x270] sm:$0xc0] %v2826_v47  ;;  %719 = vrot.lane.b32.xlu0 %v690_v13, %s7291_s21  ;;  %v601_v47 = vld [vmem:[%s11952_s0 + $0x70] sm:$0x1]  ;;  %v635_v33 = vrot.slane %v594_v22, 2 }
 0x1bb   :  { %v2334_v50 = vpop.permute.xlu1 %2333  ;;  %v789_v2 = vld [vmem:[%s11952_s0 + $0x28] sm:$0xc0] }
 0x1bc   :  { %12333 = vst [vmem:[#allocation106_spill] sm:$0xff] %v9711_v20  ;;  %v2352_v1 = vsel %vm12335_vm10, %v9558_v14, %v2334_v50  ;;  %v2328_v24 = vpop.permute.xlu0 %2327  ;;  %v636_v14 = vrot.slane %v601_v47, 2 }
 0x1bd   :  { %2380 = vst [vmem:[#allocation2 + $0x240] sm:$0x3] %v2352_v1  ;;  %v2350_v49 = vsel %vm12336_vm9, %v2328_v24, %v9563_v19  ;;  %433 = vrot.lane.b32.xlu1 %v410_v39, %s7288_s24  ;;  %v797_v19 = vld [vmem:[%s11952_s0 + $0x68] sm:$0x1]  ;;  %vm12337_vm9 = vcmask 531456  }
 0x1be   :  { %2378 = vst [vmem:[#allocation2 + $0x230] sm:$0x3] %v2350_v49  ;;  %379 = vrot.lane.b32.xlu0 %v364_v37, %s7287_s19  ;;  %v637_v52 = vsel %vm616_vm1, %v635_v33, %v636_v14  ;;  %v666_v24 = vld [vmem:[%s11952_s0 + $0x70] sm:$0x1]  ;;  %v832_v33 = vrot.slane %v789_v2, 4  ;;  %v833_v14 = vrot.slane %v797_v19, 4 }
 0x1bf   :  { %v2442_v39 = vpop.permute.xlu1 %2441  ;;  %651 = vst [vmem:[#allocation2 + $0xd8] sm:$0x70] %v637_v52  ;;  %v884_v52 = vld [vmem:[%s11952_s0 + $0x28] sm:$0xc0]  ;;  %v705_v2 = vrot.slane %v666_v24, 7 }
 0x1c0   :  { %v2457_v1 = vsel %vm12337_vm9, %v2442_v39, %v9580_v17  ;;  %v9759_v37 = vpop.permute.xlu0 %2335  ;;  %v704_v17 = vsel %vm684_vm2, %v690_v13, %v703_v55  ;;  %v790_v55 = vld [vmem:[%s11952_s0 + $0x30] sm:$0xc0]  ;;  %v798_v13 = vld [vmem:[%s11952_s0 + $0x70] sm:$0x1] }
 0x1c1   :  { %12338 = vst [vmem:[#allocation107_spill] sm:$0xff] %v9759_v37  ;;  %2471 = vst [vmem:[#allocation2 + $0x230] sm:$0x1c] %v2457_v1  ;;  %v2353_v22 = vsel %vm12335_vm10, %v2334_v50, %v9759_v37  ;;  %564 = vrot.lane.b32.xlu1 %v549_v38, %s7290_s11  ;;  %v3134_v49 = vld [vmem:[#allocation2 + $0x270] sm:$0xff]  ;;  %v892_v50 = vld [vmem:[%s11952_s0 + $0x68] sm:$0x1] }
 0x1c2   :  { %2381 = vst [vmem:[#allocation2 + $0x248] sm:$0x3] %v2353_v22  ;;  %495 = vrot.lane.b32.xlu0 %v480_v46, %s7289_s5  ;;  %v3194_v39 = vand.u32 4294901760, %v3134_v49  ;;  %v3374_v38 = vand.u32 4294901760, %v9711_v20  ;;  %vm12342_vm10 = vmmov %vm12337_vm9  ;;  %v928_v24 = vrot.slane %v892_v50, 1  ;;  %v836_v50 = vrot.slane %v798_v13, 4 }
 0x1c3   :  { %v9777_v1 = vpop.permute.xlu1 %2449 }
 0x1c4   :  { %12339 = vst [vmem:[#allocation108_spill] sm:$0xff] %v9777_v1  ;;  %v2448_v19 = vpop.permute.xlu0 %2447  ;;  %v9779_v22 = vpack.c.bf16 %v3194_v39, %v3190_v28  ;;  %v9781_v46 = vsub.f32 %v3134_v49, %v3194_v39  ;;  %v927_v28 = vrot.slane %v884_v52, 1  ;;  %v12343_v49 = vrot.slane %v9748_v23, 7 }
 0x1c5   :  { %v2459_v47 = vsel %vm12337_vm9, %v9571_v9, %v2448_v19  ;;  %v2460_v37 = vsel %vm12342_vm10, %v2448_v19, %v9777_v1  ;;  %735 = vrot.lane.b32.xlu1 %v704_v17, %s7291_s21  ;;  %v834_v39 = vsel %vm816_vm3, %v832_v33, %v833_v14  ;;  %v3375_v56 = vsub.f32 %v9711_v20, %v3374_v38  ;;  %v987_v33 = vld [vmem:[%s11952_s0 + $0x68] sm:$0x1] }
 0x1c6   :  { %12340 = vst [vmem:[#allocation109_spill] sm:$0xff] %v9779_v22  ;;  %12341 = vst [vmem:[#allocation110_spill] sm:$0xff] %v9781_v46  ;;  %723 = vrot.lane.b32.xlu0 %v12343_v49, %s7291_s21  ;;  %6683 = vmatprep.subr.bf16.mxu0 %v9779_v22  ;;  %v3386_v9 = vand.u32 4294901760, %v9781_v46  ;;  %v12344_v52 = vrot.slane %v9660_v26, 7  ;;  %v979_v49 = vld [vmem:[%s11952_s0 + $0x28] sm:$0xc0] }
 0x1c7   :  { %2473 = vst [vmem:[#allocation2 + $0x240] sm:$0x1c] %v2459_v47  ;;  %2474 = vst [vmem:[#allocation2 + $0x248] sm:$0x1c] %v2460_v37  ;;  %v2541_v17 = vpop.permute.xlu1 %2540  ;;  %v835_v47 = vrot.slane %v790_v55, 4  ;;  %v1022_v19 = vrot.slane %v979_v49, 6 }
 0x1c8   :  { %v706_v37 = vsel %vm684_vm2, %v12344_v52, %v705_v2  ;;  %v2553_v14 = vsel %vm2550_vm0, %v9599_v57, %v2541_v17  ;;  %v2535_v1 = vpop.permute.xlu0 %2534  ;;  %v885_v26 = vld [vmem:[%s11952_s0 + $0x30] sm:$0xc0]  ;;  %v893_v2 = vld [vmem:[%s11952_s0 + $0x70] sm:$0x1]  ;;  %v3387_v55 = vsub.f32 %v9781_v46, %v3386_v9  ;;  %v929_v52 = vsel %vm911_vm4, %v927_v28, %v928_v24 }
 0x1c9   :  { %2567 = vst [vmem:[#allocation2 + $0x240] sm:$0xe0] %v2553_v14  ;;  %v2551_v13 = vsel %vm2550_vm0, %v2535_v1, %v9611_v51  ;;  %851 = vrot.lane.b32.xlu1 %v834_v39, %s7292_s16  ;;  %v9825_v57 = vpack.c.bf16 %v3386_v9, %v3374_v38  ;;  %v1023_v22 = vrot.slane %v987_v33, 6  ;;  %v3376_v20 = vand.u32 4294901760, %v3375_v56  ;;  %v1074_v51 = vld [vmem:[%s11952_s0 + $0x28] sm:$0xc0] }
 0x1ca   :  { %2565 = vst [vmem:[#allocation2 + $0x230] sm:$0xe0] %v2551_v13  ;;  %737 = vrot.lane.b32.xlu0 %v706_v37, %s7291_s21  ;;  %v3388_v4 = vand.u32 4294901760, %v3387_v55  ;;  %v837_v46 = vsel %vm816_vm3, %v835_v47, %v836_v50  ;;  %v930_v14 = vrot.slane %v885_v26, 1  ;;  %v931_v43 = vrot.slane %v893_v2, 1 }
 0x1cb   :  { %12345 = vst [vmem:[#allocation111_spill] sm:$0xff] %v9825_v57  ;;  %v2629_v6 = vpop.permute.xlu1 %2628  ;;  %v1082_v38 = vld [vmem:[%s11952_s0 + $0x68] sm:$0x1]  ;;  %v980_v56 = vld [vmem:[%s11952_s0 + $0x30] sm:$0xc0]  ;;  %vm12121_vm9 = vcmask 367616  }
 0x1cc   :  { %v2645_v1 = vsel %vm2644_vm11, %v2629_v6, %v9649_v12  ;;  %v9837_v28 = vpop.permute.xlu0 %2542  ;;  %v988_v24 = vld [vmem:[%s11952_s0 + $0x70] sm:$0x1]  ;;  %v9845_v39 = vpack.c.bf16 %v3388_v4, %v3376_v20  ;;  %v1024_v6 = vsel %vm1006_vm5, %v1022_v19, %v1023_v22  ;;  %v1117_v12 = vrot.slane %v1074_v51, 3  ;;  %v1169_v51 = vld [vmem:[%s11952_s0 + $0x28] sm:$0xc0] }
 0x1cd   :  { %12346 = vst [vmem:[#allocation112_spill] sm:$0xff] %v9837_v28  ;;  %2659 = vst [vmem:[#allocation2 + $0x268] sm:$0x7] %v2645_v1  ;;  %v2554_v9 = vsel %vm2550_vm0, %v2541_v17, %v9837_v28  ;;  %946 = vrot.lane.b32.xlu1 %v929_v52, %s7293_s3  ;;  %v1118_v37 = vrot.slane %v1082_v38, 3  ;;  %v932_v50 = vsel %vm911_vm4, %v930_v14, %v931_v43  ;;  %v1025_v49 = vrot.slane %v980_v56, 6 }
 0x1ce   :  { %2568 = vst [vmem:[#allocation2 + $0x248] sm:$0xe0] %v2554_v9  ;;  %853 = vrot.lane.b32.xlu0 %v837_v46, %s7292_s16  ;;  %v1026_v4 = vrot.slane %v988_v24, 6  ;;  %v1075_v17 = vld [vmem:[%s11952_s0 + $0x30] sm:$0xc0]  ;;  %vm12118_vm10 = vcmask 359424  }
 0x1cf   :  { %v9852_v47 = vpop.permute.xlu1 %2636  ;;  %v1083_v33 = vld [vmem:[%s11952_s0 + $0x70] sm:$0x1]  ;;  %v1119_v43 = vsel %vm1101_vm6, %v1117_v12, %v1118_v37  ;;  %v1120_v2 = vrot.slane %v1075_v17, 3  ;;  %v799_v12 = vld [vmem:[%s11952_s0 + $0x78] sm:$0x1] }
 0x1d0   :  { %12347 = vst [vmem:[#allocation113_spill] sm:$0xff] %v9852_v47  ;;  %v2635_v20 = vpop.permute.xlu0 %2634  ;;  %v1027_v26 = vsel %vm1006_vm5, %v1025_v49, %v1026_v4  ;;  %v1121_v55 = vrot.slane %v1083_v33, 3  ;;  %v1170_v49 = vld [vmem:[%s11952_s0 + $0x30] sm:$0xc0] }
 0x1d1   :  { %v2647_v22 = vsel %vm2644_vm11, %v9643_v29, %v2635_v20  ;;  %v2648_v46 = vsel %vm2644_vm11, %v2635_v20, %v9852_v47  ;;  %1041 = vrot.lane.b32.xlu1 %v1024_v6, %s7294_s6  ;;  %v667_v29 = vld [vmem:[%s11952_s0 + $0x78] sm:$0x1]  ;;  %v791_v6 = vld [vmem:[%s11952_s0 + $0x38] sm:$0xc0]  ;;  %v3126_v17 = vld [vmem:[#allocation2 + $0x230] sm:$0xff] }
 0x1d2   :  { %2661 = vst [vmem:[#allocation2 + $0x278] sm:$0x7] %v2647_v22  ;;  %2662 = vst [vmem:[#allocation2 + $0x280] sm:$0x7] %v2648_v46  ;;  %948 = vrot.lane.b32.xlu0 %v932_v50, %s7293_s3  ;;  %v707_v38 = vrot.slane %v667_v29, 7  ;;  %v1122_v56 = vsel %vm1101_vm6, %v1120_v2, %v1121_v55  ;;  %v838_v22 = vrot.slane %v791_v6, 4 }
 0x1d3   :  { %v2729_v19 = vpop.permute.xlu1 %2728  ;;  %v839_v46 = vrot.slane %v799_v12, 4  ;;  %v989_v2 = vld [vmem:[%s11952_s0 + $0x78] sm:$0x1]  ;;  %v3128_v6 = vld [vmem:[#allocation2 + $0x240] sm:$0xff]  ;;  %v1284_v47 = vld [vmem:[%s11952_s0 + $0x70] sm:$0x1] }
 0x1d4   :  { %v2741_v13 = vsel %vm2738_vm15, %v9673_v58, %v2729_v19  ;;  %v2723_v52 = vpop.permute.xlu0 %2722  ;;  %v886_v58 = vld [vmem:[%s11952_s0 + $0x38] sm:$0xc0] }
 0x1d5   :  { %2755 = vst [vmem:[#allocation2 + $0x278] sm:$0x38] %v2741_v13  ;;  %v2739_v14 = vsel %vm2738_vm15, %v2723_v52, %v9686_v10  ;;  %1136 = vrot.lane.b32.xlu1 %v1119_v43, %s7295_s13  ;;  %v894_v10 = vld [vmem:[%s11952_s0 + $0x78] sm:$0x1]  ;;  %v933_v4 = vrot.slane %v886_v58, 1  ;;  %v3192_v13 = vand.u32 4294901760, %v3126_v17 }
 0x1d6   :  { %2753 = vst [vmem:[#allocation2 + $0x268] sm:$0x38] %v2739_v14  ;;  %1043 = vrot.lane.b32.xlu0 %v1027_v26, %s7294_s6  ;;  %v934_v20 = vrot.slane %v894_v10, 1  ;;  %v1076_v43 = vld [vmem:[%s11952_s0 + $0x38] sm:$0xc0]  ;;  %v3129_v58 = vld [vmem:[#allocation2 + $0x248] sm:$0xff] }
 0x1d7   :  { %v2793_v1 = vpop.permute.xlu1 %2792  ;;  %v981_v26 = vld [vmem:[%s11952_s0 + $0x38] sm:$0xc0]  ;;  %v1123_v14 = vrot.slane %v1076_v43, 3 }
 0x1d8   :  { %v2825_v24 = vsel %vm2824_vm14, %v2793_v1, %v9708_v3  ;;  %v9890_v9 = vpop.permute.xlu0 %2730  ;;  %v12349_v3 = vrot.slane %v9748_v23, 7  ;;  %v1084_v23 = vld [vmem:[%s11952_s0 + $0x78] sm:$0x1]  ;;  %v935_v52 = vsel %vm911_vm4, %v933_v4, %v934_v20  ;;  %v840_v1 = vsel %vm816_vm3, %v838_v22, %v839_v46  ;;  %v1283_v20 = vld [vmem:[%s11952_s0 + $0x68] sm:$0x1] }
 0x1d9   :  { %12348 = vst [vmem:[#allocation114_spill] sm:$0xff] %v9890_v9  ;;  %2853 = vst [vmem:[#allocation2 + $0x268] sm:$0xc0] %v2825_v24  ;;  %v2742_v37 = vsel %vm2738_vm15, %v2729_v19, %v9890_v9  ;;  %1206 = vrot.lane.b32.xlu1 %v1169_v51, %s7282_s18  ;;  %v1124_v51 = vrot.slane %v1084_v23, 3  ;;  %v3967_v4 = vand.u32 4294901760, %v3129_v58  ;;  %v3969_v23 = vand.u32 4294901760, %v3128_v6 }
 0x1da   :  { %2756 = vst [vmem:[#allocation2 + $0x280] sm:$0x38] %v2742_v37  ;;  %1138 = vrot.lane.b32.xlu0 %v1122_v56, %s7295_s13  ;;  %v708_v50 = vsel %vm684_vm2, %v12349_v3, %v707_v38  ;;  %v1028_v56 = vrot.slane %v981_v26, 6  ;;  %v9938_v3 = vsub.f32 %v3126_v17, %v3192_v13  ;;  %v1276_v9 = vld [vmem:[%s11952_s0 + $0x30] sm:$0xc0] }
 0x1db   :  { %v9908_v33 = vpop.permute.xlu1 %2800 }
 0x1dc   :  { %12350 = vst [vmem:[#allocation115_spill] sm:$0xff] %v9908_v33  ;;  %v2799_v19 = vpop.permute.xlu0 %2798 }
 0x1dd   :  { %v2827_v55 = vsel %vm2824_vm14, %v9702_v44, %v2799_v19  ;;  %v2828_v29 = vsel %vm2824_vm14, %v2799_v19, %v9908_v33  ;;  %739 = vrot.lane.b32.xlu1 %v708_v50, %s7291_s21  ;;  %v1029_v44 = vrot.slane %v989_v2, 6  ;;  %v1275_v50 = vld [vmem:[%s11952_s0 + $0x28] sm:$0xc0] }
 0x1de   :  { %2855 = vst [vmem:[#allocation2 + $0x278] sm:$0xc0] %v2827_v55  ;;  %2856 = vst [vmem:[#allocation2 + $0x280] sm:$0xc0] %v2828_v29  ;;  %1208 = vrot.lane.b32.xlu0 %v1170_v49, %s7282_s18  ;;  %v1125_v49 = vsel %vm1101_vm6, %v1123_v14, %v1124_v51  ;;  %v1318_v26 = vrot.slane %v1275_v50, 5  ;;  %v9978_v50 = vsub.f32 %v3128_v6, %v3969_v23 }
 0x1df   :  { %v9929_v38 = vpop.permute.xlu1 %2812  ;;  %v1030_v17 = vsel %vm1006_vm5, %v1028_v56, %v1029_v44  ;;  %v1177_v51 = vld [vmem:[%s11952_s0 + $0x68] sm:$0x1]  ;;  %v9968_v56 = vsub.f32 %v3129_v58, %v3967_v4 }
 0x1e0   :  { %v9932_v10 = vpop.permute.xlu0 %2810  ;;  %v3133_v24 = vld [vmem:[#allocation2 + $0x268] sm:$0xff] }
 0x1e1   :  { %v2833_v12 = vsel %vm2824_vm14, %v9932_v10, %v9929_v38  ;;  %950 = vrot.lane.b32.xlu1 %v935_v52, %s7293_s3  ;;  %v3196_v37 = vand.u32 4294901760, %v3133_v24  ;;  %v1319_v52 = vrot.slane %v1283_v20, 5 }
 0x1e2   :  { %2861 = vst [vmem:[#allocation2 + $0x2a8] sm:$0x1] %v2833_v12  ;;  %855 = vrot.lane.b32.xlu0 %v840_v1, %s7292_s16 }
 0x1e3   :  { %v9948_v22 = vpop.permute.xlu1 %2927  ;;  %v9951_v46 = vpack.c.bf16 %v3196_v37, %v3192_v13  ;;  %v9953_v43 = vsub.f32 %v3133_v24, %v3196_v37  ;;  %v12111_v13 = vand.u32 4294901760, %v9938_v3  ;;  %v1369_v24 = vld [vmem:[%s11952_s0 + $0x28] sm:$0xc0]  ;;  %v1171_v37 = vld [vmem:[%s11952_s0 + $0x38] sm:$0xc0] }
 0x1e4   :  { %v9955_v19 = vpop.permute.xlu0 %2925 }
 0x1e5   :  { %12351 = vst [vmem:[#allocation116_spill] sm:$0xff] %v9951_v46  ;;  %v2941_v2 = vsel %vm12121_vm9, %v9955_v19, %v9948_v22  ;;  %1140 = vrot.lane.b32.xlu1 %v1125_v49, %s7295_s13  ;;  %6685 = vmatpush1.bf16.msra.mxu0 %v9951_v46  ;;  %v3136_v55 = vld [vmem:[#allocation2 + $0x280] sm:$0xff]  ;;  %v3135_v29 = vld [vmem:[#allocation2 + $0x278] sm:$0xff]  ;;  %v12112_v14 = vand.u32 4294901760, %v9953_v43  ;;  %v1377_v49 = vld [vmem:[%s11952_s0 + $0x68] sm:$0x1] }
 0x1e6   :  { %2955 = vst [vmem:[#allocation2 + $0x2a8] sm:$0xe] %v2941_v2  ;;  %1045 = vrot.lane.b32.xlu0 %v1030_v17, %s7294_s6  ;;  %v3971_v1 = vand.u32 4294901760, %v3136_v55  ;;  %v3973_v44 = vand.u32 4294901760, %v3135_v29  ;;  %v1882_v46 = vld [vmem:[%s11952_s0 + $0x70] sm:$0x1] }
 0x1e7   :  { %v9973_v12 = vpop.permute.xlu1 %3021  ;;  %v9987_v58 = vpack.c.bf16 %v12112_v14, %v12111_v13  ;;  %s12520_s13 = smov 64   ;;  %s12539_s6 = smov 47  }
 0x1e8   :  { %v9989_v20 = vpop.permute.xlu0 %3019  ;;  %v9991_v17 = vpack.c.bf16 %v3971_v1, %v3967_v4  ;;  %v9993_v2 = vsub.f32 %v3136_v55, %v3971_v1  ;;  %v9995_v33 = vpack.c.bf16 %v3973_v44, %v3969_v23  ;;  %v9997_v6 = vsub.f32 %v3135_v29, %v3973_v44  ;;  %v3055_v44 = vld [vmem:[%s11953_s1] sm:$0xff]  ;;  %v1462_v1 = vld [vmem:[%s11952_s0 + $0x28] sm:$0xc0] }
 0x1e9   :  { %12352 = vst [vmem:[#allocation117_spill] sm:$0xff] %v9987_v58  ;;  %v3035_v13 = vsel %vm12118_vm10, %v9989_v20, %v9973_v12  ;;  %1222 = vrot.lane.b32.xlu1 %v1177_v51, %s7282_s18  ;;  %v1320_v4 = vsel %vm1302_vm12, %v1318_v26, %v1319_v52  ;;  %v1411_v23 = vrot.slane %v1369_v24, 2  ;;  %v1412_v55 = vrot.slane %v1377_v49, 2  ;;  %v1178_v26 = vld [vmem:[%s11952_s0 + $0x70] sm:$0x1] }
 0x1ea   :  { %12353 = vst [vmem:[#allocation118_spill] sm:$0xff] %v9991_v17  ;;  %12354 = vst [vmem:[#allocation119_spill] sm:$0xff] %v9995_v33  ;;  %1210 = vrot.lane.b32.xlu0 %v1171_v37, %s7282_s18  ;;  %6827 = vmatprep.subr.bf16.mxu1 %v9991_v17  ;;  %v12114_v29 = vand.u32 4294901760, %v9968_v56  ;;  %v1321_v52 = vrot.slane %v1276_v9, 5  ;;  %v1370_v37 = vld [vmem:[%s11952_s0 + $0x30] sm:$0xc0] }
 0x1eb   :  { %3049 = vst [vmem:[#allocation2 + $0x2a8] sm:$0x70] %v3035_v13  ;;  %6829 = vmatpush1.bf16.msra.mxu1 %v9995_v33  ;;  %v2815_v14 = vpop.permute.xlu1 %2814  ;;  %v1322_v13 = vrot.slane %v1284_v47, 5  ;;  %v1378_v49 = vld [vmem:[%s11952_s0 + $0x70] sm:$0x1]  ;;  %v12355_v47 = vand.u32 4294901760, %v9993_v2  ;;  %v1413_v28 = vsel %vm616_vm1, %v1411_v23, %v1412_v55 }
 0x1ec   :  { %v2834_v51 = vsel %vm2824_vm14, %v9929_v38, %v2815_v14  ;;  %v2809_v24 = vpop.permute.xlu0 %2808  ;;  %v12357_v58 = vand.u32 4294901760, %v9978_v50  ;;  %v3148_v23 = vsel %vm1545_vm13, %v3055_v44, 0  ;;  %v1874_v17 = vld [vmem:[%s11952_s0 + $0x30] sm:$0xc0] }
 0x1ed   :  { %v10035_v9 = vpack.c.bf16 %v12355_v47, %v12114_v29  ;;  %2862 = vst [vmem:[#allocation2 + $0x2b0] sm:$0x1] %v2834_v51  ;;  %v2832_v38 = vsel %vm2824_vm14, %v2809_v24, %v9932_v10  ;;  %1337 = vrot.lane.b32.xlu1 %v1320_v4, %s7281_s17  ;;  %v12358_v47 = vand.u32 4294901760, %v9997_v6  ;;  %v1323_v10 = vsel %vm1302_vm12, %v1321_v52, %v1322_v13 }
 0x1ee   :  { %2860 = vst [vmem:[#allocation2 + $0x2a0] sm:$0x1] %v2832_v38  ;;  %1224 = vrot.lane.b32.xlu0 %v1178_v26, %s7282_s18  ;;  %v1414_v24 = vrot.slane %v1370_v37, 2  ;;  %v1415_v4 = vrot.slane %v1378_v49, 2  ;;  %v1470_v26 = vld [vmem:[%s11952_s0 + $0x68] sm:$0x1] }
 0x1ef   :  { %12356 = vst [vmem:[#allocation120_spill] sm:$0xff] %v10035_v9  ;;  %v10049_v29 = vpack.c.bf16 %v12358_v47, %v12357_v58  ;;  %v2924_v51 = vpop.permute.xlu1 %2923  ;;  %v1494_v13 = vrot.slane %v1462_v1, 7  ;;  %v1507_v44 = vrot.slane %v1470_v26, 7  ;;  %v10072_v49 = vand.u32 4294901760, %v3148_v23  ;;  %v1601_v1 = vld [vmem:[%s11952_s0 + $0x68] sm:$0x1] }
 0x1f0   :  { %v2940_v55 = vsel %vm12121_vm9, %v2924_v51, %v9955_v19  ;;  %v10058_v38 = vpop.permute.xlu0 %2816  ;;  %v1463_v19 = vld [vmem:[%s11952_s0 + $0x30] sm:$0xc0] }
 0x1f1   :  { %12359 = vst [vmem:[#allocation121_spill] sm:$0xff] %v10049_v29  ;;  %12360 = vst [vmem:[#allocation122_spill] sm:$0xff] %v10058_v38  ;;  %v2835_v58 = vsel %vm2824_vm14, %v2815_v14, %v10058_v38  ;;  %1430 = vrot.lane.b32.xlu1 %v1413_v28, %s7283_s27  ;;  %v1416_v28 = vsel %vm616_vm1, %v1414_v24, %v1415_v4  ;;  %v1593_v14 = vld [vmem:[%s11952_s0 + $0x28] sm:$0xc0]  ;;  %v1495_v4 = vrot.slane %v1463_v19, 7  ;;  %v1636_v38 = vrot.slane %v1601_v1, 4 }
 0x1f2   :  { %2954 = vst [vmem:[#allocation2 + $0x2a0] sm:$0xe] %v2940_v55  ;;  %v10063_v52 = vld [vmem:[#allocation2 + $0x2a8] sm:$0xff]  ;;  %2863 = vst [vmem:[#allocation2 + $0x2b8] sm:$0x1] %v2835_v58  ;;  %1339 = vrot.lane.b32.xlu0 %v1323_v10, %s7281_s17  ;;  %v1508_v55 = vsel %vm684_vm2, %v1494_v13, %v1507_v44  ;;  %v1635_v58 = vrot.slane %v1593_v14, 4  ;;  %v10095_v29 = vsub.f32 %v3148_v23, %v10072_v49 }
 0x1f3   :  { %v10067_v37 = vand.u32 4294901760, %v10063_v52  ;;  %12361 = vst [vmem:[#allocation123_spill] sm:$0xff] %v10072_v49  ;;  %v10074_v47 = vpop.permute.xlu1 %2931  ;;  %v1471_v10 = vld [vmem:[%s11952_s0 + $0x70] sm:$0x1]  ;;  %v1695_v19 = vld [vmem:[%s11952_s0 + $0x68] sm:$0x1] }
 0x1f4   :  { %12362 = vst [vmem:[#allocation124_spill] sm:$0xff] %v10074_v47  ;;  %v2930_v51 = vpop.permute.xlu0 %2929  ;;  %12363 = vst [vmem:[#allocation125_spill] sm:$0xff] %v10095_v29  ;;  %v1509_v57 = vrot.slane %v1471_v10, 7  ;;  %v1602_v23 = vld [vmem:[%s11952_s0 + $0x70] sm:$0x1]  ;;  %v1730_v1 = vrot.slane %v1695_v19, 1 }
 0x1f5   :  { %3199 = vmatprep.subr.mxu0 %v10067_v37  ;;  %v2942_v26 = vsel %vm12121_vm9, %v9948_v22, %v2930_v51  ;;  %v2943_v24 = vsel %vm12121_vm9, %v2930_v51, %v10074_v47  ;;  %1523 = vrot.lane.b32.xlu1 %v1494_v13, %s7296_s14  ;;  %v1687_v22 = vld [vmem:[%s11952_s0 + $0x28] sm:$0xc0]  ;;  %v1594_v13 = vld [vmem:[%s11952_s0 + $0x30] sm:$0xc0]  ;;  %v10117_v10 = vand.u32 4294901760, %v10095_v29  ;;  %vm12370_vm9 = vcmask 859136  }
 0x1f6   :  { %2956 = vst [vmem:[#allocation2 + $0x2b0] sm:$0xe] %v2942_v26  ;;  %2957 = vst [vmem:[#allocation2 + $0x2b8] sm:$0xe] %v2943_v24  ;;  %1432 = vrot.lane.b32.xlu0 %v1416_v28, %s7283_s27  ;;  %v1729_v14 = vrot.slane %v1687_v22, 1  ;;  %v1510_v24 = vsel %vm684_vm2, %v1495_v4, %v1509_v57  ;;  %v1638_v47 = vrot.slane %v1594_v13, 4 }
 0x1f7   :  { %v3024_v9 = vpop.permute.xlu1 %3023  ;;  %12364 = vst [vmem:[#allocation126_spill] sm:$0xff] %v10117_v10  ;;  %v3244_v57 = vsub.f32 %v10095_v29, %v10117_v10  ;;  %v1788_v10 = vld [vmem:[%s11952_s0 + $0x68] sm:$0x1]  ;;  %v1919_v49 = vrot.slane %v1882_v46, 3 }
 0x1f8   :  { %v3036_v28 = vsel %vm12118_vm10, %v9973_v12, %v3024_v9  ;;  %v3018_v51 = vpop.permute.xlu0 %3017  ;;  %v1637_v12 = vsel %vm816_vm3, %v1635_v58, %v1636_v38  ;;  %v1696_v38 = vld [vmem:[%s11952_s0 + $0x70] sm:$0x1]  ;;  %v1823_v36 = vrot.slane %v1788_v10, 6 }
 0x1f9   :  { %3050 = vst [vmem:[#allocation2 + $0x2b0] sm:$0x70] %v3036_v28  ;;  %v3034_v44 = vsel %vm12118_vm10, %v3018_v51, %v9989_v20  ;;  %1539 = vrot.lane.b32.xlu1 %v1508_v55, %s7296_s14  ;;  %v1639_v28 = vrot.slane %v1602_v23, 4  ;;  %v1688_v55 = vld [vmem:[%s11952_s0 + $0x30] sm:$0xc0]  ;;  %v1733_v13 = vrot.slane %v1696_v38, 1 }
 0x1fa   :  { %3048 = vst [vmem:[#allocation2 + $0x2a0] sm:$0x70] %v3034_v44  ;;  %1525 = vrot.lane.b32.xlu0 %v1495_v4, %s7296_s14  ;;  %v1732_v19 = vrot.slane %v1688_v55, 1  ;;  %v1371_v23 = vld [vmem:[%s11952_s0 + $0x38] sm:$0xc0] }
 0x1fb   :  { %v59_v26 = vpop.permute.xlu1 %58  ;;  %v1640_v22 = vsel %vm816_vm3, %v1638_v47, %v1639_v28  ;;  %v1285_v47 = vld [vmem:[%s11952_s0 + $0x78] sm:$0x1]  ;;  %v1417_v55 = vrot.slane %v1371_v23, 2 }
 0x1fc   :  { %v69_v20 = vsel %vm64_vm8, %v7797_v61, %v59_v26  ;;  %v10122_v51 = vpop.permute.xlu0 %3025  ;;  %v1731_v61 = vsel %vm911_vm4, %v1729_v14, %v1730_v1  ;;  %v1277_v14 = vld [vmem:[%s11952_s0 + $0x38] sm:$0xc0] }
 0x1fd   :  { %12365 = vst [vmem:[#allocation127_spill] sm:$0xff] %v10122_v51  ;;  %83 = vst [vmem:[#allocation2 + $0x20] sm:$0xe] %v69_v20  ;;  %v3037_v58 = vsel %vm12118_vm10, %v3024_v9, %v10122_v51  ;;  %1654 = vrot.lane.b32.xlu1 %v1637_v12, %s7297_s28  ;;  %v1379_v9 = vld [vmem:[%s11952_s0 + $0x78] sm:$0x1]  ;;  %v10166_v20 = vand.u32 4294901760, %v3244_v57 }
 0x1fe   :  { %3051 = vst [vmem:[#allocation2 + $0x2b8] sm:$0x70] %v3037_v58  ;;  %1541 = vrot.lane.b32.xlu0 %v1510_v24, %s7296_s14  ;;  %v1418_v38 = vrot.slane %v1379_v9, 2  ;;  %v1325_v51 = vrot.slane %v1285_v47, 5  ;;  %vm12367_vm10 = vcmask 859136  }
 0x1ff   :  { %v121_v4 = vpop.permute.xlu1 %120  ;;  %12366 = vst [vmem:[#allocation128_spill] sm:$0xff] %v10166_v20  ;;  %v1697_v47 = vld [vmem:[%s11952_s0 + $0x78] sm:$0x1] }
 0x200   :  { %v131_v44 = vsel %vm126_vm7, %v7820_v5, %v121_v4  ;;  %v10146_v12 = vpop.permute.xlu0 %60  ;;  %v1179_v5 = vld [vmem:[%s11952_s0 + $0x78] sm:$0x1]  ;;  %v10182_v9 = vld [vmem:[#allocation2 + $0x2b0] sm:$0xff]  ;;  %v1736_v33 = vrot.slane %v1697_v47, 1  ;;  %v1881_v47 = vld [vmem:[%s11952_s0 + $0x68] sm:$0x1] }
 0x201   :  { %145 = vst [vmem:[#allocation2 + $0x20] sm:$0x70] %v131_v44  ;;  %v70_v1 = vsel %vm64_vm8, %v59_v26, %v10146_v12  ;;  %1748 = vrot.lane.b32.xlu1 %v1731_v61, %s7284_s4  ;;  %v10157_v24 = vld [vmem:[#allocation2 + $0x2a0] sm:$0xff]  ;;  %v10171_v26 = vld [vmem:[%s11952_s0 + $0x38] sm:$0xc0]  ;;  %v1734_v61 = vsel %vm911_vm4, %v1732_v19, %v1733_v13  ;;  %v1324_v44 = vrot.slane %v1277_v14, 5 }
 0x202   :  { %84 = vst [vmem:[#allocation2 + $0x28] sm:$0xe] %v70_v1  ;;  %1656 = vrot.lane.b32.xlu0 %v1640_v22, %s7297_s28  ;;  %v10164_v28 = vand.u32 4294901760, %v10157_v24  ;;  %v1472_v22 = vld [vmem:[%s11952_s0 + $0x78] sm:$0x1]  ;;  %v1496_v13 = vrot.slane %v10171_v26, 7 }
 0x203   :  { %v183_v58 = vpop.permute.xlu1 %182  ;;  %v1511_v14 = vrot.slane %v1472_v22, 7  ;;  %v10219_v22 = vld [vmem:[#allocation2 + $0x2c0] sm:$0xff]  ;;  %v1916_v10 = vrot.slane %v1881_v47, 3 }
 0x204   :  { %v193_v57 = vsel %vm12367_vm10, %v7857_v34, %v183_v58  ;;  %3201 = vmatpush1.msra.mxu0 %v10164_v28  ;;  %v10180_v23 = vpop.permute.xlu0 %122  ;;  %v10194_v34 = vld [vmem:[%s11952_s0 + $0x38] sm:$0xc0]  ;;  %vm12369_vm10 = vcmask 711680  }
 0x205   :  { %207 = vst [vmem:[#allocation2 + $0x58] ss:$-52 sps:$4 sm:$0x83] %v193_v57   ;;  %v132_v1 = vsel %vm126_vm7, %v121_v4, %v10180_v23  ;;  %6687 = vmatprep.subr.bf16.mxu0 %v7860_v35  ;;  %1226 = vrot.lane.b32.xlu1 %v1179_v5, %s7282_s18  ;;  %v10188_v19 = vld [vmem:[#allocation2 + $0x2b8] sm:$0xff]  ;;  %v1419_v35 = vsel %vm616_vm1, %v1417_v55, %v1418_v38  ;;  %v1781_v38 = vld [vmem:[%s11952_s0 + $0x30] sm:$0xc0] }
 0x206   :  { %146 = vst [vmem:[#allocation2 + $0x28] sm:$0x70] %v132_v1  ;;  %1750 = vrot.lane.b32.xlu0 %v1734_v61, %s7284_s4  ;;  %3246 = vmatmul.mubr.f32.vlgmr.msra.gmra.mrb[0].mxu0 %v10166_v20  ;;  %v10199_v4 = vand.u32 4294901760, %v10188_v19  ;;  %v1595_v5 = vld [vmem:[%s11952_s0 + $0x38] sm:$0xc0]  ;;  %v10210_v61 = vand.u32 4294901760, %v10182_v9  ;;  %v1326_v57 = vsel %vm1302_vm12, %v1324_v44, %v1325_v51 }
 0x207   :  { %6689 = vmatpush1.bf16.msra.mxu0 %v8075_v0  ;;  %v252_v26 = vpop.permute.xlu1 %251  ;;  %v1603_v55 = vld [vmem:[%s11952_s0 + $0x78] sm:$0x1]  ;;  %3446 = vmatprep.mubr.f32.mxu0 %v10219_v22  ;;  %v1789_v44 = vld [vmem:[%s11952_s0 + $0x70] sm:$0x1]  ;;  %v1780_v1 = vld [vmem:[%s11952_s0 + $0x28] sm:$0xc0] }
 0x208   :  { %12368 = vst [vmem:[#allocation129_spill] sm:$0xff] %v10199_v4  ;;  %6691 = vmatprep.subr.bf16.mxu0 %v8208_v54  ;;  %v262_v0 = vsel %vm12369_vm10, %v7874_v42, %v252_v26  ;;  %3976 = vmatprep.subr.mxu1 %v10199_v4  ;;  %v10226_v51 = vpop.permute.xlu0 %184  ;;  %v1735_v54 = vrot.slane %v10194_v34, 1  ;;  %v1873_v34 = vld [vmem:[%s11952_s0 + $0x28] sm:$0xc0]  ;;  %v1826_v29 = vrot.slane %v1789_v44, 6  ;;  %v12372_v44 = vand.u32 4294901760, %v9953_v43 }
 0x209   :  { %276 = vst [vmem:[#allocation2 + $0x58] sm:$0x1c] %v262_v0  ;;  %v194_v42 = vsel %vm12370_vm9, %v183_v58, %v10226_v51  ;;  %3978 = vmatpush1.msra.mxu1 %v10210_v61  ;;  %1434 = vrot.lane.b32.xlu1 %v1419_v35, %s7283_s27  ;;  %v1512_v58 = vsel %vm684_vm2, %v1496_v13, %v1511_v14  ;;  %v1641_v0 = vrot.slane %v1595_v5, 4  ;;  %v1642_v35 = vrot.slane %v1603_v55, 4 }
 0x20a   :  { %208 = vst [vmem:[#allocation2 + $0x60] ss:$-52 sps:$4 sm:$0x83] %v194_v42   ;;  %1341 = vrot.lane.b32.xlu0 %v1326_v57, %s7281_s17  ;;  %6831 = vmatprep.subr.bf16.mxu1 %v8098_v11  ;;  %v1825_v57 = vrot.slane %v1781_v38, 6  ;;  %v1822_v11 = vrot.slane %v1780_v1, 6  ;;  %vm12371_vm9 = vcmask 703488  }
 0x20b   :  { %6693 = vmatpush1.bf16.msra.mxu0 %v8425_v41  ;;  %4023 = vmatmul.mubr.f32.vlgmr.msra.gmra.mrb[0].mxu1 %v10166_v20  ;;  %v314_v42 = vpop.permute.xlu1 %313  ;;  %v1918_v55 = vrot.slane %v1874_v17, 3  ;;  %v1643_v46 = vsel %vm816_vm3, %v1641_v0, %v1642_v35  ;;  %v10277_v17 = vsub.f32 %v10063_v52, %v10067_v37 }
 0x20c   :  { %6695 = vmatprep.subr.bf16.mxu0 %v8586_v62  ;;  %6833 = vmatpush1.bf16.msra.mxu1 %v8087_v18  ;;  %v324_v14 = vsel %vm12371_vm9, %v7940_v16, %v314_v42  ;;  %v10263_v5 = vpop.permute.xlu0 %253  ;;  %v10265_v40 = vld [vmem:[#allocation2 + $0x20] sm:$0xff]  ;;  %v1915_v62 = vrot.slane %v1873_v34, 3  ;;  %v1737_v16 = vsel %vm911_vm4, %v1735_v54, %v1736_v33  ;;  %v1824_v38 = vsel %vm1006_vm5, %v1822_v11, %v1823_v36  ;;  %v10289_v33 = vld [vmem:[%s11952_s0 + $0x30] sm:$0xc0] }
 0x20d   :  { %338 = vst [vmem:[#allocation2 + $0x58] sm:$0xe0] %v324_v14  ;;  %6835 = vmatprep.subr.bf16.mxu1 %v8437_v31  ;;  %v263_v41 = vsel %vm12369_vm10, %v252_v26, %v10263_v5  ;;  %1543 = vrot.lane.b32.xlu1 %v1512_v58, %s7296_s14  ;;  %v12136_v18 = vand.u32 4294901760, %v10265_v40  ;;  %v1827_v26 = vsel %vm1006_vm5, %v1825_v57, %v1826_v29  ;;  %v12374_v58 = vand.u32 4294901760, %v9938_v3 }
 0x20e   :  { %277 = vst [vmem:[#allocation2 + $0x60] sm:$0x1c] %v263_v41  ;;  %1527 = vrot.lane.b32.xlu0 %v1496_v13, %s7296_s14  ;;  %4223 = vmatprep.mubr.f32.mxu1 %v10219_v22  ;;  %v3393_v13 = vsub.f32 %v9953_v43, %v12372_v44  ;;  %v1920_v1 = vsel %vm1101_vm6, %v1918_v55, %v1919_v49  ;;  %v12145_v49 = vand.u32 4294901760, %v10277_v17  ;;  %v2118_v0 = vrot.slane %v10289_v33, 5  ;;  %v10337_v41 = vld [vmem:[%s11952_s0 + $0x70] sm:$0x1] }
 0x20f   :  { %6697 = vmatpush1.bf16.msra.mxu0 %v8793_v30  ;;  %v63_v31 = vpop.permute.xlu1 %62  ;;  %v10294_v52 = vsub.f32 %v10265_v40, %v12136_v18  ;;  %v10298_v30 = vsub.f32 %v10157_v24, %v10164_v28  ;;  %v1917_v24 = vsel %vm1101_vm6, %v1915_v62, %v1916_v10  ;;  %v12377_v11 = vand.u32 4294901760, %v9997_v6  ;;  %v12403_v18 = vld [vmem:[#allocation21_spill] sm:$0xff] }
 0x210   :  { %6699 = vmatprep.subr.bf16.mxu0 %v9003_v7  ;;  %6837 = vmatpush1.bf16.msra.mxu1 %v8439_v60  ;;  %v71_v36 = vsel %vm64_vm8, %v10146_v12, %v63_v31  ;;  %v316_v29 = vpop.permute.xlu0 %315  ;;  %v3381_v7 = vsub.f32 %v9938_v3, %v12374_v58  ;;  %v12375_v12 = vand.u32 4294901760, %v9968_v56  ;;  %v3394_v47 = vand.u32 4294901760, %v3393_v13 }
 0x211   :  { %12373 = vst [vmem:[#allocation130_spill] sm:$0xff] %v10294_v52  ;;  %85 = vst [vmem:[#allocation2 + $0x30] sm:$0xe] %v71_v36  ;;  %6839 = vmatprep.subr.bf16.mxu1 %v8830_v48  ;;  %v325_v54 = vsel %vm12371_vm9, %v314_v42, %v316_v29  ;;  %1752 = vrot.lane.b32.xlu1 %v1737_v16, %s7284_s4  ;;  %v10312_v60 = vld [vmem:[#allocation2 + $0x28] sm:$0xff]  ;;  %v12376_v42 = vand.u32 4294901760, %v9993_v2  ;;  %v10328_v14 = vsub.f32 %v9997_v6, %v12377_v11  ;;  %vm12378_vm10 = vcmask 859136  }
 0x212   :  { %339 = vst [vmem:[#allocation2 + $0x60] sm:$0xe0] %v325_v54  ;;  %1658 = vrot.lane.b32.xlu0 %v1643_v46, %s7297_s28  ;;  %v4152_v48 = vsub.f32 %v9968_v56, %v12375_v12  ;;  %v12138_v35 = vand.u32 4294901760, %v10312_v60  ;;  %v10332_v55 = vsub.f32 %v10188_v19, %v10199_v4  ;;  %v12142_v19 = vand.u32 4294901760, %v10298_v30  ;;  %s12530_s4 = smov 48  }
 0x213   :  { %6701 = vmatpush1.bf16.msra.mxu0 %v9291_v53  ;;  %v187_v34 = vpop.permute.xlu1 %186  ;;  %v4164_v57 = vsub.f32 %v9993_v2, %v12376_v42  ;;  %v10341_v53 = vsub.f32 %v10182_v9, %v10210_v61  ;;  %v3399_v31 = vsub.f32 %v10277_v17, %v12145_v49  ;;  %v2167_v42 = vld [vmem:[%s11952_s0 + $0x28] sm:$0xc0] }
 0x214   :  { %6703 = vmatprep.subr.bf16.mxu0 %v9459_v21  ;;  %6841 = vmatpush1.bf16.msra.mxu1 %v8832_v63  ;;  %v195_v62 = vsel %vm12378_vm10, %v10226_v51, %v187_v34  ;;  %v125_v10 = vpop.permute.xlu0 %124  ;;  %v10351_v16 = vsub.f32 %v10312_v60, %v12138_v35  ;;  %v10353_v46 = vld [vmem:[#allocation2 + $0x58] sm:$0xff]  ;;  %v3382_v63 = vand.u32 4294901760, %v3381_v7  ;;  %v4814_v51 = vand.u32 4294901760, %v10294_v52 }
 0x215   :  { %12380 = vst [vmem:[#allocation132_spill] sm:$0xff] %v10353_v46  ;;  %209 = vst [vmem:[#allocation2 + $0x68] ss:$-52 sps:$4 sm:$0x83] %v195_v62   ;;  %6843 = vmatprep.subr.bf16.mxu1 %v9315_v27  ;;  %v133_v21 = vsel %vm126_vm7, %v10180_v23, %v125_v10  ;;  %1843 = vrot.lane.b32.xlu1 %v1827_v26, %s7285_s9  ;;  %v12135_v9 = vand.u32 4294901760, %v10353_v46  ;;  %v4153_v44 = vand.u32 4294901760, %v4152_v48 }
 0x216   :  { %12379 = vst [vmem:[#allocation131_spill] sm:$0xff] %v10351_v16  ;;  %147 = vst [vmem:[#allocation2 + $0x30] sm:$0x70] %v133_v21  ;;  %1841 = vrot.lane.b32.xlu0 %v1824_v38, %s7285_s9  ;;  %v12381_v27 = vand.u32 4294901760, %v9978_v50  ;;  %v2119_v23 = vrot.slane %v10337_v41, 5  ;;  %v6708_v36 = vpack.c.bf16 %v3394_v47, %v3382_v63  ;;  %v4165_v54 = vand.u32 4294901760, %v4164_v57 }
 0x217   :  { %6705 = vmatpush1.bf16.msra.mxu0 %v9645_v25  ;;  %v318_v26 = vpop.permute.xlu1 %317  ;;  %v12141_v58 = vand.u32 4294901760, %v10332_v55  ;;  %v10374_v38 = vsub.f32 %v10353_v46, %v12135_v9  ;;  %v3405_v25 = vsub.f32 %v10298_v30, %v12142_v19  ;;  %v4171_v48 = vand.u32 4294901760, %v10328_v14  ;;  %v1966_v10 = vld [vmem:[%s11952_s0 + $0x28] sm:$0xc0] }
 0x218   :  { %v4158_v13 = vsub.f32 %v9978_v50, %v12381_v27  ;;  %6707 = vmatprep.subr.bf16.mxu0 %v9845_v39  ;;  %6845 = vmatpush1.bf16.msra.mxu1 %v9281_v59  ;;  %v326_v7 = vsel %vm12371_vm9, %v316_v29, %v318_v26  ;;  %v256_v12 = vpop.permute.xlu0 %255  ;;  %v12140_v34 = vand.u32 4294901760, %v10341_v53  ;;  %vm12383_vm10 = vcmask 711680   ;;  %v2073_v26 = vld [vmem:[%s11952_s0 + $0x28] sm:$0xc0] }
 0x219   :  { %12382 = vst [vmem:[#allocation133_spill] sm:$0xff] %v10374_v38  ;;  %340 = vst [vmem:[#allocation2 + $0x68] sm:$0xe0] %v326_v7  ;;  %6847 = vmatprep.subr.bf16.mxu1 %v9688_v15  ;;  %v264_v47 = vsel %vm12383_vm10, %v10263_v5, %v256_v12  ;;  %1936 = vrot.lane.b32.xlu1 %v1920_v1, %s7287_s19  ;;  %v10388_v59 = vld [vmem:[#allocation2 + $0x60] sm:$0xff]  ;;  %v4815_v39 = vsub.f32 %v10294_v52, %v4814_v51  ;;  %v4826_v29 = vand.u32 4294901760, %v10374_v38  ;;  %vm12386_vm9 = vcmask 695296  }
 0x21a   :  { %278 = vst [vmem:[#allocation2 + $0x68] sm:$0x1c] %v264_v47  ;;  %1934 = vrot.lane.b32.xlu0 %v1917_v24, %s7287_s19  ;;  %v3400_v57 = vand.u32 4294901760, %v3399_v31  ;;  %v1967_v15 = vld [vmem:[%s11952_s0 + $0x30] sm:$0xc0]  ;;  %v4159_v5 = vand.u32 4294901760, %v4158_v13  ;;  %v6850_v62 = vpack.c.bf16 %v4165_v54, %v4153_v44  ;;  %v4176_v24 = vsub.f32 %v10332_v55, %v12141_v58  ;;  %vm12387_vm10 = vmmov %vm12386_vm9 }
 0x21b   :  { %v12137_v1 = vand.u32 4294901760, %v10388_v59  ;;  %v4808_v11 = vand.u32 4294901760, %v10351_v16  ;;  %6709 = vmatpush1.bf16.msra.mxu0 %v6708_v36  ;;  %v10400_v14 = vpop.permute.xlu1 %377  ;;  %v4827_v21 = vsub.f32 %v10374_v38, %v4826_v29  ;;  %v10409_v63 = vpack.c.bf16 %v4826_v29, %v4814_v51  ;;  %v2081_v36 = vld [vmem:[%s11952_s0 + $0x68] sm:$0x1]  ;;  %v12449_v58 = vld [vmem:[#allocation76_spill] sm:$0xff] }
 0x21c   :  { %3401 = vmatprep.subr.mxu0 %v3400_v57  ;;  %6849 = vmatpush1.bf16.msra.mxu1 %v9690_v32  ;;  %v376_v31 = vpop.permute.xlu0 %375  ;;  %v3406_v27 = vand.u32 4294901760, %v3405_v25  ;;  %v6852_v13 = vpack.c.bf16 %v4171_v48, %v4159_v5  ;;  %v4182_v44 = vsub.f32 %v10341_v53, %v12140_v34  ;;  %v4816_v12 = vand.u32 4294901760, %v4815_v39  ;;  %v1975_v39 = vld [vmem:[%s11952_s0 + $0x70] sm:$0x1]  ;;  %v12408_v41 = vld [vmem:[#allocation13_spill] sm:$0xff] }
 0x21d   :  { %12384 = vst [vmem:[#allocation134_spill] sm:$0xff] %v10409_v63  ;;  %v10424_v51 = vsub.f32 %v10388_v59, %v12137_v1  ;;  %6851 = vmatprep.subr.bf16.mxu1 %v6850_v62  ;;  %v386_v32 = vsel %vm12386_vm9, %v8110_v45, %v376_v31  ;;  %v387_v54 = vsel %vm12387_vm10, %v376_v31, %v10400_v14  ;;  %v10431_v7 = vld [vmem:[#allocation2 + $0x30] sm:$0xff]  ;;  %v4828_v25 = vand.u32 4294901760, %v4827_v21  ;;  %v12391_v21 = vld [vmem:[#allocation3_spill] sm:$0xff] }
 0x21e   :  { %2005 = vrot.lane.b32.xlu1 %v1967_v15, %s12388_s23  ;;  %12389 = vst [vmem:[#allocation136_spill] sm:$0xff] %v10431_v7  ;;  %400 = vst [vmem:[#allocation2 + $0x90] sm:$0x7] %v386_v32  ;;  %2003 = vrot.lane.b32.xlu0 %v1966_v10, %s12388_s23  ;;  %v12134_v48 = vand.u32 4294901760, %v10431_v7  ;;  %v4809_v47 = vsub.f32 %v10351_v16, %v4808_v11  ;;  %v4177_v15 = vand.u32 4294901760, %v4176_v24  ;;  %v2115_v5 = vrot.slane %v2073_v26, 5 }
 0x21f   :  { %12385 = vst [vmem:[#allocation135_spill] sm:$0xff] %v10424_v51  ;;  %401 = vst [vmem:[#allocation2 + $0x98] sm:$0x7] %v387_v54  ;;  %v4820_v29 = vand.u32 4294901760, %v10424_v51  ;;  %3407 = vmatpush1.msra.mxu0 %v3406_v27  ;;  %v10439_v57 = vpop.permute.xlu1 %431  ;;  %v2116_v62 = vrot.slane %v2081_v36, 5  ;;  %v10444_v10 = vpack.c.bf16 %v4828_v25, %v4816_v12  ;;  %v12392_v31 = vpack.c.bf16 %v7824_v8, %v12391_v21  ;;  %v12395_v8 = vld [vmem:[#allocation123_spill] sm:$0xff] }
 0x220   :  { %6853 = vmatpush1.bf16.msra.mxu1 %v6852_v13  ;;  %v430_v32 = vpop.permute.xlu0 %429  ;;  %v1974_v27 = vld [vmem:[%s11952_s0 + $0x68] sm:$0x1]  ;;  %v2168_v24 = vld [vmem:[%s11952_s0 + $0x30] sm:$0xc0]  ;;  %v10458_v26 = vsub.f32 %v10431_v7, %v12134_v48  ;;  %3448 = vmatmul.mubr.f32.vlgmr.msra.gmra.mrb[0].mxu0 %v12395_v8  ;;  %v12396_v13 = vld [vmem:[#allocation19_spill] sm:$0xff]  ;;  %vm12397_vm9 = vcmask 547840  }
 0x221   :  { %12390 = vst [vmem:[#allocation137_spill] sm:$0xff] %v10444_v10  ;;  %6711 = vmatprep.subr.bf16.mxu0 %v12392_v31  ;;  %v4821_v36 = vsub.f32 %v10424_v51, %v4820_v29  ;;  %v10461_v54 = vpack.c.bf16 %v4820_v29, %v4808_v11  ;;  %4178 = vmatprep.subr.mxu1 %v4177_v15  ;;  %vm12398_vm10 = vmmov %vm12397_vm9  ;;  %v4183_v21 = vand.u32 4294901760, %v4182_v44  ;;  %v2176_v31 = vld [vmem:[%s11952_s0 + $0x70] sm:$0x1]  ;;  %v10474_v11 = vld [vmem:[#allocation2 + $0x68] sm:$0xff] }
 0x222   :  { %12393 = vst [vmem:[#allocation3_spill] sm:$0xff] %v10458_v26  ;;  %v440_v12 = vsel %vm12397_vm9, %v12396_v13, %v430_v32  ;;  %v441_v25 = vsel %vm12398_vm10, %v430_v32, %v10439_v57  ;;  %12399 = vst [vmem:[#allocation123_spill] sm:$0xff] %v10474_v11  ;;  %v12400_v29 = vld [vmem:[#allocation10_spill] sm:$0xff]  ;;  %2021 = vrot.lane.b32.xlu1 %v1975_v39, %s12388_s23  ;;  %v2175_v44 = vld [vmem:[%s11952_s0 + $0x68] sm:$0x1]  ;;  %v12139_v32 = vand.u32 4294901760, %v10474_v11  ;;  %2019 = vrot.lane.b32.xlu0 %v1974_v27, %s12388_s23 }
 0x223   :  { %12394 = vst [vmem:[#allocation138_spill] sm:$0xff] %v10461_v54  ;;  %v12401_v45 = vld [vmem:[#allocation6_spill] sm:$0xff]  ;;  %454 = vst [vmem:[#allocation2 + $0x90] sm:$0x38] %v440_v12  ;;  %v4810_v13 = vand.u32 4294901760, %v4809_v47  ;;  %v4822_v48 = vand.u32 4294901760, %v4821_v36  ;;  %v2120_v39 = vsel %vm1302_vm12, %v2118_v0, %v2119_v23  ;;  %v2117_v12 = vsel %vm1302_vm12, %v2115_v5, %v2116_v62  ;;  %3570 = vmatprep.mubr.f32.mxu0 %v10219_v22 }
 0x224   :  { %v12402_v15 = vpack.c.bf16 %v12400_v29, %v12401_v45  ;;  %455 = vst [vmem:[#allocation2 + $0x98] sm:$0x38] %v441_v25  ;;  %v5572_v9 = vand.u32 4294901760, %v10458_v26  ;;  %v12404_v1 = vld [vmem:[#allocation18_spill] sm:$0xff]  ;;  %v10489_v45 = vpop.permute.xlu1 %493  ;;  %4184 = vmatpush1.msra.mxu1 %v4183_v21  ;;  %v492_v47 = vpop.permute.xlu0 %491  ;;  %v2212_v36 = vrot.slane %v2168_v24, 2  ;;  %v2213_v25 = vrot.slane %v2176_v31, 2 }
 0x225   :  { %v12405_v35 = vpack.c.bf16 %v12403_v18, %v12404_v1  ;;  %v10501_v18 = vsub.f32 %v10474_v11, %v12139_v32  ;;  %v12409_v1 = vld [vmem:[#allocation8_spill] sm:$0xff]  ;;  %v12411_v0 = vld [vmem:[#allocation22_spill] sm:$0xff]  ;;  %vm12412_vm9 = vcmask 539648   ;;  %4225 = vmatmul.mubr.f32.vlgmr.msra.gmra.mrb[0].mxu1 %v12395_v8  ;;  %v2209_v62 = vrot.slane %v2167_v42, 2  ;;  %v12415_v21 = vld [vmem:[#allocation25_spill] sm:$0xff] }
 0x226   :  { %6713 = vmatpush1.bf16.msra.mxu0 %v12402_v15  ;;  %v12410_v33 = vpack.c.bf16 %v12408_v41, %v12409_v1  ;;  %v502_v23 = vsel %vm12412_vm9, %v12411_v0, %v492_v47  ;;  %vm12413_vm10 = vmmov %vm12412_vm9  ;;  %v2210_v27 = vrot.slane %v2175_v44, 2  ;;  %v12414_v24 = vld [vmem:[#allocation30_spill] sm:$0xff]  ;;  %v12418_v29 = vld [vmem:[#allocation7_spill] sm:$0xff]  ;;  %2136 = vrot.lane.b32.xlu1 %v2120_v39, %s12423_s30  ;;  %vm12429_vm9 = vcmask 531456  }
 0x227   :  { %6715 = vmatprep.subr.bf16.mxu0 %v12405_v35  ;;  %12406 = vst [vmem:[#allocation19_spill] sm:$0xff] %v10501_v18  ;;  %v10503_v35 = vpack.c.bf16 %v4822_v48, %v4810_v13  ;;  %v503_v5 = vsel %vm12413_vm10, %v492_v47, %v10489_v45  ;;  %v12416_v31 = vpack.c.bf16 %v12414_v24, %v12415_v21  ;;  %516 = vst [vmem:[#allocation2 + $0xc8] ss:$-52 sps:$4 sm:$0xc1] %v502_v23   ;;  %v12417_v48 = vld [vmem:[#allocation11_spill] sm:$0xff]  ;;  %v12420_v1 = vld [vmem:[#allocation42_spill] sm:$0xff] }
 0x228   :  { %6855 = vmatprep.subr.bf16.mxu1 %v12410_v33  ;;  %517 = vst [vmem:[#allocation2 + $0xd0] ss:$-52 sps:$4 sm:$0xc1] %v503_v5   ;;  %v12419_v15 = vpack.c.bf16 %v12417_v48, %v12418_v29  ;;  %v5573_v13 = vsub.f32 %v10458_v26, %v5572_v9  ;;  %v5579_v41 = vand.u32 4294901760, %v10501_v18  ;;  %v12421_v42 = vld [vmem:[#allocation38_spill] sm:$0xff]  ;;  %v10527_v33 = vpop.permute.xlu1 %562  ;;  %2134 = vrot.lane.b32.xlu0 %v2117_v12, %s12423_s30  ;;  %v12424_v0 = vld [vmem:[#allocation32_spill] sm:$0xff]  ;;  %v561_v24 = vpop.permute.xlu0 %560  ;;  %vm12430_vm10 = vmmov %vm12429_vm9 }
 0x229   :  { %12407 = vst [vmem:[#allocation10_spill] sm:$0xff] %v10503_v35  ;;  %v12422_v44 = vpack.c.bf16 %v12420_v1, %v12421_v42  ;;  %v12425_v23 = vld [vmem:[#allocation27_spill] sm:$0xff]  ;;  %v2214_v21 = vsel %vm616_vm1, %v2212_v36, %v2213_v25  ;;  %v572_v25 = vsel %vm12430_vm10, %v561_v24, %v10527_v33  ;;  %v2211_v1 = vsel %vm616_vm1, %v2209_v62, %v2210_v27  ;;  %v10556_v42 = vld [vmem:[%s11952_s0 + $0x28] sm:$0xc0]  ;;  %v12437_v47 = vld [vmem:[#allocation64_spill] sm:$0xff] }
 0x22a   :  { %6717 = vmatpush1.bf16.msra.mxu0 %v12416_v31  ;;  %6857 = vmatpush1.bf16.msra.mxu1 %v12419_v15  ;;  %v12426_v5 = vpack.c.bf16 %v12424_v0, %v12425_v23  ;;  %v10537_v31 = vld [vmem:[%s11952_s0 + $0x30] sm:$0xc0]  ;;  %v1875_v39 = vld [vmem:[%s11952_s0 + $0x38] sm:$0xc0]  ;;  %v1883_v12 = vld [vmem:[%s11952_s0 + $0x78] sm:$0x1]  ;;  %v5580_v48 = vsub.f32 %v10501_v18, %v5579_v41  ;;  %v10546_v29 = vpack.c.bf16 %v5579_v41, %v5572_v9 }
 0x22b   :  { %6719 = vmatprep.subr.bf16.mxu0 %v12422_v44  ;;  %v12428_v15 = vld [vmem:[#allocation24_spill] sm:$0xff]  ;;  %4347 = vmatprep.mubr.f32.mxu1 %v10219_v22  ;;  %v12432_v0 = vld [vmem:[#allocation46_spill] sm:$0xff]  ;;  %586 = vst [vmem:[#allocation2 + $0xd0] sm:$0xe] %v572_v25  ;;  %v1782_v62 = vld [vmem:[%s11952_s0 + $0x38] sm:$0xc0] }
 0x22c   :  { %6859 = vmatprep.subr.bf16.mxu1 %v12426_v5  ;;  %12427 = vst [vmem:[#allocation6_spill] sm:$0xff] %v10546_v29  ;;  %v571_v36 = vsel %vm12429_vm9, %v12428_v15, %v561_v24  ;;  %v12431_v44 = vld [vmem:[#allocation52_spill] sm:$0xff]  ;;  %v12434_v9 = vld [vmem:[#allocation34_spill] sm:$0xff]  ;;  %v1790_v27 = vld [vmem:[%s11952_s0 + $0x78] sm:$0x1]  ;;  %v5574_v24 = vand.u32 4294901760, %v5573_v13  ;;  %2230 = vrot.lane.b32.xlu1 %v2214_v21, %s7288_s24  ;;  %v720_v13 = vpop.permute.xlu0 %719 }
 0x22d   :  { %v12433_v23 = vpack.c.bf16 %v12431_v44, %v12432_v0  ;;  %585 = vst [vmem:[#allocation2 + $0xc8] sm:$0xe] %v571_v36  ;;  %v12435_v41 = vld [vmem:[#allocation28_spill] sm:$0xff]  ;;  %v5581_v15 = vand.u32 4294901760, %v5580_v48  ;;  %v10575_v36 = vpop.permute.xlu1 %721  ;;  %v12146_v25 = vrot.slane %v10537_v31, 7  ;;  %v1921_v0 = vrot.slane %v1875_v39, 3  ;;  %2228 = vrot.lane.b32.xlu0 %v2211_v1, %s7288_s24 }
 0x22e   :  { %v12436_v5 = vpack.c.bf16 %v12434_v9, %v12435_v41  ;;  %v12438_v32 = vld [vmem:[#allocation60_spill] sm:$0xff]  ;;  %v12440_v9 = vld [vmem:[#allocation55_spill] sm:$0xff]  ;;  %v2292_v48 = vrot.slane %v10556_v42, 7  ;;  %vm12445_vm9 = vcmask 1039360   ;;  %v1829_v39 = vrot.slane %v1790_v27, 6  ;;  %v10591_v1 = vld [vmem:[#allocation2 + $0x90] sm:$0xff] }
 0x22f   :  { %6721 = vmatpush1.bf16.msra.mxu0 %v12433_v23  ;;  %v12439_v44 = vpack.c.bf16 %v12437_v47, %v12438_v32  ;;  %v1922_v23 = vrot.slane %v1883_v12, 3  ;;  %v12441_v41 = vld [vmem:[#allocation48_spill] sm:$0xff]  ;;  %v10583_v34 = vpack.c.bf16 %v5581_v15, %v5574_v24  ;;  %v12444_v32 = vld [vmem:[#allocation26_spill] sm:$0xff]  ;;  %vm12446_vm10 = vmmov %vm12445_vm9  ;;  %12448 = vst [vmem:[#allocation13_spill] sm:$0xff] %v10591_v1 }
 0x230   :  { %6861 = vmatpush1.bf16.msra.mxu1 %v12436_v5  ;;  %v12442_v5 = vpack.c.bf16 %v12440_v9, %v12441_v41  ;;  %v746_v47 = vsel %vm12445_vm9, %v12444_v32, %v720_v13  ;;  %v747_v21 = vsel %vm12446_vm10, %v720_v13, %v10575_v36  ;;  %v10589_v12 = vld [vmem:[#allocation2 + $0x98] sm:$0xff]  ;;  %v12450_v9 = vld [vmem:[#allocation68_spill] sm:$0xff]  ;;  %v12452_v24 = vld [vmem:[#allocation57_spill] sm:$0xff]  ;;  %v12144_v13 = vand.u32 4294901760, %v10591_v1  ;;  %2323 = vrot.lane.b32.xlu1 %v12146_v25, %s7289_s5 }
 0x231   :  { %6723 = vmatprep.subr.bf16.mxu0 %v12439_v44  ;;  %12443 = vst [vmem:[#allocation21_spill] sm:$0xff] %v10583_v34  ;;  %v1828_v44 = vrot.slane %v1782_v62, 6  ;;  %12447 = vst [vmem:[#allocation18_spill] sm:$0xff] %v10589_v12  ;;  %v12451_v41 = vpack.c.bf16 %v12449_v58, %v12450_v9  ;;  %v12453_v15 = vld [vmem:[#allocation47_spill] sm:$0xff]  ;;  %v12143_v32 = vand.u32 4294901760, %v10589_v12  ;;  %v434_v58 = vpop.permute.xlu1 %433  ;;  %2321 = vrot.lane.b32.xlu0 %v2292_v48, %s7289_s5  ;;  %vm12461_vm9 = vcmask 547840  }
 0x232   :  { %6863 = vmatprep.subr.bf16.mxu1 %v12442_v5  ;;  %774 = vst [vmem:[#allocation2 + $0xc8] sm:$0x80] %v746_v47  ;;  %775 = vst [vmem:[#allocation2 + $0xd0] sm:$0x80] %v747_v21  ;;  %v12454_v5 = vpack.c.bf16 %v12452_v24, %v12453_v15  ;;  %v12455_v62 = vld [vmem:[#allocation87_spill] sm:$0xff]  ;;  %v1923_v47 = vsel %vm1101_vm6, %v1921_v0, %v1922_v23  ;;  %v442_v24 = vsel %vm12461_vm9, %v10439_v57, %v434_v58  ;;  %v380_v15 = vpop.permute.xlu0 %379  ;;  %vm12464_vm10 = vcmask 695296  }
 0x233   :  { %6725 = vmatpush1.bf16.msra.mxu0 %v12451_v41  ;;  %v12456_v27 = vld [vmem:[#allocation83_spill] sm:$0xff]  ;;  %v10625_v23 = vsub.f32 %v10589_v12, %v12143_v32  ;;  %456 = vst [vmem:[#allocation2 + $0xa0] sm:$0x38] %v442_v24  ;;  %v388_v57 = vsel %vm12464_vm10, %v10400_v14, %v380_v15  ;;  %v12466_v58 = vld [vmem:[#allocation90_spill] sm:$0xff]  ;;  %v2268_v14 = vld [vmem:[%s11952_s0 + $0x68] sm:$0x1]  ;;  %v6874_v25 = vpack.c.bf16 %v9993_v2, %v9968_v56 }
 0x234   :  { %6865 = vmatpush1.bf16.msra.mxu1 %v12454_v5  ;;  %v12457_v19 = vpack.c.bf16 %v12455_v62, %v12456_v27  ;;  %v12458_v21 = vld [vmem:[#allocation79_spill] sm:$0xff]  ;;  %v10630_v5 = vsub.f32 %v10591_v1, %v12144_v13  ;;  %v1830_v62 = vsel %vm1006_vm5, %v1828_v44, %v1829_v39  ;;  %v12465_v27 = vld [vmem:[#allocation98_spill] sm:$0xff]  ;;  %402 = vst [vmem:[#allocation2 + $0xa0] sm:$0x7] %v388_v57  ;;  %vm12477_vm9 = vcmask 531456  }
 0x235   :  { %v12459_v9 = vld [vmem:[#allocation71_spill] sm:$0xff]  ;;  %12462 = vst [vmem:[#allocation8_spill] sm:$0xff] %v10625_v23  ;;  %v12471_v44 = vld [vmem:[#allocation110_spill] sm:$0xff]  ;;  %1938 = vrot.lane.b32.xlu1 %v1923_v47, %s7287_s19  ;;  %v565_v57 = vpop.permute.xlu1 %564  ;;  %1845 = vrot.lane.b32.xlu0 %v1830_v62, %s7285_s9  ;;  %vm12478_vm10 = vcmask 539648  }
 0x236   :  { %6727 = vmatprep.subr.bf16.mxu0 %v12457_v19  ;;  %v12460_v41 = vpack.c.bf16 %v12458_v21, %v12459_v9  ;;  %v2169_v19 = vld [vmem:[%s11952_s0 + $0x38] sm:$0xc0]  ;;  %v2177_v0 = vld [vmem:[%s11952_s0 + $0x78] sm:$0x1]  ;;  %12463 = vst [vmem:[#allocation22_spill] sm:$0xff] %v10630_v5  ;;  %v12467_v21 = vpack.c.bf16 %v12465_v27, %v12466_v58  ;;  %v12468_v9 = vld [vmem:[#allocation74_spill] sm:$0xff]  ;;  %v573_v49 = vsel %vm12477_vm9, %v10527_v33, %v565_v57  ;;  %v496_v47 = vpop.permute.xlu0 %495 }
 0x237   :  { %v2075_v13 = vld [vmem:[%s11952_s0 + $0x38] sm:$0xc0]  ;;  %v2083_v24 = vld [vmem:[%s11952_s0 + $0x78] sm:$0x1]  ;;  %v12472_v39 = vld [vmem:[#allocation106_spill] sm:$0xff]  ;;  %v2215_v27 = vrot.slane %v2169_v19, 2  ;;  %v504_v33 = vsel %vm12478_vm10, %v10489_v45, %v496_v47 }
 0x238   :  { %6867 = vmatprep.subr.bf16.mxu1 %v12460_v41  ;;  %6729 = vmatpush1.bf16.msra.mxu0 %v12467_v21  ;;  %v12469_v41 = vld [vmem:[#allocation72_spill] sm:$0xff]  ;;  %v12473_v15 = vpack.c.bf16 %v12471_v44, %v12472_v39  ;;  %v2216_v58 = vrot.slane %v2177_v0, 2  ;;  %v12474_v21 = vld [vmem:[#allocation101_spill] sm:$0xff]  ;;  %v6732_v44 = vpack.c.bf16 %v9953_v43, %v9938_v3  ;;  %v1968_v39 = vld [vmem:[%s11952_s0 + $0x38] sm:$0xc0]  ;;  %v2121_v62 = vrot.slane %v2075_v13, 5 }
 0x239   :  { %v12470_v32 = vpack.c.bf16 %v12468_v9, %v12469_v41  ;;  %v12475_v9 = vld [vmem:[#allocation93_spill] sm:$0xff]  ;;  %587 = vst [vmem:[#allocation2 + $0xd8] sm:$0xe] %v573_v49  ;;  %v2305_v3 = vrot.slane %v2268_v14, 7  ;;  %v10676_v43 = vld [vmem:[#allocation2 + $0xd0] sm:$0xff]  ;;  %v4832_v13 = vand.u32 4294901760, %v10625_v23  ;;  %2007 = vrot.lane.b32.xlu0 %v1968_v39, %s12388_s23 }
 0x23a   :  { %6731 = vmatprep.subr.bf16.mxu0 %v12473_v15  ;;  %v12476_v41 = vpack.c.bf16 %v12474_v21, %v12475_v9  ;;  %v2390_v19 = vld [vmem:[%s11952_s0 + $0x28] sm:$0xc0]  ;;  %v2398_v0 = vld [vmem:[%s11952_s0 + $0x68] sm:$0x1]  ;;  %v2122_v15 = vrot.slane %v2083_v24, 5  ;;  %12479 = vst [vmem:[#allocation30_spill] sm:$0xff] %v10676_v43  ;;  %v736_v24 = vpop.permute.xlu1 %735  ;;  %v2217_v14 = vsel %vm616_vm1, %v2215_v27, %v2216_v58 }
 0x23b   :  { %6869 = vmatpush1.bf16.msra.mxu1 %v12470_v32  ;;  %v1976_v32 = vld [vmem:[%s11952_s0 + $0x78] sm:$0x1]  ;;  %v10678_v57 = vld [vmem:[#allocation2 + $0xc8] sm:$0xff]  ;;  %518 = vst [vmem:[#allocation2 + $0xd8] ss:$-52 sps:$4 sm:$0xc1] %v504_v33  }
 0x23c   :  { %6871 = vmatprep.subr.bf16.mxu1 %v12476_v41  ;;  %12480 = vst [vmem:[#allocation25_spill] sm:$0xff] %v10678_v57  ;;  %6733 = vmatpush1.bf16.msra.mxu0 %v6732_v44  ;;  %v12481_v21 = vld [vmem:[#allocation103_spill] sm:$0xff]  ;;  %v12482_v9 = vld [vmem:[#allocation94_spill] sm:$0xff]  ;;  %v12148_v49 = vand.u32 4294901760, %v10676_v43  ;;  %v12147_v45 = vand.u32 4294901760, %v10678_v57  ;;  %v2432_v44 = vrot.slane %v2390_v19, 4  ;;  %v2123_v19 = vsel %vm1302_vm12, %v2121_v62, %v2122_v15 }
 0x23d   :  { %v12483_v41 = vpack.c.bf16 %v12481_v21, %v12482_v9  ;;  %3528 = vmatprep.subr.mxu0 %v10277_v17  ;;  %2023 = vrot.lane.b32.xlu1 %v1976_v32, %s12388_s23  ;;  %v2433_v47 = vrot.slane %v2398_v0, 4  ;;  %v2269_v33 = vld [vmem:[%s11952_s0 + $0x70] sm:$0x1]  ;;  %v4838_v56 = vand.u32 4294901760, %v10630_v5  ;;  %v12484_v2 = vld [vmem:[#allocation39_spill] sm:$0xff]  ;;  %vm12485_vm9 = vcmask 1039360   ;;  %v724_v9 = vpop.permute.xlu0 %723 }
 0x23e   :  { %v753_v21 = vsel %vm12485_vm9, %v12484_v2, %v736_v24  ;;  %v6876_v32 = vpack.c.bf16 %v9997_v6, %v9978_v50  ;;  %v10703_v27 = vsub.f32 %v10676_v43, %v12148_v49  ;;  %vm12487_vm10 = vmmov %vm12485_vm9  ;;  %v10714_v39 = vld [vmem:[%s11952_s0 + $0x38] sm:$0xc0]  ;;  %v10719_v50 = vsub.f32 %v10678_v57, %v12147_v45  ;;  %v12489_v0 = vld [vmem:[#allocation4_spill] sm:$0xff]  ;;  %v852_v62 = vpop.permute.xlu1 %851  ;;  %2138 = vrot.lane.b32.xlu0 %v2123_v19, %s12423_s30 }
 0x23f   :  { %6873 = vmatpush1.bf16.msra.mxu1 %v12483_v41  ;;  %781 = vst [vmem:[#allocation2 + $0x100] sm:$0x3] %v753_v21  ;;  %v748_v58 = vsel %vm12487_vm10, %v10575_v36, %v724_v9  ;;  %v2307_v6 = vrot.slane %v2269_v33, 7  ;;  %v4833_v36 = vsub.f32 %v10625_v23, %v4832_v13  ;;  %v2434_v15 = vsel %vm816_vm3, %v2432_v44, %v2433_v47  ;;  %v12490_v2 = vld [vmem:[#allocation125_spill] sm:$0xff]  ;;  %v12491_v21 = vld [vmem:[#allocation40_spill] sm:$0xff]  ;;  %v12550_v1 = vld [vmem:[#allocation126_spill] sm:$0xff] }
 0x240   :  { %6875 = vmatprep.subr.bf16.mxu1 %v6874_v25  ;;  %12486 = vst [vmem:[#allocation11_spill] sm:$0xff] %v10703_v27  ;;  %v2306_v25 = vsel %vm684_vm2, %v2292_v48, %v2305_v3  ;;  %12488 = vst [vmem:[#allocation7_spill] sm:$0xff] %v10719_v50  ;;  %3531 = vmatpush1.msra.mxu0 %v10298_v30  ;;  %v4844_v42 = vand.u32 4294901760, %v10703_v27  ;;  %v4839_v3 = vsub.f32 %v10630_v5, %v4838_v56  ;;  %vm12492_vm9 = vcmask 1031168   ;;  %v2483_v44 = vld [vmem:[%s11952_s0 + $0x28] sm:$0xc0] }
 0x241   :  { %776 = vst [vmem:[#allocation2 + $0xd8] sm:$0x80] %v748_v58  ;;  %6735 = vmatprep.subr.bf16.mxu0 %v12489_v0  ;;  %2232 = vrot.lane.b32.xlu1 %v2217_v14, %s7288_s24  ;;  %v4850_v41 = vand.u32 4294901760, %v10719_v50  ;;  %v862_v9 = vsel %vm12492_vm9, %v12491_v21, %v852_v62  ;;  %v2491_v47 = vld [vmem:[%s11952_s0 + $0x68] sm:$0x1]  ;;  %v12500_v54 = vrot.slane %v10714_v39, 7 }
 0x242   :  { %3573 = vmatmul.mubr.f32.vlgmr.msra.gmra.mrb[0].mxu0 %v12490_v2  ;;  %v4845_v58 = vsub.f32 %v10703_v27, %v4844_v42  ;;  %v10747_v19 = vpack.c.bf16 %v4844_v42, %v4832_v13  ;;  %v12494_v33 = vld [vmem:[#allocation9_spill] sm:$0xff]  ;;  %876 = vst [vmem:[#allocation2 + $0x100] sm:$0x1c] %v862_v9  ;;  %v2391_v48 = vld [vmem:[%s11952_s0 + $0x30] sm:$0xc0]  ;;  %v10756_v45 = vld [vmem:[#allocation2 + $0xa0] sm:$0xff] }
 0x243   :  { %6877 = vmatpush1.bf16.msra.mxu1 %v6876_v32  ;;  %v10737_v32 = vpop.permute.xlu0 %737  ;;  %6737 = vmatpush1.bf16.msra.mxu0 %v12494_v33  ;;  %12495 = vst [vmem:[#allocation38_spill] sm:$0xff] %v10756_v45  ;;  %v4851_v49 = vsub.f32 %v10719_v50, %v4850_v41  ;;  %v10759_v14 = vpack.c.bf16 %v4850_v41, %v4838_v56  ;;  %v12497_v13 = vld [vmem:[#allocation20_spill] sm:$0xff]  ;;  %v12498_v42 = vrot.slane %v10537_v31, 7  ;;  %v12156_v29 = vand.u32 4294901760, %v10756_v45  ;;  %v947_v41 = vpop.permute.xlu1 %946  ;;  %v2577_v31 = vld [vmem:[%s11952_s0 + $0x28] sm:$0xc0] }
 0x244   :  { %12493 = vst [vmem:[#allocation42_spill] sm:$0xff] %v10747_v19  ;;  %4305 = vmatprep.subr.mxu1 %v10332_v55  ;;  %v754_v21 = vsel %vm12487_vm10, %v736_v24, %v10737_v32  ;;  %6739 = vmatprep.subr.bf16.mxu0 %v12497_v13  ;;  %v2399_v24 = vld [vmem:[%s11952_s0 + $0x70] sm:$0x1]  ;;  %v4834_v19 = vand.u32 4294901760, %v4833_v36  ;;  %v4846_v63 = vand.u32 4294901760, %v4845_v58  ;;  %v12499_v56 = vld [vmem:[#allocation12_spill] sm:$0xff] }
 0x245   :  { %12496 = vst [vmem:[#allocation32_spill] sm:$0xff] %v10759_v14  ;;  %782 = vst [vmem:[#allocation2 + $0x108] sm:$0x3] %v754_v21  ;;  %v2308_v9 = vsel %vm684_vm2, %v12498_v42, %v2307_v6  ;;  %2337 = vrot.lane.b32.xlu1 %v2306_v25, %s7289_s5  ;;  %v2525_v21 = vrot.slane %v2483_v44, 1  ;;  %v2526_v14 = vrot.slane %v2491_v47, 1  ;;  %v4840_v6 = vand.u32 4294901760, %v4839_v3  ;;  %2325 = vrot.lane.b32.xlu0 %v12500_v54, %s7289_s5 }
 0x246   :  { %v4852_v42 = vand.u32 4294901760, %v4851_v49  ;;  %v12501_v36 = vld [vmem:[#allocation44_spill] sm:$0xff]  ;;  %vm12502_vm9 = vcmask 1022976   ;;  %v2585_v44 = vld [vmem:[%s11952_s0 + $0x68] sm:$0x1]  ;;  %v10795_v54 = vsub.f32 %v10756_v45, %v12156_v29  ;;  %v10797_v47 = vpack.c.bf16 %v4846_v63, %v4834_v19  ;;  %v12511_v29 = vld [vmem:[#allocation31_spill] sm:$0xff]  ;;  %3669 = vmatprep.mubr.f32.mxu0 %v10219_v22 }
 0x247   :  { %4308 = vmatpush1.msra.mxu1 %v10341_v53  ;;  %v957_v25 = vsel %vm12502_vm9, %v12501_v36, %v947_v41  ;;  %v10781_v58 = vpop.permute.xlu0 %853  ;;  %v2484_v3 = vld [vmem:[%s11952_s0 + $0x30] sm:$0xc0]  ;;  %v2492_v49 = vld [vmem:[%s11952_s0 + $0x70] sm:$0x1]  ;;  %v12505_v36 = vld [vmem:[#allocation29_spill] sm:$0xff]  ;;  %vm12507_vm10 = vcmask 1031168  }
 0x248   :  { %6879 = vmatprep.subr.bf16.mxu1 %v12499_v56  ;;  %4350 = vmatmul.mubr.f32.vlgmr.msra.gmra.mrb[0].mxu1 %v12490_v2  ;;  %12503 = vst [vmem:[#allocation27_spill] sm:$0xff] %v10795_v54  ;;  %12504 = vst [vmem:[#allocation24_spill] sm:$0xff] %v10797_v47  ;;  %v12506_v2 = vld [vmem:[#allocation14_spill] sm:$0xff]  ;;  %v863_v5 = vsel %vm12507_vm10, %v852_v62, %v10781_v58  ;;  %v2435_v50 = vrot.slane %v2391_v48, 4  ;;  %v2436_v26 = vrot.slane %v2399_v24, 4  ;;  %v10803_v18 = vld [vmem:[#allocation2 + $0xd8] sm:$0xff] }
 0x249   :  { %6741 = vmatpush1.bf16.msra.mxu0 %v12505_v36  ;;  %6881 = vmatpush1.bf16.msra.mxu1 %v12506_v2  ;;  %971 = vst [vmem:[#allocation2 + $0x100] sm:$0xe0] %v957_v25  ;;  %12508 = vst [vmem:[#allocation52_spill] sm:$0xff] %v10803_v18  ;;  %v10805_v23 = vpack.c.bf16 %v4852_v42, %v4840_v6  ;;  %v12510_v27 = vld [vmem:[#allocation41_spill] sm:$0xff]  ;;  %v12159_v63 = vand.u32 4294901760, %v10803_v18  ;;  %v5586_v19 = vand.u32 4294901760, %v10795_v54  ;;  %v1042_v25 = vpop.permute.xlu1 %1041 }
 0x24a   :  { %6743 = vmatprep.subr.bf16.mxu0 %v12510_v27  ;;  %6883 = vmatprep.subr.bf16.mxu1 %v12511_v29  ;;  %877 = vst [vmem:[#allocation2 + $0x108] sm:$0x1c] %v863_v5  ;;  %v2619_v52 = vrot.slane %v2577_v31, 6  ;;  %v2620_v62 = vrot.slane %v2585_v44, 6  ;;  %v2528_v48 = vrot.slane %v2484_v3, 1  ;;  %v2529_v24 = vrot.slane %v2492_v49, 1 }
 0x24b   :  { %12509 = vst [vmem:[#allocation46_spill] sm:$0xff] %v10805_v23  ;;  %2451 = vrot.lane.b32.xlu1 %v2434_v15, %s7290_s11  ;;  %2339 = vrot.lane.b32.xlu0 %v2308_v9, %s7289_s5  ;;  %v12512_v6 = vld [vmem:[#allocation45_spill] sm:$0xff]  ;;  %vm12513_vm9 = vcmask 1014784   ;;  %v10816_v38 = vpop.permute.xlu0 %948  ;;  %v2527_v5 = vsel %vm911_vm4, %v2525_v21, %v2526_v14  ;;  %v10826_v31 = vsub.f32 %v10803_v18, %v12159_v63  ;;  %v12515_v44 = vld [vmem:[#allocation51_spill] sm:$0xff]  ;;  %vm12517_vm10 = vcmask 1022976   ;;  %v12519_v49 = vld [vmem:[#allocation54_spill] sm:$0xff] }
 0x24c   :  { %v1052_v42 = vsel %vm12513_vm9, %v12512_v6, %v1042_v25  ;;  %v2671_v15 = vld [vmem:[%s11952_s0 + $0x28] sm:$0xc0]  ;;  %4446 = vmatprep.mubr.f32.mxu1 %v10219_v22  ;;  %v958_v3 = vsel %vm12517_vm10, %v947_v41, %v10816_v38  ;;  %v2437_v14 = vsel %vm816_vm3, %v2435_v50, %v2436_v26  ;;  %v2679_v21 = vld [vmem:[%s11952_s0 + $0x68] sm:$0x1]  ;;  %v12518_v22 = vld [vmem:[#allocation63_spill] sm:$0xff]  ;;  %v5587_v41 = vsub.f32 %v10795_v54, %v5586_v19 }
 0x24d   :  { %12514 = vst [vmem:[#allocation34_spill] sm:$0xff] %v10826_v31  ;;  %6745 = vmatpush1.bf16.msra.mxu0 %v12515_v44  ;;  %v12516_v9 = vld [vmem:[#allocation33_spill] sm:$0xff]  ;;  %1066 = vst [vmem:[#allocation2 + $0x138] sm:$0x7] %v1052_v42  ;;  %v2578_v6 = vld [vmem:[%s11952_s0 + $0x30] sm:$0xc0]  ;;  %v1137_v63 = vpop.permute.xlu1 %1136  ;;  %v2530_v16 = vsel %vm911_vm4, %v2528_v48, %v2529_v24 }
 0x24e   :  { %6885 = vmatpush1.bf16.msra.mxu1 %v12516_v9  ;;  %6747 = vmatprep.subr.bf16.mxu0 %v12518_v22  ;;  %972 = vst [vmem:[#allocation2 + $0x108] sm:$0xe0] %v958_v3  ;;  %v2586_v42 = vld [vmem:[%s11952_s0 + $0x70] sm:$0x1]  ;;  %v5593_v26 = vand.u32 4294901760, %v10826_v31  ;;  %v2621_v3 = vsel %vm1006_vm5, %v2619_v52, %v2620_v62  ;;  %v2713_v51 = vrot.slane %v2671_v15, 3 }
 0x24f   :  { %6887 = vmatprep.subr.bf16.mxu1 %v12519_v49  ;;  %2544 = vrot.lane.b32.xlu1 %v2527_v5, %s12520_s13  ;;  %v12521_v23 = vld [vmem:[#allocation49_spill] sm:$0xff]  ;;  %vm12522_vm9 = vcmask 883712   ;;  %v10854_v47 = vpop.permute.xlu0 %1043  ;;  %v2714_v10 = vrot.slane %v2679_v21, 3  ;;  %v12525_v5 = vld [vmem:[#allocation75_spill] sm:$0xff]  ;;  %v12526_v52 = vld [vmem:[#allocation56_spill] sm:$0xff]  ;;  %vm12527_vm10 = vcmask 1014784  }
 0x250   :  { %2453 = vrot.lane.b32.xlu0 %v2437_v14, %s7290_s11  ;;  %v1147_v34 = vsel %vm12522_vm9, %v12521_v23, %v1137_v63  ;;  %v10856_v20 = vld [vmem:[#allocation2 + $0x100] sm:$0xff]  ;;  %v5594_v50 = vsub.f32 %v10826_v31, %v5593_v26  ;;  %v10859_v54 = vpack.c.bf16 %v5593_v26, %v5586_v19  ;;  %v1053_v62 = vsel %vm12527_vm10, %v1042_v25, %v10854_v47  ;;  %v12528_v15 = vld [vmem:[#allocation86_spill] sm:$0xff]  ;;  %v2587_v11 = vld [vmem:[%s11952_s0 + $0x78] sm:$0x1] }
 0x251   :  { %12523 = vst [vmem:[#allocation28_spill] sm:$0xff] %v10856_v20  ;;  %6749 = vmatpush1.bf16.msra.mxu0 %v12525_v5  ;;  %1161 = vst [vmem:[#allocation2 + $0x138] sm:$0x38] %v1147_v34  ;;  %v2622_v48 = vrot.slane %v2578_v6, 6  ;;  %v2623_v24 = vrot.slane %v2586_v42, 6  ;;  %v12166_v23 = vand.u32 4294901760, %v10856_v20  ;;  %v1207_v25 = vpop.permute.xlu1 %1206  ;;  %v2715_v31 = vsel %vm1101_vm6, %v2713_v51, %v2714_v10 }
 0x252   :  { %12524 = vst [vmem:[#allocation64_spill] sm:$0xff] %v10859_v54  ;;  %6889 = vmatpush1.bf16.msra.mxu1 %v12526_v52  ;;  %6751 = vmatprep.subr.bf16.mxu0 %v12528_v15  ;;  %v12529_v14 = vld [vmem:[#allocation78_spill] sm:$0xff]  ;;  %1067 = vst [vmem:[#allocation2 + $0x140] sm:$0x7] %v1053_v62  ;;  %v5588_v21 = vand.u32 4294901760, %v5587_v41  ;;  %v5595_v26 = vand.u32 4294901760, %v5594_v50 }
 0x253   :  { %6891 = vmatprep.subr.bf16.mxu1 %v12529_v14  ;;  %v2672_v19 = vld [vmem:[%s11952_s0 + $0x30] sm:$0xc0]  ;;  %v2680_v34 = vld [vmem:[%s11952_s0 + $0x70] sm:$0x1]  ;;  %2638 = vrot.lane.b32.xlu1 %v2621_v3, %s12530_s4  ;;  %v10878_v6 = vsub.f32 %v10856_v20, %v12166_v23  ;;  %v10883_v54 = vpop.permute.xlu0 %1138  ;;  %v12534_v41 = vld [vmem:[#allocation97_spill] sm:$0xff]  ;;  %v2624_v23 = vsel %vm1006_vm5, %v2622_v48, %v2623_v24  ;;  %vm12540_vm10 = vcmask 1039360  }
 0x254   :  { %2546 = vrot.lane.b32.xlu0 %v2530_v16, %s12520_s13  ;;  %v12532_v42 = vld [vmem:[#allocation50_spill] sm:$0xff]  ;;  %v10886_v35 = vpack.c.bf16 %v5595_v26, %v5588_v21  ;;  %v12535_v50 = vld [vmem:[#allocation81_spill] sm:$0xff]  ;;  %v1148_v3 = vsel %vm12522_vm9, %v1137_v63, %v10883_v54  ;;  %v2716_v16 = vrot.slane %v2672_v19, 3  ;;  %v2717_v18 = vrot.slane %v2680_v34, 3  ;;  %v12538_v20 = vld [vmem:[#allocation100_spill] sm:$0xff] }
 0x255   :  { %12531 = vst [vmem:[#allocation60_spill] sm:$0xff] %v10878_v6  ;;  %v1232_v62 = vsel %vm64_vm8, %v12532_v42, %v1207_v25  ;;  %6753 = vmatpush1.bf16.msra.mxu0 %v12534_v41  ;;  %v10893_v45 = vld [vmem:[#allocation2 + $0x108] sm:$0xff]  ;;  %1162 = vst [vmem:[#allocation2 + $0x140] sm:$0x38] %v1148_v3  ;;  %v2270_v51 = vld [vmem:[%s11952_s0 + $0x78] sm:$0x1]  ;;  %v740_v63 = vpop.permute.xlu1 %739 }
 0x256   :  { %12533 = vst [vmem:[#allocation55_spill] sm:$0xff] %v10886_v35  ;;  %6893 = vmatpush1.bf16.msra.mxu1 %v12535_v50  ;;  %1260 = vst [vmem:[#allocation2 + $0x138] sm:$0xc0] %v1232_v62  ;;  %v12537_v42 = vld [vmem:[#allocation109_spill] sm:$0xff]  ;;  %v12170_v10 = vand.u32 4294901760, %v10893_v45  ;;  %v755_v48 = vsel %vm12540_vm10, %v10737_v32, %v740_v63  ;;  %v12542_v32 = vld [vmem:[#allocation116_spill] sm:$0xff]  ;;  %v2718_v62 = vsel %vm1101_vm6, %v2716_v16, %v2717_v18 }
 0x257   :  { %12536 = vst [vmem:[#allocation48_spill] sm:$0xff] %v10893_v45  ;;  %6755 = vmatprep.subr.bf16.mxu0 %v12537_v42  ;;  %6895 = vmatprep.subr.bf16.mxu1 %v12538_v20  ;;  %v10905_v24 = vpop.permute.xlu0 %1208  ;;  %v2765_v19 = vld [vmem:[%s11952_s0 + $0x28] sm:$0xc0]  ;;  %v2485_v34 = vld [vmem:[%s11952_s0 + $0x38] sm:$0xc0]  ;;  %v12543_v21 = vld [vmem:[#allocation102_spill] sm:$0xff] }
 0x258   :  { %2732 = vrot.lane.b32.xlu1 %v2715_v31, %s12539_s6  ;;  %2640 = vrot.lane.b32.xlu0 %v2624_v23, %s12530_s4  ;;  %v2493_v31 = vld [vmem:[%s11952_s0 + $0x78] sm:$0x1]  ;;  %v10919_v23 = vsub.f32 %v10893_v45, %v12170_v10  ;;  %783 = vst [vmem:[#allocation2 + $0x110] sm:$0x3] %v755_v48  ;;  %v1233_v26 = vsel %vm64_vm8, %v1207_v25, %v10905_v24  ;;  %v2309_v3 = vrot.slane %v2270_v51, 7  ;;  %v12544_v63 = vld [vmem:[#allocation118_spill] sm:$0xff] }
 0x259   :  { %6757 = vmatpush1.bf16.msra.mxu0 %v12542_v32  ;;  %1261 = vst [vmem:[#allocation2 + $0x140] sm:$0xc0] %v1233_v26  ;;  %v951_v10 = vpop.permute.xlu1 %950  ;;  %v2531_v35 = vrot.slane %v2485_v34, 1  ;;  %v2532_v45 = vrot.slane %v2493_v31, 1  ;;  %v2392_v48 = vld [vmem:[%s11952_s0 + $0x38] sm:$0xc0] }
 0x25a   :  { %12541 = vst [vmem:[#allocation26_spill] sm:$0xff] %v10919_v23  ;;  %6897 = vmatpush1.bf16.msra.mxu1 %v12543_v21  ;;  %3628 = vmatprep.subr.mxu0 %v10067_v37  ;;  %v2400_v25 = vld [vmem:[%s11952_s0 + $0x78] sm:$0x1]  ;;  %vm12545_vm9 = vcmask 1022976   ;;  %v2673_v51 = vld [vmem:[%s11952_s0 + $0x38] sm:$0xc0] }
 0x25b   :  { %6899 = vmatprep.subr.bf16.mxu1 %v12544_v63  ;;  %v959_v18 = vsel %vm12545_vm9, %v10816_v38, %v951_v10  ;;  %v856_v16 = vpop.permute.xlu0 %855  ;;  %v12546_v31 = vld [vmem:[#allocation119_spill] sm:$0xff]  ;;  %vm12547_vm10 = vcmask 1031168   ;;  %v12548_v38 = vrot.slane %v10714_v39, 7  ;;  %v4862_v57 = vand.u32 4294901760, %v10878_v6  ;;  %v2766_v39 = vld [vmem:[%s11952_s0 + $0x30] sm:$0xc0] }
 0x25c   :  { %2802 = vrot.lane.b32.xlu1 %v2765_v19, %s7303_s25  ;;  %2734 = vrot.lane.b32.xlu0 %v2718_v62, %s12539_s6  ;;  %v2681_v19 = vld [vmem:[%s11952_s0 + $0x78] sm:$0x1]  ;;  %973 = vst [vmem:[#allocation2 + $0x110] sm:$0xe0] %v959_v18  ;;  %v864_v26 = vsel %vm12547_vm10, %v10781_v58, %v856_v16  ;;  %v2579_v62 = vld [vmem:[%s11952_s0 + $0x38] sm:$0xc0]  ;;  %v2533_v7 = vsel %vm911_vm4, %v2531_v35, %v2532_v45 }
 0x25d   :  { %v10944_v34 = vld [vmem:[#allocation2 + $0x138] sm:$0xff]  ;;  %3630 = vmatpush1.msra.mxu0 %v10164_v28  ;;  %v2310_v10 = vsel %vm684_vm2, %v12548_v38, %v2309_v3  ;;  %v12549_v18 = vld [vmem:[#allocation5_spill] sm:$0xff]  ;;  %878 = vst [vmem:[#allocation2 + $0x110] sm:$0x1c] %v864_v26  ;;  %v2438_v58 = vrot.slane %v2392_v48, 4  ;;  %v2439_v3 = vrot.slane %v2400_v25, 4  ;;  %v1141_v38 = vpop.permute.xlu1 %1140  ;;  %v4863_v45 = vsub.f32 %v10878_v6, %v4862_v57 }
 0x25e   :  { %6901 = vmatpush1.bf16.msra.mxu1 %v12546_v31  ;;  %6759 = vmatprep.subr.bf16.mxu0 %v12549_v18  ;;  %v12551_v16 = vld [vmem:[#allocation15_spill] sm:$0xff]  ;;  %v2719_v43 = vrot.slane %v2673_v51, 3  ;;  %v12552_v12 = vand.u32 4294901760, %v10944_v34  ;;  %vm12555_vm2 = vcmask 883712   ;;  %v2625_v46 = vrot.slane %v2579_v62, 6 }
 0x25f   :  { %3673 = vmatmul.mubr.f32.vlgmr.msra.gmra.mrb[0].mxu0 %v12550_v1  ;;  %4405 = vmatprep.subr.mxu1 %v10199_v4  ;;  %v12554_v26 = vld [vmem:[#allocation23_spill] sm:$0xff]  ;;  %v1149_v48 = vsel %vm12555_vm2, %v10883_v54, %v1141_v38  ;;  %v1046_v25 = vpop.permute.xlu0 %1045  ;;  %v2626_v4 = vrot.slane %v2587_v11, 6  ;;  %vm12556_vm4 = vcmask 1014784   ;;  %v2440_v11 = vsel %vm816_vm3, %v2438_v58, %v2439_v3  ;;  %v12570_v54 = vld [vmem:[#allocation62_spill] sm:$0xff] }
 0x260   :  { %6761 = vmatpush1.bf16.msra.mxu0 %v12551_v16  ;;  %v10972_v18 = vsub.f32 %v10944_v34, %v12552_v12  ;;  %2341 = vrot.lane.b32.xlu1 %v2310_v10, %s7289_s5  ;;  %v2720_v16 = vrot.slane %v2681_v19, 3  ;;  %1163 = vst [vmem:[#allocation2 + $0x148] sm:$0x38] %v1149_v48  ;;  %v1054_v35 = vsel %vm12556_vm4, %v10854_v47, %v1046_v25  ;;  %v10982_v12 = vld [vmem:[#allocation2 + $0x140] sm:$0xff]  ;;  %v12557_v19 = vld [vmem:[#allocation17_spill] sm:$0xff]  ;;  %v4856_v47 = vand.u32 4294901760, %v10919_v23 }
 0x261   :  { %6763 = vmatprep.subr.bf16.mxu0 %v12554_v26  ;;  %2804 = vrot.lane.b32.xlu0 %v2766_v39, %s7303_s25  ;;  %1068 = vst [vmem:[#allocation2 + $0x148] sm:$0x7] %v1054_v35  ;;  %v12180_v10 = vand.u32 4294901760, %v10982_v12  ;;  %v12558_v62 = vld [vmem:[#allocation35_spill] sm:$0xff]  ;;  %v12559_v39 = vld [vmem:[#allocation16_spill] sm:$0xff]  ;;  %v1223_v38 = vpop.permute.xlu1 %1222  ;;  %v12562_v35 = vld [vmem:[#allocation61_spill] sm:$0xff] }
 0x262   :  { %12553 = vst [vmem:[#allocation76_spill] sm:$0xff] %v10972_v18  ;;  %4407 = vmatpush1.msra.mxu1 %v10210_v61  ;;  %v4874_v51 = vand.u32 4294901760, %v10972_v18  ;;  %v12561_v25 = vld [vmem:[#allocation43_spill] sm:$0xff]  ;;  %v1239_v58 = vsel %vm64_vm8, %v12562_v35, %v1223_v38  ;;  %vm12579_vm3 = vcmask 859136   ;;  %vm12612_vm10 = vcmask 703488  }
 0x263   :  { %6903 = vmatprep.subr.bf16.mxu1 %v12557_v19  ;;  %4450 = vmatmul.mubr.f32.vlgmr.msra.gmra.mrb[0].mxu1 %v12550_v1  ;;  %v1211_v3 = vpop.permute.xlu0 %1210  ;;  %v2721_v19 = vsel %vm1101_vm6, %v2719_v43, %v2720_v16  ;;  %1267 = vst [vmem:[#allocation2 + $0x170] sm:$0x1] %v1239_v58  ;;  %v2872_v43 = vld [vmem:[%s11952_s0 + $0x28] sm:$0xc0]  ;;  %v2880_v16 = vld [vmem:[%s11952_s0 + $0x68] sm:$0x1]  ;;  %vm12613_vm2 = vmmov %vm12612_vm10 }
 0x264   :  { %6765 = vmatpush1.bf16.msra.mxu0 %v12558_v62  ;;  %6905 = vmatpush1.bf16.msra.mxu1 %v12559_v39  ;;  %v4875_v26 = vsub.f32 %v10972_v18, %v4874_v51  ;;  %v10996_v48 = vpack.c.bf16 %v4874_v51, %v4862_v57  ;;  %v11006_v62 = vsub.f32 %v10982_v12, %v12180_v10  ;;  %v12564_v39 = vld [vmem:[#allocation36_spill] sm:$0xff]  ;;  %v11013_v51 = vld [vmem:[#allocation2 + $0x110] sm:$0xff]  ;;  %v12567_v58 = vld [vmem:[#allocation37_spill] sm:$0xff]  ;;  %vm12599_vm6 = vcmask 719872  }
 0x265   :  { %6767 = vmatprep.subr.bf16.mxu0 %v12561_v25  ;;  %2548 = vrot.lane.b32.xlu1 %v2533_v7, %s12520_s13  ;;  %v1234_v57 = vsel %vm64_vm8, %v10905_v24, %v1211_v3  ;;  %v2627_v7 = vsel %vm1006_vm5, %v2625_v46, %v2626_v4  ;;  %12565 = vst [vmem:[#allocation47_spill] sm:$0xff] %v11013_v51  ;;  %v4864_v25 = vand.u32 4294901760, %v4863_v45  ;;  %v1338_v3 = vpop.permute.xlu1 %1337  ;;  %v12575_v1 = vld [vmem:[#allocation80_spill] sm:$0xff]  ;;  %v12576_v6 = vld [vmem:[#allocation59_spill] sm:$0xff]  ;;  %vm12588_vm5 = vmmov %vm12579_vm3  ;;  %s12592_s13 = smov 44   ;;  %vm12625_vm4 = vcmask 695296  }
 0x266   :  { %12560 = vst [vmem:[#allocation68_spill] sm:$0xff] %v10996_v48  ;;  %12563 = vst [vmem:[#allocation57_spill] sm:$0xff] %v11006_v62  ;;  %6907 = vmatprep.subr.bf16.mxu1 %v12564_v39  ;;  %2455 = vrot.lane.b32.xlu0 %v2440_v11, %s7290_s11  ;;  %v4876_v35 = vand.u32 4294901760, %v4875_v26  ;;  %v11021_v11 = vld [vmem:[#allocation2 + $0x2c0] sm:$0xff]  ;;  %v4857_v46 = vsub.f32 %v10919_v23, %v4856_v47  ;;  %v4868_v24 = vand.u32 4294901760, %v11006_v62  ;;  %v12566_v26 = vld [vmem:[#allocation53_spill] sm:$0xff] }
 0x267   :  { %1262 = vst [vmem:[#allocation2 + $0x148] sm:$0xc0] %v1234_v57  ;;  %3821 = vmatprep.mubr.f32.mxu0 %v11021_v11  ;;  %4598 = vmatprep.mubr.f32.mxu1 %v11021_v11  ;;  %v12569_v57 = vld [vmem:[#allocation65_spill] sm:$0xff]  ;;  %v1347_v10 = vsel %vm126_vm7, %v12570_v54, %v1338_v3  ;;  %v11038_v4 = vpop.permute.xlu0 %1224  ;;  %v12571_v48 = vand.u32 4294901760, %v11013_v51 }
 0x268   :  { %6769 = vmatpush1.bf16.msra.mxu0 %v12566_v26  ;;  %6909 = vmatpush1.bf16.msra.mxu1 %v12567_v58  ;;  %v11032_v39 = vpack.c.bf16 %v4876_v35, %v4864_v25  ;;  %v4869_v26 = vsub.f32 %v11006_v62, %v4868_v24  ;;  %v12573_v58 = vld [vmem:[#allocation58_spill] sm:$0xff]  ;;  %1361 = vst [vmem:[#allocation2 + $0x170] sm:$0xe] %v1347_v10  ;;  %v2773_v54 = vld [vmem:[%s11952_s0 + $0x68] sm:$0x1]  ;;  %v2915_v35 = vrot.slane %v2880_v16, 5 }
 0x269   :  { %6771 = vmatprep.subr.bf16.mxu0 %v12569_v57  ;;  %2736 = vrot.lane.b32.xlu1 %v2721_v19, %s12539_s6  ;;  %v11043_v45 = vsub.f32 %v11013_v51, %v12571_v48  ;;  %v1240_v19 = vsel %vm64_vm8, %v1223_v38, %v11038_v4  ;;  %v2767_v25 = vld [vmem:[%s11952_s0 + $0x38] sm:$0xc0]  ;;  %v2914_v48 = vrot.slane %v2872_v43, 5  ;;  %v11056_v57 = vpack.c.bf16 %v4868_v24, %v4856_v47  ;;  %v2966_v10 = vld [vmem:[%s11952_s0 + $0x28] sm:$0xc0]  ;;  %v1431_v18 = vpop.permute.xlu1 %1430  ;;  %v12578_v24 = vld [vmem:[#allocation66_spill] sm:$0xff] }
 0x26a   :  { %12568 = vst [vmem:[#allocation87_spill] sm:$0xff] %v11032_v39  ;;  %6911 = vmatprep.subr.bf16.mxu1 %v12573_v58  ;;  %2642 = vrot.lane.b32.xlu0 %v2627_v7, %s12530_s4  ;;  %1268 = vst [vmem:[#allocation2 + $0x178] sm:$0x1] %v1240_v19  ;;  %v2974_v38 = vld [vmem:[%s11952_s0 + $0x68] sm:$0x1]  ;;  %v4858_v7 = vand.u32 4294901760, %v4857_v46  ;;  %v1440_v46 = vsel %vm12579_vm3, %v12578_v24, %v1431_v18 }
 0x26b   :  { %12572 = vst [vmem:[#allocation83_spill] sm:$0xff] %v11043_v45  ;;  %12574 = vst [vmem:[#allocation79_spill] sm:$0xff] %v11056_v57  ;;  %v4870_v58 = vand.u32 4294901760, %v4869_v26  ;;  %v2873_v47 = vld [vmem:[%s11952_s0 + $0x30] sm:$0xc0]  ;;  %v12577_v16 = vld [vmem:[#allocation89_spill] sm:$0xff]  ;;  %v11076_v26 = vpop.permute.xlu0 %1339  ;;  %v2916_v57 = vsel %vm1302_vm12, %v2914_v48, %v2915_v35 }
 0x26c   :  { %6773 = vmatpush1.bf16.msra.mxu0 %v12575_v1  ;;  %6913 = vmatpush1.bf16.msra.mxu1 %v12576_v6  ;;  %v2881_v43 = vld [vmem:[%s11952_s0 + $0x70] sm:$0x1]  ;;  %1454 = vst [vmem:[#allocation2 + $0x170] sm:$0x70] %v1440_v46  ;;  %v1348_v19 = vsel %vm126_vm7, %v1338_v3, %v11076_v26  ;;  %v3009_v23 = vrot.slane %v2974_v38, 2  ;;  %v12583_v46 = vld [vmem:[#allocation99_spill] sm:$0xff] }
 0x26d   :  { %6775 = vmatprep.subr.bf16.mxu0 %v12577_v16  ;;  %2818 = vrot.lane.b32.xlu1 %v2773_v54, %s7303_s25  ;;  %v11078_v1 = vpack.c.bf16 %v4870_v58, %v4858_v7  ;;  %v12581_v6 = vld [vmem:[#allocation82_spill] sm:$0xff]  ;;  %v3008_v16 = vrot.slane %v2966_v10, 2  ;;  %1362 = vst [vmem:[#allocation2 + $0x178] sm:$0xe] %v1348_v19  ;;  %v2917_v58 = vrot.slane %v2873_v47, 5  ;;  %v2918_v24 = vrot.slane %v2881_v43, 5  ;;  %v1524_v48 = vpop.permute.xlu1 %1523 }
 0x26e   :  { %6915 = vmatprep.subr.bf16.mxu1 %v12581_v6  ;;  %2806 = vrot.lane.b32.xlu0 %v2767_v25, %s7303_s25  ;;  %v11085_v54 = vld [vmem:[#allocation2 + $0x148] sm:$0xff]  ;;  %v2774_v7 = vld [vmem:[%s11952_s0 + $0x70] sm:$0x1]  ;;  %v5600_v25 = vand.u32 4294901760, %v11043_v45  ;;  %v12585_v35 = vld [vmem:[#allocation111_spill] sm:$0xff] }
 0x26f   :  { %12580 = vst [vmem:[#allocation71_spill] sm:$0xff] %v11078_v1  ;;  %12582 = vst [vmem:[#allocation98_spill] sm:$0xff] %v11085_v54  ;;  %v12186_v6 = vand.u32 4294901760, %v11085_v54  ;;  %v12584_v3 = vld [vmem:[#allocation77_spill] sm:$0xff]  ;;  %v12586_v10 = vld [vmem:[#allocation67_spill] sm:$0xff]  ;;  %v11098_v19 = vpop.permute.xlu0 %1432 }
 0x270   :  { %6777 = vmatpush1.bf16.msra.mxu0 %v12583_v46  ;;  %6917 = vmatpush1.bf16.msra.mxu1 %v12584_v3  ;;  %v1550_v38 = vsel %vm1545_vm13, %v12586_v10, %v1524_v48  ;;  %v2967_v47 = vld [vmem:[%s11952_s0 + $0x30] sm:$0xc0]  ;;  %v2975_v43 = vld [vmem:[%s11952_s0 + $0x70] sm:$0x1]  ;;  %v12587_v3 = vld [vmem:[#allocation104_spill] sm:$0xff]  ;;  %v2919_v10 = vsel %vm1302_vm12, %v2917_v58, %v2918_v24 }
 0x271   :  { %6779 = vmatprep.subr.bf16.mxu0 %v12585_v35  ;;  %2933 = vrot.lane.b32.xlu1 %v2916_v57, %s7305_s15  ;;  %v11109_v46 = vsub.f32 %v11085_v54, %v12186_v6  ;;  %1578 = vst [vmem:[#allocation2 + $0x170] sm:$0x80] %v1550_v38  ;;  %v1441_v57 = vsel %vm12588_vm5, %v1431_v18, %v11098_v19  ;;  %v2968_v62 = vld [vmem:[%s11952_s0 + $0x38] sm:$0xc0]  ;;  %v2976_v6 = vld [vmem:[%s11952_s0 + $0x78] sm:$0x1] }
 0x272   :  { %6919 = vmatprep.subr.bf16.mxu1 %v12587_v3  ;;  %2820 = vrot.lane.b32.xlu0 %v2774_v7, %s7303_s25  ;;  %v3010_v35 = vsel %vm616_vm1, %v3008_v16, %v3009_v23  ;;  %1455 = vst [vmem:[#allocation2 + $0x178] sm:$0x70] %v1441_v57  ;;  %v5601_v3 = vsub.f32 %v11043_v45, %v5600_v25  ;;  %v12589_v38 = vld [vmem:[#allocation117_spill] sm:$0xff]  ;;  %v1540_v16 = vpop.permute.xlu1 %1539  ;;  %v3011_v58 = vrot.slane %v2967_v47, 2  ;;  %v3012_v24 = vrot.slane %v2975_v43, 2 }
 0x273   :  { %v5607_v7 = vand.u32 4294901760, %v11109_v46  ;;  %v12590_v23 = vld [vmem:[#allocation105_spill] sm:$0xff]  ;;  %v12591_v57 = vand.u32 4294901760, %v10277_v17  ;;  %v11134_v54 = vpop.permute.xlu0 %1525  ;;  %v2874_v18 = vld [vmem:[%s11952_s0 + $0x38] sm:$0xc0]  ;;  %v12595_v17 = vld [vmem:[#allocation120_spill] sm:$0xff] }
 0x274   :  { %6781 = vmatpush1.bf16.msra.mxu0 %v12589_v38  ;;  %6921 = vmatpush1.bf16.msra.mxu1 %v12590_v23  ;;  %v12593_v39 = vld [vmem:[#allocation69_spill] sm:$0xff]  ;;  %v2882_v38 = vld [vmem:[%s11952_s0 + $0x78] sm:$0x1]  ;;  %v3014_v23 = vrot.slane %v2968_v62, 2  ;;  %v5602_v45 = vand.u32 4294901760, %v5601_v3  ;;  %vm12639_vm5 = vcmask 687104  }
 0x275   :  { %3778 = vmatprep.subr.mxu0 %v12591_v57  ;;  %3027 = vrot.lane.b32.xlu1 %v3010_v35, %s12592_s13  ;;  %v1557_v1 = vsel %vm1545_vm13, %v12593_v39, %v1540_v16  ;;  %v5608_v47 = vsub.f32 %v11109_v46, %v5607_v7  ;;  %v11143_v43 = vpack.c.bf16 %v5607_v7, %v5600_v25  ;;  %v2775_v35 = vld [vmem:[%s11952_s0 + $0x78] sm:$0x1]  ;;  %v3015_v57 = vrot.slane %v2976_v6, 2  ;;  %v12597_v7 = vld [vmem:[#allocation121_spill] sm:$0xff] }
 0x276   :  { %6923 = vmatprep.subr.bf16.mxu1 %v12595_v17  ;;  %2935 = vrot.lane.b32.xlu0 %v2919_v10, %s7305_s15  ;;  %1585 = vst [vmem:[#allocation2 + $0x1a8] sm:$0x3] %v1557_v1  ;;  %v1551_v39 = vsel %vm1545_vm13, %v1524_v48, %v11134_v54  ;;  %v12596_v25 = vand.u32 4294901760, %v10298_v30  ;;  %v3013_v10 = vsel %vm616_vm1, %v3011_v58, %v3012_v24  ;;  %v1655_v1 = vpop.permute.xlu1 %1654  ;;  %v2920_v17 = vrot.slane %v2874_v18, 5  ;;  %v12598_v48 = vld [vmem:[#allocation70_spill] sm:$0xff] }
 0x277   :  { %12594 = vst [vmem:[#allocation90_spill] sm:$0xff] %v11143_v43  ;;  %1579 = vst [vmem:[#allocation2 + $0x178] sm:$0x80] %v1551_v39  ;;  %v5609_v51 = vand.u32 4294901760, %v5608_v47  ;;  %v2921_v43 = vrot.slane %v2882_v38, 5  ;;  %v1665_v62 = vsel %vm12599_vm6, %v12598_v48, %v1655_v1  ;;  %v1542_v6 = vpop.permute.xlu0 %1541  ;;  %v12600_v30 = vand.u32 4294901760, %v10332_v55 }
 0x278   :  { %3782 = vmatpush1.msra.mxu0 %v12596_v25  ;;  %6925 = vmatpush1.bf16.msra.mxu1 %v12597_v7  ;;  %v11160_v3 = vld [vmem:[#allocation2 + $0x170] sm:$0xff]  ;;  %1679 = vst [vmem:[#allocation2 + $0x1a8] sm:$0x1c] %v1665_v62  ;;  %v1558_v18 = vsel %vm1545_vm13, %v1540_v16, %v1542_v6 }
 0x279   :  { %6783 = vmatprep.subr.bf16.mxu0 %v12489_v0  ;;  %2822 = vrot.lane.b32.xlu1 %v2775_v35, %s7303_s25  ;;  %v11162_v47 = vpack.c.bf16 %v5609_v51, %v5602_v45  ;;  %v3016_v0 = vsel %vm616_vm1, %v3014_v23, %v3015_v57  ;;  %v4730_v58 = vand.u32 4294901760, %v11160_v3  ;;  %1586 = vst [vmem:[#allocation2 + $0x1b0] sm:$0x3] %v1558_v18  ;;  %v12601_v51 = vand.u32 4294901760, %v10341_v53 }
 0x27a   :  { %3823 = vmatmul.mubr.f32.vlgmr.msra.gmra.mrb[0].mxu0 %v12395_v8  ;;  %4555 = vmatprep.subr.mxu1 %v12600_v30  ;;  %v2922_v55 = vsel %vm1302_vm12, %v2920_v17, %v2921_v43  ;;  %v1749_v45 = vpop.permute.xlu1 %1748  ;;  %vm12603_vm1 = vcmask 711680   ;;  %vm12604_vm12 = vmmov %vm12599_vm6  ;;  %v7309_v18 = vmov 2  }
 0x27b   :  { %6785 = vmatpush1.bf16.msra.mxu0 %v12494_v33  ;;  %3029 = vrot.lane.b32.xlu0 %v3013_v10, %s12592_s13  ;;  %v11179_v16 = vsub.f32 %v11160_v3, %v4730_v58  ;;  %v12602_v33 = vld [vmem:[#allocation73_spill] sm:$0xff]  ;;  %v11185_v38 = vpop.permute.xlu0 %1656  ;;  %vm12605_vm9 = vmmov %vm12603_vm1 }
 0x27c   :  { %6787 = vmatprep.subr.bf16.mxu0 %v12497_v13  ;;  %4559 = vmatpush1.msra.mxu1 %v12601_v51  ;;  %v1758_v24 = vsel %vm12603_vm1, %v12602_v33, %v1749_v45  ;;  %v1666_v53 = vsel %vm12604_vm12, %v1655_v1, %v11185_v38  ;;  %v12611_v33 = vld [vmem:[#allocation84_spill] sm:$0xff]  ;;  %vm12650_vm12 = vmmov %vm12639_vm5 }
 0x27d   :  { %3031 = vrot.lane.b32.xlu1 %v3016_v0, %s12592_s13  ;;  %6927 = vmatprep.subr.bf16.mxu1 %v12499_v56  ;;  %1772 = vst [vmem:[#allocation2 + $0x1a8] sm:$0xe0] %v1758_v24  ;;  %1680 = vst [vmem:[#allocation2 + $0x1b0] sm:$0x1c] %v1666_v53  ;;  %v4886_v25 = vand.u32 4294901760, %v11179_v16  ;;  %v12615_v53 = vand.u32 4294901760, %v10388_v59 }
 0x27e   :  { %4600 = vmatmul.mubr.f32.vlgmr.msra.gmra.mrb[0].mxu1 %v12395_v8  ;;  %3919 = vmatprep.mubr.f32.mxu0 %v11021_v11  ;;  %v11191_v13 = vld [vmem:[#allocation2 + $0x178] sm:$0xff]  ;;  %v1227_v43 = vpop.permute.xlu1 %1226  ;;  %v12619_v59 = vld [vmem:[#allocation129_spill] sm:$0xff] }
 0x27f   :  { %6789 = vmatpush1.bf16.msra.mxu0 %v12505_v36  ;;  %2937 = vrot.lane.b32.xlu0 %v2922_v55, %s7305_s15  ;;  %v4728_v56 = vand.u32 4294901760, %v11191_v13  ;;  %v1241_v39 = vsel %vm64_vm8, %v11038_v4, %v1227_v43  ;;  %v1751_v35 = vpop.permute.xlu0 %1750  ;;  %vm12606_vm8 = vmmov %vm12579_vm3 }
 0x280   :  { %6791 = vmatprep.subr.bf16.mxu0 %v12510_v27  ;;  %6929 = vmatpush1.bf16.msra.mxu1 %v12506_v2  ;;  %1269 = vst [vmem:[#allocation2 + $0x180] sm:$0x1] %v1241_v39  ;;  %v1759_v23 = vsel %vm12605_vm9, %v1749_v45, %v1751_v35  ;;  %vm12626_vm3 = vmmov %vm12625_vm4 }
 0x281   :  { %6931 = vmatprep.subr.bf16.mxu1 %v12511_v29  ;;  %4696 = vmatprep.mubr.f32.mxu1 %v11021_v11  ;;  %v11205_v36 = vsub.f32 %v11191_v13, %v4728_v56  ;;  %1773 = vst [vmem:[#allocation2 + $0x1b0] sm:$0xe0] %v1759_v23  ;;  %v12616_v23 = vand.u32 4294901760, %v10265_v40  ;;  %vm12651_vm9 = vmmov %vm12639_vm5 }
 0x282   :  { %v1435_v29 = vpop.permute.xlu1 %1434  ;;  %7276 = vset.pattern.permute.xlu1 %v7309_v18 }
 0x283   :  { %6793 = vmatpush1.bf16.msra.mxu0 %v12515_v44  ;;  %v1442_v27 = vsel %vm12606_vm8, %v11098_v19, %v1435_v29  ;;  %v1342_v2 = vpop.permute.xlu0 %1341  ;;  %v4880_v10 = vand.u32 4294901760, %v11205_v36  ;;  %v12617_v29 = vld [vmem:[#allocation132_spill] sm:$0xff]  ;;  %vm12657_vm8 = vcmask 556032  }
 0x284   :  { %6795 = vmatprep.subr.bf16.mxu0 %v12518_v22  ;;  %6933 = vmatpush1.bf16.msra.mxu1 %v12516_v9  ;;  %v11214_v4 = vld [vmem:[#allocation2 + $0x1a8] sm:$0xff]  ;;  %1456 = vst [vmem:[#allocation2 + $0x180] sm:$0x70] %v1442_v27  ;;  %v1349_v57 = vsel %vm126_vm7, %v11076_v26, %v1342_v2  ;;  %vm12608_vm7 = vmmov %vm12603_vm1  ;;  %v12620_v2 = vld [vmem:[#allocation18_spill] sm:$0xff]  ;;  %vm7308_vm1 = vmmov 0  }
 0x285   :  { %6935 = vmatprep.subr.bf16.mxu1 %v12519_v49  ;;  %v4734_v44 = vand.u32 4294901760, %v11214_v4  ;;  %1363 = vst [vmem:[#allocation2 + $0x180] sm:$0xe] %v1349_v57  ;;  %v4881_v30 = vsub.f32 %v11205_v36, %v4880_v10  ;;  %v12621_v57 = vand.u32 4294901760, %v12620_v2 }
 0x286   :  { %v1544_v9 = vpop.permute.xlu1 %1543 }
 0x287   :  { %6797 = vmatpush1.bf16.msra.mxu0 %v12525_v5  ;;  %v11226_v22 = vsub.f32 %v11214_v4, %v4734_v44  ;;  %v1559_v49 = vsel %vm1545_vm13, %v1542_v6, %v1544_v9  ;;  %v1528_v26 = vpop.permute.xlu0 %1527  ;;  %v4882_v39 = vand.u32 4294901760, %v4881_v30  ;;  %v12631_v30 = vld [vmem:[#allocation136_spill] sm:$0xff] }
 0x288   :  { %6799 = vmatprep.subr.bf16.mxu0 %v12528_v15  ;;  %6937 = vmatpush1.bf16.msra.mxu1 %v12526_v52  ;;  %1587 = vst [vmem:[#allocation2 + $0x1b8] sm:$0x3] %v1559_v49  ;;  %v1552_v5 = vsel %vm1545_vm13, %v11134_v54, %v1528_v26  ;;  %v11232_v19 = vld [vmem:[#allocation2 + $0x1b0] sm:$0xff]  ;;  %v4887_v15 = vsub.f32 %v11179_v16, %v4886_v25  ;;  %vm12609_vm13 = vmmov %vm12599_vm6 }
 0x289   :  { %6939 = vmatprep.subr.bf16.mxu1 %v12529_v14  ;;  %v4898_v52 = vand.u32 4294901760, %v11226_v22  ;;  %1580 = vst [vmem:[#allocation2 + $0x180] sm:$0x80] %v1552_v5  ;;  %v4732_v14 = vand.u32 4294901760, %v11232_v19  ;;  %v12624_v5 = vld [vmem:[#allocation85_spill] sm:$0xff]  ;;  %vm12640_vm6 = vmmov %vm12639_vm5 }
 0x28a   :  { %v1753_v54 = vpop.permute.xlu1 %1752 }
 0x28b   :  { %6801 = vmatpush1.bf16.msra.mxu0 %v12534_v41  ;;  %v4899_v1 = vsub.f32 %v11226_v22, %v4898_v52  ;;  %v11244_v17 = vpack.c.bf16 %v4898_v52, %v4886_v25  ;;  %v1760_v48 = vsel %vm12608_vm7, %v1751_v35, %v1753_v54  ;;  %v1659_v62 = vpop.permute.xlu0 %1658  ;;  %v11251_v41 = vsub.f32 %v11232_v19, %v4732_v14  ;;  %v12622_v25 = vld [vmem:[#allocation30_spill] sm:$0xff]  ;;  %vm12658_vm7 = vmmov %vm12657_vm8 }
 0x28c   :  { %6803 = vmatprep.subr.bf16.mxu0 %v12537_v42  ;;  %6941 = vmatpush1.bf16.msra.mxu1 %v12535_v50  ;;  %1774 = vst [vmem:[#allocation2 + $0x1b8] sm:$0xe0] %v1760_v48  ;;  %v1667_v42 = vsel %vm12609_vm13, %v11185_v38, %v1659_v62  ;;  %v4888_v50 = vand.u32 4294901760, %v4887_v15  ;;  %v12623_v9 = vand.u32 4294901760, %v12622_v25  ;;  %v12627_v48 = vld [vmem:[#allocation13_spill] sm:$0xff]  ;;  %v12641_v25 = vld [vmem:[#allocation28_spill] sm:$0xff] }
 0x28d   :  { %12607 = vst [vmem:[#allocation74_spill] sm:$0xff] %v11244_v17  ;;  %6943 = vmatprep.subr.bf16.mxu1 %v12538_v20  ;;  %v4900_v6 = vand.u32 4294901760, %v4899_v1  ;;  %1681 = vst [vmem:[#allocation2 + $0x1b8] sm:$0x1c] %v1667_v42  ;;  %v4892_v20 = vand.u32 4294901760, %v11251_v41  ;;  %v12628_v62 = vand.u32 4294901760, %v12627_v48 }
 0x28e   :  { %v11262_v0 = vpop.permute.xlu1 %1843  ;;  %v11300_v49 = vpack.c.bf16 %v12623_v9, %v12621_v57  ;;  %v12629_v42 = vld [vmem:[#allocation25_spill] sm:$0xff]  ;;  %v12642_v9 = vand.u32 4294901760, %v12641_v25  ;;  %vm12660_vm13 = vcmask 547840   ;;  %v12681_v57 = vld [vmem:[#allocation115_spill] sm:$0xff] }
 0x28f   :  { %6805 = vmatpush1.bf16.msra.mxu0 %v12542_v32  ;;  %v11264_v51 = vpack.c.bf16 %v4900_v6, %v4888_v50  ;;  %v1842_v55 = vpop.permute.xlu0 %1841  ;;  %v4893_v32 = vsub.f32 %v11251_v41, %v4892_v20  ;;  %v11268_v45 = vpack.c.bf16 %v4892_v20, %v4880_v10  ;;  %v12630_v50 = vand.u32 4294901760, %v12629_v42 }
 0x290   :  { %3878 = vmatprep.subr.mxu0 %v10067_v37  ;;  %6945 = vmatpush1.bf16.msra.mxu1 %v12543_v21  ;;  %v1851_v24 = vsel %vm12612_vm10, %v12611_v33, %v1842_v55  ;;  %v1852_v38 = vsel %vm12613_vm2, %v1842_v55, %v11262_v0  ;;  %v11274_v37 = vld [vmem:[#allocation2 + $0x180] sm:$0xff]  ;;  %v12614_v21 = vand.u32 4294901760, %v10312_v60  ;;  %v12632_v20 = vand.u32 4294901760, %v12631_v30  ;;  %v12633_v55 = vld [vmem:[#allocation123_spill] sm:$0xff]  ;;  %vm12661_vm10 = vmmov %vm12660_vm13 }
 0x291   :  { %6947 = vmatprep.subr.bf16.mxu1 %v12544_v63  ;;  %12610 = vst [vmem:[#allocation72_spill] sm:$0xff] %v11268_v45  ;;  %1865 = vst [vmem:[#allocation2 + $0x1e0] sm:$0x7] %v1851_v24  ;;  %v5500_v43 = vand.u32 4294901760, %v11274_v37  ;;  %v4894_v35 = vand.u32 4294901760, %v4893_v32  ;;  %v11322_v6 = vpack.c.bf16 %v12630_v50, %v12628_v62  ;;  %v12634_v32 = vand.u32 4294901760, %v12633_v55 }
 0x292   :  { %v11281_v63 = vpack.c.bf16 %v12615_v53, %v12614_v21  ;;  %1866 = vst [vmem:[#allocation2 + $0x1e8] sm:$0x7] %v1852_v38  ;;  %v11292_v60 = vpop.permute.xlu1 %1936  ;;  %v12190_v38 = vmov 0.0|0.0   ;;  %v12637_v53 = vand.u32 4294901760, %v10982_v12  ;;  %v11372_v42 = vpack.c.bf16 %v4732_v14, %v4728_v56  ;;  %v12649_v55 = vld [vmem:[#allocation91_spill] sm:$0xff] }
 0x293   :  { %3880 = vmatpush1.msra.mxu0 %v10164_v28  ;;  %v12618_v28 = vand.u32 4294901760, %v12617_v29  ;;  %v1935_v26 = vpop.permute.xlu0 %1934  ;;  %v11305_v40 = vsub.f32 %v11274_v37, %v5500_v43  ;;  %v11328_v33 = vpack.c.bf16 %v12634_v32, %v12632_v20  ;;  %v12638_v29 = vld [vmem:[#allocation88_spill] sm:$0xff]  ;;  %v12652_v32 = vld [vmem:[#allocation47_spill] sm:$0xff]  ;;  %vm12663_vm2 = vcmask 539648  }
 0x294   :  { %3921 = vmatmul.mubr.f32.vlgmr.msra.gmra.mrb[0].mxu0 %v12395_v8  ;;  %6949 = vmatpush1.bf16.msra.mxu1 %v12546_v31  ;;  %v11307_v31 = vpack.c.bf16 %v4894_v35, %v4882_v39  ;;  %v1944_v15 = vsel %vm12625_vm4, %v12624_v5, %v1935_v26  ;;  %v1945_v52 = vsel %vm12626_vm3, %v1935_v26, %v11292_v60  ;;  %v3111_v10 = vld [vmem:[#allocation2 + $0x1b8] sm:$0xff]  ;;  %v12643_v26 = vand.u32 4294901760, %v10944_v34  ;;  %vm12664_vm4 = vmmov %vm12663_vm2 }
 0x295   :  { %v11290_v27 = vpack.c.bf16 %v12618_v28, %v12616_v23  ;;  %6951 = vmatprep.subr.bf16.mxu0 %v11281_v63  ;;  %4655 = vmatprep.subr.mxu1 %v12619_v59  ;;  %1958 = vst [vmem:[#allocation2 + $0x1e0] sm:$0x38] %v1944_v15  ;;  %1959 = vst [vmem:[#allocation2 + $0x1e8] sm:$0x38] %v1945_v52  ;;  %v5503_v54 = vand.u32 4294901760, %v3111_v10  ;;  %v5614_v1 = vand.u32 4294901760, %v11305_v40 }
 0x296   :  { %4794 = vmatprep.mubr.f32.mxu0 %v11021_v11  ;;  %v11330_v24 = vpop.permute.xlu1 %2005  ;;  %v11358_v5 = vpack.c.bf16 %v12643_v26, %v12642_v9  ;;  %v12644_v15 = vld [vmem:[#allocation38_spill] sm:$0xff]  ;;  %v12706_v45 = vld [vmem:[#allocation87_spill] sm:$0xff] }
 0x297   :  { %6953 = vmatpush1.bf16.msra.mxu0 %v11290_v27  ;;  %v2004_v35 = vpop.permute.xlu0 %2003  ;;  %v11340_v23 = vsub.f32 %v3111_v10, %v5503_v54  ;;  %v5615_v12 = vsub.f32 %v11305_v40, %v5614_v1  ;;  %v12645_v52 = vand.u32 4294901760, %v12644_v15  ;;  %v12646_v10 = vld [vmem:[#allocation52_spill] sm:$0xff]  ;;  %v11406_v9 = vpack.c.bf16 %v5503_v54, %v5500_v43 }
 0x298   :  { %6955 = vmatprep.subr.bf16.mxu0 %v11300_v49  ;;  %4657 = vmatpush1.msra.mxu1 %v10210_v61  ;;  %v12635_v61 = vld [vmem:[#allocation48_spill] sm:$0xff]  ;;  %v2030_v28 = vsel %vm12639_vm5, %v12638_v29, %v2004_v35  ;;  %v2031_v59 = vsel %vm12640_vm6, %v2004_v35, %v11330_v24  ;;  %v12647_v48 = vand.u32 4294901760, %v12646_v10  ;;  %vm12665_vm5 = vcmask 703488  }
 0x299   :  { %4698 = vmatmul.mubr.f32.vlgmr.msra.gmra.mrb[0].mxu1 %v12395_v8  ;;  %7094 = vmatprep.subr.bf16.mxu1 %v12190_v38  ;;  %v12636_v21 = vand.u32 4294901760, %v12635_v61  ;;  %2058 = vst [vmem:[#allocation2 + $0x1e0] sm:$0xc0] %v2030_v28  ;;  %2059 = vst [vmem:[#allocation2 + $0x1e8] sm:$0xc0] %v2031_v59  ;;  %v5621_v2 = vand.u32 4294901760, %v11340_v23 }
 0x29a   :  { %7096 = vmatpush3.bf16.msra.mxu1 %v11328_v33  ;;  %v11364_v62 = vpack.c.bf16 %v12647_v48, %v12645_v52  ;;  %6514 = vmatprep.mubr.msk.f32.mxu1 %vm7308_vm1, %v11021_v11  ;;  %v2022_v50 = vpop.permute.xlu1 %2021  ;;  %v5616_v19 = vand.u32 4294901760, %v5615_v12  ;;  %v12653_v61 = vand.u32 4294901760, %v12652_v32  ;;  %v12656_v12 = vld [vmem:[#allocation92_spill] sm:$0xff]  ;;  %v12659_v48 = vld [vmem:[#allocation95_spill] sm:$0xff] }
 0x29b   :  { %v11338_v39 = vpack.c.bf16 %v12637_v53, %v12636_v21  ;;  %6957 = vmatpush1.bf16.msra.mxu0 %v11322_v6  ;;  %7097 = vmatprep.subr.bf16.mxu1 %v12190_v38  ;;  %v5622_v34 = vsub.f32 %v11340_v23, %v5621_v2  ;;  %v11375_v30 = vpack.c.bf16 %v5621_v2, %v5614_v1  ;;  %v2020_v20 = vpop.permute.xlu0 %2019  ;;  %v12654_v21 = vld [vmem:[#allocation98_spill] sm:$0xff]  ;;  %v12662_v54 = vld [vmem:[#allocation96_spill] sm:$0xff] }
 0x29c   :  { %v2037_v13 = vsel %vm12650_vm12, %v12649_v55, %v2020_v20  ;;  %v2038_v56 = vsel %vm12651_vm9, %v2020_v20, %v2022_v50  ;;  %v11388_v1 = vpack.c.bf16 %v4734_v44, %v4730_v58  ;;  %v12655_v53 = vand.u32 4294901760, %v12654_v21  ;;  %vm12666_vm12 = vmmov %vm12640_vm6 }
 0x29d   :  { %6959 = vmatprep.subr.bf16.mxu0 %v11338_v39  ;;  %12648 = vst [vmem:[#allocation110_spill] sm:$0xff] %v11375_v30  ;;  %v5623_v14 = vand.u32 4294901760, %v5622_v34  ;;  %2065 = vst [vmem:[#allocation2 + $0x218] sm:$0x1] %v2037_v13 }
 0x29e   :  { %7099 = vmatpush3.bf16.msra.mxu1 %v11364_v62  ;;  %2066 = vst [vmem:[#allocation2 + $0x220] sm:$0x1] %v2038_v56  ;;  %v11394_v35 = vpack.c.bf16 %v12655_v53, %v12653_v61  ;;  %v2137_v28 = vpop.permute.xlu1 %2136  ;;  %vm12667_vm9 = vmmov %vm12661_vm10 }
 0x29f   :  { %6961 = vmatpush1.bf16.msra.mxu0 %v11358_v5  ;;  %7100 = vmatprep.subr.bf16.mxu1 %v12190_v38  ;;  %v11396_v29 = vpack.c.bf16 %v5623_v14, %v5616_v19  ;;  %v2135_v58 = vpop.permute.xlu0 %2134 }
 0x2a0   :  { %6963 = vmatprep.subr.bf16.mxu0 %v11372_v42  ;;  %v3117_v3 = vld [vmem:[#allocation2 + $0x1e8] sm:$0xff]  ;;  %v3116_v59 = vld [vmem:[#allocation2 + $0x1e0] sm:$0xff]  ;;  %v2145_v2 = vsel %vm12657_vm8, %v12656_v12, %v2135_v58  ;;  %v2146_v25 = vsel %vm12658_vm7, %v2135_v58, %v2137_v28  ;;  %vm12668_vm8 = vmmov %vm12658_vm7 }
 0x2a1   :  { %v4736_v4 = vand.u32 4294901760, %v3117_v3  ;;  %v4738_v44 = vand.u32 4294901760, %v3116_v59  ;;  %2159 = vst [vmem:[#allocation2 + $0x218] sm:$0xe] %v2145_v2  ;;  %2160 = vst [vmem:[#allocation2 + $0x220] sm:$0xe] %v2146_v25 }
 0x2a2   :  { %7102 = vmatpush3.bf16.msra.mxu1 %v11394_v35  ;;  %v2231_v52 = vpop.permute.xlu1 %2230  ;;  %vm12670_vm7 = vmmov %vm12663_vm2 }
 0x2a3   :  { %6965 = vmatpush1.bf16.msra.mxu0 %v11388_v1  ;;  %7103 = vmatprep.subr.bf16.mxu1 %v12190_v38  ;;  %v11408_v26 = vsub.f32 %v3117_v3, %v4736_v4  ;;  %v11410_v15 = vsub.f32 %v3116_v59, %v4738_v44  ;;  %v2229_v10 = vpop.permute.xlu0 %2228 }
 0x2a4   :  { %v2238_v34 = vsel %vm12660_vm13, %v12659_v48, %v2229_v10  ;;  %v2239_v20 = vsel %vm12661_vm10, %v2229_v10, %v2231_v52  ;;  %vm12672_vm13 = vmmov %vm12663_vm2  ;;  %vm12675_vm10 = vcmask 531456  }
 0x2a5   :  { %2252 = vst [vmem:[#allocation2 + $0x218] sm:$0x70] %v2238_v34  ;;  %2253 = vst [vmem:[#allocation2 + $0x220] sm:$0x70] %v2239_v20  ;;  %v4910_v10 = vand.u32 4294901760, %v11410_v15 }
 0x2a6   :  { %7105 = vmatpush3.bf16.msra.mxu1 %v11406_v9  ;;  %v2324_v37 = vpop.permute.xlu1 %2323 }
 0x2a7   :  { %7106 = vmatprep.subr.bf16.mxu1 %v12190_v38  ;;  %v2322_v43 = vpop.permute.xlu0 %2321 }
 0x2a8   :  { %v2347_v55 = vsel %vm12663_vm2, %v12662_v54, %v2322_v43  ;;  %v2348_v13 = vsel %vm12664_vm4, %v2322_v43, %v2324_v37  ;;  %vm12677_vm4 = vmmov %vm12675_vm10 }
 0x2a9   :  { %2375 = vst [vmem:[#allocation2 + $0x218] sm:$0x80] %v2347_v55  ;;  %2376 = vst [vmem:[#allocation2 + $0x220] sm:$0x80] %v2348_v13 }
 0x2aa   :  { %v1939_v56 = vpop.permute.xlu1 %1938 }
 0x2ab   :  { %v1946_v19 = vsel %vm12626_vm3, %v11292_v60, %v1939_v56  ;;  %v1846_v14 = vpop.permute.xlu0 %1845  ;;  %v4904_v60 = vand.u32 4294901760, %v11408_v26  ;;  %v12669_v56 = vld [vmem:[#allocation107_spill] sm:$0xff]  ;;  %vm12682_vm3 = vmmov %vm12663_vm2 }
 0x2ac   :  { %1960 = vst [vmem:[#allocation2 + $0x1f0] sm:$0x38] %v1946_v19  ;;  %v1853_v32 = vsel %vm12665_vm5, %v11262_v0, %v1846_v14  ;;  %vm12683_vm5 = vmmov %vm12677_vm4 }
 0x2ad   :  { %1867 = vst [vmem:[#allocation2 + $0x1f0] sm:$0x7] %v1853_v32  ;;  %v4905_v54 = vsub.f32 %v11408_v26, %v4904_v60 }
 0x2af   :  { %v2024_v61 = vpop.permute.xlu1 %2023  ;;  %v2008_v53 = vpop.permute.xlu0 %2007 }
 0x2b0   :  { %v2039_v21 = vsel %vm12640_vm6, %v2022_v50, %v2024_v61  ;;  %v2032_v3 = vsel %vm12666_vm12, %v11330_v24, %v2008_v53  ;;  %v3124_v59 = vld [vmem:[#allocation2 + $0x220] sm:$0xff]  ;;  %v3123_v58 = vld [vmem:[#allocation2 + $0x218] sm:$0xff] }
 0x2b1   :  { %2067 = vst [vmem:[#allocation2 + $0x228] sm:$0x1] %v2039_v21  ;;  %2060 = vst [vmem:[#allocation2 + $0x1f0] sm:$0xc0] %v2032_v3  ;;  %v4740_v12 = vand.u32 4294901760, %v3124_v59  ;;  %v4742_v2 = vand.u32 4294901760, %v3123_v58 }
 0x2b3   :  { %v2233_v25 = vpop.permute.xlu1 %2232  ;;  %v2139_v48 = vpop.permute.xlu0 %2138  ;;  %v11430_v34 = vpack.c.bf16 %v4740_v12, %v4736_v4  ;;  %v11432_v50 = vsub.f32 %v3124_v59, %v4740_v12  ;;  %v11434_v20 = vpack.c.bf16 %v4742_v2, %v4738_v44  ;;  %v11437_v43 = vsub.f32 %v3123_v58, %v4742_v2 }
 0x2b4   :  { %v2240_v0 = vsel %vm12667_vm9, %v2231_v52, %v2233_v25  ;;  %v2147_v24 = vsel %vm12668_vm8, %v2137_v28, %v2139_v48  ;;  %v4911_v44 = vsub.f32 %v11410_v15, %v4910_v10  ;;  %v4906_v12 = vand.u32 4294901760, %v4905_v54  ;;  %v12676_v54 = vld [vmem:[#allocation112_spill] sm:$0xff] }
 0x2b5   :  { %2254 = vst [vmem:[#allocation2 + $0x228] sm:$0x70] %v2240_v0  ;;  %2161 = vst [vmem:[#allocation2 + $0x228] sm:$0xe] %v2147_v24  ;;  %6967 = vmatprep.subr.bf16.mxu0 %v11430_v34  ;;  %v4916_v55 = vand.u32 4294901760, %v11432_v50  ;;  %v4922_v13 = vand.u32 4294901760, %v11437_v43 }
 0x2b6   :  { %6969 = vmatpush1.bf16.msra.mxu0 %v11434_v20  ;;  %v4912_v0 = vand.u32 4294901760, %v4911_v44  ;;  %v12674_v24 = vld [vmem:[#allocation108_spill] sm:$0xff] }
 0x2b7   :  { %v2338_v52 = vpop.permute.xlu1 %2337  ;;  %v2326_v14 = vpop.permute.xlu0 %2325  ;;  %v4917_v32 = vsub.f32 %v11432_v50, %v4916_v55  ;;  %v11452_v61 = vpack.c.bf16 %v4916_v55, %v4904_v60  ;;  %v4923_v3 = vsub.f32 %v11437_v43, %v4922_v13  ;;  %v11456_v59 = vpack.c.bf16 %v4922_v13, %v4910_v10 }
 0x2b8   :  { %v2354_v19 = vsel %vm12670_vm7, %v12669_v56, %v2338_v52  ;;  %v2349_v21 = vsel %vm12672_vm13, %v2324_v37, %v2326_v14  ;;  %v3118_v53 = vld [vmem:[#allocation2 + $0x1f0] sm:$0xff] }
 0x2b9   :  { %12671 = vst [vmem:[#allocation106_spill] sm:$0xff] %v11452_v61  ;;  %2382 = vst [vmem:[#allocation2 + $0x250] sm:$0x3] %v2354_v19  ;;  %v5506_v58 = vand.u32 4294901760, %v3118_v53  ;;  %v4918_v2 = vand.u32 4294901760, %v4917_v32  ;;  %v4924_v48 = vand.u32 4294901760, %v4923_v3 }
 0x2ba   :  { %12673 = vst [vmem:[#allocation101_spill] sm:$0xff] %v11456_v59  ;;  %2377 = vst [vmem:[#allocation2 + $0x228] sm:$0x80] %v2349_v21  ;;  %v12697_v61 = vld [vmem:[#allocation10_spill] sm:$0xff] }
 0x2bb   :  { %v11460_v55 = vpack.c.bf16 %v4918_v2, %v4906_v12  ;;  %v11463_v19 = vpack.c.bf16 %v4924_v48, %v4912_v0  ;;  %v11465_v10 = vsub.f32 %v3118_v53, %v5506_v58  ;;  %v12678_v2 = vld [vmem:[#allocation113_spill] sm:$0xff] }
 0x2bd   :  { %v2452_v25 = vpop.permute.xlu1 %2451  ;;  %v2340_v60 = vpop.permute.xlu0 %2339 }
 0x2be   :  { %v2461_v56 = vsel %vm12675_vm10, %v12674_v24, %v2452_v25  ;;  %v2355_v37 = vsel %vm12663_vm2, %v2338_v52, %v2340_v60  ;;  %v5628_v52 = vand.u32 4294901760, %v11465_v10 }
 0x2bf   :  { %2475 = vst [vmem:[#allocation2 + $0x250] sm:$0x1c] %v2461_v56  ;;  %2383 = vst [vmem:[#allocation2 + $0x258] sm:$0x3] %v2355_v37 }
 0x2c1   :  { %v2545_v13 = vpop.permute.xlu1 %2544  ;;  %v3125_v21 = vld [vmem:[#allocation2 + $0x228] sm:$0xff] }
 0x2c2   :  { %v2555_v14 = vsel %vm2550_vm0, %v12676_v54, %v2545_v13  ;;  %v11469_v44 = vpop.permute.xlu0 %2453  ;;  %v5509_v3 = vand.u32 4294901760, %v3125_v21 }
 0x2c3   :  { %2569 = vst [vmem:[#allocation2 + $0x250] sm:$0xe0] %v2555_v14  ;;  %v2462_v32 = vsel %vm12677_vm4, %v2452_v25, %v11469_v44  ;;  %v5629_v25 = vsub.f32 %v11465_v10, %v5628_v52 }
 0x2c4   :  { %2476 = vst [vmem:[#allocation2 + $0x258] sm:$0x1c] %v2462_v32  ;;  %v11476_v48 = vpack.c.bf16 %v5509_v3, %v5506_v58  ;;  %v11478_v24 = vsub.f32 %v3125_v21, %v5509_v3  ;;  %v12679_v58 = vld [vmem:[#allocation114_spill] sm:$0xff] }
 0x2c5   :  { %v2639_v12 = vpop.permute.xlu1 %2638 }
 0x2c6   :  { %v2649_v53 = vsel %vm2644_vm11, %v12678_v2, %v2639_v12  ;;  %v2547_v0 = vpop.permute.xlu0 %2546  ;;  %7108 = vmatpush3.bf16.msra.mxu1 %v11476_v48  ;;  %v5635_v37 = vand.u32 4294901760, %v11478_v24 }
 0x2c7   :  { %2663 = vst [vmem:[#allocation2 + $0x288] sm:$0x7] %v2649_v53  ;;  %v2556_v56 = vsel %vm2550_vm0, %v2545_v13, %v2547_v0  ;;  %7109 = vmatprep.subr.bf16.mxu1 %v12190_v38  ;;  %v5630_v53 = vand.u32 4294901760, %v5629_v25  ;;  %v7310_v25 = vmov 1  }
 0x2c8   :  { %2570 = vst [vmem:[#allocation2 + $0x258] sm:$0xe0] %v2556_v56  ;;  %v5636_v3 = vsub.f32 %v11478_v24, %v5635_v37  ;;  %v11490_v13 = vpack.c.bf16 %v5635_v37, %v5628_v52  ;;  %v6083_v52 = vld [vmem:[%s11953_s1 + $0x8] sm:$0xff]  ;;  %7275 = vset.pattern.permute.xlu0 %v7310_v25  ;;  %s7313_s1 = smov 42  }
 0x2c9   :  { %6146 = vperm.xlu1 %7276, %v6083_v52   ;;  %6089 = vperm.xlu0 %7275, %v6083_v52  }
 0x2ca   :  { %v2733_v14 = vpop.permute.xlu1 %2732  ;;  %v2641_v21 = vpop.permute.xlu0 %2640  ;;  %12680 = vst [vmem:[#allocation93_spill] sm:$0xff] %v11490_v13  ;;  %v5637_v56 = vand.u32 4294901760, %v5636_v3  ;;  %v7312_v13 = vmov 0  }
 0x2cb   :  { %v2743_v32 = vsel %vm2738_vm15, %v12679_v58, %v2733_v14  ;;  %v2650_v2 = vsel %vm2644_vm11, %v2639_v12, %v2641_v21  ;;  %v3130_v12 = vld [vmem:[#allocation2 + $0x250] sm:$0xff] }
 0x2cc   :  { %2757 = vst [vmem:[#allocation2 + $0x288] sm:$0x38] %v2743_v32  ;;  %2664 = vst [vmem:[#allocation2 + $0x290] sm:$0x7] %v2650_v2  ;;  %v11495_v7 = vpack.c.bf16 %v5637_v56, %v5630_v53  ;;  %v4746_v3 = vand.u32 4294901760, %v3130_v12  ;;  %v7311_v2 = vmov 3  }
 0x2cd   :  { %7277 = vset.pattern.permute.xlu1 %v7311_v2  ;;  %7278 = vset.pattern.permute.xlu0 %v7312_v13 }
 0x2ce   :  { %v2803_v28 = vpop.permute.xlu1 %2802  ;;  %v2735_v4 = vpop.permute.xlu0 %2734  ;;  %6211 = vperm.xlu1 %7277, %v6083_v52   ;;  %v11504_v38 = vsub.f32 %v3130_v12, %v4746_v3  ;;  %6272 = vperm.xlu0 %7278, %v6083_v52  }
 0x2cf   :  { %v2829_v54 = vsel %vm2824_vm14, %v12681_v57, %v2803_v28  ;;  %v2744_v37 = vsel %vm2738_vm15, %v2733_v14, %v2735_v4  ;;  %v3131_v14 = vld [vmem:[#allocation2 + $0x258] sm:$0xff] }
 0x2d0   :  { %2857 = vst [vmem:[#allocation2 + $0x288] sm:$0xc0] %v2829_v54  ;;  %2758 = vst [vmem:[#allocation2 + $0x290] sm:$0x38] %v2744_v37 }
 0x2d2   :  { %v2342_v58 = vpop.permute.xlu1 %2341 }
 0x2d3   :  { %v2356_v57 = vsel %vm12682_vm3, %v2340_v60, %v2342_v58  ;;  %v2805_v32 = vpop.permute.xlu0 %2804 }
 0x2d4   :  { %2384 = vst [vmem:[#allocation2 + $0x260] sm:$0x3] %v2356_v57  ;;  %v2830_v18 = vsel %vm2824_vm14, %v2803_v28, %v2805_v32  ;;  %v4744_v28 = vand.u32 4294901760, %v3131_v14 }
 0x2d5   :  { %2858 = vst [vmem:[#allocation2 + $0x290] sm:$0xc0] %v2830_v18 }
 0x2d7   :  { %v2549_v54 = vpop.permute.xlu1 %2548  ;;  %v3137_v53 = vld [vmem:[#allocation2 + $0x288] sm:$0xff] }
 0x2d8   :  { %v2557_v56 = vsel %vm2550_vm0, %v2547_v0, %v2549_v54  ;;  %v2456_v37 = vpop.permute.xlu0 %2455  ;;  %v4750_v25 = vand.u32 4294901760, %v3137_v53  ;;  %v12192_v0 = vand.u32 4294901760, %v11504_v38  ;;  %vm12690_vm0 = vcmask 359424  }
 0x2d9   :  { %2571 = vst [vmem:[#allocation2 + $0x260] sm:$0xe0] %v2557_v56  ;;  %v2463_v60 = vsel %vm12683_vm5, %v11469_v44, %v2456_v37  ;;  %v11514_v44 = vsub.f32 %v3131_v14, %v4744_v28  ;;  %vm12692_vm6 = vmmov %vm12690_vm0  ;;  %vm12764_vm5 = vcmask 703488  }
 0x2da   :  { %2477 = vst [vmem:[#allocation2 + $0x260] sm:$0x1c] %v2463_v60  ;;  %v11508_v58 = vsub.f32 %v3137_v53, %v4750_v25  ;;  %v12685_v53 = vld [vmem:[#allocation122_spill] sm:$0xff]  ;;  %v11529_v14 = vpack.c.bf16 %v4750_v25, %v4746_v3  ;;  %vm12693_vm12 = vmmov %vm12690_vm0 }
 0x2db   :  { %v2737_v57 = vpop.permute.xlu1 %2736 }
 0x2dc   :  { %v2745_v2 = vsel %vm2738_vm15, %v2735_v4, %v2737_v57  ;;  %v2643_v18 = vpop.permute.xlu0 %2642  ;;  %v12193_v12 = vand.u32 4294901760, %v11508_v58  ;;  %v3138_v54 = vld [vmem:[#allocation2 + $0x290] sm:$0xff]  ;;  %vm12687_vm15 = vcmask 367616  }
 0x2dd   :  { %2759 = vst [vmem:[#allocation2 + $0x298] sm:$0x38] %v2745_v2  ;;  %v2651_v13 = vsel %vm2644_vm11, %v2641_v21, %v2643_v18  ;;  %v4748_v56 = vand.u32 4294901760, %v3138_v54  ;;  %v12194_v18 = vand.u32 4294901760, %v11514_v44  ;;  %vm12691_vm11 = vmmov %vm12687_vm15 }
 0x2de   :  { %2665 = vst [vmem:[#allocation2 + $0x298] sm:$0x7] %v2651_v13  ;;  %v11520_v52 = vpack.c.bf16 %v12193_v12, %v12192_v0 }
 0x2df   :  { %v2819_v4 = vpop.permute.xlu1 %2818  ;;  %v11524_v57 = vpack.c.bf16 %v4748_v56, %v4744_v28  ;;  %v11526_v2 = vsub.f32 %v3138_v54, %v4748_v56  ;;  %v12686_v28 = vld [vmem:[#allocation124_spill] sm:$0xff] }
 0x2e0   :  { %12684 = vst [vmem:[#allocation103_spill] sm:$0xff] %v11520_v52  ;;  %v2836_v37 = vsel %vm2824_vm14, %v12685_v53, %v2819_v4  ;;  %v2807_v60 = vpop.permute.xlu0 %2806 }
 0x2e1   :  { %2864 = vst [vmem:[#allocation2 + $0x2c0] sm:$0x1] %v2836_v37  ;;  %v2831_v21 = vsel %vm2824_vm14, %v2805_v32, %v2807_v60  ;;  %6971 = vmatprep.subr.bf16.mxu0 %v11524_v57  ;;  %v4940_v13 = vand.u32 4294901760, %v11526_v2  ;;  %v3132_v0 = vld [vmem:[#allocation2 + $0x260] sm:$0xff]  ;;  %v12689_v60 = vld [vmem:[#allocation127_spill] sm:$0xff] }
 0x2e2   :  { %2859 = vst [vmem:[#allocation2 + $0x298] sm:$0xc0] %v2831_v21  ;;  %6973 = vmatpush1.bf16.msra.mxu0 %v11529_v14  ;;  %v5512_v25 = vand.u32 4294901760, %v3132_v0 }
 0x2e3   :  { %v2934_v53 = vpop.permute.xlu1 %2933  ;;  %v11539_v32 = vpack.c.bf16 %v4940_v13, %v12194_v18 }
 0x2e4   :  { %v2944_v54 = vsel %vm12687_vm15, %v12686_v28, %v2934_v53  ;;  %v2821_v56 = vpop.permute.xlu0 %2820  ;;  %v11545_v30 = vsub.f32 %v3132_v0, %v5512_v25  ;;  %vm12765_vm15 = vmmov %vm12764_vm5 }
 0x2e5   :  { %12688 = vst [vmem:[#allocation94_spill] sm:$0xff] %v11539_v32  ;;  %2958 = vst [vmem:[#allocation2 + $0x2c0] sm:$0xe] %v2944_v54  ;;  %v2837_v3 = vsel %vm2824_vm14, %v2819_v4, %v2821_v56 }
 0x2e6   :  { %2865 = vst [vmem:[#allocation2 + $0x2c8] sm:$0x1] %v2837_v3 }
 0x2e7   :  { %v3028_v37 = vpop.permute.xlu1 %3027 }
 0x2e8   :  { %v3038_v21 = vsel %vm12690_vm0, %v12689_v60, %v3028_v37  ;;  %v2936_v12 = vpop.permute.xlu0 %2935  ;;  %vm12766_vm0 = vmmov %vm12764_vm5 }
 0x2e9   :  { %3052 = vst [vmem:[#allocation2 + $0x2c0] sm:$0x70] %v3038_v21  ;;  %v2945_v52 = vsel %vm12691_vm11, %v2934_v53, %v2936_v12  ;;  %v3139_v59 = vld [vmem:[#allocation2 + $0x298] sm:$0xff]  ;;  %v5642_v53 = vand.u32 4294901760, %v11545_v30 }
 0x2ea   :  { %2959 = vst [vmem:[#allocation2 + $0x2c8] sm:$0xe] %v2945_v52  ;;  %v5515_v28 = vand.u32 4294901760, %v3139_v59 }
 0x2eb   :  { %v2823_v18 = vpop.permute.xlu1 %2822 }
 0x2ec   :  { %v2838_v54 = vsel %vm2824_vm14, %v2821_v56, %v2823_v18  ;;  %v11548_v32 = vpack.c.bf16 %v5515_v28, %v5512_v25  ;;  %v11550_v4 = vsub.f32 %v3139_v59, %v5515_v28  ;;  %vm12695_vm14 = vmmov %vm12691_vm11 }
 0x2ed   :  { %2866 = vst [vmem:[#allocation2 + $0x2d0] sm:$0x1] %v2838_v54  ;;  %v3030_v3 = vpop.permute.xlu0 %3029  ;;  %vm12767_vm11 = vmmov %vm12766_vm0 }
 0x2ee   :  { %v3039_v60 = vsel %vm12692_vm6, %v3028_v37, %v3030_v3  ;;  %7111 = vmatpush3.bf16.msra.mxu1 %v11548_v32  ;;  %v5649_v52 = vand.u32 4294901760, %v11550_v4  ;;  %vm12768_vm6 = vmmov %vm12766_vm0 }
 0x2ef   :  { %3053 = vst [vmem:[#allocation2 + $0x2c8] sm:$0x70] %v3039_v60  ;;  %v3032_v0 = vpop.permute.xlu1 %3031  ;;  %6512 = vmatprep.subr.mxu1 %v11021_v11 }
 0x2f0   :  { %v3040_v18 = vsel %vm12693_vm12, %v3030_v3, %v3032_v0  ;;  %v11558_v56 = vpack.c.bf16 %v5649_v52, %v5642_v53  ;;  %v3144_v37 = vld [vmem:[#allocation2 + $0x2c0] sm:$0xff]  ;;  %vm12769_vm12 = vmmov %vm12766_vm0 }
 0x2f1   :  { %3054 = vst [vmem:[#allocation2 + $0x2d0] sm:$0x70] %v3040_v18  ;;  %v2938_v59 = vpop.permute.xlu0 %2937  ;;  %v11563_v54 = vand.u32 4294901760, %v3144_v37  ;;  %v12698_v3 = vld [vmem:[#allocation128_spill] sm:$0xff]  ;;  %v12699_v18 = vld [vmem:[#allocation137_spill] sm:$0xff] }
 0x2f2   :  { %12694 = vst [vmem:[#allocation39_spill] sm:$0xff] %v11558_v56  ;;  %v2946_v25 = vsel %vm12695_vm14, %v2936_v12, %v2938_v59  ;;  %v12700_v12 = vld [vmem:[#allocation24_spill] sm:$0xff]  ;;  %v12701_v59 = vmov 0.0|0.0   ;;  %v12705_v56 = vld [vmem:[#allocation55_spill] sm:$0xff]  ;;  %vm12770_vm14 = vmmov %vm12766_vm0 }
 0x2f3   :  { %2960 = vst [vmem:[#allocation2 + $0x2d0] sm:$0xe] %v2946_v25  ;;  %12696 = vst [vmem:[#allocation4_spill] sm:$0xff] %v11563_v54  ;;  %v12702_v25 = vld [vmem:[#allocation21_spill] sm:$0xff] }
 0x2f6   :  { %v3145_v21 = vld [vmem:[#allocation2 + $0x2c8] sm:$0xff] }
 0x2f7   :  { %v11561_v28 = vand.u32 4294901760, %v3145_v21 }
 0x2f9   :  { %4753 = vmatprep.subr.mxu0 %v11561_v28  ;;  %v11586_v17 = vsub.f32 %v3145_v21, %v11561_v28 }
 0x2fa   :  { %4755 = vmatpush1.msra.mxu0 %v11563_v54  ;;  %v3146_v60 = vld [vmem:[#allocation2 + $0x2d0] sm:$0xff] }
 0x2fb   :  { %6975 = vmatprep.subr.bf16.mxu0 %v12697_v61  ;;  %4800 = vmatmul.mubr.f32.vlgmr.msra.gmra.mrb[2].mxu0 %v12698_v3  ;;  %v11569_v0 = vand.u32 4294901760, %v3146_v60  ;;  %v12703_v61 = vld [vmem:[#allocation46_spill] sm:$0xff] }
 0x2fc   :  { %6977 = vmatpush1.bf16.msra.mxu0 %v12699_v18  ;;  %5000 = vmatprep.mubr.f32.mxu0 %v11021_v11  ;;  %v12704_v18 = vld [vmem:[#allocation71_spill] sm:$0xff] }
 0x2fd   :  { %6979 = vmatprep.subr.bf16.mxu0 %v12700_v12  ;;  %6513 = vmatpush3.msra.mxu1 %v11569_v0  ;;  %v4941_v12 = vsub.f32 %v11526_v2, %v4940_v13 }
 0x2fe   :  { %7112 = vmatprep.subr.bf16.mxu1 %v12701_v59  ;;  %6515 = vmatmul.mubr.f32.vlgmr.msra.gmra.mrb[2].mxu1 %v12698_v3  ;;  %v12707_v3 = vand.u32 4294901760, %v11514_v44 }
 0x2ff   :  { %7114 = vmatpush3.bf16.msra.mxu1 %v12702_v25  ;;  %6543 = vmatprep.mubr.msk.f32.mxu1 %vm7308_vm1, %v11021_v11  ;;  %v4942_v21 = vand.u32 4294901760, %v4941_v12 }
 0x300   :  { %6981 = vmatpush1.bf16.msra.mxu0 %v12703_v61  ;;  %7115 = vmatprep.subr.bf16.mxu1 %v12701_v59  ;;  %v4929_v25 = vsub.f32 %v11514_v44, %v12707_v3  ;;  %v11595_v61 = vsub.f32 %v3144_v37, %v11563_v54  ;;  %v11608_v37 = vsub.f32 %v3146_v60, %v11569_v0 }
 0x301   :  { %6983 = vmatprep.subr.bf16.mxu0 %v12704_v18 }
 0x302   :  { %v4930_v3 = vand.u32 4294901760, %v4929_v25  ;;  %v4958_v12 = vand.u32 4294901760, %v11595_v61 }
 0x303   :  { %7117 = vmatpush3.bf16.msra.mxu1 %v12705_v56  ;;  %v12708_v56 = vand.u32 4294901760, %v11508_v58 }
 0x304   :  { %6985 = vmatpush1.bf16.msra.mxu0 %v12706_v45  ;;  %7118 = vmatprep.subr.bf16.mxu1 %v12701_v59  ;;  %v4952_v45 = vand.u32 4294901760, %v11586_v17 }
 0x305   :  { %6987 = vmatprep.subr.bf16.mxu0 %v11307_v31  ;;  %v4947_v13 = vsub.f32 %v11508_v58, %v12708_v56  ;;  %v12709_v31 = vand.u32 4294901760, %v11504_v38  ;;  %v5650_v56 = vsub.f32 %v11550_v4, %v5649_v52  ;;  %v5656_v52 = vand.u32 4294901760, %v11608_v37 }
 0x306   :  { %v4953_v54 = vsub.f32 %v11586_v17, %v4952_v45 }
 0x307   :  { %7120 = vmatpush3.bf16.msra.mxu1 %v11162_v47  ;;  %v4935_v18 = vsub.f32 %v11504_v38, %v12709_v31  ;;  %v4948_v47 = vand.u32 4294901760, %v4947_v13  ;;  %v5643_v31 = vsub.f32 %v11545_v30, %v5642_v53  ;;  %v5651_v60 = vand.u32 4294901760, %v5650_v56  ;;  %v12711_v56 = vld [vmem:[#allocation131_spill] sm:$0xff] }
 0x308   :  { %6989 = vmatpush1.bf16.msra.mxu0 %v11264_v51  ;;  %7121 = vmatprep.subr.bf16.mxu1 %v12701_v59  ;;  %v6994_v51 = vpack.c.bf16 %v4942_v21, %v4930_v3  ;;  %v4954_v13 = vand.u32 4294901760, %v4953_v54  ;;  %v5657_v53 = vsub.f32 %v11608_v37, %v5656_v52  ;;  %v12710_v3 = vld [vmem:[#allocation135_spill] sm:$0xff]  ;;  %v12713_v54 = vld [vmem:[#allocation133_spill] sm:$0xff] }
 0x309   :  { %6991 = vmatprep.subr.bf16.mxu0 %v11460_v55  ;;  %v4936_v55 = vand.u32 4294901760, %v4935_v18  ;;  %v5644_v21 = vand.u32 4294901760, %v5643_v31 }
 0x30b   :  { %7123 = vmatpush3.bf16.msra.mxu1 %v11396_v29  ;;  %v6996_v25 = vpack.c.bf16 %v4948_v47, %v4936_v55  ;;  %v4959_v29 = vsub.f32 %v11595_v61, %v4958_v12  ;;  %v12712_v47 = vpack.c.bf16 %v12710_v3, %v12711_v56  ;;  %v12716_v55 = vld [vmem:[#allocation11_spill] sm:$0xff]  ;;  %v12725_v3 = vld [vmem:[#allocation57_spill] sm:$0xff]  ;;  %v12726_v56 = vld [vmem:[#allocation26_spill] sm:$0xff] }
 0x30c   :  { %6993 = vmatpush1.bf16.msra.mxu0 %v11463_v19  ;;  %7124 = vmatprep.subr.bf16.mxu1 %v12701_v59  ;;  %v7128_v19 = vpack.c.bf16 %v5651_v60, %v5644_v21  ;;  %v12717_v60 = vld [vmem:[#allocation8_spill] sm:$0xff] }
 0x30d   :  { %6995 = vmatprep.subr.bf16.mxu0 %v6994_v51  ;;  %v4960_v18 = vand.u32 4294901760, %v4959_v29  ;;  %v12714_v51 = vld [vmem:[#allocation130_spill] sm:$0xff]  ;;  %v12719_v29 = vld [vmem:[#allocation19_spill] sm:$0xff] }
 0x30e   :  { %v12715_v31 = vpack.c.bf16 %v12713_v54, %v12714_v51  ;;  %v12729_v54 = vld [vmem:[#allocation27_spill] sm:$0xff] }
 0x30f   :  { %7126 = vmatpush3.bf16.msra.mxu1 %v11495_v7  ;;  %v5658_v7 = vand.u32 4294901760, %v5657_v53  ;;  %v12723_v53 = vld [vmem:[#allocation22_spill] sm:$0xff] }
 0x310   :  { %6997 = vmatpush1.bf16.msra.mxu0 %v6996_v25  ;;  %7127 = vmatprep.subr.bf16.mxu1 %v12701_v59  ;;  %v12718_v25 = vpack.c.bf16 %v12716_v55, %v12717_v60  ;;  %v12732_v55 = vld [vmem:[#allocation60_spill] sm:$0xff] }
 0x311   :  { %4955 = vmatprep.subr.mxu0 %v4954_v13  ;;  %v12720_v13 = vld [vmem:[#allocation3_spill] sm:$0xff] }
 0x312   :  { %v12721_v21 = vpack.c.bf16 %v12719_v29, %v12720_v13  ;;  %v12735_v29 = vld [vmem:[#allocation83_spill] sm:$0xff] }
 0x313   :  { %7129 = vmatpush3.bf16.msra.mxu1 %v7128_v19  ;;  %v12722_v19 = vld [vmem:[#allocation7_spill] sm:$0xff]  ;;  %v12736_v13 = vpack.c.bf16 %v11109_v46, %v12735_v29  ;;  %v12740_v46 = vpack.c.bf16 %v11437_v43, %v11410_v15  ;;  %v12747_v15 = vld [vmem:[#allocation42_spill] sm:$0xff]  ;;  %v12749_v43 = vld [vmem:[#allocation32_spill] sm:$0xff] }
 0x314   :  { %4961 = vmatpush1.msra.mxu0 %v4960_v18  ;;  %6541 = vmatprep.subr.mxu1 %v11021_v11  ;;  %v12724_v18 = vpack.c.bf16 %v12722_v19, %v12723_v53  ;;  %v12738_v19 = vpack.c.bf16 %v11432_v50, %v11408_v26  ;;  %v12739_v53 = vpack.c.bf16 %v11340_v23, %v11305_v40  ;;  %v12742_v40 = vld [vmem:[#allocation125_spill] sm:$0xff]  ;;  %v12744_v23 = vld [vmem:[#allocation138_spill] sm:$0xff] }
 0x315   :  { %6999 = vmatprep.subr.bf16.mxu0 %v12712_v47  ;;  %5002 = vmatmul.mubr.f32.vlgmr.msra.gmra.mrb[2].mxu0 %v12395_v8  ;;  %v12727_v47 = vpack.c.bf16 %v12725_v3, %v12726_v56  ;;  %v12746_v26 = vld [vmem:[#allocation134_spill] sm:$0xff]  ;;  %v12758_v56 = vld [vmem:[#allocation101_spill] sm:$0xff] }
 0x316   :  { %7001 = vmatpush1.bf16.msra.mxu0 %v12715_v31  ;;  %5124 = vmatprep.mubr.f32.mxu0 %v11021_v11  ;;  %v12731_v31 = vld [vmem:[#allocation76_spill] sm:$0xff]  ;;  %v12748_v50 = vld [vmem:[#allocation6_spill] sm:$0xff] }
 0x317   :  { %7003 = vmatprep.subr.bf16.mxu0 %v12718_v25  ;;  %6542 = vmatpush3.msra.mxu1 %v5658_v7  ;;  %v12728_v7 = vld [vmem:[#allocation34_spill] sm:$0xff]  ;;  %v12733_v60 = vpack.c.bf16 %v12731_v31, %v12732_v55  ;;  %v12734_v25 = vpack.c.bf16 %v11251_v41, %v11205_v36  ;;  %v7018_v36 = vpack.c.bf16 %v11526_v2, %v11514_v44  ;;  %v12753_v44 = vld [vmem:[#allocation72_spill] sm:$0xff] }
 0x318   :  { %7130 = vmatprep.subr.bf16.mxu1 %v12701_v59  ;;  %6544 = vmatmul.mubr.f32.vlgmr.msra.gmra.mrb[2].mxu1 %v12395_v8  ;;  %v12730_v51 = vpack.c.bf16 %v12728_v7, %v12729_v54  ;;  %v7146_v41 = vpack.c.bf16 %v11550_v4, %v11545_v30  ;;  %v12745_v30 = vld [vmem:[#allocation126_spill] sm:$0xff]  ;;  %v12760_v7 = vld [vmem:[#allocation93_spill] sm:$0xff]  ;;  %v12761_v54 = vld [vmem:[#allocation103_spill] sm:$0xff] }
 0x319   :  { %7132 = vmatpush3.bf16.msra.mxu1 %v12721_v21  ;;  %6572 = vmatprep.mubr.msk.f32.mxu1 %vm7308_vm1, %v11021_v11  ;;  %v12737_v21 = vpack.c.bf16 %v11226_v22, %v11179_v16  ;;  %v7020_v16 = vpack.c.bf16 %v11508_v58, %v11504_v38  ;;  %v12741_v22 = vpack.c.bf16 %v11478_v24, %v11465_v10  ;;  %v12743_v38 = vld [vmem:[#allocation4_spill] sm:$0xff]  ;;  %v12750_v10 = vld [vmem:[#allocation79_spill] sm:$0xff]  ;;  %v12754_v2 = vld [vmem:[#allocation90_spill] sm:$0xff] }
 0x31a   :  { %7005 = vmatpush1.bf16.msra.mxu0 %v12724_v18  ;;  %7133 = vmatprep.subr.bf16.mxu1 %v12701_v59  ;;  %v12751_v24 = vld [vmem:[#allocation64_spill] sm:$0xff]  ;;  %v12755_v4 = vld [vmem:[#allocation74_spill] sm:$0xff] }
 0x31b   :  { %7007 = vmatprep.subr.bf16.mxu0 %v12727_v47  ;;  %v12752_v58 = vld [vmem:[#allocation68_spill] sm:$0xff]  ;;  %v12756_v18 = vld [vmem:[#allocation106_spill] sm:$0xff] }
 0x31c   :  { %v12757_v3 = vld [vmem:[#allocation110_spill] sm:$0xff] }
 0x31d   :  { %7135 = vmatpush3.bf16.msra.mxu1 %v12730_v51  ;;  %v12759_v47 = vld [vmem:[#allocation94_spill] sm:$0xff]  ;;  %v12762_v51 = vld [vmem:[#allocation39_spill] sm:$0xff] }
 0x31e   :  { %7009 = vmatpush1.bf16.msra.mxu0 %v12733_v60  ;;  %7136 = vmatprep.subr.bf16.mxu1 %v12701_v59 }
 0x31f   :  { %7011 = vmatprep.subr.bf16.mxu0 %v12734_v25 }
 0x321   :  { %7138 = vmatpush3.bf16.msra.mxu1 %v12736_v13 }
 0x322   :  { %7013 = vmatpush1.bf16.msra.mxu0 %v12737_v21  ;;  %7139 = vmatprep.subr.bf16.mxu1 %v12701_v59 }
 0x323   :  { %7015 = vmatprep.subr.bf16.mxu0 %v12738_v19 }
 0x325   :  { %7141 = vmatpush3.bf16.msra.mxu1 %v12739_v53 }
 0x326   :  { %7017 = vmatpush1.bf16.msra.mxu0 %v12740_v46  ;;  %7142 = vmatprep.subr.bf16.mxu1 %v12701_v59 }
 0x327   :  { %7019 = vmatprep.subr.bf16.mxu0 %v7018_v36 }
 0x329   :  { %7144 = vmatpush3.bf16.msra.mxu1 %v12741_v22 }
 0x32a   :  { %7021 = vmatpush1.bf16.msra.mxu0 %v7020_v16  ;;  %7145 = vmatprep.subr.bf16.mxu1 %v12701_v59 }
 0x32b   :  { %5082 = vmatprep.subr.mxu0 %v11586_v17 }
 0x32d   :  { %7147 = vmatpush3.bf16.msra.mxu1 %v7146_v41 }
 0x32e   :  { %5085 = vmatpush1.msra.mxu0 %v11595_v61  ;;  %6570 = vmatprep.subr.mxu1 %v11021_v11 }
 0x32f   :  { %7023 = vmatprep.subr.bf16.mxu0 %v11281_v63  ;;  %5127 = vmatmul.mubr.f32.vlgmr.msra.gmra.mrb[2].mxu0 %v12742_v40 }
 0x330   :  { %7025 = vmatpush1.bf16.msra.mxu0 %v11290_v27  ;;  %5223 = vmatprep.mubr.f32.mxu0 %v11021_v11 }
 0x331   :  { %7027 = vmatprep.subr.bf16.mxu0 %v11300_v49  ;;  %6571 = vmatpush3.msra.mxu1 %v11608_v37 }
 0x332   :  { %7148 = vmatprep.subr.bf16.mxu1 %v12701_v59  ;;  %6573 = vmatmul.mubr.f32.vlgmr.msra.gmra.mrb[2].mxu1 %v12742_v40 }
 0x333   :  { %7150 = vmatpush3.bf16.msra.mxu1 %v11328_v33  ;;  %6601 = vmatprep.mubr.msk.f32.mxu1 %vm7308_vm1, %v11021_v11 }
 0x334   :  { %7029 = vmatpush1.bf16.msra.mxu0 %v11322_v6  ;;  %7151 = vmatprep.subr.bf16.mxu1 %v12701_v59 }
 0x335   :  { %7031 = vmatprep.subr.bf16.mxu0 %v11338_v39 }
 0x337   :  { %7153 = vmatpush3.bf16.msra.mxu1 %v11364_v62 }
 0x338   :  { %7033 = vmatpush1.bf16.msra.mxu0 %v11358_v5  ;;  %7154 = vmatprep.subr.bf16.mxu1 %v12701_v59 }
 0x339   :  { %7035 = vmatprep.subr.bf16.mxu0 %v11372_v42 }
 0x33b   :  { %7156 = vmatpush3.bf16.msra.mxu1 %v11394_v35 }
 0x33c   :  { %7037 = vmatpush1.bf16.msra.mxu0 %v11388_v1  ;;  %7157 = vmatprep.subr.bf16.mxu1 %v12701_v59 }
 0x33d   :  { %7039 = vmatprep.subr.bf16.mxu0 %v11430_v34 }
 0x33f   :  { %7159 = vmatpush3.bf16.msra.mxu1 %v11406_v9 }
 0x340   :  { %7041 = vmatpush1.bf16.msra.mxu0 %v11434_v20  ;;  %7160 = vmatprep.subr.bf16.mxu1 %v12701_v59 }
 0x341   :  { %7043 = vmatprep.subr.bf16.mxu0 %v11524_v57 }
 0x343   :  { %7162 = vmatpush3.bf16.msra.mxu1 %v11476_v48 }
 0x344   :  { %7045 = vmatpush1.bf16.msra.mxu0 %v11529_v14  ;;  %7163 = vmatprep.subr.bf16.mxu1 %v12701_v59 }
 0x345   :  { %5182 = vmatprep.subr.mxu0 %v11561_v28 }
 0x347   :  { %7165 = vmatpush3.bf16.msra.mxu1 %v11548_v32 }
 0x348   :  { %5184 = vmatpush1.msra.mxu0 %v12743_v38  ;;  %6599 = vmatprep.subr.mxu1 %v11021_v11 }
 0x349   :  { %7047 = vmatprep.subr.bf16.mxu0 %v12744_v23  ;;  %5227 = vmatmul.mubr.f32.vlgmr.msra.gmra.mrb[2].mxu0 %v12745_v30 }
 0x34a   :  { %7049 = vmatpush1.bf16.msra.mxu0 %v12746_v26  ;;  %5375 = vmatprep.mubr.f32.mxu0 %v11021_v11 }
 0x34b   :  { %7051 = vmatprep.subr.bf16.mxu0 %v12747_v15  ;;  %6600 = vmatpush3.msra.mxu1 %v11569_v0 }
 0x34c   :  { %7166 = vmatprep.subr.bf16.mxu1 %v12701_v59  ;;  %6602 = vmatmul.mubr.f32.vlgmr.msra.gmra.mrb[2].mxu1 %v12745_v30 }
 0x34d   :  { %7168 = vmatpush3.bf16.msra.mxu1 %v12748_v50  ;;  %6630 = vmatprep.mubr.msk.f32.mxu1 %vm7308_vm1, %v11021_v11 }
 0x34e   :  { %7053 = vmatpush1.bf16.msra.mxu0 %v12749_v43  ;;  %7169 = vmatprep.subr.bf16.mxu1 %v12701_v59 }
 0x34f   :  { %7055 = vmatprep.subr.bf16.mxu0 %v12750_v10 }
 0x351   :  { %7171 = vmatpush3.bf16.msra.mxu1 %v12751_v24 }
 0x352   :  { %7057 = vmatpush1.bf16.msra.mxu0 %v12752_v58  ;;  %7172 = vmatprep.subr.bf16.mxu1 %v12701_v59 }
 0x353   :  { %7059 = vmatprep.subr.bf16.mxu0 %v12753_v44 }
 0x355   :  { %7174 = vmatpush3.bf16.msra.mxu1 %v12754_v2 }
 0x356   :  { %7061 = vmatpush1.bf16.msra.mxu0 %v12755_v4  ;;  %7175 = vmatprep.subr.bf16.mxu1 %v12701_v59 }
 0x357   :  { %7063 = vmatprep.subr.bf16.mxu0 %v12756_v18 }
 0x359   :  { %7177 = vmatpush3.bf16.msra.mxu1 %v12757_v3 }
 0x35a   :  { %7065 = vmatpush1.bf16.msra.mxu0 %v12758_v56  ;;  %7178 = vmatprep.subr.bf16.mxu1 %v12701_v59 }
 0x35b   :  { %7067 = vmatprep.subr.bf16.mxu0 %v12759_v47 }
 0x35d   :  { %7180 = vmatpush3.bf16.msra.mxu1 %v12760_v7 }
 0x35e   :  { %7069 = vmatpush1.bf16.msra.mxu0 %v12761_v54  ;;  %7181 = vmatprep.subr.bf16.mxu1 %v12701_v59 }
 0x35f   :  { %5332 = vmatprep.subr.mxu0 %v4952_v45 }
 0x361   :  { %7183 = vmatpush3.bf16.msra.mxu1 %v12762_v51 }
 0x362   :  { %5336 = vmatpush1.msra.mxu0 %v4958_v12  ;;  %6628 = vmatprep.subr.mxu1 %v11021_v11 }
 0x363   :  { %7071 = vmatprep.subr.bf16.mxu0 %v11281_v63  ;;  %5377 = vmatmul.mubr.f32.vlgmr.msra.gmra.mrb[2].mxu0 %v12395_v8 }
 0x364   :  { %7073 = vmatpush1.bf16.msra.mxu0 %v11290_v27  ;;  %5473 = vmatprep.mubr.f32.mxu0 %v11021_v11 }
 0x365   :  { %7075 = vmatprep.subr.bf16.mxu0 %v11300_v49  ;;  %6629 = vmatpush3.msra.mxu1 %v5656_v52 }
 0x366   :  { %7184 = vmatprep.subr.bf16.mxu1 %v12701_v59  ;;  %6631 = vmatmul.mubr.f32.vlgmr.msra.gmra.mrb[2].mxu1 %v12395_v8 }
 0x367   :  { %v3922_v17 = vpop.f32.mrb[0].mxu0  ;;  %7186 = vmatpush3.bf16.msra.mxu1 %v11328_v33  ;;  %6659 = vmatprep.mubr.msk.f32.mxu1 %vm7308_vm1, %v11021_v11  ;;  %vm6312_vm1 = vcmask 343040  }
 0x368   :  { %6298 = vrot.lane.b32.xlu1 %v3922_v17, %s7313_s1  ;;  %v3924_v63 = vpop.f32.mrb[1].mxu0  ;;  %7077 = vmatpush1.bf16.msra.mxu0 %v11322_v6  ;;  %v12763_v6 = vlaneseq }
 0x369   :  { %7079 = vmatprep.subr.bf16.mxu0 %v11338_v39  ;;  %7187 = vmatprep.subr.bf16.mxu1 %v12701_v59  ;;  %v6084_v39 = vld [vmem:[%s11952_s0] ss:$8 sm:$0xf] }
 0x36a   :  { %v11805_v33 = vshrl.u32 %v12763_v6, 7 }
 0x36b   :  { %7189 = vmatpush3.bf16.msra.mxu1 %v11364_v62  ;;  %v6401_v62 = vld [vmem:[%s11952_s0 + $0x1] ss:$8 sm:$0xf0] }
 0x36c   :  { %6300 = vrot.lane.b32.xlu1 %v3924_v63, %s7313_s1  ;;  %v4699_v27 = vpop.f32.mrb[0].mxu1  ;;  %7081 = vmatpush1.bf16.msra.mxu0 %v11358_v5  ;;  %v6085_v5 = vld [vmem:[%s11952_s0] ss:$8 sm:$0xf0]  ;;  %v6107_v37 = vsub.s32 3, %v11805_v33 }
 0x36d   :  { %v4701_v49 = vpop.f32.mrb[1].mxu1  ;;  %6302 = vrot.lane.b32.xlu0 %v4699_v27, %s7313_s1  ;;  %7083 = vmatprep.subr.bf16.mxu0 %v11372_v42  ;;  %v6403_v42 = vld [vmem:[%s11952_s0 + $0x2] ss:$8 sm:$0xf0] }
 0x36e   :  { %7190 = vmatprep.subr.bf16.mxu1 %v12701_v59 }
 0x36f   :  { %7192 = vmatpush3.bf16.msra.mxu1 %v11394_v35  ;;  %v6095_v35 = vsub.s32 0, %v11805_v33 }
 0x370   :  { %6304 = vrot.lane.b32.xlu1 %v4701_v49, %s7313_s1  ;;  %7085 = vmatpush1.bf16.msra.mxu0 %v11388_v1  ;;  %v11825_v1 = vor.u32 %v6085_v5, %v6084_v39 }
 0x371   :  { %7087 = vmatprep.subr.bf16.mxu0 %v11430_v34  ;;  %7193 = vmatprep.subr.bf16.mxu1 %v12701_v59  ;;  %v11830_v34 = vpop.permute.xlu1 %6146 }
 0x372   :  { %v6108_v21 = vrot.slane %v11825_v1, %v6107_v37 }
 0x373   :  { %7195 = vmatpush3.bf16.msra.mxu1 %v11406_v9 }
 0x374   :  { %7089 = vmatpush1.bf16.msra.mxu0 %v11434_v20  ;;  %7196 = vmatprep.subr.bf16.mxu1 %v12701_v59 }
 0x375   :  { %7091 = vmatprep.subr.bf16.mxu0 %v11524_v57  ;;  %v6096_v57 = vrot.slane %v11825_v1, %v6095_v35 }
 0x377   :  { %7198 = vmatpush3.bf16.msra.mxu1 %v11476_v48  ;;  %v6099_v48 = vsub.s32 1, %v11805_v33 }
 0x378   :  { %7093 = vmatpush1.bf16.msra.mxu0 %v11529_v14  ;;  %7199 = vmatprep.subr.bf16.mxu1 %v12701_v59  ;;  %v11841_v59 = vpop.permute.xlu1 %6211 }
 0x379   :  { %5432 = vmatprep.subr.mxu0 %v11561_v28  ;;  %v11838_v28 = vpop.permute.xlu0 %6089  ;;  %v6100_v61 = vrot.slane %v11825_v1, %v6099_v48 }
 0x37a   :  { %v6133_v52 = vmul.f32 %v6096_v57, %v11838_v28  ;;  %v6136_v30 = vmul.f32 %v6108_v21, %v11838_v28 }
 0x37b   :  { %7201 = vmatpush3.bf16.msra.mxu1 %v11548_v32  ;;  %v6103_v32 = vsub.s32 2, %v11805_v33  ;;  %v6134_v13 = vmul.f32 %v6100_v61, %v11838_v28 }
 0x37c   :  { %5434 = vmatpush1.msra.mxu0 %v12743_v38  ;;  %6657 = vmatprep.subr.mxu1 %v11021_v11  ;;  %v6400_v11 = vld [vmem:[%s11952_s0 + $0x1] ss:$8 sm:$0xf] }
 0x37d   :  { %5475 = vmatmul.mubr.f32.vlgmr.msra.gmra.mrb[2].mxu0 %v12395_v8  ;;  %v11828_v9 = vor.u32 %v6401_v62, %v6400_v11  ;;  %v6104_v31 = vrot.slane %v11825_v1, %v6103_v32  ;;  %v11864_v43 = vpop.permute.xlu0 %6272 }
 0x37f   :  { %6658 = vmatpush3.msra.mxu1 %v11569_v0  ;;  %v6153_v14 = vrot.slane %v11828_v9, %v6095_v35  ;;  %v6157_v45 = vrot.slane %v11828_v9, %v6099_v48  ;;  %v6161_v55 = vrot.slane %v11828_v9, %v6103_v32  ;;  %v6165_v19 = vrot.slane %v11828_v9, %v6107_v37 }
 0x380   :  { %6660 = vmatmul.mubr.f32.vlgmr.msra.gmra.mrb[2].mxu1 %v12395_v8  ;;  %v6402_v8 = vld [vmem:[%s11952_s0 + $0x2] ss:$8 sm:$0xf]  ;;  %v6135_v36 = vmul.f32 %v6104_v31, %v11838_v28  ;;  %v6119_v31 = vsub.s32 6, %v11805_v33 }
 0x381   :  { %v11832_v20 = vor.u32 %v6403_v42, %v6402_v8  ;;  %v6190_v12 = vmul.f32 %v6153_v14, %v11830_v34  ;;  %v6191_v29 = vmul.f32 %v6157_v45, %v11830_v34  ;;  %v6192_v46 = vmul.f32 %v6161_v55, %v11830_v34 }
 0x382   :  { %v6193_v38 = vmul.f32 %v6165_v19, %v11830_v34  ;;  %v6111_v45 = vsub.s32 4, %v11805_v33  ;;  %v6123_v55 = vsub.s32 7, %v11805_v33  ;;  %v6120_v19 = vrot.slane %v11825_v1, %v6119_v31 }
 0x383   :  { %v6218_v0 = vrot.slane %v11832_v20, %v6095_v35  ;;  %v6222_v25 = vrot.slane %v11832_v20, %v6099_v48  ;;  %v6198_v53 = vadd.f32 %v6190_v12, %v6133_v52  ;;  %v6226_v16 = vrot.slane %v11832_v20, %v6103_v32 }
 0x384   :  { %v6199_v40 = vadd.f32 %v6191_v29, %v6134_v13  ;;  %v6230_v23 = vrot.slane %v11832_v20, %v6107_v37  ;;  %v6200_v15 = vadd.f32 %v6192_v46, %v6135_v36  ;;  %v6201_v44 = vadd.f32 %v6193_v38, %v6136_v30 }
 0x385   :  { %v6255_v60 = vmul.f32 %v6218_v0, %v11841_v59  ;;  %v6256_v41 = vmul.f32 %v6222_v25, %v11841_v59  ;;  %v6257_v50 = vmul.f32 %v6226_v16, %v11841_v59  ;;  %v6115_v37 = vsub.s32 5, %v11805_v33 }
 0x386   :  { %v6258_v58 = vmul.f32 %v6230_v23, %v11841_v59  ;;  %v6112_v12 = vrot.slane %v11825_v1, %v6111_v45  ;;  %v6169_v52 = vrot.slane %v11828_v9, %v6111_v45  ;;  %v6234_v21 = vrot.slane %v11832_v20, %v6111_v45 }
 0x387   :  { %v6263_v26 = vadd.f32 %v6255_v60, %v6198_v53  ;;  %v6264_v24 = vadd.f32 %v6256_v41, %v6199_v40  ;;  %v6265_v4 = vadd.f32 %v6257_v50, %v6200_v15  ;;  %v6116_v60 = vrot.slane %v11825_v1, %v6115_v37 }
 0x388   :  { %v6266_v56 = vadd.f32 %v6258_v58, %v6201_v44  ;;  %v6173_v25 = vrot.slane %v11828_v9, %v6115_v37  ;;  %v6137_v29 = vmul.f32 %v6112_v12, %v11838_v28  ;;  %v6194_v13 = vmul.f32 %v6169_v52, %v11830_v34 }
 0x389   :  { %v6275_v2 = vadd.f32 %v11864_v43, %v6263_v26  ;;  %v6276_v3 = vadd.f32 %v11864_v43, %v6264_v24  ;;  %v6277_v51 = vadd.f32 %v11864_v43, %v6265_v4  ;;  %v6124_v53 = vrot.slane %v11825_v1, %v6123_v55 }
 0x38a   :  { %v6278_v5 = vadd.f32 %v11864_v43, %v6266_v56  ;;  %v6177_v36 = vrot.slane %v11828_v9, %v6119_v31  ;;  %v6195_v46 = vmul.f32 %v6173_v25, %v11830_v34  ;;  %v6238_v33 = vrot.slane %v11832_v20, %v6115_v37 }
 0x38b   :  { %v6335_v63 = vmul.f32 0.03, %v6275_v2  ;;  %vm6283_vm9 = vcmp.gt.f32.partialorder %v6275_v2, 0.0  ;;  %vm6284_vm8 = vcmp.gt.f32.partialorder %v6276_v3, 0.0  ;;  %v6336_v62 = vmul.f32 0.03, %v6276_v3 }
 0x38c   :  { %v6337_v48 = vmul.f32 0.03, %v6277_v51  ;;  %vm6285_vm7 = vcmp.gt.f32.partialorder %v6277_v51, 0.0  ;;  %v6338_v32 = vmul.f32 0.03, %v6278_v5  ;;  %vm6286_vm13 = vcmp.gt.f32.partialorder %v6278_v5, 0.0 }
 0x38d   :  { %v6138_v16 = vmul.f32 %v6116_v60, %v11838_v28  ;;  %v6202_v41 = vadd.f32 %v6194_v13, %v6137_v29  ;;  %v6259_v40 = vmul.f32 %v6234_v21, %v11841_v59  ;;  %v6139_v38 = vmul.f32 %v6120_v19, %v11838_v28 }
 0x38e   :  { %v6140_v23 = vmul.f32 %v6124_v53, %v11838_v28  ;;  %v6196_v30 = vmul.f32 %v6177_v36, %v11830_v34  ;;  %v6242_v1 = vrot.slane %v11832_v20, %v6119_v31  ;;  %v6260_v26 = vmul.f32 %v6238_v33, %v11841_v59 }
 0x38f   :  { %v6203_v15 = vadd.f32 %v6195_v46, %v6138_v16  ;;  %v6267_v24 = vadd.f32 %v6259_v40, %v6202_v41 }
 0x390   :  { %v6261_v58 = vmul.f32 %v6242_v1, %v11841_v59 }
 0x391   :  { %v6268_v44 = vadd.f32 %v6260_v26, %v6203_v15  ;;  %v6279_v28 = vadd.f32 %v11864_v43, %v6267_v24 }
 0x393   :  { %vm6287_vm10 = vcmp.gt.f32.partialorder %v6279_v28, 0.0 }
 0x3da   :  { %v6299_v22 = vpop.permute.xlu1 %6298 }
 0x3db   :  { %v6327_v7 = vadd.f32 %v6299_v22, %v6275_v2 }
 0x3dd   :  { %v6343_v35 = vsel %vm6283_vm9, %v6327_v7, %v6335_v63 }
 0x3de   :  { %v6301_v10 = vpop.permute.xlu1 %6300 }
 0x3df   :  { %v6303_v18 = vpop.permute.xlu0 %6302  ;;  %v6313_v54 = vsel %vm6312_vm1, %v6299_v22, %v6301_v10  ;;  %v6181_v22 = vrot.slane %v11828_v9, %v6123_v55  ;;  %v6204_v9 = vadd.f32 %v6196_v30, %v6139_v38 }
 0x3e0   :  { %v6314_v27 = vsel %vm6312_vm1, %v6301_v10, %v6303_v18  ;;  %v6328_v39 = vadd.f32 %v6313_v54, %v6276_v3  ;;  %v6246_v10 = vrot.slane %v11832_v20, %v6123_v55  ;;  %v6280_v3 = vadd.f32 %v11864_v43, %v6268_v44 }
 0x3e1   :  { %v6329_v8 = vadd.f32 %v6314_v27, %v6277_v51  ;;  %v6197_v50 = vmul.f32 %v6181_v22, %v11830_v34 }
 0x3e2   :  { %v11873_v49 = vpop.permute.xlu1 %6304  ;;  %v6344_v14 = vsel %vm6284_vm8, %v6328_v39, %v6336_v62  ;;  %v6262_v4 = vmul.f32 %v6246_v10, %v11841_v59  ;;  %v6340_v27 = vmul.f32 0.03, %v6280_v3  ;;  %vm6288_vm2 = vcmp.gt.f32.partialorder %v6280_v3, 0.0 }
 0x3e3   :  { %v6315_v42 = vsel %vm6312_vm1, %v6303_v18, %v11873_v49  ;;  %v6345_v0 = vsel %vm6285_vm7, %v6329_v8, %v6337_v48  ;;  %v6205_v2 = vadd.f32 %v6197_v50, %v6140_v23  ;;  %v6269_v18 = vadd.f32 %v6261_v58, %v6204_v9 }
 0x3e4   :  { %v6330_v57 = vadd.f32 %v6315_v42, %v6278_v5 }
 0x3e5   :  { %v6270_v56 = vadd.f32 %v6262_v4, %v6205_v2  ;;  %v6281_v51 = vadd.f32 %v11864_v43, %v6269_v18 }
 0x3e6   :  { %v6346_v61 = vsel %vm6286_vm13, %v6330_v57, %v6338_v32 }
 0x3e7   :  { %v6282_v59 = vadd.f32 %v11864_v43, %v6270_v56  ;;  %v6341_v42 = vmul.f32 0.03, %v6281_v51  ;;  %vm6289_vm4 = vcmp.gt.f32.partialorder %v6281_v51, 0.0 }
 0x3e9   :  { %vm6290_vm3 = vcmp.gt.f32.partialorder %v6282_v59, 0.0 }
 0x450   :  { %v5476_v47 = vpop.f32.mrb[2].mxu0 }
 0x451   :  { %6306 = vrot.lane.b32.xlu0 %v5476_v47, %s7313_s1  ;;  %v5478_v17 = vpop.f32.mrb[3].mxu0 }
 0x452   :  { %6308 = vrot.lane.b32.xlu1 %v5478_v17, %s7313_s1  ;;  %v6339_v17 = vmul.f32 0.03, %v6279_v28 }
 0x453   :  { %v6079_v6 = vpop.f32.mrb[2].mxu1 }
 0x454   :  { %v6661_v11 = vpop.f32.mrb[3].mxu1 }
 0x455   :  { %6310 = vrot.lane.b32.xlu0 %v6079_v6, %s7313_s1 }
 0x456   :  { %6359 = vrot.lane.b32.xlu1 %v6343_v35, %s7285_s9  ;;  %v6342_v35 = vmul.f32 0.03, %v6282_v59 }
 0x459   :  { %6361 = vrot.lane.b32.xlu0 %v6344_v14, %s7285_s9 }
 0x45a   :  { %6363 = vrot.lane.b32.xlu1 %v6345_v0, %s7285_s9 }
 0x45d   :  { %6365 = vrot.lane.b32.xlu0 %v6346_v61, %s7285_s9 }
 0x4c3   :  { %v6307_v47 = vpop.permute.xlu0 %6306 }
 0x4c4   :  { %v6316_v34 = vsel %vm6312_vm1, %v11873_v49, %v6307_v47  ;;  %v6309_v7 = vpop.permute.xlu1 %6308 }
 0x4c5   :  { %v6331_v20 = vadd.f32 %v6316_v34, %v6279_v28  ;;  %v6317_v54 = vsel %vm6312_vm1, %v6307_v47, %v6309_v7 }
 0x4c6   :  { %v6332_v63 = vadd.f32 %v6317_v54, %v6280_v3 }
 0x4c7   :  { %v6311_v6 = vpop.permute.xlu0 %6310  ;;  %v6347_v39 = vsel %vm6287_vm10, %v6331_v20, %v6339_v17 }
 0x4c8   :  { %v6318_v5 = vsel %vm6312_vm1, %v6309_v7, %v6311_v6  ;;  %v6334_v11 = vadd.f32 %v6311_v6, %v6282_v59  ;;  %v6360_v62 = vpop.permute.xlu1 %6359  ;;  %6367 = vrot.lane.b32.xlu1 %v6347_v39, %s7285_s9  ;;  %v6348_v49 = vsel %vm6288_vm2, %v6332_v63, %v6340_v27 }
 0x4c9   :  { %v6333_v8 = vadd.f32 %v6318_v5, %v6281_v51  ;;  %6369 = vrot.lane.b32.xlu0 %v6348_v49, %s7285_s9 }
 0x4ca   :  { %v6350_v32 = vsel %vm6290_vm3, %v6334_v11, %v6342_v35 }
 0x4cb   :  { %v6362_v48 = vpop.permute.xlu0 %6361  ;;  %v6349_v43 = vsel %vm6289_vm4, %v6333_v8, %v6341_v42 }
 0x4cc   :  { %v6375_v57 = vsel %vm12764_vm5, %v6360_v62, %v6362_v48  ;;  %v6364_v14 = vpop.permute.xlu1 %6363  ;;  %6371 = vrot.lane.b32.xlu1 %v6349_v43, %s7285_s9 }
 0x4cd   :  { %6389 = vst [vmem:[%s11954_s2] sm:$0xff] %v6375_v57  ;;  %v6376_v0 = vsel %vm12765_vm15, %v6362_v48, %v6364_v14  ;;  %6373 = vrot.lane.b32.xlu0 %v6350_v32, %s7285_s9 }
 0x4ce   :  { %6390 = vst [vmem:[%s11954_s2 + $0x8] sm:$0xff] %v6376_v0 }
 0x4cf   :  { %v6366_v61 = vpop.permute.xlu0 %6365 }
 0x4d0   :  { %v6377_v45 = vsel %vm12766_vm0, %v6364_v14, %v6366_v61 }
 0x4d1   :  { %6391 = vst [vmem:[%s11954_s2 + $0x10] sm:$0xff] %v6377_v45 }
 0x53a   :  { %v6368_v37 = vpop.permute.xlu1 %6367 }
 0x53b   :  { %v6378_v12 = vsel %vm12767_vm11, %v6366_v61, %v6368_v37  ;;  %v6370_v52 = vpop.permute.xlu0 %6369 }
 0x53c   :  { %6392 = vst [vmem:[%s11954_s2 + $0x18] sm:$0xff] %v6378_v12  ;;  %v6379_v31 = vsel %vm12768_vm6, %v6368_v37, %v6370_v52 }
 0x53d   :  { %6393 = vst [vmem:[%s11954_s2 + $0x20] sm:$0xff] %v6379_v31 }
 0x53e   :  { %v6372_v55 = vpop.permute.xlu1 %6371 }
 0x53f   :  { %v6380_v60 = vsel %vm12769_vm12, %v6370_v52, %v6372_v55  ;;  %v6374_v25 = vpop.permute.xlu0 %6373 }
 0x540   :  { %6394 = vst [vmem:[%s11954_s2 + $0x28] sm:$0xff] %v6380_v60  ;;  %v6381_v29 = vsel %vm12770_vm14, %v6372_v55, %v6374_v25 }
 0x541   :  { %6395 = vst [vmem:[%s11954_s2 + $0x30] sm:$0xff] %v6381_v29 }

</bundles_post_ra>
